<compile_context>
chip_gen: v6e
topology: v6e:2x2x1
jax: 0.10.0
libtpu: 0.0.40
codegen_flags: <defaults>
</compile_context>

<pallas_src>
import functools

import jax
import jax.numpy as jnp
from jax import lax
from jax.experimental import pallas as pl
from jax.experimental.pallas import tpu as pltpu


# ----------------------------------------------------------------------------
# Kernel: Bw windows (= rows // N) per grid step, rows presented as a 2-D slab.
# ----------------------------------------------------------------------------
def window_attention_kernel(x_ref, wqkv_ref, bqkv_ref, bias_ref, wproj_ref, bproj_ref,
                            o_ref, qkv_scr, oh_scr, ocat_scr, *, num_heads, seq_len):
    rows, C = x_ref.shape                     # rows = windows_per_block * seq_len
    hd = C // num_heads
    N = seq_len
    Bw = rows // N

    # (1) QKV projection: one (rows, C) @ (C, 3C) MXU pass; bf16 operands, f32 accumulate.
    qkv = jnp.dot(x_ref[...], wqkv_ref[...], preferred_element_type=jnp.float32)
    qkv = (qkv + bqkv_ref[...]).astype(jnp.bfloat16)          # q columns are pre-scaled

    # (2) One-time head-major relayout (static slices) so the hot loop only does
    #     leading-dim indexing (no lane-unaligned hd-wide selects per head per step).
    for i in range(3 * num_heads):
        qkv_scr[i] = qkv[:, i * hd:(i + 1) * hd].reshape(Bw, N, hd)

    # (3) Attention per head.  fori_loop bounds the live ranges of the (Bw, N, N) f32
    #     temporaries for large head counts; fully unrolled for small ones.
    def head_body(h, carry):
        q = qkv_scr[h]                        # (Bw, N, hd) bf16  (scale already folded in)
        k = qkv_scr[num_heads + h]
        v = qkv_scr[2 * num_heads + h]
        # Batched q @ k^T contracting the last dims -> no explicit transpose.
        s = lax.dot_general(q, k, (((2,), (2,)), ((0,), (0,))),
                            preferred_element_type=jnp.float32)           # (Bw, N, N) f32
        s = s + bias_ref[h]                   # relative position bias (N, N), f32
        # Numerically-stable softmax; the divide is deferred past the PV matmul.
        # TODO(synk): on v6e/v7x the exp could run in bf16 to double EUP throughput.
        m = jnp.max(s, axis=-1, keepdims=True)
        p = jnp.exp(s - m)
        r = jnp.sum(p, axis=-1, keepdims=True)
        o = lax.dot_general(p.astype(jnp.bfloat16), v, (((2,), (1,)), ((0,), (0,))),
                            preferred_element_type=jnp.float32)           # (Bw, N, hd)
        o = o * pl.reciprocal(r, approx=True)                 # EUP slot, off the MXU path
        oh_scr[h] = o.astype(jnp.bfloat16)
        return carry

    lax.fori_loop(0, num_heads, head_body, 0, unroll=num_heads <= 8)

    # (4) Head concat via static lane-slice stores -> single K=C output projection
    #     (instead of num_heads shallow K=hd MXU passes).
    for i in range(num_heads):
        ocat_scr[:, i * hd:(i + 1) * hd] = oh_scr[i].reshape(rows, hd)
    out = jnp.dot(ocat_scr[...], wproj_ref[...], preferred_element_type=jnp.float32)
    out = out + bproj_ref[...]
    o_ref[...] = out.astype(o_ref.dtype)      # lane-dense (rows, Cp) store


# ----------------------------------------------------------------------------
# Wrapper: block sizing, weight prep, pallas_call
# ----------------------------------------------------------------------------
def _round_up(a, b):
    return -(-a // b) * b


def _step_vmem_bytes(bw, N, C, Cp, num_heads, out_bytes):
    """Rough per-step VMEM footprint ((8,128)-padded, pipeline buffers counted)."""
    rows = bw * N
    hd = C // num_heads
    rpad, cpad = _round_up(rows, 8), _round_up(C, 128)
    c3pad, cppad = _round_up(3 * C, 128), _round_up(Cp, 128)
    npad, hdpad = _round_up(N, 8), _round_up(hd, 128)
    x_blk = 2 * rpad * cpad * 2                               # bf16 input block, double buffered
    out_blk = 2 * rpad * cppad * out_bytes                    # output block, double buffered
    weights = 2 * (_round_up(C, 8) * (c3pad + cppad)) * 2     # W_qkv + W_proj bf16 (worst case x2)
    bias = 2 * num_heads * npad * _round_up(N, 128) * 4
    qkv_scr = 3 * num_heads * bw * npad * hdpad * 2
    oh_scr = num_heads * bw * npad * hdpad * 2
    ocat = rpad * cpad * 2
    qkv_val = rpad * c3pad * 4                                # transient f32 qkv value
    sp_val = 2 * bw * npad * _round_up(N, 128) * 4            # s and p f32 live in the head loop
    return x_blk + out_blk + weights + bias + qkv_scr + oh_scr + ocat + qkv_val + sp_val


def _pick_block_windows(B_, N, C, Cp, num_heads, out_bytes,
                        vmem_budget=24 * 1024 * 1024, max_rows=1024):
    """Largest divisor Bw of B_ within the VMEM budget, preferring >=4 (else >=2) grid steps
    so the BlockSpec pipeline overlaps DMA with compute and both v7x cores get slices."""
    for min_steps in (4, 2, 1):
        best = 0
        for bw in range(1, B_ + 1):
            if B_ % bw:
                continue
            if B_ // bw < min_steps:
                continue
            if bw * N > max_rows:
                continue
            if _step_vmem_bytes(bw, N, C, Cp, num_heads, out_bytes) > vmem_budget:
                continue
            best = bw
        if best:
            return best
    return 1


def window_attention(x, params, window_size, num_heads, mask=None):
    # TODO(synk): mask != None (shifted-window additive mask) and attn_drop/proj_drop are not
    # wired in; only the inference W-MSA (mask=None) path is implemented.
    assert mask is None
    B_, N, C = x.shape
    assert N == window_size[0] * window_size[1]
    hd = C // num_heads
    scale = hd ** (-0.5)
    Cp = _round_up(C, 128)                    # lane-dense output channel count
    out_dtype = x.dtype
    out_bytes = x.dtype.itemsize

    # Fold the qk scale into the Q columns of the qkv weights/bias; bf16 MXU operands.
    col_scale = jnp.concatenate(
        [jnp.full((C,), scale, jnp.float32), jnp.ones((2 * C,), jnp.float32)])
    w_qkv = (params["w_qkv"].astype(jnp.float32) * col_scale).astype(jnp.bfloat16)
    b_qkv = params["b_qkv"].astype(jnp.float32) * col_scale   # stays f32 (added to f32 acc)
    w_proj = params["w_proj"].astype(jnp.float32)
    b_proj = params["b_proj"].astype(jnp.float32)
    if Cp != C:                               # zero-pad projection columns -> lane-dense store
        w_proj = jnp.pad(w_proj, ((0, 0), (0, Cp - C)))
        b_proj = jnp.pad(b_proj, ((0, 0), (0, Cp - C)))
    w_proj = w_proj.astype(jnp.bfloat16)

    # Relative position bias gather: (N*N, H) -> (H, N, N)   (plain-JAX glue)
    rel_bias = params["rpb_table"][params["rp_index"].reshape(-1)]
    rel_bias = rel_bias.reshape(N, N, num_heads).transpose(2, 0, 1).astype(jnp.float32)

    # Flatten windows host-side (free, row-major); cast the dominant input to bf16.
    x_rows = x.reshape(B_ * N, C).astype(jnp.bfloat16)

    Bw = _pick_block_windows(B_, N, C, Cp, num_heads, out_bytes)
    rows = Bw * N
    grid = (B_ // Bw,)
    vmem_limit = int(min(64 * 1024 * 1024,
                         max(32 * 1024 * 1024,
                             2 * _step_vmem_bytes(Bw, N, C, Cp, num_heads, out_bytes))))

    kernel = functools.partial(window_attention_kernel, num_heads=num_heads, seq_len=N)

    def build(single_buffer_weights):
        # Invariant operands never change across the grid; single-buffer them to save VMEM.
        inv = dict(pipeline_mode=pl.Buffered(1)) if single_buffer_weights else {}
        return pl.pallas_call(
            kernel,
            out_shape=jax.ShapeDtypeStruct((B_ * N, Cp), out_dtype),
            grid_spec=pltpu.PrefetchScalarGridSpec(
                num_scalar_prefetch=0,
                grid=grid,
                in_specs=[
                    pl.BlockSpec((rows, C), lambda b: (b, 0)),                    # x row slab
                    pl.BlockSpec((C, 3 * C), lambda b: (0, 0), **inv),            # W_qkv (scaled, bf16)
                    pl.BlockSpec((1, 3 * C), lambda b: (0, 0), **inv),            # b_qkv (scaled, f32)
                    pl.BlockSpec((num_heads, N, N), lambda b: (0, 0, 0), **inv),  # rel-pos bias
                    pl.BlockSpec((C, Cp), lambda b: (0, 0), **inv),               # W_proj (padded, bf16)
                    pl.BlockSpec((1, Cp), lambda b: (0, 0), **inv),               # b_proj (padded, f32)
                ],
                out_specs=pl.BlockSpec((rows, Cp), lambda b: (b, 0)),
                scratch_shapes=[
                    pltpu.VMEM((3 * num_heads, Bw, N, hd), jnp.bfloat16),  # head-major qkv
                    pltpu.VMEM((num_heads, Bw, N, hd), jnp.bfloat16),      # per-head attn out
                    pltpu.VMEM((rows, C), jnp.bfloat16),                   # concatenated heads
                ],
            ),
            compiler_params=pltpu.CompilerParams(
                dimension_semantics=("parallel",),
                vmem_limit_bytes=vmem_limit),
        )

    args = (x_rows, w_qkv, b_qkv, rel_bias, w_proj, b_proj)
    try:
        out = build(True)(*args)
    except Exception:
        # TODO(synk): pl.Buffered(1) single-buffering of invariant operands rejected on this
        # jax/libtpu combo; fall back to default double-buffering (correctness unaffected).
        out = build(False)(*args)

    if Cp != C:
        out = out[:, :C]
    return out.reshape(B_, N, C)


# ----------------------------------------------------------------------------
# Relative position index (identical to the PyTorch __init__ buffer)
# ----------------------------------------------------------------------------
def make_relative_position_index(window_size):
    Wh, Ww = window_size
    coords = jnp.stack(jnp.meshgrid(jnp.arange(Wh), jnp.arange(Ww), indexing="ij"))
    coords_flatten = coords.reshape(2, -1)                                # (2, N)
    rel = coords_flatten[:, :, None] - coords_flatten[:, None, :]         # (2, N, N)
    rel = rel.transpose(1, 2, 0)                                          # (N, N, 2)
    rel = rel.at[:, :, 0].add(Wh - 1)
    rel = rel.at[:, :, 1].add(Ww - 1)
    rel = rel.at[:, :, 0].multiply(2 * Ww - 1)
    return rel.sum(-1)                                                    # (N, N)


# ----------------------------------------------------------------------------
# Pure-JAX reference (mirrors the PyTorch forward exactly, f32)
# ----------------------------------------------------------------------------
def reference(x, params, window_size, num_heads):
    B_, N, C = x.shape
    hd = C // num_heads
    scale = hd ** (-0.5)
    qkv = x @ params["w_qkv"] + params["b_qkv"][0]                        # (B_, N, 3C)
    qkv = qkv.reshape(B_, N, 3, num_heads, hd).transpose(2, 0, 3, 1, 4)
    q, k, v = qkv[0], qkv[1], qkv[2]
    q = q * scale
    attn = q @ jnp.swapaxes(k, -2, -1)                                    # (B_, H, N, N)
    bias = params["rpb_table"][params["rp_index"].reshape(-1)]
    bias = bias.reshape(N, N, num_heads).transpose(2, 0, 1)
    attn = jax.nn.softmax(attn + bias[None], axis=-1)
    out = (attn @ v).transpose(0, 2, 1, 3).reshape(B_, N, C)
    return out @ params["w_proj"] + params["b_proj"][0]


# ----------------------------------------------------------------------------
# Main
# ----------------------------------------------------------------------------
if __name__ == "__main__":
    window_size = (4, 4)
    num_heads = 4
    dim = 32
    batch, nW = 4, 8                 # e.g. four 8x16 images -> 8 windows of 4x4 each
    B_ = batch * nW
    N = window_size[0] * window_size[1]

    key = jax.random.PRNGKey(0)
    k_x, k_wq, k_bq, k_wp, k_bp, k_tbl = jax.random.split(key, 6)

    x = jax.random.normal(k_x, (B_, N, dim), dtype=jnp.float32)

    # Deterministic synthetic parameters (PyTorch Linear: y = x @ W.T + b,
    # we store W already transposed to (in, out)).
    params = {
        "w_qkv": 0.05 * jax.random.normal(k_wq, (dim, 3 * dim), jnp.float32),
        "b_qkv": 0.05 * jax.random.normal(k_bq, (1, 3 * dim), jnp.float32),
        "w_proj": 0.05 * jax.random.normal(k_wp, (dim, dim), jnp.float32),
        "b_proj": 0.05 * jax.random.normal(k_bp, (1, dim), jnp.float32),
        # trunc_normal_(std=0.02) stand-in: plain normal * 0.02 (deterministic)
        "rpb_table": 0.02 * jax.random.normal(
            k_tbl,
            ((2 * window_size[0] - 1) * (2 * window_size[1] - 1), num_heads),
            jnp.float32),
        "rp_index": make_relative_position_index(window_size),
    }

    out = window_attention(x, params, window_size, num_heads)
    out = jax.block_until_ready(out)

    ref = reference(x, params, window_size, num_heads)
    assert out.shape == (B_, N, dim)
    # Tolerance accounts for bf16 MXU operands (f32 accumulation) and the hardware
    # approximate reciprocal used for the softmax normalization.
    assert jnp.allclose(out, ref, atol=2e-2, rtol=2e-2), "mismatch vs reference"

    print("KERNEL_OK")
</pallas_src>

<mosaic_0001>
module attributes {stable_mosaic.version = 11 : i64} {
  func.func @window_attention_kernel(%arg0: i32, %arg1: memref<128x32xbf16, #tpu.memory_space<vmem>>, %arg2: memref<32x96xbf16, #tpu.memory_space<vmem>>, %arg3: memref<1x96xf32, #tpu.memory_space<vmem>>, %arg4: memref<4x16x16xf32, #tpu.memory_space<vmem>>, %arg5: memref<32x128xbf16, #tpu.memory_space<vmem>>, %arg6: memref<1x128xf32, #tpu.memory_space<vmem>>, %arg7: memref<128x128xf32, #tpu.memory_space<vmem>>, %arg8: memref<12x8x16x8xbf16, #tpu.memory_space<vmem>>, %arg9: memref<4x8x16x8xbf16, #tpu.memory_space<vmem>>, %arg10: memref<128x32xbf16, #tpu.memory_space<vmem>>) attributes {dimension_semantics = [#tpu.dimension_semantics<parallel>], iteration_bounds = array<i64: 4>, scalar_prefetch = 0 : i64, scratch_operands = 3 : i64, tpu.core_type = #tpu.core_type<tc>, window_params = [{transform_indices = @transform_0, window_bounds = array<i64: 128, 32>}, {pipeline_mode = #tpu.pipeline_mode<synchronous>, transform_indices = @transform_1, window_bounds = array<i64: 32, 96>}, {pipeline_mode = #tpu.pipeline_mode<synchronous>, transform_indices = @transform_2, window_bounds = array<i64: 1, 96>}, {pipeline_mode = #tpu.pipeline_mode<synchronous>, transform_indices = @transform_3, window_bounds = array<i64: 4, 16, 16>}, {pipeline_mode = #tpu.pipeline_mode<synchronous>, transform_indices = @transform_4, window_bounds = array<i64: 32, 128>}, {pipeline_mode = #tpu.pipeline_mode<synchronous>, transform_indices = @transform_5, window_bounds = array<i64: 1, 128>}, {transform_indices = @transform_6, window_bounds = array<i64: 128, 128>}]} {
    %c0 = arith.constant 0 : index
    %c0_0 = arith.constant 0 : index
    %0 = vector.load %arg1[%c0, %c0_0] : memref<128x32xbf16, #tpu.memory_space<vmem>>, vector<128x32xbf16>
    %c0_1 = arith.constant 0 : index
    %c0_2 = arith.constant 0 : index
    %1 = vector.load %arg2[%c0_1, %c0_2] : memref<32x96xbf16, #tpu.memory_space<vmem>>, vector<32x96xbf16>
    %cst = arith.constant dense<0.000000e+00> : vector<128x96xf32>
    %2 = tpu.matmul %0, %1, %cst {dimension_numbers = #tpu.dot_dimension_numbers<[1], [0], [0], [1], [0, 0, 1, 1], [], []>} : vector<128x32xbf16>, vector<32x96xbf16>, vector<128x96xf32> -> vector<128x96xf32>
    %c0_3 = arith.constant 0 : index
    %c0_4 = arith.constant 0 : index
    %3 = vector.load %arg3[%c0_3, %c0_4] : memref<1x96xf32, #tpu.memory_space<vmem>>, vector<1x96xf32>
    %4 = vector.broadcast %3 : vector<1x96xf32> to vector<128x96xf32>
    %5 = arith.addf %2, %4 : vector<128x96xf32>
    %6 = arith.truncf %5 : vector<128x96xf32> to vector<128x96xbf16>
    %7 = vector.extract_strided_slice %6 {offsets = [0, 0], sizes = [128, 8], strides = [1, 1]} : vector<128x96xbf16> to vector<128x8xbf16>
    %8 = vector.shape_cast %7 : vector<128x8xbf16> to vector<8x16x8xbf16>
    %c0_5 = arith.constant 0 : index
    %c0_6 = arith.constant 0 : index
    %c0_7 = arith.constant 0 : index
    %c0_8 = arith.constant 0 : index
    %9 = vector.load %arg8[%c0_5, %c0_6, %c0_7, %c0_8] : memref<12x8x16x8xbf16, #tpu.memory_space<vmem>>, vector<1x8x16x8xbf16>
    %10 = vector.shape_cast %9 : vector<1x8x16x8xbf16> to vector<8x16x8xbf16>
    %11 = vector.shape_cast %8 : vector<8x16x8xbf16> to vector<1x8x16x8xbf16>
    tpu.vector_store %arg8[%c0_5, %c0_6, %c0_7, %c0_8], %11 {strides = array<i32>} : memref<12x8x16x8xbf16, #tpu.memory_space<vmem>>, vector<1x8x16x8xbf16>,
    %12 = vector.extract_strided_slice %6 {offsets = [0, 8], sizes = [128, 8], strides = [1, 1]} : vector<128x96xbf16> to vector<128x8xbf16>
    %13 = vector.shape_cast %12 : vector<128x8xbf16> to vector<8x16x8xbf16>
    %c1 = arith.constant 1 : index
    %c0_9 = arith.constant 0 : index
    %c0_10 = arith.constant 0 : index
    %c0_11 = arith.constant 0 : index
    %14 = vector.load %arg8[%c1, %c0_9, %c0_10, %c0_11] : memref<12x8x16x8xbf16, #tpu.memory_space<vmem>>, vector<1x8x16x8xbf16>
    %15 = vector.shape_cast %14 : vector<1x8x16x8xbf16> to vector<8x16x8xbf16>
    %16 = vector.shape_cast %13 : vector<8x16x8xbf16> to vector<1x8x16x8xbf16>
    tpu.vector_store %arg8[%c1, %c0_9, %c0_10, %c0_11], %16 {strides = array<i32>} : memref<12x8x16x8xbf16, #tpu.memory_space<vmem>>, vector<1x8x16x8xbf16>,
    %17 = vector.extract_strided_slice %6 {offsets = [0, 16], sizes = [128, 8], strides = [1, 1]} : vector<128x96xbf16> to vector<128x8xbf16>
    %18 = vector.shape_cast %17 : vector<128x8xbf16> to vector<8x16x8xbf16>
    %c2 = arith.constant 2 : index
    %c0_12 = arith.constant 0 : index
    %c0_13 = arith.constant 0 : index
    %c0_14 = arith.constant 0 : index
    %19 = vector.load %arg8[%c2, %c0_12, %c0_13, %c0_14] : memref<12x8x16x8xbf16, #tpu.memory_space<vmem>>, vector<1x8x16x8xbf16>
    %20 = vector.shape_cast %19 : vector<1x8x16x8xbf16> to vector<8x16x8xbf16>
    %21 = vector.shape_cast %18 : vector<8x16x8xbf16> to vector<1x8x16x8xbf16>
    tpu.vector_store %arg8[%c2, %c0_12, %c0_13, %c0_14], %21 {strides = array<i32>} : memref<12x8x16x8xbf16, #tpu.memory_space<vmem>>, vector<1x8x16x8xbf16>,
    %22 = vector.extract_strided_slice %6 {offsets = [0, 24], sizes = [128, 8], strides = [1, 1]} : vector<128x96xbf16> to vector<128x8xbf16>
    %23 = vector.shape_cast %22 : vector<128x8xbf16> to vector<8x16x8xbf16>
    %c3 = arith.constant 3 : index
    %c0_15 = arith.constant 0 : index
    %c0_16 = arith.constant 0 : index
    %c0_17 = arith.constant 0 : index
    %24 = vector.load %arg8[%c3, %c0_15, %c0_16, %c0_17] : memref<12x8x16x8xbf16, #tpu.memory_space<vmem>>, vector<1x8x16x8xbf16>
    %25 = vector.shape_cast %24 : vector<1x8x16x8xbf16> to vector<8x16x8xbf16>
    %26 = vector.shape_cast %23 : vector<8x16x8xbf16> to vector<1x8x16x8xbf16>
    tpu.vector_store %arg8[%c3, %c0_15, %c0_16, %c0_17], %26 {strides = array<i32>} : memref<12x8x16x8xbf16, #tpu.memory_space<vmem>>, vector<1x8x16x8xbf16>,
    %27 = vector.extract_strided_slice %6 {offsets = [0, 32], sizes = [128, 8], strides = [1, 1]} : vector<128x96xbf16> to vector<128x8xbf16>
    %28 = vector.shape_cast %27 : vector<128x8xbf16> to vector<8x16x8xbf16>
    %c4 = arith.constant 4 : index
    %c0_18 = arith.constant 0 : index
    %c0_19 = arith.constant 0 : index
    %c0_20 = arith.constant 0 : index
    %29 = vector.load %arg8[%c4, %c0_18, %c0_19, %c0_20] : memref<12x8x16x8xbf16, #tpu.memory_space<vmem>>, vector<1x8x16x8xbf16>
    %30 = vector.shape_cast %29 : vector<1x8x16x8xbf16> to vector<8x16x8xbf16>
    %31 = vector.shape_cast %28 : vector<8x16x8xbf16> to vector<1x8x16x8xbf16>
    tpu.vector_store %arg8[%c4, %c0_18, %c0_19, %c0_20], %31 {strides = array<i32>} : memref<12x8x16x8xbf16, #tpu.memory_space<vmem>>, vector<1x8x16x8xbf16>,
    %32 = vector.extract_strided_slice %6 {offsets = [0, 40], sizes = [128, 8], strides = [1, 1]} : vector<128x96xbf16> to vector<128x8xbf16>
    %33 = vector.shape_cast %32 : vector<128x8xbf16> to vector<8x16x8xbf16>
    %c5 = arith.constant 5 : index
    %c0_21 = arith.constant 0 : index
    %c0_22 = arith.constant 0 : index
    %c0_23 = arith.constant 0 : index
    %34 = vector.load %arg8[%c5, %c0_21, %c0_22, %c0_23] : memref<12x8x16x8xbf16, #tpu.memory_space<vmem>>, vector<1x8x16x8xbf16>
    %35 = vector.shape_cast %34 : vector<1x8x16x8xbf16> to vector<8x16x8xbf16>
    %36 = vector.shape_cast %33 : vector<8x16x8xbf16> to vector<1x8x16x8xbf16>
    tpu.vector_store %arg8[%c5, %c0_21, %c0_22, %c0_23], %36 {strides = array<i32>} : memref<12x8x16x8xbf16, #tpu.memory_space<vmem>>, vector<1x8x16x8xbf16>,
    %37 = vector.extract_strided_slice %6 {offsets = [0, 48], sizes = [128, 8], strides = [1, 1]} : vector<128x96xbf16> to vector<128x8xbf16>
    %38 = vector.shape_cast %37 : vector<128x8xbf16> to vector<8x16x8xbf16>
    %c6 = arith.constant 6 : index
    %c0_24 = arith.constant 0 : index
    %c0_25 = arith.constant 0 : index
    %c0_26 = arith.constant 0 : index
    %39 = vector.load %arg8[%c6, %c0_24, %c0_25, %c0_26] : memref<12x8x16x8xbf16, #tpu.memory_space<vmem>>, vector<1x8x16x8xbf16>
    %40 = vector.shape_cast %39 : vector<1x8x16x8xbf16> to vector<8x16x8xbf16>
    %41 = vector.shape_cast %38 : vector<8x16x8xbf16> to vector<1x8x16x8xbf16>
    tpu.vector_store %arg8[%c6, %c0_24, %c0_25, %c0_26], %41 {strides = array<i32>} : memref<12x8x16x8xbf16, #tpu.memory_space<vmem>>, vector<1x8x16x8xbf16>,
    %42 = vector.extract_strided_slice %6 {offsets = [0, 56], sizes = [128, 8], strides = [1, 1]} : vector<128x96xbf16> to vector<128x8xbf16>
    %43 = vector.shape_cast %42 : vector<128x8xbf16> to vector<8x16x8xbf16>
    %c7 = arith.constant 7 : index
    %c0_27 = arith.constant 0 : index
    %c0_28 = arith.constant 0 : index
    %c0_29 = arith.constant 0 : index
    %44 = vector.load %arg8[%c7, %c0_27, %c0_28, %c0_29] : memref<12x8x16x8xbf16, #tpu.memory_space<vmem>>, vector<1x8x16x8xbf16>
    %45 = vector.shape_cast %44 : vector<1x8x16x8xbf16> to vector<8x16x8xbf16>
    %46 = vector.shape_cast %43 : vector<8x16x8xbf16> to vector<1x8x16x8xbf16>
    tpu.vector_store %arg8[%c7, %c0_27, %c0_28, %c0_29], %46 {strides = array<i32>} : memref<12x8x16x8xbf16, #tpu.memory_space<vmem>>, vector<1x8x16x8xbf16>,
    %47 = vector.extract_strided_slice %6 {offsets = [0, 64], sizes = [128, 8], strides = [1, 1]} : vector<128x96xbf16> to vector<128x8xbf16>
    %48 = vector.shape_cast %47 : vector<128x8xbf16> to vector<8x16x8xbf16>
    %c8 = arith.constant 8 : index
    %c0_30 = arith.constant 0 : index
    %c0_31 = arith.constant 0 : index
    %c0_32 = arith.constant 0 : index
    %49 = vector.load %arg8[%c8, %c0_30, %c0_31, %c0_32] : memref<12x8x16x8xbf16, #tpu.memory_space<vmem>>, vector<1x8x16x8xbf16>
    %50 = vector.shape_cast %49 : vector<1x8x16x8xbf16> to vector<8x16x8xbf16>
    %51 = vector.shape_cast %48 : vector<8x16x8xbf16> to vector<1x8x16x8xbf16>
    tpu.vector_store %arg8[%c8, %c0_30, %c0_31, %c0_32], %51 {strides = array<i32>} : memref<12x8x16x8xbf16, #tpu.memory_space<vmem>>, vector<1x8x16x8xbf16>,
    %52 = vector.extract_strided_slice %6 {offsets = [0, 72], sizes = [128, 8], strides = [1, 1]} : vector<128x96xbf16> to vector<128x8xbf16>
    %53 = vector.shape_cast %52 : vector<128x8xbf16> to vector<8x16x8xbf16>
    %c9 = arith.constant 9 : index
    %c0_33 = arith.constant 0 : index
    %c0_34 = arith.constant 0 : index
    %c0_35 = arith.constant 0 : index
    %54 = vector.load %arg8[%c9, %c0_33, %c0_34, %c0_35] : memref<12x8x16x8xbf16, #tpu.memory_space<vmem>>, vector<1x8x16x8xbf16>
    %55 = vector.shape_cast %54 : vector<1x8x16x8xbf16> to vector<8x16x8xbf16>
    %56 = vector.shape_cast %53 : vector<8x16x8xbf16> to vector<1x8x16x8xbf16>
    tpu.vector_store %arg8[%c9, %c0_33, %c0_34, %c0_35], %56 {strides = array<i32>} : memref<12x8x16x8xbf16, #tpu.memory_space<vmem>>, vector<1x8x16x8xbf16>,
    %57 = vector.extract_strided_slice %6 {offsets = [0, 80], sizes = [128, 8], strides = [1, 1]} : vector<128x96xbf16> to vector<128x8xbf16>
    %58 = vector.shape_cast %57 : vector<128x8xbf16> to vector<8x16x8xbf16>
    %c10 = arith.constant 10 : index
    %c0_36 = arith.constant 0 : index
    %c0_37 = arith.constant 0 : index
    %c0_38 = arith.constant 0 : index
    %59 = vector.load %arg8[%c10, %c0_36, %c0_37, %c0_38] : memref<12x8x16x8xbf16, #tpu.memory_space<vmem>>, vector<1x8x16x8xbf16>
    %60 = vector.shape_cast %59 : vector<1x8x16x8xbf16> to vector<8x16x8xbf16>
    %61 = vector.shape_cast %58 : vector<8x16x8xbf16> to vector<1x8x16x8xbf16>
    tpu.vector_store %arg8[%c10, %c0_36, %c0_37, %c0_38], %61 {strides = array<i32>} : memref<12x8x16x8xbf16, #tpu.memory_space<vmem>>, vector<1x8x16x8xbf16>,
    %62 = vector.extract_strided_slice %6 {offsets = [0, 88], sizes = [128, 8], strides = [1, 1]} : vector<128x96xbf16> to vector<128x8xbf16>
    %63 = vector.shape_cast %62 : vector<128x8xbf16> to vector<8x16x8xbf16>
    %c11 = arith.constant 11 : index
    %c0_39 = arith.constant 0 : index
    %c0_40 = arith.constant 0 : index
    %c0_41 = arith.constant 0 : index
    %64 = vector.load %arg8[%c11, %c0_39, %c0_40, %c0_41] : memref<12x8x16x8xbf16, #tpu.memory_space<vmem>>, vector<1x8x16x8xbf16>
    %65 = vector.shape_cast %64 : vector<1x8x16x8xbf16> to vector<8x16x8xbf16>
    %66 = vector.shape_cast %63 : vector<8x16x8xbf16> to vector<1x8x16x8xbf16>
    tpu.vector_store %arg8[%c11, %c0_39, %c0_40, %c0_41], %66 {strides = array<i32>} : memref<12x8x16x8xbf16, #tpu.memory_space<vmem>>, vector<1x8x16x8xbf16>,
    %c0_i32 = arith.constant 0 : i32
    %67 = arith.index_cast %c0_i32 : i32 to index
    %c0_42 = arith.constant 0 : index
    %c0_43 = arith.constant 0 : index
    %c0_44 = arith.constant 0 : index
    %68 = vector.load %arg8[%67, %c0_42, %c0_43, %c0_44] : memref<12x8x16x8xbf16, #tpu.memory_space<vmem>>, vector<1x8x16x8xbf16>
    %69 = vector.shape_cast %68 : vector<1x8x16x8xbf16> to vector<8x16x8xbf16>
    %c4_i32 = arith.constant 4 : i32
    %70 = arith.addi %c4_i32, %c0_i32 : i32
    %71 = arith.index_cast %70 : i32 to index
    %c0_45 = arith.constant 0 : index
    %c0_46 = arith.constant 0 : index
    %c0_47 = arith.constant 0 : index
    %72 = vector.load %arg8[%71, %c0_45, %c0_46, %c0_47] : memref<12x8x16x8xbf16, #tpu.memory_space<vmem>>, vector<1x8x16x8xbf16>
    %73 = vector.shape_cast %72 : vector<1x8x16x8xbf16> to vector<8x16x8xbf16>
    %c8_i32 = arith.constant 8 : i32
    %74 = arith.addi %c8_i32, %c0_i32 : i32
    %75 = arith.index_cast %74 : i32 to index
    %c0_48 = arith.constant 0 : index
    %c0_49 = arith.constant 0 : index
    %c0_50 = arith.constant 0 : index
    %76 = vector.load %arg8[%75, %c0_48, %c0_49, %c0_50] : memref<12x8x16x8xbf16, #tpu.memory_space<vmem>>, vector<1x8x16x8xbf16>
    %77 = vector.shape_cast %76 : vector<1x8x16x8xbf16> to vector<8x16x8xbf16>
    %cst_51 = arith.constant dense<0.000000e+00> : vector<8x16x16xf32>
    %78 = tpu.matmul %69, %73, %cst_51 {dimension_numbers = #tpu.dot_dimension_numbers<[2], [2], [1], [1], [0, 0, 0, 1, 1, 1], [0], [0]>} : vector<8x16x8xbf16>, vector<8x16x8xbf16>, vector<8x16x16xf32> -> vector<8x16x16xf32>
    %79 = arith.index_cast %c0_i32 : i32 to index
    %c0_52 = arith.constant 0 : index
    %c0_53 = arith.constant 0 : index
    %80 = vector.load %arg4[%79, %c0_52, %c0_53] : memref<4x16x16xf32, #tpu.memory_space<vmem>>, vector<1x16x16xf32>
    %81 = vector.shape_cast %80 : vector<1x16x16xf32> to vector<16x16xf32>
    %82 = vector.shape_cast %81 : vector<16x16xf32> to vector<1x16x16xf32>
    %83 = vector.broadcast %82 : vector<1x16x16xf32> to vector<8x16x16xf32>
    %84 = arith.addf %78, %83 : vector<8x16x16xf32>
    %cst_54 = arith.constant dense<0xFF800000> : vector<8x16xf32>
    %85 = vector.multi_reduction <maximumf>, %84, %cst_54 [2] : vector<8x16x16xf32> to vector<8x16xf32>
    %86 = vector.shape_cast %85 : vector<8x16xf32> to vector<8x16x1xf32>
    %87 = vector.broadcast %86 : vector<8x16x1xf32> to vector<8x16x16xf32>
    %88 = arith.subf %84, %87 : vector<8x16x16xf32>
    %89 = math.exp %88 : vector<8x16x16xf32>
    %cst_55 = arith.constant dense<0.000000e+00> : vector<8x16xf32>
    %90 = vector.multi_reduction <add>, %89, %cst_55 [2] : vector<8x16x16xf32> to vector<8x16xf32>
    %91 = vector.shape_cast %90 : vector<8x16xf32> to vector<8x16x1xf32>
    %92 = arith.truncf %89 : vector<8x16x16xf32> to vector<8x16x16xbf16>
    %cst_56 = arith.constant dense<0.000000e+00> : vector<8x16x8xf32>
    %93 = tpu.matmul %92, %77, %cst_56 {dimension_numbers = #tpu.dot_dimension_numbers<[2], [1], [1], [2], [0, 0, 0, 1, 1, 2], [0], [0]>} : vector<8x16x16xbf16>, vector<8x16x8xbf16>, vector<8x16x8xf32> -> vector<8x16x8xf32>
    %94 = tpu.reciprocal %91 {approx = true} : vector<8x16x1xf32> -> vector<8x16x1xf32>
    %95 = vector.broadcast %94 : vector<8x16x1xf32> to vector<8x16x8xf32>
    %96 = arith.mulf %93, %95 : vector<8x16x8xf32>
    %97 = arith.truncf %96 : vector<8x16x8xf32> to vector<8x16x8xbf16>
    %98 = arith.index_cast %c0_i32 : i32 to index
    %c0_57 = arith.constant 0 : index
    %c0_58 = arith.constant 0 : index
    %c0_59 = arith.constant 0 : index
    %99 = vector.load %arg9[%98, %c0_57, %c0_58, %c0_59] : memref<4x8x16x8xbf16, #tpu.memory_space<vmem>>, vector<1x8x16x8xbf16>
    %100 = vector.shape_cast %99 : vector<1x8x16x8xbf16> to vector<8x16x8xbf16>
    %101 = vector.shape_cast %97 : vector<8x16x8xbf16> to vector<1x8x16x8xbf16>
    tpu.vector_store %arg9[%98, %c0_57, %c0_58, %c0_59], %101 {strides = array<i32>} : memref<4x8x16x8xbf16, #tpu.memory_space<vmem>>, vector<1x8x16x8xbf16>,
    %c1_i32 = arith.constant 1 : i32
    %102 = arith.index_cast %c1_i32 : i32 to index
    %c0_60 = arith.constant 0 : index
    %c0_61 = arith.constant 0 : index
    %c0_62 = arith.constant 0 : index
    %103 = vector.load %arg8[%102, %c0_60, %c0_61, %c0_62] : memref<12x8x16x8xbf16, #tpu.memory_space<vmem>>, vector<1x8x16x8xbf16>
    %104 = vector.shape_cast %103 : vector<1x8x16x8xbf16> to vector<8x16x8xbf16>
    %c4_i32_63 = arith.constant 4 : i32
    %105 = arith.addi %c4_i32_63, %c1_i32 : i32
    %106 = arith.index_cast %105 : i32 to index
    %c0_64 = arith.constant 0 : index
    %c0_65 = arith.constant 0 : index
    %c0_66 = arith.constant 0 : index
    %107 = vector.load %arg8[%106, %c0_64, %c0_65, %c0_66] : memref<12x8x16x8xbf16, #tpu.memory_space<vmem>>, vector<1x8x16x8xbf16>
    %108 = vector.shape_cast %107 : vector<1x8x16x8xbf16> to vector<8x16x8xbf16>
    %c8_i32_67 = arith.constant 8 : i32
    %109 = arith.addi %c8_i32_67, %c1_i32 : i32
    %110 = arith.index_cast %109 : i32 to index
    %c0_68 = arith.constant 0 : index
    %c0_69 = arith.constant 0 : index
    %c0_70 = arith.constant 0 : index
    %111 = vector.load %arg8[%110, %c0_68, %c0_69, %c0_70] : memref<12x8x16x8xbf16, #tpu.memory_space<vmem>>, vector<1x8x16x8xbf16>
    %112 = vector.shape_cast %111 : vector<1x8x16x8xbf16> to vector<8x16x8xbf16>
    %cst_71 = arith.constant dense<0.000000e+00> : vector<8x16x16xf32>
    %113 = tpu.matmul %104, %108, %cst_71 {dimension_numbers = #tpu.dot_dimension_numbers<[2], [2], [1], [1], [0, 0, 0, 1, 1, 1], [0], [0]>} : vector<8x16x8xbf16>, vector<8x16x8xbf16>, vector<8x16x16xf32> -> vector<8x16x16xf32>
    %114 = arith.index_cast %c1_i32 : i32 to index
    %c0_72 = arith.constant 0 : index
    %c0_73 = arith.constant 0 : index
    %115 = vector.load %arg4[%114, %c0_72, %c0_73] : memref<4x16x16xf32, #tpu.memory_space<vmem>>, vector<1x16x16xf32>
    %116 = vector.shape_cast %115 : vector<1x16x16xf32> to vector<16x16xf32>
    %117 = vector.shape_cast %116 : vector<16x16xf32> to vector<1x16x16xf32>
    %118 = vector.broadcast %117 : vector<1x16x16xf32> to vector<8x16x16xf32>
    %119 = arith.addf %113, %118 : vector<8x16x16xf32>
    %cst_74 = arith.constant dense<0xFF800000> : vector<8x16xf32>
    %120 = vector.multi_reduction <maximumf>, %119, %cst_74 [2] : vector<8x16x16xf32> to vector<8x16xf32>
    %121 = vector.shape_cast %120 : vector<8x16xf32> to vector<8x16x1xf32>
    %122 = vector.broadcast %121 : vector<8x16x1xf32> to vector<8x16x16xf32>
    %123 = arith.subf %119, %122 : vector<8x16x16xf32>
    %124 = math.exp %123 : vector<8x16x16xf32>
    %cst_75 = arith.constant dense<0.000000e+00> : vector<8x16xf32>
    %125 = vector.multi_reduction <add>, %124, %cst_75 [2] : vector<8x16x16xf32> to vector<8x16xf32>
    %126 = vector.shape_cast %125 : vector<8x16xf32> to vector<8x16x1xf32>
    %127 = arith.truncf %124 : vector<8x16x16xf32> to vector<8x16x16xbf16>
    %cst_76 = arith.constant dense<0.000000e+00> : vector<8x16x8xf32>
    %128 = tpu.matmul %127, %112, %cst_76 {dimension_numbers = #tpu.dot_dimension_numbers<[2], [1], [1], [2], [0, 0, 0, 1, 1, 2], [0], [0]>} : vector<8x16x16xbf16>, vector<8x16x8xbf16>, vector<8x16x8xf32> -> vector<8x16x8xf32>
    %129 = tpu.reciprocal %126 {approx = true} : vector<8x16x1xf32> -> vector<8x16x1xf32>
    %130 = vector.broadcast %129 : vector<8x16x1xf32> to vector<8x16x8xf32>
    %131 = arith.mulf %128, %130 : vector<8x16x8xf32>
    %132 = arith.truncf %131 : vector<8x16x8xf32> to vector<8x16x8xbf16>
    %133 = arith.index_cast %c1_i32 : i32 to index
    %c0_77 = arith.constant 0 : index
    %c0_78 = arith.constant 0 : index
    %c0_79 = arith.constant 0 : index
    %134 = vector.load %arg9[%133, %c0_77, %c0_78, %c0_79] : memref<4x8x16x8xbf16, #tpu.memory_space<vmem>>, vector<1x8x16x8xbf16>
    %135 = vector.shape_cast %134 : vector<1x8x16x8xbf16> to vector<8x16x8xbf16>
    %136 = vector.shape_cast %132 : vector<8x16x8xbf16> to vector<1x8x16x8xbf16>
    tpu.vector_store %arg9[%133, %c0_77, %c0_78, %c0_79], %136 {strides = array<i32>} : memref<4x8x16x8xbf16, #tpu.memory_space<vmem>>, vector<1x8x16x8xbf16>,
    %c2_i32 = arith.constant 2 : i32
    %137 = arith.index_cast %c2_i32 : i32 to index
    %c0_80 = arith.constant 0 : index
    %c0_81 = arith.constant 0 : index
    %c0_82 = arith.constant 0 : index
    %138 = vector.load %arg8[%137, %c0_80, %c0_81, %c0_82] : memref<12x8x16x8xbf16, #tpu.memory_space<vmem>>, vector<1x8x16x8xbf16>
    %139 = vector.shape_cast %138 : vector<1x8x16x8xbf16> to vector<8x16x8xbf16>
    %c4_i32_83 = arith.constant 4 : i32
    %140 = arith.addi %c4_i32_83, %c2_i32 : i32
    %141 = arith.index_cast %140 : i32 to index
    %c0_84 = arith.constant 0 : index
    %c0_85 = arith.constant 0 : index
    %c0_86 = arith.constant 0 : index
    %142 = vector.load %arg8[%141, %c0_84, %c0_85, %c0_86] : memref<12x8x16x8xbf16, #tpu.memory_space<vmem>>, vector<1x8x16x8xbf16>
    %143 = vector.shape_cast %142 : vector<1x8x16x8xbf16> to vector<8x16x8xbf16>
    %c8_i32_87 = arith.constant 8 : i32
    %144 = arith.addi %c8_i32_87, %c2_i32 : i32
    %145 = arith.index_cast %144 : i32 to index
    %c0_88 = arith.constant 0 : index
    %c0_89 = arith.constant 0 : index
    %c0_90 = arith.constant 0 : index
    %146 = vector.load %arg8[%145, %c0_88, %c0_89, %c0_90] : memref<12x8x16x8xbf16, #tpu.memory_space<vmem>>, vector<1x8x16x8xbf16>
    %147 = vector.shape_cast %146 : vector<1x8x16x8xbf16> to vector<8x16x8xbf16>
    %cst_91 = arith.constant dense<0.000000e+00> : vector<8x16x16xf32>
    %148 = tpu.matmul %139, %143, %cst_91 {dimension_numbers = #tpu.dot_dimension_numbers<[2], [2], [1], [1], [0, 0, 0, 1, 1, 1], [0], [0]>} : vector<8x16x8xbf16>, vector<8x16x8xbf16>, vector<8x16x16xf32> -> vector<8x16x16xf32>
    %149 = arith.index_cast %c2_i32 : i32 to index
    %c0_92 = arith.constant 0 : index
    %c0_93 = arith.constant 0 : index
    %150 = vector.load %arg4[%149, %c0_92, %c0_93] : memref<4x16x16xf32, #tpu.memory_space<vmem>>, vector<1x16x16xf32>
    %151 = vector.shape_cast %150 : vector<1x16x16xf32> to vector<16x16xf32>
    %152 = vector.shape_cast %151 : vector<16x16xf32> to vector<1x16x16xf32>
    %153 = vector.broadcast %152 : vector<1x16x16xf32> to vector<8x16x16xf32>
    %154 = arith.addf %148, %153 : vector<8x16x16xf32>
    %cst_94 = arith.constant dense<0xFF800000> : vector<8x16xf32>
    %155 = vector.multi_reduction <maximumf>, %154, %cst_94 [2] : vector<8x16x16xf32> to vector<8x16xf32>
    %156 = vector.shape_cast %155 : vector<8x16xf32> to vector<8x16x1xf32>
    %157 = vector.broadcast %156 : vector<8x16x1xf32> to vector<8x16x16xf32>
    %158 = arith.subf %154, %157 : vector<8x16x16xf32>
    %159 = math.exp %158 : vector<8x16x16xf32>
    %cst_95 = arith.constant dense<0.000000e+00> : vector<8x16xf32>
    %160 = vector.multi_reduction <add>, %159, %cst_95 [2] : vector<8x16x16xf32> to vector<8x16xf32>
    %161 = vector.shape_cast %160 : vector<8x16xf32> to vector<8x16x1xf32>
    %162 = arith.truncf %159 : vector<8x16x16xf32> to vector<8x16x16xbf16>
    %cst_96 = arith.constant dense<0.000000e+00> : vector<8x16x8xf32>
    %163 = tpu.matmul %162, %147, %cst_96 {dimension_numbers = #tpu.dot_dimension_numbers<[2], [1], [1], [2], [0, 0, 0, 1, 1, 2], [0], [0]>} : vector<8x16x16xbf16>, vector<8x16x8xbf16>, vector<8x16x8xf32> -> vector<8x16x8xf32>
    %164 = tpu.reciprocal %161 {approx = true} : vector<8x16x1xf32> -> vector<8x16x1xf32>
    %165 = vector.broadcast %164 : vector<8x16x1xf32> to vector<8x16x8xf32>
    %166 = arith.mulf %163, %165 : vector<8x16x8xf32>
    %167 = arith.truncf %166 : vector<8x16x8xf32> to vector<8x16x8xbf16>
    %168 = arith.index_cast %c2_i32 : i32 to index
    %c0_97 = arith.constant 0 : index
    %c0_98 = arith.constant 0 : index
    %c0_99 = arith.constant 0 : index
    %169 = vector.load %arg9[%168, %c0_97, %c0_98, %c0_99] : memref<4x8x16x8xbf16, #tpu.memory_space<vmem>>, vector<1x8x16x8xbf16>
    %170 = vector.shape_cast %169 : vector<1x8x16x8xbf16> to vector<8x16x8xbf16>
    %171 = vector.shape_cast %167 : vector<8x16x8xbf16> to vector<1x8x16x8xbf16>
    tpu.vector_store %arg9[%168, %c0_97, %c0_98, %c0_99], %171 {strides = array<i32>} : memref<4x8x16x8xbf16, #tpu.memory_space<vmem>>, vector<1x8x16x8xbf16>,
    %c3_i32 = arith.constant 3 : i32
    %172 = arith.index_cast %c3_i32 : i32 to index
    %c0_100 = arith.constant 0 : index
    %c0_101 = arith.constant 0 : index
    %c0_102 = arith.constant 0 : index
    %173 = vector.load %arg8[%172, %c0_100, %c0_101, %c0_102] : memref<12x8x16x8xbf16, #tpu.memory_space<vmem>>, vector<1x8x16x8xbf16>
    %174 = vector.shape_cast %173 : vector<1x8x16x8xbf16> to vector<8x16x8xbf16>
    %c4_i32_103 = arith.constant 4 : i32
    %175 = arith.addi %c4_i32_103, %c3_i32 : i32
    %176 = arith.index_cast %175 : i32 to index
    %c0_104 = arith.constant 0 : index
    %c0_105 = arith.constant 0 : index
    %c0_106 = arith.constant 0 : index
    %177 = vector.load %arg8[%176, %c0_104, %c0_105, %c0_106] : memref<12x8x16x8xbf16, #tpu.memory_space<vmem>>, vector<1x8x16x8xbf16>
    %178 = vector.shape_cast %177 : vector<1x8x16x8xbf16> to vector<8x16x8xbf16>
    %c8_i32_107 = arith.constant 8 : i32
    %179 = arith.addi %c8_i32_107, %c3_i32 : i32
    %180 = arith.index_cast %179 : i32 to index
    %c0_108 = arith.constant 0 : index
    %c0_109 = arith.constant 0 : index
    %c0_110 = arith.constant 0 : index
    %181 = vector.load %arg8[%180, %c0_108, %c0_109, %c0_110] : memref<12x8x16x8xbf16, #tpu.memory_space<vmem>>, vector<1x8x16x8xbf16>
    %182 = vector.shape_cast %181 : vector<1x8x16x8xbf16> to vector<8x16x8xbf16>
    %cst_111 = arith.constant dense<0.000000e+00> : vector<8x16x16xf32>
    %183 = tpu.matmul %174, %178, %cst_111 {dimension_numbers = #tpu.dot_dimension_numbers<[2], [2], [1], [1], [0, 0, 0, 1, 1, 1], [0], [0]>} : vector<8x16x8xbf16>, vector<8x16x8xbf16>, vector<8x16x16xf32> -> vector<8x16x16xf32>
    %184 = arith.index_cast %c3_i32 : i32 to index
    %c0_112 = arith.constant 0 : index
    %c0_113 = arith.constant 0 : index
    %185 = vector.load %arg4[%184, %c0_112, %c0_113] : memref<4x16x16xf32, #tpu.memory_space<vmem>>, vector<1x16x16xf32>
    %186 = vector.shape_cast %185 : vector<1x16x16xf32> to vector<16x16xf32>
    %187 = vector.shape_cast %186 : vector<16x16xf32> to vector<1x16x16xf32>
    %188 = vector.broadcast %187 : vector<1x16x16xf32> to vector<8x16x16xf32>
    %189 = arith.addf %183, %188 : vector<8x16x16xf32>
    %cst_114 = arith.constant dense<0xFF800000> : vector<8x16xf32>
    %190 = vector.multi_reduction <maximumf>, %189, %cst_114 [2] : vector<8x16x16xf32> to vector<8x16xf32>
    %191 = vector.shape_cast %190 : vector<8x16xf32> to vector<8x16x1xf32>
    %192 = vector.broadcast %191 : vector<8x16x1xf32> to vector<8x16x16xf32>
    %193 = arith.subf %189, %192 : vector<8x16x16xf32>
    %194 = math.exp %193 : vector<8x16x16xf32>
    %cst_115 = arith.constant dense<0.000000e+00> : vector<8x16xf32>
    %195 = vector.multi_reduction <add>, %194, %cst_115 [2] : vector<8x16x16xf32> to vector<8x16xf32>
    %196 = vector.shape_cast %195 : vector<8x16xf32> to vector<8x16x1xf32>
    %197 = arith.truncf %194 : vector<8x16x16xf32> to vector<8x16x16xbf16>
    %cst_116 = arith.constant dense<0.000000e+00> : vector<8x16x8xf32>
    %198 = tpu.matmul %197, %182, %cst_116 {dimension_numbers = #tpu.dot_dimension_numbers<[2], [1], [1], [2], [0, 0, 0, 1, 1, 2], [0], [0]>} : vector<8x16x16xbf16>, vector<8x16x8xbf16>, vector<8x16x8xf32> -> vector<8x16x8xf32>
    %199 = tpu.reciprocal %196 {approx = true} : vector<8x16x1xf32> -> vector<8x16x1xf32>
    %200 = vector.broadcast %199 : vector<8x16x1xf32> to vector<8x16x8xf32>
    %201 = arith.mulf %198, %200 : vector<8x16x8xf32>
    %202 = arith.truncf %201 : vector<8x16x8xf32> to vector<8x16x8xbf16>
    %203 = arith.index_cast %c3_i32 : i32 to index
    %c0_117 = arith.constant 0 : index
    %c0_118 = arith.constant 0 : index
    %c0_119 = arith.constant 0 : index
    %204 = vector.load %arg9[%203, %c0_117, %c0_118, %c0_119] : memref<4x8x16x8xbf16, #tpu.memory_space<vmem>>, vector<1x8x16x8xbf16>
    %205 = vector.shape_cast %204 : vector<1x8x16x8xbf16> to vector<8x16x8xbf16>
    %206 = vector.shape_cast %202 : vector<8x16x8xbf16> to vector<1x8x16x8xbf16>
    tpu.vector_store %arg9[%203, %c0_117, %c0_118, %c0_119], %206 {strides = array<i32>} : memref<4x8x16x8xbf16, #tpu.memory_space<vmem>>, vector<1x8x16x8xbf16>,
    %c4_i32_120 = arith.constant 4 : i32
    %c0_121 = arith.constant 0 : index
    %c0_122 = arith.constant 0 : index
    %c0_123 = arith.constant 0 : index
    %c0_124 = arith.constant 0 : index
    %207 = vector.load %arg9[%c0_121, %c0_122, %c0_123, %c0_124] : memref<4x8x16x8xbf16, #tpu.memory_space<vmem>>, vector<1x8x16x8xbf16>
    %208 = vector.shape_cast %207 : vector<1x8x16x8xbf16> to vector<8x16x8xbf16>
    %209 = vector.shape_cast %208 : vector<8x16x8xbf16> to vector<128x8xbf16>
    %c0_125 = arith.constant 0 : index
    %c0_126 = arith.constant 0 : index
    %210 = vector.load %arg10[%c0_125, %c0_126] : memref<128x32xbf16, #tpu.memory_space<vmem>>, vector<128x8xbf16>
    tpu.vector_store %arg10[%c0_125, %c0_126], %209 {strides = array<i32>} : memref<128x32xbf16, #tpu.memory_space<vmem>>, vector<128x8xbf16>,
    %c1_127 = arith.constant 1 : index
    %c0_128 = arith.constant 0 : index
    %c0_129 = arith.constant 0 : index
    %c0_130 = arith.constant 0 : index
    %211 = vector.load %arg9[%c1_127, %c0_128, %c0_129, %c0_130] : memref<4x8x16x8xbf16, #tpu.memory_space<vmem>>, vector<1x8x16x8xbf16>
    %212 = vector.shape_cast %211 : vector<1x8x16x8xbf16> to vector<8x16x8xbf16>
    %213 = vector.shape_cast %212 : vector<8x16x8xbf16> to vector<128x8xbf16>
    %c0_131 = arith.constant 0 : index
    %c8_132 = arith.constant 8 : index
    %214 = vector.load %arg10[%c0_131, %c8_132] : memref<128x32xbf16, #tpu.memory_space<vmem>>, vector<128x8xbf16>
    tpu.vector_store %arg10[%c0_131, %c8_132], %213 {strides = array<i32>} : memref<128x32xbf16, #tpu.memory_space<vmem>>, vector<128x8xbf16>,
    %c2_133 = arith.constant 2 : index
    %c0_134 = arith.constant 0 : index
    %c0_135 = arith.constant 0 : index
    %c0_136 = arith.constant 0 : index
    %215 = vector.load %arg9[%c2_133, %c0_134, %c0_135, %c0_136] : memref<4x8x16x8xbf16, #tpu.memory_space<vmem>>, vector<1x8x16x8xbf16>
    %216 = vector.shape_cast %215 : vector<1x8x16x8xbf16> to vector<8x16x8xbf16>
    %217 = vector.shape_cast %216 : vector<8x16x8xbf16> to vector<128x8xbf16>
    %c0_137 = arith.constant 0 : index
    %c16 = arith.constant 16 : index
    %218 = vector.load %arg10[%c0_137, %c16] : memref<128x32xbf16, #tpu.memory_space<vmem>>, vector<128x8xbf16>
    tpu.vector_store %arg10[%c0_137, %c16], %217 {strides = array<i32>} : memref<128x32xbf16, #tpu.memory_space<vmem>>, vector<128x8xbf16>,
    %c3_138 = arith.constant 3 : index
    %c0_139 = arith.constant 0 : index
    %c0_140 = arith.constant 0 : index
    %c0_141 = arith.constant 0 : index
    %219 = vector.load %arg9[%c3_138, %c0_139, %c0_140, %c0_141] : memref<4x8x16x8xbf16, #tpu.memory_space<vmem>>, vector<1x8x16x8xbf16>
    %220 = vector.shape_cast %219 : vector<1x8x16x8xbf16> to vector<8x16x8xbf16>
    %221 = vector.shape_cast %220 : vector<8x16x8xbf16> to vector<128x8xbf16>
    %c0_142 = arith.constant 0 : index
    %c24 = arith.constant 24 : index
    %222 = vector.load %arg10[%c0_142, %c24] : memref<128x32xbf16, #tpu.memory_space<vmem>>, vector<128x8xbf16>
    tpu.vector_store %arg10[%c0_142, %c24], %221 {strides = array<i32>} : memref<128x32xbf16, #tpu.memory_space<vmem>>, vector<128x8xbf16>,
    %c0_143 = arith.constant 0 : index
    %c0_144 = arith.constant 0 : index
    %223 = vector.load %arg10[%c0_143, %c0_144] : memref<128x32xbf16, #tpu.memory_space<vmem>>, vector<128x32xbf16>
    %c0_145 = arith.constant 0 : index
    %c0_146 = arith.constant 0 : index
    %224 = vector.load %arg5[%c0_145, %c0_146] : memref<32x128xbf16, #tpu.memory_space<vmem>>, vector<32x128xbf16>
    %cst_147 = arith.constant dense<0.000000e+00> : vector<128x128xf32>
    %225 = tpu.matmul %223, %224, %cst_147 {dimension_numbers = #tpu.dot_dimension_numbers<[1], [0], [0], [1], [0, 0, 1, 1], [], []>} : vector<128x32xbf16>, vector<32x128xbf16>, vector<128x128xf32> -> vector<128x128xf32>
    %c0_148 = arith.constant 0 : index
    %c0_149 = arith.constant 0 : index
    %226 = vector.load %arg6[%c0_148, %c0_149] : memref<1x128xf32, #tpu.memory_space<vmem>>, vector<1x128xf32>
    %227 = vector.broadcast %226 : vector<1x128xf32> to vector<128x128xf32>
    %228 = arith.addf %225, %227 : vector<128x128xf32>
    %c0_150 = arith.constant 0 : index
    %c0_151 = arith.constant 0 : index
    %229 = vector.load %arg7[%c0_150, %c0_151] : memref<128x128xf32, #tpu.memory_space<vmem>>, vector<128x128xf32>
    tpu.vector_store %arg7[%c0_150, %c0_151], %228 {strides = array<i32>} : memref<128x128xf32, #tpu.memory_space<vmem>>, vector<128x128xf32>,
    return
  }
  func.func @transform_0(%arg0: i32) -> (i32, i32) {
    %c0_i32 = arith.constant 0 : i32
    %c0_i32_0 = arith.constant 0 : i32
    return %arg0, %c0_i32 : i32, i32
  }
  func.func @transform_1(%arg0: i32) -> (i32, i32) {
    %c0_i32 = arith.constant 0 : i32
    %c0_i32_0 = arith.constant 0 : i32
    %c0_i32_1 = arith.constant 0 : i32
    return %c0_i32, %c0_i32_0 : i32, i32
  }
  func.func @transform_2(%arg0: i32) -> (i32, i32) {
    %c0_i32 = arith.constant 0 : i32
    %c0_i32_0 = arith.constant 0 : i32
    %c0_i32_1 = arith.constant 0 : i32
    return %c0_i32, %c0_i32_0 : i32, i32
  }
  func.func @transform_3(%arg0: i32) -> (i32, i32, i32) {
    %c0_i32 = arith.constant 0 : i32
    %c0_i32_0 = arith.constant 0 : i32
    %c0_i32_1 = arith.constant 0 : i32
    %c0_i32_2 = arith.constant 0 : i32
    return %c0_i32, %c0_i32_0, %c0_i32_1 : i32, i32, i32
  }
  func.func @transform_4(%arg0: i32) -> (i32, i32) {
    %c0_i32 = arith.constant 0 : i32
    %c0_i32_0 = arith.constant 0 : i32
    %c0_i32_1 = arith.constant 0 : i32
    return %c0_i32, %c0_i32_0 : i32, i32
  }
  func.func @transform_5(%arg0: i32) -> (i32, i32) {
    %c0_i32 = arith.constant 0 : i32
    %c0_i32_0 = arith.constant 0 : i32
    %c0_i32_1 = arith.constant 0 : i32
    return %c0_i32, %c0_i32_0 : i32, i32
  }
  func.func @transform_6(%arg0: i32) -> (i32, i32) {
    %c0_i32 = arith.constant 0 : i32
    %c0_i32_0 = arith.constant 0 : i32
    return %arg0, %c0_i32 : i32, i32
  }
}

module attributes {stable_mosaic.version = 11 : i64} {
  func.func @window_attention_kernel(%arg0: i32, %arg1: memref<128x32xbf16, #tpu.memory_space<vmem>>, %arg2: memref<32x96xbf16, #tpu.memory_space<vmem>>, %arg3: memref<1x96xf32, #tpu.memory_space<vmem>>, %arg4: memref<4x16x16xf32, #tpu.memory_space<vmem>>, %arg5: memref<32x128xbf16, #tpu.memory_space<vmem>>, %arg6: memref<1x128xf32, #tpu.memory_space<vmem>>, %arg7: memref<128x128xf32, #tpu.memory_space<vmem>>, %arg8: memref<12x8x16x8xbf16, #tpu.memory_space<vmem>>, %arg9: memref<4x8x16x8xbf16, #tpu.memory_space<vmem>>, %arg10: memref<128x32xbf16, #tpu.memory_space<vmem>>) attributes {dimension_semantics = [#tpu.dimension_semantics<parallel>], iteration_bounds = array<i64: 4>, scalar_prefetch = 0 : i64, scratch_operands = 3 : i64, tpu.core_type = #tpu.core_type<tc>, window_params = [{transform_indices = @transform_0, window_bounds = array<i64: 128, 32>}, {pipeline_mode = #tpu.pipeline_mode<synchronous>, transform_indices = @transform_1, window_bounds = array<i64: 32, 96>}, {pipeline_mode = #tpu.pipeline_mode<synchronous>, transform_indices = @transform_2, window_bounds = array<i64: 1, 96>}, {pipeline_mode = #tpu.pipeline_mode<synchronous>, transform_indices = @transform_3, window_bounds = array<i64: 4, 16, 16>}, {pipeline_mode = #tpu.pipeline_mode<synchronous>, transform_indices = @transform_4, window_bounds = array<i64: 32, 128>}, {pipeline_mode = #tpu.pipeline_mode<synchronous>, transform_indices = @transform_5, window_bounds = array<i64: 1, 128>}, {transform_indices = @transform_6, window_bounds = array<i64: 128, 128>}]} {
    %c0 = arith.constant 0 : index
    %c0_0 = arith.constant 0 : index
    %0 = vector.load %arg1[%c0, %c0_0] : memref<128x32xbf16, #tpu.memory_space<vmem>>, vector<128x32xbf16>
    %c0_1 = arith.constant 0 : index
    %c0_2 = arith.constant 0 : index
    %1 = vector.load %arg2[%c0_1, %c0_2] : memref<32x96xbf16, #tpu.memory_space<vmem>>, vector<32x96xbf16>
    %cst = arith.constant dense<0.000000e+00> : vector<128x96xf32>
    %2 = tpu.matmul %0, %1, %cst {dimension_numbers = #tpu.dot_dimension_numbers<[1], [0], [0], [1], [0, 0, 1, 1], [], []>} : vector<128x32xbf16>, vector<32x96xbf16>, vector<128x96xf32> -> vector<128x96xf32>
    %c0_3 = arith.constant 0 : index
    %c0_4 = arith.constant 0 : index
    %3 = vector.load %arg3[%c0_3, %c0_4] : memref<1x96xf32, #tpu.memory_space<vmem>>, vector<1x96xf32>
    %4 = vector.broadcast %3 : vector<1x96xf32> to vector<128x96xf32>
    %5 = arith.addf %2, %4 : vector<128x96xf32>
    %6 = arith.truncf %5 : vector<128x96xf32> to vector<128x96xbf16>
    %7 = vector.extract_strided_slice %6 {offsets = [0, 0], sizes = [128, 8], strides = [1, 1]} : vector<128x96xbf16> to vector<128x8xbf16>
    %8 = vector.shape_cast %7 : vector<128x8xbf16> to vector<8x16x8xbf16>
    %c0_5 = arith.constant 0 : index
    %c0_6 = arith.constant 0 : index
    %c0_7 = arith.constant 0 : index
    %c0_8 = arith.constant 0 : index
    %9 = vector.load %arg8[%c0_5, %c0_6, %c0_7, %c0_8] : memref<12x8x16x8xbf16, #tpu.memory_space<vmem>>, vector<1x8x16x8xbf16>
    %10 = vector.shape_cast %9 : vector<1x8x16x8xbf16> to vector<8x16x8xbf16>
    %11 = vector.shape_cast %8 : vector<8x16x8xbf16> to vector<1x8x16x8xbf16>
    tpu.vector_store %arg8[%c0_5, %c0_6, %c0_7, %c0_8], %11 {strides = array<i32>} : memref<12x8x16x8xbf16, #tpu.memory_space<vmem>>, vector<1x8x16x8xbf16>,
    %12 = vector.extract_strided_slice %6 {offsets = [0, 8], sizes = [128, 8], strides = [1, 1]} : vector<128x96xbf16> to vector<128x8xbf16>
    %13 = vector.shape_cast %12 : vector<128x8xbf16> to vector<8x16x8xbf16>
    %c1 = arith.constant 1 : index
    %c0_9 = arith.constant 0 : index
    %c0_10 = arith.constant 0 : index
    %c0_11 = arith.constant 0 : index
    %14 = vector.load %arg8[%c1, %c0_9, %c0_10, %c0_11] : memref<12x8x16x8xbf16, #tpu.memory_space<vmem>>, vector<1x8x16x8xbf16>
    %15 = vector.shape_cast %14 : vector<1x8x16x8xbf16> to vector<8x16x8xbf16>
    %16 = vector.shape_cast %13 : vector<8x16x8xbf16> to vector<1x8x16x8xbf16>
    tpu.vector_store %arg8[%c1, %c0_9, %c0_10, %c0_11], %16 {strides = array<i32>} : memref<12x8x16x8xbf16, #tpu.memory_space<vmem>>, vector<1x8x16x8xbf16>,
    %17 = vector.extract_strided_slice %6 {offsets = [0, 16], sizes = [128, 8], strides = [1, 1]} : vector<128x96xbf16> to vector<128x8xbf16>
    %18 = vector.shape_cast %17 : vector<128x8xbf16> to vector<8x16x8xbf16>
    %c2 = arith.constant 2 : index
    %c0_12 = arith.constant 0 : index
    %c0_13 = arith.constant 0 : index
    %c0_14 = arith.constant 0 : index
    %19 = vector.load %arg8[%c2, %c0_12, %c0_13, %c0_14] : memref<12x8x16x8xbf16, #tpu.memory_space<vmem>>, vector<1x8x16x8xbf16>
    %20 = vector.shape_cast %19 : vector<1x8x16x8xbf16> to vector<8x16x8xbf16>
    %21 = vector.shape_cast %18 : vector<8x16x8xbf16> to vector<1x8x16x8xbf16>
    tpu.vector_store %arg8[%c2, %c0_12, %c0_13, %c0_14], %21 {strides = array<i32>} : memref<12x8x16x8xbf16, #tpu.memory_space<vmem>>, vector<1x8x16x8xbf16>,
    %22 = vector.extract_strided_slice %6 {offsets = [0, 24], sizes = [128, 8], strides = [1, 1]} : vector<128x96xbf16> to vector<128x8xbf16>
    %23 = vector.shape_cast %22 : vector<128x8xbf16> to vector<8x16x8xbf16>
    %c3 = arith.constant 3 : index
    %c0_15 = arith.constant 0 : index
    %c0_16 = arith.constant 0 : index
    %c0_17 = arith.constant 0 : index
    %24 = vector.load %arg8[%c3, %c0_15, %c0_16, %c0_17] : memref<12x8x16x8xbf16, #tpu.memory_space<vmem>>, vector<1x8x16x8xbf16>
    %25 = vector.shape_cast %24 : vector<1x8x16x8xbf16> to vector<8x16x8xbf16>
    %26 = vector.shape_cast %23 : vector<8x16x8xbf16> to vector<1x8x16x8xbf16>
    tpu.vector_store %arg8[%c3, %c0_15, %c0_16, %c0_17], %26 {strides = array<i32>} : memref<12x8x16x8xbf16, #tpu.memory_space<vmem>>, vector<1x8x16x8xbf16>,
    %27 = vector.extract_strided_slice %6 {offsets = [0, 32], sizes = [128, 8], strides = [1, 1]} : vector<128x96xbf16> to vector<128x8xbf16>
    %28 = vector.shape_cast %27 : vector<128x8xbf16> to vector<8x16x8xbf16>
    %c4 = arith.constant 4 : index
    %c0_18 = arith.constant 0 : index
    %c0_19 = arith.constant 0 : index
    %c0_20 = arith.constant 0 : index
    %29 = vector.load %arg8[%c4, %c0_18, %c0_19, %c0_20] : memref<12x8x16x8xbf16, #tpu.memory_space<vmem>>, vector<1x8x16x8xbf16>
    %30 = vector.shape_cast %29 : vector<1x8x16x8xbf16> to vector<8x16x8xbf16>
    %31 = vector.shape_cast %28 : vector<8x16x8xbf16> to vector<1x8x16x8xbf16>
    tpu.vector_store %arg8[%c4, %c0_18, %c0_19, %c0_20], %31 {strides = array<i32>} : memref<12x8x16x8xbf16, #tpu.memory_space<vmem>>, vector<1x8x16x8xbf16>,
    %32 = vector.extract_strided_slice %6 {offsets = [0, 40], sizes = [128, 8], strides = [1, 1]} : vector<128x96xbf16> to vector<128x8xbf16>
    %33 = vector.shape_cast %32 : vector<128x8xbf16> to vector<8x16x8xbf16>
    %c5 = arith.constant 5 : index
    %c0_21 = arith.constant 0 : index
    %c0_22 = arith.constant 0 : index
    %c0_23 = arith.constant 0 : index
    %34 = vector.load %arg8[%c5, %c0_21, %c0_22, %c0_23] : memref<12x8x16x8xbf16, #tpu.memory_space<vmem>>, vector<1x8x16x8xbf16>
    %35 = vector.shape_cast %34 : vector<1x8x16x8xbf16> to vector<8x16x8xbf16>
    %36 = vector.shape_cast %33 : vector<8x16x8xbf16> to vector<1x8x16x8xbf16>
    tpu.vector_store %arg8[%c5, %c0_21, %c0_22, %c0_23], %36 {strides = array<i32>} : memref<12x8x16x8xbf16, #tpu.memory_space<vmem>>, vector<1x8x16x8xbf16>,
    %37 = vector.extract_strided_slice %6 {offsets = [0, 48], sizes = [128, 8], strides = [1, 1]} : vector<128x96xbf16> to vector<128x8xbf16>
    %38 = vector.shape_cast %37 : vector<128x8xbf16> to vector<8x16x8xbf16>
    %c6 = arith.constant 6 : index
    %c0_24 = arith.constant 0 : index
    %c0_25 = arith.constant 0 : index
    %c0_26 = arith.constant 0 : index
    %39 = vector.load %arg8[%c6, %c0_24, %c0_25, %c0_26] : memref<12x8x16x8xbf16, #tpu.memory_space<vmem>>, vector<1x8x16x8xbf16>
    %40 = vector.shape_cast %39 : vector<1x8x16x8xbf16> to vector<8x16x8xbf16>
    %41 = vector.shape_cast %38 : vector<8x16x8xbf16> to vector<1x8x16x8xbf16>
    tpu.vector_store %arg8[%c6, %c0_24, %c0_25, %c0_26], %41 {strides = array<i32>} : memref<12x8x16x8xbf16, #tpu.memory_space<vmem>>, vector<1x8x16x8xbf16>,
    %42 = vector.extract_strided_slice %6 {offsets = [0, 56], sizes = [128, 8], strides = [1, 1]} : vector<128x96xbf16> to vector<128x8xbf16>
    %43 = vector.shape_cast %42 : vector<128x8xbf16> to vector<8x16x8xbf16>
    %c7 = arith.constant 7 : index
    %c0_27 = arith.constant 0 : index
    %c0_28 = arith.constant 0 : index
    %c0_29 = arith.constant 0 : index
    %44 = vector.load %arg8[%c7, %c0_27, %c0_28, %c0_29] : memref<12x8x16x8xbf16, #tpu.memory_space<vmem>>, vector<1x8x16x8xbf16>
    %45 = vector.shape_cast %44 : vector<1x8x16x8xbf16> to vector<8x16x8xbf16>
    %46 = vector.shape_cast %43 : vector<8x16x8xbf16> to vector<1x8x16x8xbf16>
    tpu.vector_store %arg8[%c7, %c0_27, %c0_28, %c0_29], %46 {strides = array<i32>} : memref<12x8x16x8xbf16, #tpu.memory_space<vmem>>, vector<1x8x16x8xbf16>,
    %47 = vector.extract_strided_slice %6 {offsets = [0, 64], sizes = [128, 8], strides = [1, 1]} : vector<128x96xbf16> to vector<128x8xbf16>
    %48 = vector.shape_cast %47 : vector<128x8xbf16> to vector<8x16x8xbf16>
    %c8 = arith.constant 8 : index
    %c0_30 = arith.constant 0 : index
    %c0_31 = arith.constant 0 : index
    %c0_32 = arith.constant 0 : index
    %49 = vector.load %arg8[%c8, %c0_30, %c0_31, %c0_32] : memref<12x8x16x8xbf16, #tpu.memory_space<vmem>>, vector<1x8x16x8xbf16>
    %50 = vector.shape_cast %49 : vector<1x8x16x8xbf16> to vector<8x16x8xbf16>
    %51 = vector.shape_cast %48 : vector<8x16x8xbf16> to vector<1x8x16x8xbf16>
    tpu.vector_store %arg8[%c8, %c0_30, %c0_31, %c0_32], %51 {strides = array<i32>} : memref<12x8x16x8xbf16, #tpu.memory_space<vmem>>, vector<1x8x16x8xbf16>,
    %52 = vector.extract_strided_slice %6 {offsets = [0, 72], sizes = [128, 8], strides = [1, 1]} : vector<128x96xbf16> to vector<128x8xbf16>
    %53 = vector.shape_cast %52 : vector<128x8xbf16> to vector<8x16x8xbf16>
    %c9 = arith.constant 9 : index
    %c0_33 = arith.constant 0 : index
    %c0_34 = arith.constant 0 : index
    %c0_35 = arith.constant 0 : index
    %54 = vector.load %arg8[%c9, %c0_33, %c0_34, %c0_35] : memref<12x8x16x8xbf16, #tpu.memory_space<vmem>>, vector<1x8x16x8xbf16>
    %55 = vector.shape_cast %54 : vector<1x8x16x8xbf16> to vector<8x16x8xbf16>
    %56 = vector.shape_cast %53 : vector<8x16x8xbf16> to vector<1x8x16x8xbf16>
    tpu.vector_store %arg8[%c9, %c0_33, %c0_34, %c0_35], %56 {strides = array<i32>} : memref<12x8x16x8xbf16, #tpu.memory_space<vmem>>, vector<1x8x16x8xbf16>,
    %57 = vector.extract_strided_slice %6 {offsets = [0, 80], sizes = [128, 8], strides = [1, 1]} : vector<128x96xbf16> to vector<128x8xbf16>
    %58 = vector.shape_cast %57 : vector<128x8xbf16> to vector<8x16x8xbf16>
    %c10 = arith.constant 10 : index
    %c0_36 = arith.constant 0 : index
    %c0_37 = arith.constant 0 : index
    %c0_38 = arith.constant 0 : index
    %59 = vector.load %arg8[%c10, %c0_36, %c0_37, %c0_38] : memref<12x8x16x8xbf16, #tpu.memory_space<vmem>>, vector<1x8x16x8xbf16>
    %60 = vector.shape_cast %59 : vector<1x8x16x8xbf16> to vector<8x16x8xbf16>
    %61 = vector.shape_cast %58 : vector<8x16x8xbf16> to vector<1x8x16x8xbf16>
    tpu.vector_store %arg8[%c10, %c0_36, %c0_37, %c0_38], %61 {strides = array<i32>} : memref<12x8x16x8xbf16, #tpu.memory_space<vmem>>, vector<1x8x16x8xbf16>,
    %62 = vector.extract_strided_slice %6 {offsets = [0, 88], sizes = [128, 8], strides = [1, 1]} : vector<128x96xbf16> to vector<128x8xbf16>
    %63 = vector.shape_cast %62 : vector<128x8xbf16> to vector<8x16x8xbf16>
    %c11 = arith.constant 11 : index
    %c0_39 = arith.constant 0 : index
    %c0_40 = arith.constant 0 : index
    %c0_41 = arith.constant 0 : index
    %64 = vector.load %arg8[%c11, %c0_39, %c0_40, %c0_41] : memref<12x8x16x8xbf16, #tpu.memory_space<vmem>>, vector<1x8x16x8xbf16>
    %65 = vector.shape_cast %64 : vector<1x8x16x8xbf16> to vector<8x16x8xbf16>
    %66 = vector.shape_cast %63 : vector<8x16x8xbf16> to vector<1x8x16x8xbf16>
    tpu.vector_store %arg8[%c11, %c0_39, %c0_40, %c0_41], %66 {strides = array<i32>} : memref<12x8x16x8xbf16, #tpu.memory_space<vmem>>, vector<1x8x16x8xbf16>,
    %c0_i32 = arith.constant 0 : i32
    %67 = arith.index_cast %c0_i32 : i32 to index
    %c0_42 = arith.constant 0 : index
    %c0_43 = arith.constant 0 : index
    %c0_44 = arith.constant 0 : index
    %68 = vector.load %arg8[%67, %c0_42, %c0_43, %c0_44] : memref<12x8x16x8xbf16, #tpu.memory_space<vmem>>, vector<1x8x16x8xbf16>
    %69 = vector.shape_cast %68 : vector<1x8x16x8xbf16> to vector<8x16x8xbf16>
    %c4_i32 = arith.constant 4 : i32
    %70 = arith.addi %c4_i32, %c0_i32 : i32
    %71 = arith.index_cast %70 : i32 to index
    %c0_45 = arith.constant 0 : index
    %c0_46 = arith.constant 0 : index
    %c0_47 = arith.constant 0 : index
    %72 = vector.load %arg8[%71, %c0_45, %c0_46, %c0_47] : memref<12x8x16x8xbf16, #tpu.memory_space<vmem>>, vector<1x8x16x8xbf16>
    %73 = vector.shape_cast %72 : vector<1x8x16x8xbf16> to vector<8x16x8xbf16>
    %c8_i32 = arith.constant 8 : i32
    %74 = arith.addi %c8_i32, %c0_i32 : i32
    %75 = arith.index_cast %74 : i32 to index
    %c0_48 = arith.constant 0 : index
    %c0_49 = arith.constant 0 : index
    %c0_50 = arith.constant 0 : index
    %76 = vector.load %arg8[%75, %c0_48, %c0_49, %c0_50] : memref<12x8x16x8xbf16, #tpu.memory_space<vmem>>, vector<1x8x16x8xbf16>
    %77 = vector.shape_cast %76 : vector<1x8x16x8xbf16> to vector<8x16x8xbf16>
    %cst_51 = arith.constant dense<0.000000e+00> : vector<8x16x16xf32>
    %78 = tpu.matmul %69, %73, %cst_51 {dimension_numbers = #tpu.dot_dimension_numbers<[2], [2], [1], [1], [0, 0, 0, 1, 1, 1], [0], [0]>} : vector<8x16x8xbf16>, vector<8x16x8xbf16>, vector<8x16x16xf32> -> vector<8x16x16xf32>
    %79 = arith.index_cast %c0_i32 : i32 to index
    %c0_52 = arith.constant 0 : index
    %c0_53 = arith.constant 0 : index
    %80 = vector.load %arg4[%79, %c0_52, %c0_53] : memref<4x16x16xf32, #tpu.memory_space<vmem>>, vector<1x16x16xf32>
    %81 = vector.shape_cast %80 : vector<1x16x16xf32> to vector<16x16xf32>
    %82 = vector.shape_cast %81 : vector<16x16xf32> to vector<1x16x16xf32>
    %83 = vector.broadcast %82 : vector<1x16x16xf32> to vector<8x16x16xf32>
    %84 = arith.addf %78, %83 : vector<8x16x16xf32>
    %cst_54 = arith.constant dense<0xFF800000> : vector<8x16xf32>
    %85 = vector.multi_reduction <maximumf>, %84, %cst_54 [2] : vector<8x16x16xf32> to vector<8x16xf32>
    %86 = vector.shape_cast %85 : vector<8x16xf32> to vector<8x16x1xf32>
    %87 = vector.broadcast %86 : vector<8x16x1xf32> to vector<8x16x16xf32>
    %88 = arith.subf %84, %87 : vector<8x16x16xf32>
    %89 = math.exp %88 : vector<8x16x16xf32>
    %cst_55 = arith.constant dense<0.000000e+00> : vector<8x16xf32>
    %90 = vector.multi_reduction <add>, %89, %cst_55 [2] : vector<8x16x16xf32> to vector<8x16xf32>
    %91 = vector.shape_cast %90 : vector<8x16xf32> to vector<8x16x1xf32>
    %92 = arith.truncf %89 : vector<8x16x16xf32> to vector<8x16x16xbf16>
    %cst_56 = arith.constant dense<0.000000e+00> : vector<8x16x8xf32>
    %93 = tpu.matmul %92, %77, %cst_56 {dimension_numbers = #tpu.dot_dimension_numbers<[2], [1], [1], [2], [0, 0, 0, 1, 1, 2], [0], [0]>} : vector<8x16x16xbf16>, vector<8x16x8xbf16>, vector<8x16x8xf32> -> vector<8x16x8xf32>
    %94 = tpu.reciprocal %91 {approx = true} : vector<8x16x1xf32> -> vector<8x16x1xf32>
    %95 = vector.broadcast %94 : vector<8x16x1xf32> to vector<8x16x8xf32>
    %96 = arith.mulf %93, %95 : vector<8x16x8xf32>
    %97 = arith.truncf %96 : vector<8x16x8xf32> to vector<8x16x8xbf16>
    %98 = arith.index_cast %c0_i32 : i32 to index
    %c0_57 = arith.constant 0 : index
    %c0_58 = arith.constant 0 : index
    %c0_59 = arith.constant 0 : index
    %99 = vector.load %arg9[%98, %c0_57, %c0_58, %c0_59] : memref<4x8x16x8xbf16, #tpu.memory_space<vmem>>, vector<1x8x16x8xbf16>
    %100 = vector.shape_cast %99 : vector<1x8x16x8xbf16> to vector<8x16x8xbf16>
    %101 = vector.shape_cast %97 : vector<8x16x8xbf16> to vector<1x8x16x8xbf16>
    tpu.vector_store %arg9[%98, %c0_57, %c0_58, %c0_59], %101 {strides = array<i32>} : memref<4x8x16x8xbf16, #tpu.memory_space<vmem>>, vector<1x8x16x8xbf16>,
    %c1_i32 = arith.constant 1 : i32
    %102 = arith.index_cast %c1_i32 : i32 to index
    %c0_60 = arith.constant 0 : index
    %c0_61 = arith.constant 0 : index
    %c0_62 = arith.constant 0 : index
    %103 = vector.load %arg8[%102, %c0_60, %c0_61, %c0_62] : memref<12x8x16x8xbf16, #tpu.memory_space<vmem>>, vector<1x8x16x8xbf16>
    %104 = vector.shape_cast %103 : vector<1x8x16x8xbf16> to vector<8x16x8xbf16>
    %c4_i32_63 = arith.constant 4 : i32
    %105 = arith.addi %c4_i32_63, %c1_i32 : i32
    %106 = arith.index_cast %105 : i32 to index
    %c0_64 = arith.constant 0 : index
    %c0_65 = arith.constant 0 : index
    %c0_66 = arith.constant 0 : index
    %107 = vector.load %arg8[%106, %c0_64, %c0_65, %c0_66] : memref<12x8x16x8xbf16, #tpu.memory_space<vmem>>, vector<1x8x16x8xbf16>
    %108 = vector.shape_cast %107 : vector<1x8x16x8xbf16> to vector<8x16x8xbf16>
    %c8_i32_67 = arith.constant 8 : i32
    %109 = arith.addi %c8_i32_67, %c1_i32 : i32
    %110 = arith.index_cast %109 : i32 to index
    %c0_68 = arith.constant 0 : index
    %c0_69 = arith.constant 0 : index
    %c0_70 = arith.constant 0 : index
    %111 = vector.load %arg8[%110, %c0_68, %c0_69, %c0_70] : memref<12x8x16x8xbf16, #tpu.memory_space<vmem>>, vector<1x8x16x8xbf16>
    %112 = vector.shape_cast %111 : vector<1x8x16x8xbf16> to vector<8x16x8xbf16>
    %cst_71 = arith.constant dense<0.000000e+00> : vector<8x16x16xf32>
    %113 = tpu.matmul %104, %108, %cst_71 {dimension_numbers = #tpu.dot_dimension_numbers<[2], [2], [1], [1], [0, 0, 0, 1, 1, 1], [0], [0]>} : vector<8x16x8xbf16>, vector<8x16x8xbf16>, vector<8x16x16xf32> -> vector<8x16x16xf32>
    %114 = arith.index_cast %c1_i32 : i32 to index
    %c0_72 = arith.constant 0 : index
    %c0_73 = arith.constant 0 : index
    %115 = vector.load %arg4[%114, %c0_72, %c0_73] : memref<4x16x16xf32, #tpu.memory_space<vmem>>, vector<1x16x16xf32>
    %116 = vector.shape_cast %115 : vector<1x16x16xf32> to vector<16x16xf32>
    %117 = vector.shape_cast %116 : vector<16x16xf32> to vector<1x16x16xf32>
    %118 = vector.broadcast %117 : vector<1x16x16xf32> to vector<8x16x16xf32>
    %119 = arith.addf %113, %118 : vector<8x16x16xf32>
    %cst_74 = arith.constant dense<0xFF800000> : vector<8x16xf32>
    %120 = vector.multi_reduction <maximumf>, %119, %cst_74 [2] : vector<8x16x16xf32> to vector<8x16xf32>
    %121 = vector.shape_cast %120 : vector<8x16xf32> to vector<8x16x1xf32>
    %122 = vector.broadcast %121 : vector<8x16x1xf32> to vector<8x16x16xf32>
    %123 = arith.subf %119, %122 : vector<8x16x16xf32>
    %124 = math.exp %123 : vector<8x16x16xf32>
    %cst_75 = arith.constant dense<0.000000e+00> : vector<8x16xf32>
    %125 = vector.multi_reduction <add>, %124, %cst_75 [2] : vector<8x16x16xf32> to vector<8x16xf32>
    %126 = vector.shape_cast %125 : vector<8x16xf32> to vector<8x16x1xf32>
    %127 = arith.truncf %124 : vector<8x16x16xf32> to vector<8x16x16xbf16>
    %cst_76 = arith.constant dense<0.000000e+00> : vector<8x16x8xf32>
    %128 = tpu.matmul %127, %112, %cst_76 {dimension_numbers = #tpu.dot_dimension_numbers<[2], [1], [1], [2], [0, 0, 0, 1, 1, 2], [0], [0]>} : vector<8x16x16xbf16>, vector<8x16x8xbf16>, vector<8x16x8xf32> -> vector<8x16x8xf32>
    %129 = tpu.reciprocal %126 {approx = true} : vector<8x16x1xf32> -> vector<8x16x1xf32>
    %130 = vector.broadcast %129 : vector<8x16x1xf32> to vector<8x16x8xf32>
    %131 = arith.mulf %128, %130 : vector<8x16x8xf32>
    %132 = arith.truncf %131 : vector<8x16x8xf32> to vector<8x16x8xbf16>
    %133 = arith.index_cast %c1_i32 : i32 to index
    %c0_77 = arith.constant 0 : index
    %c0_78 = arith.constant 0 : index
    %c0_79 = arith.constant 0 : index
    %134 = vector.load %arg9[%133, %c0_77, %c0_78, %c0_79] : memref<4x8x16x8xbf16, #tpu.memory_space<vmem>>, vector<1x8x16x8xbf16>
    %135 = vector.shape_cast %134 : vector<1x8x16x8xbf16> to vector<8x16x8xbf16>
    %136 = vector.shape_cast %132 : vector<8x16x8xbf16> to vector<1x8x16x8xbf16>
    tpu.vector_store %arg9[%133, %c0_77, %c0_78, %c0_79], %136 {strides = array<i32>} : memref<4x8x16x8xbf16, #tpu.memory_space<vmem>>, vector<1x8x16x8xbf16>,
    %c2_i32 = arith.constant 2 : i32
    %137 = arith.index_cast %c2_i32 : i32 to index
    %c0_80 = arith.constant 0 : index
    %c0_81 = arith.constant 0 : index
    %c0_82 = arith.constant 0 : index
    %138 = vector.load %arg8[%137, %c0_80, %c0_81, %c0_82] : memref<12x8x16x8xbf16, #tpu.memory_space<vmem>>, vector<1x8x16x8xbf16>
    %139 = vector.shape_cast %138 : vector<1x8x16x8xbf16> to vector<8x16x8xbf16>
    %c4_i32_83 = arith.constant 4 : i32
    %140 = arith.addi %c4_i32_83, %c2_i32 : i32
    %141 = arith.index_cast %140 : i32 to index
    %c0_84 = arith.constant 0 : index
    %c0_85 = arith.constant 0 : index
    %c0_86 = arith.constant 0 : index
    %142 = vector.load %arg8[%141, %c0_84, %c0_85, %c0_86] : memref<12x8x16x8xbf16, #tpu.memory_space<vmem>>, vector<1x8x16x8xbf16>
    %143 = vector.shape_cast %142 : vector<1x8x16x8xbf16> to vector<8x16x8xbf16>
    %c8_i32_87 = arith.constant 8 : i32
    %144 = arith.addi %c8_i32_87, %c2_i32 : i32
    %145 = arith.index_cast %144 : i32 to index
    %c0_88 = arith.constant 0 : index
    %c0_89 = arith.constant 0 : index
    %c0_90 = arith.constant 0 : index
    %146 = vector.load %arg8[%145, %c0_88, %c0_89, %c0_90] : memref<12x8x16x8xbf16, #tpu.memory_space<vmem>>, vector<1x8x16x8xbf16>
    %147 = vector.shape_cast %146 : vector<1x8x16x8xbf16> to vector<8x16x8xbf16>
    %cst_91 = arith.constant dense<0.000000e+00> : vector<8x16x16xf32>
    %148 = tpu.matmul %139, %143, %cst_91 {dimension_numbers = #tpu.dot_dimension_numbers<[2], [2], [1], [1], [0, 0, 0, 1, 1, 1], [0], [0]>} : vector<8x16x8xbf16>, vector<8x16x8xbf16>, vector<8x16x16xf32> -> vector<8x16x16xf32>
    %149 = arith.index_cast %c2_i32 : i32 to index
    %c0_92 = arith.constant 0 : index
    %c0_93 = arith.constant 0 : index
    %150 = vector.load %arg4[%149, %c0_92, %c0_93] : memref<4x16x16xf32, #tpu.memory_space<vmem>>, vector<1x16x16xf32>
    %151 = vector.shape_cast %150 : vector<1x16x16xf32> to vector<16x16xf32>
    %152 = vector.shape_cast %151 : vector<16x16xf32> to vector<1x16x16xf32>
    %153 = vector.broadcast %152 : vector<1x16x16xf32> to vector<8x16x16xf32>
    %154 = arith.addf %148, %153 : vector<8x16x16xf32>
    %cst_94 = arith.constant dense<0xFF800000> : vector<8x16xf32>
    %155 = vector.multi_reduction <maximumf>, %154, %cst_94 [2] : vector<8x16x16xf32> to vector<8x16xf32>
    %156 = vector.shape_cast %155 : vector<8x16xf32> to vector<8x16x1xf32>
    %157 = vector.broadcast %156 : vector<8x16x1xf32> to vector<8x16x16xf32>
    %158 = arith.subf %154, %157 : vector<8x16x16xf32>
    %159 = math.exp %158 : vector<8x16x16xf32>
    %cst_95 = arith.constant dense<0.000000e+00> : vector<8x16xf32>
    %160 = vector.multi_reduction <add>, %159, %cst_95 [2] : vector<8x16x16xf32> to vector<8x16xf32>
    %161 = vector.shape_cast %160 : vector<8x16xf32> to vector<8x16x1xf32>
    %162 = arith.truncf %159 : vector<8x16x16xf32> to vector<8x16x16xbf16>
    %cst_96 = arith.constant dense<0.000000e+00> : vector<8x16x8xf32>
    %163 = tpu.matmul %162, %147, %cst_96 {dimension_numbers = #tpu.dot_dimension_numbers<[2], [1], [1], [2], [0, 0, 0, 1, 1, 2], [0], [0]>} : vector<8x16x16xbf16>, vector<8x16x8xbf16>, vector<8x16x8xf32> -> vector<8x16x8xf32>
    %164 = tpu.reciprocal %161 {approx = true} : vector<8x16x1xf32> -> vector<8x16x1xf32>
    %165 = vector.broadcast %164 : vector<8x16x1xf32> to vector<8x16x8xf32>
    %166 = arith.mulf %163, %165 : vector<8x16x8xf32>
    %167 = arith.truncf %166 : vector<8x16x8xf32> to vector<8x16x8xbf16>
    %168 = arith.index_cast %c2_i32 : i32 to index
    %c0_97 = arith.constant 0 : index
    %c0_98 = arith.constant 0 : index
    %c0_99 = arith.constant 0 : index
    %169 = vector.load %arg9[%168, %c0_97, %c0_98, %c0_99] : memref<4x8x16x8xbf16, #tpu.memory_space<vmem>>, vector<1x8x16x8xbf16>
    %170 = vector.shape_cast %169 : vector<1x8x16x8xbf16> to vector<8x16x8xbf16>
    %171 = vector.shape_cast %167 : vector<8x16x8xbf16> to vector<1x8x16x8xbf16>
    tpu.vector_store %arg9[%168, %c0_97, %c0_98, %c0_99], %171 {strides = array<i32>} : memref<4x8x16x8xbf16, #tpu.memory_space<vmem>>, vector<1x8x16x8xbf16>,
    %c3_i32 = arith.constant 3 : i32
    %172 = arith.index_cast %c3_i32 : i32 to index
    %c0_100 = arith.constant 0 : index
    %c0_101 = arith.constant 0 : index
    %c0_102 = arith.constant 0 : index
    %173 = vector.load %arg8[%172, %c0_100, %c0_101, %c0_102] : memref<12x8x16x8xbf16, #tpu.memory_space<vmem>>, vector<1x8x16x8xbf16>
    %174 = vector.shape_cast %173 : vector<1x8x16x8xbf16> to vector<8x16x8xbf16>
    %c4_i32_103 = arith.constant 4 : i32
    %175 = arith.addi %c4_i32_103, %c3_i32 : i32
    %176 = arith.index_cast %175 : i32 to index
    %c0_104 = arith.constant 0 : index
    %c0_105 = arith.constant 0 : index
    %c0_106 = arith.constant 0 : index
    %177 = vector.load %arg8[%176, %c0_104, %c0_105, %c0_106] : memref<12x8x16x8xbf16, #tpu.memory_space<vmem>>, vector<1x8x16x8xbf16>
    %178 = vector.shape_cast %177 : vector<1x8x16x8xbf16> to vector<8x16x8xbf16>
    %c8_i32_107 = arith.constant 8 : i32
    %179 = arith.addi %c8_i32_107, %c3_i32 : i32
    %180 = arith.index_cast %179 : i32 to index
    %c0_108 = arith.constant 0 : index
    %c0_109 = arith.constant 0 : index
    %c0_110 = arith.constant 0 : index
    %181 = vector.load %arg8[%180, %c0_108, %c0_109, %c0_110] : memref<12x8x16x8xbf16, #tpu.memory_space<vmem>>, vector<1x8x16x8xbf16>
    %182 = vector.shape_cast %181 : vector<1x8x16x8xbf16> to vector<8x16x8xbf16>
    %cst_111 = arith.constant dense<0.000000e+00> : vector<8x16x16xf32>
    %183 = tpu.matmul %174, %178, %cst_111 {dimension_numbers = #tpu.dot_dimension_numbers<[2], [2], [1], [1], [0, 0, 0, 1, 1, 1], [0], [0]>} : vector<8x16x8xbf16>, vector<8x16x8xbf16>, vector<8x16x16xf32> -> vector<8x16x16xf32>
    %184 = arith.index_cast %c3_i32 : i32 to index
    %c0_112 = arith.constant 0 : index
    %c0_113 = arith.constant 0 : index
    %185 = vector.load %arg4[%184, %c0_112, %c0_113] : memref<4x16x16xf32, #tpu.memory_space<vmem>>, vector<1x16x16xf32>
    %186 = vector.shape_cast %185 : vector<1x16x16xf32> to vector<16x16xf32>
    %187 = vector.shape_cast %186 : vector<16x16xf32> to vector<1x16x16xf32>
    %188 = vector.broadcast %187 : vector<1x16x16xf32> to vector<8x16x16xf32>
    %189 = arith.addf %183, %188 : vector<8x16x16xf32>
    %cst_114 = arith.constant dense<0xFF800000> : vector<8x16xf32>
    %190 = vector.multi_reduction <maximumf>, %189, %cst_114 [2] : vector<8x16x16xf32> to vector<8x16xf32>
    %191 = vector.shape_cast %190 : vector<8x16xf32> to vector<8x16x1xf32>
    %192 = vector.broadcast %191 : vector<8x16x1xf32> to vector<8x16x16xf32>
    %193 = arith.subf %189, %192 : vector<8x16x16xf32>
    %194 = math.exp %193 : vector<8x16x16xf32>
    %cst_115 = arith.constant dense<0.000000e+00> : vector<8x16xf32>
    %195 = vector.multi_reduction <add>, %194, %cst_115 [2] : vector<8x16x16xf32> to vector<8x16xf32>
    %196 = vector.shape_cast %195 : vector<8x16xf32> to vector<8x16x1xf32>
    %197 = arith.truncf %194 : vector<8x16x16xf32> to vector<8x16x16xbf16>
    %cst_116 = arith.constant dense<0.000000e+00> : vector<8x16x8xf32>
    %198 = tpu.matmul %197, %182, %cst_116 {dimension_numbers = #tpu.dot_dimension_numbers<[2], [1], [1], [2], [0, 0, 0, 1, 1, 2], [0], [0]>} : vector<8x16x16xbf16>, vector<8x16x8xbf16>, vector<8x16x8xf32> -> vector<8x16x8xf32>
    %199 = tpu.reciprocal %196 {approx = true} : vector<8x16x1xf32> -> vector<8x16x1xf32>
    %200 = vector.broadcast %199 : vector<8x16x1xf32> to vector<8x16x8xf32>
    %201 = arith.mulf %198, %200 : vector<8x16x8xf32>
    %202 = arith.truncf %201 : vector<8x16x8xf32> to vector<8x16x8xbf16>
    %203 = arith.index_cast %c3_i32 : i32 to index
    %c0_117 = arith.constant 0 : index
    %c0_118 = arith.constant 0 : index
    %c0_119 = arith.constant 0 : index
    %204 = vector.load %arg9[%203, %c0_117, %c0_118, %c0_119] : memref<4x8x16x8xbf16, #tpu.memory_space<vmem>>, vector<1x8x16x8xbf16>
    %205 = vector.shape_cast %204 : vector<1x8x16x8xbf16> to vector<8x16x8xbf16>
    %206 = vector.shape_cast %202 : vector<8x16x8xbf16> to vector<1x8x16x8xbf16>
    tpu.vector_store %arg9[%203, %c0_117, %c0_118, %c0_119], %206 {strides = array<i32>} : memref<4x8x16x8xbf16, #tpu.memory_space<vmem>>, vector<1x8x16x8xbf16>,
    %c4_i32_120 = arith.constant 4 : i32
    %c0_121 = arith.constant 0 : index
    %c0_122 = arith.constant 0 : index
    %c0_123 = arith.constant 0 : index
    %c0_124 = arith.constant 0 : index
    %207 = vector.load %arg9[%c0_121, %c0_122, %c0_123, %c0_124] : memref<4x8x16x8xbf16, #tpu.memory_space<vmem>>, vector<1x8x16x8xbf16>
    %208 = vector.shape_cast %207 : vector<1x8x16x8xbf16> to vector<8x16x8xbf16>
    %209 = vector.shape_cast %208 : vector<8x16x8xbf16> to vector<128x8xbf16>
    %c0_125 = arith.constant 0 : index
    %c0_126 = arith.constant 0 : index
    %210 = vector.load %arg10[%c0_125, %c0_126] : memref<128x32xbf16, #tpu.memory_space<vmem>>, vector<128x8xbf16>
    tpu.vector_store %arg10[%c0_125, %c0_126], %209 {strides = array<i32>} : memref<128x32xbf16, #tpu.memory_space<vmem>>, vector<128x8xbf16>,
    %c1_127 = arith.constant 1 : index
    %c0_128 = arith.constant 0 : index
    %c0_129 = arith.constant 0 : index
    %c0_130 = arith.constant 0 : index
    %211 = vector.load %arg9[%c1_127, %c0_128, %c0_129, %c0_130] : memref<4x8x16x8xbf16, #tpu.memory_space<vmem>>, vector<1x8x16x8xbf16>
    %212 = vector.shape_cast %211 : vector<1x8x16x8xbf16> to vector<8x16x8xbf16>
    %213 = vector.shape_cast %212 : vector<8x16x8xbf16> to vector<128x8xbf16>
    %c0_131 = arith.constant 0 : index
    %c8_132 = arith.constant 8 : index
    %214 = vector.load %arg10[%c0_131, %c8_132] : memref<128x32xbf16, #tpu.memory_space<vmem>>, vector<128x8xbf16>
    tpu.vector_store %arg10[%c0_131, %c8_132], %213 {strides = array<i32>} : memref<128x32xbf16, #tpu.memory_space<vmem>>, vector<128x8xbf16>,
    %c2_133 = arith.constant 2 : index
    %c0_134 = arith.constant 0 : index
    %c0_135 = arith.constant 0 : index
    %c0_136 = arith.constant 0 : index
    %215 = vector.load %arg9[%c2_133, %c0_134, %c0_135, %c0_136] : memref<4x8x16x8xbf16, #tpu.memory_space<vmem>>, vector<1x8x16x8xbf16>
    %216 = vector.shape_cast %215 : vector<1x8x16x8xbf16> to vector<8x16x8xbf16>
    %217 = vector.shape_cast %216 : vector<8x16x8xbf16> to vector<128x8xbf16>
    %c0_137 = arith.constant 0 : index
    %c16 = arith.constant 16 : index
    %218 = vector.load %arg10[%c0_137, %c16] : memref<128x32xbf16, #tpu.memory_space<vmem>>, vector<128x8xbf16>
    tpu.vector_store %arg10[%c0_137, %c16], %217 {strides = array<i32>} : memref<128x32xbf16, #tpu.memory_space<vmem>>, vector<128x8xbf16>,
    %c3_138 = arith.constant 3 : index
    %c0_139 = arith.constant 0 : index
    %c0_140 = arith.constant 0 : index
    %c0_141 = arith.constant 0 : index
    %219 = vector.load %arg9[%c3_138, %c0_139, %c0_140, %c0_141] : memref<4x8x16x8xbf16, #tpu.memory_space<vmem>>, vector<1x8x16x8xbf16>
    %220 = vector.shape_cast %219 : vector<1x8x16x8xbf16> to vector<8x16x8xbf16>
    %221 = vector.shape_cast %220 : vector<8x16x8xbf16> to vector<128x8xbf16>
    %c0_142 = arith.constant 0 : index
    %c24 = arith.constant 24 : index
    %222 = vector.load %arg10[%c0_142, %c24] : memref<128x32xbf16, #tpu.memory_space<vmem>>, vector<128x8xbf16>
    tpu.vector_store %arg10[%c0_142, %c24], %221 {strides = array<i32>} : memref<128x32xbf16, #tpu.memory_space<vmem>>, vector<128x8xbf16>,
    %c0_143 = arith.constant 0 : index
    %c0_144 = arith.constant 0 : index
    %223 = vector.load %arg10[%c0_143, %c0_144] : memref<128x32xbf16, #tpu.memory_space<vmem>>, vector<128x32xbf16>
    %c0_145 = arith.constant 0 : index
    %c0_146 = arith.constant 0 : index
    %224 = vector.load %arg5[%c0_145, %c0_146] : memref<32x128xbf16, #tpu.memory_space<vmem>>, vector<32x128xbf16>
    %cst_147 = arith.constant dense<0.000000e+00> : vector<128x128xf32>
    %225 = tpu.matmul %223, %224, %cst_147 {dimension_numbers = #tpu.dot_dimension_numbers<[1], [0], [0], [1], [0, 0, 1, 1], [], []>} : vector<128x32xbf16>, vector<32x128xbf16>, vector<128x128xf32> -> vector<128x128xf32>
    %c0_148 = arith.constant 0 : index
    %c0_149 = arith.constant 0 : index
    %226 = vector.load %arg6[%c0_148, %c0_149] : memref<1x128xf32, #tpu.memory_space<vmem>>, vector<1x128xf32>
    %227 = vector.broadcast %226 : vector<1x128xf32> to vector<128x128xf32>
    %228 = arith.addf %225, %227 : vector<128x128xf32>
    %c0_150 = arith.constant 0 : index
    %c0_151 = arith.constant 0 : index
    %229 = vector.load %arg7[%c0_150, %c0_151] : memref<128x128xf32, #tpu.memory_space<vmem>>, vector<128x128xf32>
    tpu.vector_store %arg7[%c0_150, %c0_151], %228 {strides = array<i32>} : memref<128x128xf32, #tpu.memory_space<vmem>>, vector<128x128xf32>,
    return
  }
  func.func @transform_0(%arg0: i32) -> (i32, i32) {
    %c0_i32 = arith.constant 0 : i32
    %c0_i32_0 = arith.constant 0 : i32
    return %arg0, %c0_i32 : i32, i32
  }
  func.func @transform_1(%arg0: i32) -> (i32, i32) {
    %c0_i32 = arith.constant 0 : i32
    %c0_i32_0 = arith.constant 0 : i32
    %c0_i32_1 = arith.constant 0 : i32
    return %c0_i32, %c0_i32_0 : i32, i32
  }
  func.func @transform_2(%arg0: i32) -> (i32, i32) {
    %c0_i32 = arith.constant 0 : i32
    %c0_i32_0 = arith.constant 0 : i32
    %c0_i32_1 = arith.constant 0 : i32
    return %c0_i32, %c0_i32_0 : i32, i32
  }
  func.func @transform_3(%arg0: i32) -> (i32, i32, i32) {
    %c0_i32 = arith.constant 0 : i32
    %c0_i32_0 = arith.constant 0 : i32
    %c0_i32_1 = arith.constant 0 : i32
    %c0_i32_2 = arith.constant 0 : i32
    return %c0_i32, %c0_i32_0, %c0_i32_1 : i32, i32, i32
  }
  func.func @transform_4(%arg0: i32) -> (i32, i32) {
    %c0_i32 = arith.constant 0 : i32
    %c0_i32_0 = arith.constant 0 : i32
    %c0_i32_1 = arith.constant 0 : i32
    return %c0_i32, %c0_i32_0 : i32, i32
  }
  func.func @transform_5(%arg0: i32) -> (i32, i32) {
    %c0_i32 = arith.constant 0 : i32
    %c0_i32_0 = arith.constant 0 : i32
    %c0_i32_1 = arith.constant 0 : i32
    return %c0_i32, %c0_i32_0 : i32, i32
  }
  func.func @transform_6(%arg0: i32) -> (i32, i32) {
    %c0_i32 = arith.constant 0 : i32
    %c0_i32_0 = arith.constant 0 : i32
    return %arg0, %c0_i32 : i32, i32
  }
}

</mosaic_0001>

<bundles_post_ra>
// kernel: tpu_custom_call.1
= control target key start
LH: loop header
LB: loop body
LE: loop exit
PB: predicated region body
PF: predicated region fallthrough
CT: control target
= control target key end

     0   :  { %11 = vsyncpa [#allocation6], 0  ;;  %s10206_s0 = inlined_call_operand.vmem [shape: bf16[512,32], index: 0, kind: input, shape index: {}]   ;;  %s10207_s1 = inlined_call_operand.vmem [shape: bf16[32,96], index: 1, kind: input, shape index: {}]   ;;  %s10208_s2 = inlined_call_operand.vmem [shape: f32[1,96], index: 2, kind: input, shape index: {}]   ;;  %s10209_s3 = inlined_call_operand.vmem [shape: f32[4,16,16], index: 3, kind: input, shape index: {}]   ;;  %s10210_s4 = inlined_call_operand.vmem [shape: bf16[32,128], index: 4, kind: input, shape index: {}]   ;;  %s10211_s5 = inlined_call_operand.vmem [shape: f32[1,128], index: 5, kind: input, shape index: {}]   ;;  %s10212_s6 = inlined_call_operand.hbm [shape: f32[512,128], index: 6, kind: output, shape index: {}]  }
   0x1   :  { %13 = vsyncpa [#allocation6 + $0x1], 0  ;;  %s8050_s21 = smov 0   ;;  %s8052_s22 = smov 0  }
   0x2   :  { %s8054_s23 = smov 0   ;;  %s8056_s24 = smov 0  }
   0x3 LB: > { %s8071_s25 = sadd.s32 4294967295, %s7995_s24   ;;  %s6554_s26 = sadd.s32 4294967294, %s7995_s24   ;;  %s7995_s24 = sphi %s8056_s24, %s10356_s24   ;;  %s7991_s23 = sphi %s8054_s23, %s10355_s23   ;;  %s7987_s22 = sphi %s8052_s22, %s10354_s22   ;;  %s7983_s21 = sphi %s8050_s21, %s10353_s21  }
   0x4   : > { %s8075_s27 = sadd.s32 1, %s7995_s24   ;;  %s157_s28 = sadd.s32 1, %s7991_s23 }
   0x5   : > { %s154_s29 = ssub.s32 %s7995_s24, %s8075_s27  ;;  %p167_p0 = scmp.ne.s32.totalorder %s7991_s23, %s7987_s22 }
   0x6   : > { %p155_p1 = scmp.eq.s32.totalorder %s154_s29, 0  ;;  %p168_p2 = scmp.eq.s32.totalorder %s8071_s25, 3 }
   0x7   : > { %p173_p3 = scmp.ne.s32.totalorder %s7987_s22, %s7983_s21  ;;  %p174_p4 = scmp.eq.s32.totalorder %s6554_s26, 3 }
   0x8   : > { %s8086_s30 = scalar_select %p155_p1, %s7991_s23, %s157_s28  }
   0x9   : > { %p8088_p5 = por %p168_p2, %p167_p0  ;;  %p8092_p6 = por %p174_p4, %p173_p3 }
   0xa   : > { %p6557_p7 = scmp.ge.s32.totalorder %s7995_s24, 1  ;;  %p216_p8 = scmp.lt.s32.totalorder %s7995_s24, 5 }
   0xc   : > { %p217_p9 = pnand %p6557_p7, %p216_p8 }
   0xe   : > { %220 = sbr.rel (%p217_p9) target bundleno = 2649 (0xa59), region = 44 }
  0x13   : > { %v7563_v0 = vld [vmem:[%s10207_s1 + $0x8] sm:$0xff]   ;;  %s6559_s11 = sshll.u32 %s8071_s25, 4  ;;  %v7564_v1 = vld [vmem:[%s10207_s1] sm:$0xff]   ;;  %vm333_vm0 = vcmask 261120   ;;  %vm519_vm1 = vcmask 60416   ;;  %s7997_s20 = smov 96  }
  0x14   : > { %p247_p10 = scmp.lt.s32.totalorder %s6559_s11, 63  ;;  %7079 = vmatprep.subr.bf16.mxu0 %v7563_v0  ;;  %7503 = vmatprep.subr.bf16.mxu1 %v7563_v0  ;;  %v8119_v10 = vld [vmem:[%s10208_s2] ss:$0 sm:$0xff]  ;;  %v10213_v29 = vmov 0.0   ;;  %vm7999_vm2 = vmmov 0   ;;  %s8000_s26 = smov 64  }
  0x15   : > { %7080 = vmatpush3.bf16.msra.mxu0 %v7563_v0  ;;  %7505 = vmatpush3.bf16.msra.mxu1 %v7563_v0  ;;  %s8001_s28 = smov 88   ;;  %s8002_s29 = smov 120   ;;  %vm1311_vm3 = vcmask 64512   ;;  %vm1758_vm4 = vcmask 130048   ;;  %vm6051_vm5 = vcmask 126016   ;;  %vm6148_vm6 = vcmask 191616  }
  0x16   : > { %s10358_s11 = smov (!%p247_p10, %s6559_s11), 63  ;;  %7081 = vmatprep.subr.bf16.mxu0 %v7564_v1  ;;  %7504 = vmatprep.subr.bf16.mxu1 %v7564_v1  ;;  %s8003_s13 = smov 56   ;;  %vm6245_vm7 = vcmask 257216  }
  0x17   : > { %s6560_s14 = sshll.u32 %s10358_s11, 2  ;;  %s8005_s15 = smov 112  }
  0x18   : > { %s250_s17 = scalar_lea.vmem %s10206_s0, %s6560_s14  ;;  %s8004_s14 = smov 80  }
  0x19   : > { %7082 = vmatpush3.bf16.msra.mxu0 %v7564_v1  ;;  %v7565_v2 = vld [vmem:[%s250_s17] sm:$0xff]   ;;  %7506 = vmatpush3.bf16.msra.mxu1 %v7564_v1  ;;  %v7566_v3 = vld [vmem:[%s250_s17 + $0x8] sm:$0xff]   ;;  %v7567_v4 = vld [vmem:[%s250_s17 + $0x10] sm:$0xff]   ;;  %s8009_s12 = smov 40   ;;  %s8011_s18 = smov 16  }
  0x1a   : > { %7083 = vmatprep.mubr.msk.bf16.mxu0 %vm333_vm0, %v7565_v2  ;;  %v7569_v5 = vld [vmem:[%s250_s17 + $0x20] sm:$0xff]   ;;  %v7570_v6 = vld [vmem:[%s250_s17 + $0x28] sm:$0xff]   ;;  %v7571_v7 = vld [vmem:[%s250_s17 + $0x30] sm:$0xff]   ;;  %7099 = vmatprep.subr.bf16.mxu1 %v10213_v29  ;;  %s8012_s19 = smov 24   ;;  %s243_s9 = sand.u32 1, %s7987_s22  }
  0x1b   : > { %7091 = vmatprep.mubr.msk.bf16.mxu1 %vm333_vm0, %v7569_v5  ;;  %v7568_v8 = vld [vmem:[%s250_s17 + $0x18] sm:$0xff]   ;;  %7123 = vmatprep.subr.bf16.mxu0 %v10213_v29  ;;  %s6558_s10 = sshll.u32 %s243_s9, 7 }
  0x1c   : > { %7084 = vmatmul.mubr.msk.bf16.vlgmr.msra.gmra.mxu0 %vm333_vm0, %v7566_v3  ;;  %7092 = vmatmul.mubr.msk.bf16.vlgmr.msra.gmra.mxu1 %vm333_vm0, %v7570_v6  ;;  %v7572_v9 = vld [vmem:[%s250_s17 + $0x38] sm:$0xff]   ;;  %s8010_s17 = smov 8  }
  0x1d   : > { %7087 = vmatprep.mubr.msk.bf16.mxu0 %vm333_vm0, %v7567_v4  ;;  %7095 = vmatprep.mubr.msk.bf16.mxu1 %vm333_vm0, %v7571_v7 }
  0x24   : > { %7088 = vmatmul.mubr.msk.bf16.gmra.mxu0 %vm333_vm0, %v7568_v8  ;;  %7096 = vmatmul.mubr.msk.bf16.gmra.mxu1 %vm333_vm0, %v7572_v9 }
  0x25   : > { %7101 = vmatprep.mubr.msk.bf16.mxu1 %vm7999_vm2, %v10213_v29  ;;  %7125 = vmatprep.mubr.msk.bf16.mxu0 %vm7999_vm2, %v10213_v29 }
  0xdc   : > { %v7085_v11 = vpop.f32.mrf.mxu0  ;;  %v7093_v17 = vpop.f32.mrf.mxu1 }
  0xdd   : > { %v401_v12 = vadd.f32 %v7085_v11, %v8119_v10  ;;  %v433_v20 = vadd.f32 %v7093_v17, %v8119_v10 }
  0xde   : > { %v392_v13 = vpop.f32.mrf.mxu0  ;;  %v424_v22 = vpop.f32.mrf.mxu1 }
  0xdf   : > { %v8122_v14 = vpack.c.bf16 %v401_v12, %v401_v12  ;;  %v393_v15 = vadd.f32 %v8119_v10, %v392_v13  ;;  %v8138_v25 = vpack.c.bf16 %v433_v20, %v433_v20  ;;  %v425_v26 = vadd.f32 %v8119_v10, %v424_v22 }
  0xe0   : > { %v7086_v16 = vpop.f32.mrf.mxu0  ;;  %v7094_v28 = vpop.f32.mrf.mxu1 }
  0xe1   : > { %v8125_v18 = vpack.c.bf16 %v393_v15, %v393_v15  ;;  %v404_v19 = vadd.f32 %v7086_v16, %v8119_v10  ;;  %735 = vrot.lane.b32.xlu1 %v8122_v14, %s7997_s20  ;;  %522 = vst.msk [vmem:[#allocation2 + $0x8] sm:$0xf] %vm519_vm1, %v8122_v14  ;;  %v8150_v32 = vpack.c.bf16 %v425_v26, %v425_v26  ;;  %530 = vst.msk [vmem:[#allocation2 + $0x28] sm:$0xf] %vm519_vm1, %v8138_v25 }
  0xe2   : > { %v395_v21 = vpop.f32.mrf.mxu0  ;;  %v436_v33 = vadd.f32 %v7094_v28, %v8119_v10  ;;  %v427_v35 = vpop.f32.mrf.mxu1 }
  0xe3   : > { %v8133_v23 = vpack.c.bf16 %v404_v19, %v404_v19  ;;  %v396_v24 = vadd.f32 %v8119_v10, %v395_v21  ;;  %731 = vrot.lane.b32.xlu0 %v8125_v18, %s7997_s20  ;;  %520 = vst.msk [vmem:[#allocation2] sm:$0xf] %vm519_vm1, %v8125_v18  ;;  %v428_v39 = vadd.f32 %v8119_v10, %v427_v35  ;;  %528 = vst.msk [vmem:[#allocation2 + $0x20] sm:$0xf] %vm519_vm1, %v8150_v32 }
  0xe4   : > { %v7089_v27 = vpop.f32.mrf.mxu0  ;;  %v8162_v38 = vpack.c.bf16 %v436_v33, %v436_v33  ;;  %v7097_v41 = vpop.f32.mrf.mxu1 }
  0xe5   : > { %v8145_v30 = vpack.c.bf16 %v396_v24, %v396_v24  ;;  %v417_v31 = vadd.f32 %v7089_v27, %v8119_v10  ;;  %737 = vrot.lane.b32.xlu1 %v8133_v23, %s7997_s20  ;;  %523 = vst.msk [vmem:[#allocation2 + $0xc] sm:$0xf] %vm519_vm1, %v8133_v23  ;;  %v8172_v44 = vpack.c.bf16 %v428_v39, %v428_v39 }
  0xe6   : > { %v408_v34 = vpop.f32.mrf.mxu0  ;;  %v449_v45 = vadd.f32 %v7097_v41, %v8119_v10  ;;  %531 = vst.msk [vmem:[#allocation2 + $0x2c] sm:$0xf] %vm519_vm1, %v8162_v38  ;;  %v440_v47 = vpop.f32.mrf.mxu1 }
  0xe7   : > { %v8157_v36 = vpack.c.bf16 %v417_v31, %v417_v31  ;;  %v409_v37 = vadd.f32 %v8119_v10, %v408_v34  ;;  %733 = vrot.lane.b32.xlu0 %v8145_v30, %s7997_s20  ;;  %521 = vst.msk [vmem:[#allocation2 + $0x4] sm:$0xf] %vm519_vm1, %v8145_v30  ;;  %v441_v51 = vadd.f32 %v8119_v10, %v440_v47  ;;  %529 = vst.msk [vmem:[#allocation2 + $0x24] sm:$0xf] %vm519_vm1, %v8172_v44 }
  0xe8   : > { %v7090_v40 = vpop.f32.mrf.mxu0  ;;  %v8184_v50 = vpack.c.bf16 %v449_v45, %v449_v45  ;;  %v7098_v52 = vpop.f32.mrf.mxu1 }
  0xe9   : > { %v8169_v42 = vpack.c.bf16 %v409_v37, %v409_v37  ;;  %v420_v43 = vadd.f32 %v7090_v40, %v8119_v10  ;;  %526 = vst.msk [vmem:[#allocation2 + $0x18] sm:$0xf] %vm519_vm1, %v8157_v36  ;;  %v8197_v54 = vpack.c.bf16 %v441_v51, %v441_v51  ;;  %v452_v55 = vadd.f32 %v7098_v52, %v8119_v10 }
  0xea   : > { %v411_v46 = vpop.f32.mrf.mxu0  ;;  %534 = vst.msk [vmem:[#allocation2 + $0x38] sm:$0xf] %vm519_vm1, %v8184_v50  ;;  %v443_v56 = vpop.f32.mrf.mxu1 }
  0xeb   : > { %v8179_v48 = vpack.c.bf16 %v420_v43, %v420_v43  ;;  %v412_v49 = vadd.f32 %v8119_v10, %v411_v46  ;;  %739 = vrot.lane.b32.xlu0 %v8169_v42, %s7997_s20  ;;  %524 = vst.msk [vmem:[#allocation2 + $0x10] sm:$0xf] %vm519_vm1, %v8169_v42  ;;  %v8208_v57 = vpack.c.bf16 %v452_v55, %v452_v55  ;;  %532 = vst.msk [vmem:[#allocation2 + $0x30] sm:$0xf] %vm519_vm1, %v8197_v54 }
  0xec   : > { %v444_v58 = vadd.f32 %v8119_v10, %v443_v56  ;;  %v7576_v16 = vld [vmem:[#allocation2 + $0x8] sm:$0xff]  }
  0xed   : > { %v8195_v53 = vpack.c.bf16 %v412_v49, %v412_v49  ;;  %527 = vst.msk [vmem:[#allocation2 + $0x1c] sm:$0xf] %vm519_vm1, %v8179_v48  ;;  %535 = vst.msk [vmem:[#allocation2 + $0x3c] sm:$0xf] %vm519_vm1, %v8208_v57 }
  0xee   : > { %v8215_v59 = vpack.c.bf16 %v444_v58, %v444_v58  ;;  %v7574_v10 = vld [vmem:[#allocation2] sm:$0xff]  }
  0xef   : > { %741 = vrot.lane.b32.xlu1 %v8195_v53, %s7997_s20  ;;  %743 = vrot.lane.b32.xlu0 %v8157_v36, %s7997_s20  ;;  %525 = vst.msk [vmem:[#allocation2 + $0x14] sm:$0xf] %vm519_vm1, %v8195_v53  ;;  %v7580_v31 = vld [vmem:[#allocation2 + $0x20] sm:$0xff]  }
  0xf0   : > { %533 = vst.msk [vmem:[#allocation2 + $0x34] sm:$0xf] %vm519_vm1, %v8215_v59 }
  0xf3   : > { %745 = vrot.lane.b32.xlu1 %v8179_v48, %s7997_s20  ;;  %747 = vrot.lane.b32.xlu0 %v8150_v32, %s7997_s20 }
  0xf4   : > { %v7583_v45 = vld [vmem:[#allocation2 + $0x18] sm:$0xff]  }
  0xf6   : > { %v7579_v28 = vld [vmem:[#allocation2 + $0x10] sm:$0xff]  }
  0xf7   : > { %749 = vrot.lane.b32.xlu1 %v8172_v44, %s7997_s20  ;;  %751 = vrot.lane.b32.xlu0 %v8138_v25, %s7997_s20  ;;  %v7584_v46 = vld [vmem:[#allocation2 + $0x30] sm:$0xff]  }
  0xfb   : > { %753 = vrot.lane.b32.xlu1 %v8162_v38, %s7997_s20  ;;  %755 = vrot.lane.b32.xlu0 %v8197_v54, %s7997_s20 }
  0xff   : > { %757 = vrot.lane.b32.xlu1 %v8215_v59, %s7997_s20  ;;  %759 = vrot.lane.b32.xlu0 %v8184_v50, %s7997_s20 }
 0x103   : > { %761 = vrot.lane.b32.xlu1 %v8208_v57, %s7997_s20  ;;  %993 = vrot.lane.b32.xlu0 %v8145_v30, %s8000_s26  ;;  %s8006_s20 = smov 48  }
 0x107   : > { %991 = vrot.lane.b32.xlu1 %v8125_v18, %s8000_s26  ;;  %1007 = vrot.lane.b32.xlu0 %v8150_v32, %s8000_s26 }
 0x10b   : > { %995 = vrot.lane.b32.xlu1 %v8122_v14, %s8000_s26  ;;  %1011 = vrot.lane.b32.xlu0 %v8138_v25, %s8000_s26 }
 0x10f   : > { %997 = vrot.lane.b32.xlu1 %v8133_v23, %s8000_s26  ;;  %1015 = vrot.lane.b32.xlu0 %v8197_v54, %s8000_s26 }
 0x113   : > { %999 = vrot.lane.b32.xlu1 %v8169_v42, %s8000_s26  ;;  %1019 = vrot.lane.b32.xlu0 %v8184_v50, %s8000_s26 }
 0x117   : > { %1003 = vrot.lane.b32.xlu1 %v8157_v36, %s8000_s26  ;;  %796 = vrot.lane.b32.xlu0 %v8125_v18, %s8001_s28 }
 0x11b   : > { %1005 = vrot.lane.b32.xlu1 %v8179_v48, %s8000_s26  ;;  %800 = vrot.lane.b32.xlu0 %v8122_v14, %s8001_s28 }
 0x11f   : > { %1009 = vrot.lane.b32.xlu1 %v8172_v44, %s8000_s26  ;;  %536 = vrot.lane.b32.xlu0 %v8125_v18, %s8002_s29 }
 0x123   : > { %1013 = vrot.lane.b32.xlu1 %v8162_v38, %s8000_s26  ;;  %804 = vrot.lane.b32.xlu0 %v8169_v42, %s8001_s28 }
 0x127   : > { %1021 = vrot.lane.b32.xlu1 %v8208_v57, %s8000_s26  ;;  %540 = vrot.lane.b32.xlu0 %v8122_v14, %s8002_s29 }
 0x12b   : > { %798 = vrot.lane.b32.xlu1 %v8145_v30, %s8001_s28  ;;  %808 = vrot.lane.b32.xlu0 %v8157_v36, %s8001_s28 }
 0x12f   : > { %802 = vrot.lane.b32.xlu1 %v8133_v23, %s8001_s28  ;;  %544 = vrot.lane.b32.xlu0 %v8169_v42, %s8002_s29 }
 0x133   : > { %538 = vrot.lane.b32.xlu1 %v8145_v30, %s8002_s29  ;;  %812 = vrot.lane.b32.xlu0 %v8150_v32, %s8001_s28 }
 0x137   : > { %542 = vrot.lane.b32.xlu1 %v8133_v23, %s8002_s29  ;;  %1001 = vrot.lane.b32.xlu0 %v8195_v53, %s8000_s26 }
 0x13b   : > { %810 = vrot.lane.b32.xlu1 %v8179_v48, %s8001_s28 }
 0x13f   : > { %1017 = vrot.lane.b32.xlu1 %v8215_v59, %s8000_s26  ;;  %s8007_s26 = smov 72  }
 0x143   : > { %806 = vrot.lane.b32.xlu1 %v8195_v53, %s8001_s28 }
 0x147   : > { %546 = vrot.lane.b32.xlu1 %v8195_v53, %s8002_s29 }
 0x153   : > { %v736_v60 = vpop.permute.xlu1 %735 }
 0x154   : > { %782 = vst.msk [vmem:[#allocation2 + $0x108] sm:$0xf] %vm519_vm1, %v736_v60 }
 0x155   : > { %v732_v61 = vpop.permute.xlu0 %731 }
 0x156   : > { %780 = vst.msk [vmem:[#allocation2 + $0x100] sm:$0xf] %vm519_vm1, %v732_v61 }
 0x157   : > { %v738_v62 = vpop.permute.xlu1 %737 }
 0x158   : > { %783 = vst.msk [vmem:[#allocation2 + $0x10c] sm:$0xf] %vm519_vm1, %v738_v62  ;;  %v7587_v62 = vld [vmem:[#allocation2 + $0x28] sm:$0xff]  }
 0x159   : > { %v734_v63 = vpop.permute.xlu0 %733 }
 0x15a   : > { %781 = vst.msk [vmem:[#allocation2 + $0x104] sm:$0xf] %vm519_vm1, %v734_v63 }
 0x15d   : > { %v740_v0 = vpop.permute.xlu0 %739 }
 0x15e   : > { %784 = vst.msk [vmem:[#allocation2 + $0x110] sm:$0xf] %vm519_vm1, %v740_v0 }
 0x15f   : > { %v7575_v7 = vld [vmem:[#allocation2 + $0x108] sm:$0xff]  }
 0x160   : > { %v1373_v11 = vsel %vm1311_vm3, %v7575_v7, 0 }
 0x161   : > { %v742_v1 = vpop.permute.xlu1 %741  ;;  %v744_v2 = vpop.permute.xlu0 %743  ;;  %v7573_v3 = vld [vmem:[#allocation2 + $0x100] sm:$0xff]  }
 0x162   : > { %785 = vst.msk [vmem:[#allocation2 + $0x114] sm:$0xf] %vm519_vm1, %v742_v1  ;;  %786 = vst.msk [vmem:[#allocation2 + $0x118] sm:$0xf] %vm519_vm1, %v744_v2  ;;  %v1316_v4 = vsel %vm1311_vm3, %v7573_v3, 0 }
 0x163   : > { %7100 = vmatpush3.bf16.xpose.msra.mxu1 %v1316_v4  ;;  %v7589_v4 = vld [vmem:[#allocation2 + $0x38] sm:$0xff]  }
 0x164   : > { %7105 = vmatprep.subr.bf16.mxu1 %v10213_v29 }
 0x165   : > { %v746_v5 = vpop.permute.xlu1 %745  ;;  %v748_v6 = vpop.permute.xlu0 %747 }
 0x166   : > { %787 = vst.msk [vmem:[#allocation2 + $0x11c] sm:$0xf] %vm519_vm1, %v746_v5  ;;  %788 = vst.msk [vmem:[#allocation2 + $0x120] sm:$0xf] %vm519_vm1, %v748_v6 }
 0x169   : > { %v750_v8 = vpop.permute.xlu1 %749  ;;  %v752_v9 = vpop.permute.xlu0 %751  ;;  %v7578_v15 = vld [vmem:[#allocation2 + $0x110] sm:$0xff]  }
 0x16a   : > { %789 = vst.msk [vmem:[#allocation2 + $0x124] sm:$0xf] %vm519_vm1, %v750_v8  ;;  %790 = vst.msk [vmem:[#allocation2 + $0x128] sm:$0xf] %vm519_vm1, %v752_v9  ;;  %7102 = vmatmul.mubr.msk.bf16.vlgmr.msra.gmra.mxu1 %vm1311_vm3, %v7574_v10  ;;  %v1430_v22 = vsel %vm1311_vm3, %v7578_v15, 0 }
 0x16b   : > { %7106 = vmatpush3.bf16.xpose.msra.mxu1 %v1373_v11  ;;  %7107 = vmatprep.mubr.msk.bf16.mxu1 %vm7999_vm2, %v10213_v29 }
 0x16c   : > { %7111 = vmatprep.subr.bf16.mxu1 %v10213_v29 }
 0x16d   : > { %v754_v12 = vpop.permute.xlu1 %753  ;;  %v756_v13 = vpop.permute.xlu0 %755  ;;  %v7582_v27 = vld [vmem:[#allocation2 + $0x118] sm:$0xff]  }
 0x16e   : > { %791 = vst.msk [vmem:[#allocation2 + $0x12c] sm:$0xf] %vm519_vm1, %v754_v12  ;;  %792 = vst.msk [vmem:[#allocation2 + $0x130] sm:$0xf] %vm519_vm1, %v756_v13  ;;  %v1487_v39 = vsel %vm1311_vm3, %v7582_v27, 0 }
 0x171   : > { %v758_v17 = vpop.permute.xlu1 %757  ;;  %v760_v19 = vpop.permute.xlu0 %759  ;;  %v7577_v20 = vld [vmem:[#allocation2 + $0x120] sm:$0xff]  }
 0x172   : > { %793 = vst.msk [vmem:[#allocation2 + $0x134] sm:$0xf] %vm519_vm1, %v758_v17  ;;  %794 = vst.msk [vmem:[#allocation2 + $0x138] sm:$0xf] %vm519_vm1, %v760_v19  ;;  %7108 = vmatmul.mubr.msk.bf16.vlgmr.msra.gmra.mxu1 %vm1311_vm3, %v7576_v16  ;;  %v1544_v21 = vsel %vm1311_vm3, %v7577_v20, 0 }
 0x173   : > { %7124 = vmatpush3.bf16.xpose.msra.mxu0 %v1544_v21  ;;  %7112 = vmatpush3.bf16.xpose.msra.mxu1 %v1430_v22 }
 0x174   : > { %7113 = vmatprep.mubr.msk.bf16.mxu1 %vm7999_vm2, %v10213_v29  ;;  %7117 = vmatprep.subr.bf16.mxu1 %v10213_v29 }
 0x175   : > { %v762_v24 = vpop.permute.xlu1 %761  ;;  %v994_v26 = vpop.permute.xlu0 %993  ;;  %7135 = vmatprep.subr.bf16.mxu0 %v10213_v29  ;;  %v7586_v43 = vld [vmem:[#allocation2 + $0x128] sm:$0xff]  }
 0x176   : > { %795 = vst.msk [vmem:[#allocation2 + $0x13c] sm:$0xf] %vm519_vm1, %v762_v24  ;;  %1041 = vst.msk [vmem:[#allocation2 + $0x204] sm:$0xf] %vm519_vm1, %v994_v26  ;;  %v1601_v52 = vsel %vm1311_vm3, %v7586_v43, 0  ;;  %v8393_v26 = vld [vmem:[%s10209_s3] sm:$0xff] }
 0x177   : > { %v8403_v43 = vld [vmem:[%s10209_s3 + $0x8] sm:$0xff] }
 0x179   : > { %v992_v33 = vpop.permute.xlu1 %991  ;;  %v1008_v34 = vpop.permute.xlu0 %1007  ;;  %v7581_v35 = vld [vmem:[#allocation2 + $0x130] sm:$0xff]  }
 0x17a   : > { %1040 = vst.msk [vmem:[#allocation2 + $0x200] sm:$0xf] %vm519_vm1, %v992_v33  ;;  %1048 = vst.msk [vmem:[#allocation2 + $0x220] sm:$0xf] %vm519_vm1, %v1008_v34  ;;  %7114 = vmatmul.mubr.msk.bf16.vlgmr.msra.gmra.mxu1 %vm1311_vm3, %v7579_v28  ;;  %7126 = vmatmul.mubr.msk.bf16.vlgmr.msra.gmra.mxu0 %vm1311_vm3, %v7580_v31  ;;  %v1658_v37 = vsel %vm1311_vm3, %v7581_v35, 0 }
 0x17b   : > { %7136 = vmatpush3.bf16.xpose.msra.mxu0 %v1658_v37  ;;  %7118 = vmatpush3.bf16.xpose.msra.mxu1 %v1487_v39 }
 0x17c   : > { %7119 = vmatprep.mubr.msk.bf16.mxu1 %vm7999_vm2, %v10213_v29  ;;  %7137 = vmatprep.mubr.msk.bf16.mxu0 %vm7999_vm2, %v10213_v29 }
 0x17d   : > { %v996_v40 = vpop.permute.xlu1 %995  ;;  %v1012_v41 = vpop.permute.xlu0 %1011  ;;  %7129 = vmatprep.subr.bf16.mxu1 %v10213_v29  ;;  %7147 = vmatprep.subr.bf16.mxu0 %v10213_v29  ;;  %v7588_v58 = vld [vmem:[#allocation2 + $0x138] sm:$0xff]  }
 0x17e   : > { %1042 = vst.msk [vmem:[#allocation2 + $0x208] sm:$0xf] %vm519_vm1, %v996_v40  ;;  %1050 = vst.msk [vmem:[#allocation2 + $0x228] sm:$0xf] %vm519_vm1, %v1012_v41  ;;  %v1715_v63 = vsel %vm1311_vm3, %v7588_v58, 0 }
 0x181   : > { %v998_v47 = vpop.permute.xlu1 %997  ;;  %v1016_v49 = vpop.permute.xlu0 %1015  ;;  %v7585_v51 = vld [vmem:[#allocation2 + $0x200] sm:$0xff]  }
 0x182   : > { %1043 = vst.msk [vmem:[#allocation2 + $0x20c] sm:$0xf] %vm519_vm1, %v998_v47  ;;  %1052 = vst.msk [vmem:[#allocation2 + $0x230] sm:$0xf] %vm519_vm1, %v1016_v49  ;;  %7120 = vmatmul.mubr.msk.bf16.vlgmr.msra.gmra.mxu1 %vm1311_vm3, %v7583_v45  ;;  %7138 = vmatmul.mubr.msk.bf16.vlgmr.msra.gmra.mxu0 %vm1311_vm3, %v7584_v46 }
 0x183   : > { %7148 = vmatpush3.bf16.msra.mxu0 %v7585_v51  ;;  %7130 = vmatpush3.bf16.xpose.msra.mxu1 %v1601_v52 }
 0x184   : > { %7131 = vmatprep.mubr.msk.bf16.mxu1 %vm7999_vm2, %v10213_v29  ;;  %7141 = vmatprep.subr.bf16.mxu1 %v10213_v29 }
 0x185   : > { %v1000_v55 = vpop.permute.xlu1 %999  ;;  %v1020_v56 = vpop.permute.xlu0 %1019  ;;  %7149 = vmatprep.mubr.msk.bf16.mxu0 %vm7999_vm2, %v10213_v29  ;;  %7159 = vmatprep.subr.bf16.mxu0 %v10213_v29 }
 0x186   : > { %1044 = vst.msk [vmem:[#allocation2 + $0x210] sm:$0xf] %vm519_vm1, %v1000_v55  ;;  %1054 = vst.msk [vmem:[#allocation2 + $0x238] sm:$0xf] %vm519_vm1, %v1020_v56 }
 0x189   : > { %v1004_v60 = vpop.permute.xlu1 %1003  ;;  %v797_v61 = vpop.permute.xlu0 %796  ;;  %v7590_v5 = vld [vmem:[#allocation2 + $0x208] sm:$0xff]  }
 0x18a   : > { %1046 = vst.msk [vmem:[#allocation2 + $0x218] sm:$0xf] %vm519_vm1, %v1004_v60  ;;  %845 = vst.msk [vmem:[#allocation2 + $0x140] sm:$0xf] %vm519_vm1, %v797_v61  ;;  %7132 = vmatmul.mubr.msk.bf16.vlgmr.msra.gmra.mxu1 %vm1311_vm3, %v7587_v62 }
 0x18b   : > { %7142 = vmatpush3.bf16.xpose.msra.mxu1 %v1715_v63  ;;  %7143 = vmatprep.mubr.msk.bf16.mxu1 %vm7999_vm2, %v10213_v29 }
 0x18c   : > { %7153 = vmatprep.subr.bf16.mxu1 %v10213_v29 }
 0x18d   : > { %v1006_v0 = vpop.permute.xlu1 %1005  ;;  %v801_v1 = vpop.permute.xlu0 %800 }
 0x18e   : > { %1047 = vst.msk [vmem:[#allocation2 + $0x21c] sm:$0xf] %vm519_vm1, %v1006_v0  ;;  %847 = vst.msk [vmem:[#allocation2 + $0x148] sm:$0xf] %vm519_vm1, %v801_v1 }
 0x191   : > { %v1010_v2 = vpop.permute.xlu1 %1009  ;;  %v537_v3 = vpop.permute.xlu0 %536 }
 0x192   : > { %1049 = vst.msk [vmem:[#allocation2 + $0x224] sm:$0xf] %vm519_vm1, %v1010_v2  ;;  %585 = vst.msk [vmem:[#allocation2 + $0x40] sm:$0xf] %vm519_vm1, %v537_v3  ;;  %7144 = vmatmul.mubr.msk.bf16.vlgmr.msra.gmra.mxu1 %vm1311_vm3, %v7589_v4 }
 0x193   : > { %7154 = vmatpush3.bf16.msra.mxu1 %v7590_v5  ;;  %7155 = vmatprep.mubr.msk.bf16.mxu1 %vm7999_vm2, %v10213_v29 }
 0x194   : > { %7165 = vmatprep.subr.bf16.mxu1 %v10213_v29 }
 0x195   : > { %v1014_v6 = vpop.permute.xlu1 %1013  ;;  %v805_v7 = vpop.permute.xlu0 %804 }
 0x196   : > { %1051 = vst.msk [vmem:[#allocation2 + $0x22c] sm:$0xf] %vm519_vm1, %v1014_v6  ;;  %849 = vst.msk [vmem:[#allocation2 + $0x150] sm:$0xf] %vm519_vm1, %v805_v7 }
 0x199   : > { %v1022_v8 = vpop.permute.xlu1 %1021  ;;  %v541_v9 = vpop.permute.xlu0 %540 }
 0x19a   : > { %1055 = vst.msk [vmem:[#allocation2 + $0x23c] sm:$0xf] %vm519_vm1, %v1022_v8  ;;  %587 = vst.msk [vmem:[#allocation2 + $0x48] sm:$0xf] %vm519_vm1, %v541_v9 }
 0x19d   : > { %v799_v10 = vpop.permute.xlu1 %798  ;;  %v809_v11 = vpop.permute.xlu0 %808 }
 0x19e   : > { %846 = vst.msk [vmem:[#allocation2 + $0x144] sm:$0xf] %vm519_vm1, %v799_v10  ;;  %851 = vst.msk [vmem:[#allocation2 + $0x158] sm:$0xf] %vm519_vm1, %v809_v11 }
 0x1a1   : > { %v803_v12 = vpop.permute.xlu1 %802  ;;  %v545_v13 = vpop.permute.xlu0 %544 }
 0x1a2   : > { %848 = vst.msk [vmem:[#allocation2 + $0x14c] sm:$0xf] %vm519_vm1, %v803_v12  ;;  %589 = vst.msk [vmem:[#allocation2 + $0x50] sm:$0xf] %vm519_vm1, %v545_v13 }
 0x1a5   : > { %v539_v15 = vpop.permute.xlu1 %538  ;;  %v813_v16 = vpop.permute.xlu0 %812 }
 0x1a6   : > { %586 = vst.msk [vmem:[#allocation2 + $0x44] sm:$0xf] %vm519_vm1, %v539_v15  ;;  %853 = vst.msk [vmem:[#allocation2 + $0x160] sm:$0xf] %vm519_vm1, %v813_v16 }
 0x1a9   : > { %v543_v17 = vpop.permute.xlu1 %542  ;;  %v1002_v19 = vpop.permute.xlu0 %1001 }
 0x1aa   : > { %588 = vst.msk [vmem:[#allocation2 + $0x4c] sm:$0xf] %vm519_vm1, %v543_v17  ;;  %1045 = vst.msk [vmem:[#allocation2 + $0x214] sm:$0xf] %vm519_vm1, %v1002_v19 }
 0x1ad   : > { %v811_v20 = vpop.permute.xlu1 %810 }
 0x1ae   : > { %852 = vst.msk [vmem:[#allocation2 + $0x15c] sm:$0xf] %vm519_vm1, %v811_v20 }
 0x1b1   : > { %v1018_v21 = vpop.permute.xlu1 %1017 }
 0x1b2   : > { %1053 = vst.msk [vmem:[#allocation2 + $0x234] sm:$0xf] %vm519_vm1, %v1018_v21 }
 0x1b5   : > { %v807_v22 = vpop.permute.xlu1 %806 }
 0x1b6   : > { %850 = vst.msk [vmem:[#allocation2 + $0x154] sm:$0xf] %vm519_vm1, %v807_v22 }
 0x1b9   : > { %v547_v24 = vpop.permute.xlu1 %546 }
 0x1ba   : > { %590 = vst.msk [vmem:[#allocation2 + $0x54] sm:$0xf] %vm519_vm1, %v547_v24 }
 0x22a   : > { %v1352_v27 = vpop.f32.mrf.mxu1 }
 0x22b   : > { %v8396_v28 = vadd.f32 %v1352_v27, %v8393_v26 }
 0x22c   : > { %v7103_v31 = vpop.f32.mrf.mxu1 }
 0x22d   : > { %v1759_v33 = vsel %vm1758_vm4, %v8396_v28, -inf }
 0x22e   : > { %1760 = vmax.xlane.f32.xlu0 %v1759_v33  ;;  %v1355_v34 = vpop.f32.mrf.mxu1 }
 0x22f   : > { %v8409_v52 = vadd.f32 %v1355_v34, %v8403_v43 }
 0x230   : > { %v7104_v35 = vpop.f32.mrf.mxu1 }
 0x231   : > { %v1762_v1 = vsel %vm1758_vm4, %v8409_v52, -inf }
 0x232   : > { %v1409_v37 = vpop.f32.mrf.mxu1 }
 0x233   : > { %v8417_v63 = vadd.f32 %v1409_v37, %v8393_v26 }
 0x234   : > { %v7109_v39 = vpop.f32.mrf.mxu1 }
 0x235   : > { %v1765_v7 = vsel %vm1758_vm4, %v8417_v63, -inf }
 0x236   : > { %v1412_v40 = vpop.f32.mrf.mxu1 }
 0x237   : > { %v8432_v13 = vadd.f32 %v1412_v40, %v8403_v43 }
 0x238   : > { %v7110_v41 = vpop.f32.mrf.mxu1 }
 0x239   : > { %v1768_v24 = vsel %vm1758_vm4, %v8432_v13, -inf }
 0x23a   : > { %v1466_v45 = vpop.f32.mrf.mxu1  ;;  %v1580_v46 = vpop.f32.mrf.mxu0 }
 0x23b   : > { %v8406_v47 = vadd.f32 %v1580_v46, %v8393_v26  ;;  %v8435_v15 = vadd.f32 %v1466_v45, %v8393_v26 }
 0x23c   : > { %v7115_v49 = vpop.f32.mrf.mxu1  ;;  %v7127_v51 = vpop.f32.mrf.mxu0 }
 0x23d   : > { %v1783_v55 = vsel %vm1758_vm4, %v8406_v47, -inf  ;;  %v1771_v27 = vsel %vm1758_vm4, %v8435_v15, -inf }
 0x23e   : > { %1784 = vmax.xlane.f32.xlu1 %v1783_v55  ;;  %v1469_v56 = vpop.f32.mrf.mxu1  ;;  %v1583_v58 = vpop.f32.mrf.mxu0 }
 0x23f   : > { %v8414_v60 = vadd.f32 %v1583_v58, %v8403_v43  ;;  %v8442_v21 = vadd.f32 %v1469_v56, %v8403_v43 }
 0x240   : > { %v7116_v61 = vpop.f32.mrf.mxu1  ;;  %v7128_v62 = vpop.f32.mrf.mxu0 }
 0x241   : > { %v1786_v0 = vsel %vm1758_vm4, %v8414_v60, -inf  ;;  %v1774_v35 = vsel %vm1758_vm4, %v8442_v21, -inf }
 0x242   : > { %v1694_v2 = vpop.f32.mrf.mxu0  ;;  %1787 = vmax.xlane.f32.xlu0 %v1786_v0  ;;  %1763 = vmax.xlane.f32.xlu1 %v1762_v1  ;;  %v1523_v3 = vpop.f32.mrf.mxu1 }
 0x243   : > { %v8424_v6 = vadd.f32 %v1694_v2, %v8393_v26  ;;  %v8445_v22 = vadd.f32 %v1523_v3, %v8393_v26 }
 0x244   : > { %v7121_v4 = vpop.f32.mrf.mxu1  ;;  %v7139_v5 = vpop.f32.mrf.mxu0 }
 0x245   : > { %v1795_v17 = vsel %vm1758_vm4, %v8424_v6, -inf  ;;  %v1777_v37 = vsel %vm1758_vm4, %v8445_v22, -inf }
 0x246   : > { %v1697_v8 = vpop.f32.mrf.mxu0  ;;  %1766 = vmax.xlane.f32.xlu0 %v1765_v7  ;;  %v1526_v9 = vpop.f32.mrf.mxu1 }
 0x247   : > { %v8429_v10 = vadd.f32 %v1697_v8, %v8403_v43  ;;  %v8452_v34 = vadd.f32 %v1526_v9, %v8403_v43 }
 0x248   : > { %v7122_v11 = vpop.f32.mrf.mxu1  ;;  %v7140_v12 = vpop.f32.mrf.mxu0 }
 0x249   : > { %v1798_v16 = vsel %vm1758_vm4, %v8429_v10, -inf  ;;  %v1780_v41 = vsel %vm1758_vm4, %v8452_v34, -inf }
 0x24a   : > { %1799 = vmax.xlane.f32.xlu1 %v1798_v16  ;;  %1796 = vmax.xlane.f32.xlu0 %v1795_v17  ;;  %v1637_v19 = vpop.f32.mrf.mxu1 }
 0x24b   : > { %v8465_v49 = vadd.f32 %v1637_v19, %v8393_v26 }
 0x24c   : > { %v7133_v20 = vpop.f32.mrf.mxu1 }
 0x24d   : > { %v1789_v55 = vsel %vm1758_vm4, %v8465_v49, -inf }
 0x24e   : > { %1769 = vmax.xlane.f32.xlu0 %v1768_v24  ;;  %1772 = vmax.xlane.f32.xlu1 %v1771_v27  ;;  %v1640_v31 = vpop.f32.mrf.mxu1 }
 0x24f   : > { %v8468_v51 = vadd.f32 %v1640_v31, %v8403_v43 }
 0x250   : > { %v7134_v33 = vpop.f32.mrf.mxu1 }
 0x251   : > { %v1792_v58 = vsel %vm1758_vm4, %v8468_v51, -inf }
 0x252   : > { %1775 = vmax.xlane.f32.xlu0 %v1774_v35  ;;  %1778 = vmax.xlane.f32.xlu1 %v1777_v37  ;;  %v1751_v39 = vpop.f32.mrf.mxu1 }
 0x253   : > { %v8473_v56 = vadd.f32 %v1751_v39, %v8393_v26 }
 0x254   : > { %v7145_v40 = vpop.f32.mrf.mxu1 }
 0x255   : > { %v1801_v62 = vsel %vm1758_vm4, %v8473_v56, -inf }
 0x256   : > { %1781 = vmax.xlane.f32.xlu0 %v1780_v41  ;;  %v1754_v45 = vpop.f32.mrf.mxu1 }
 0x257   : > { %v8478_v61 = vadd.f32 %v1754_v45, %v8403_v43 }
 0x258   : > { %v7146_v46 = vpop.f32.mrf.mxu1 }
 0x259   : > { %v1804_v0 = vsel %vm1758_vm4, %v8478_v61, -inf  ;;  %v7591_v46 = vld [vmem:[#allocation2 + $0x210] sm:$0xff]  }
 0x263   : > { %814 = vrot.lane.b32.xlu1 %v8172_v44, %s8001_s28 }
 0x26c   : > { %548 = vrot.lane.b32.xlu0 %v8157_v36, %s8002_s29 }
 0x287   : > { %1790 = vmax.xlane.f32.xlu1 %v1789_v55 }
 0x28b   : > { %1793 = vmax.xlane.f32.xlu0 %v1792_v58 }
 0x28f   : > { %1802 = vmax.xlane.f32.xlu0 %v1801_v62 }
 0x293   : > { %1805 = vmax.xlane.f32.xlu0 %v1804_v0 }
 0x298   : > { %550 = vrot.lane.b32.xlu1 %v8179_v48, %s8002_s29 }
 0x29c   : > { %818 = vrot.lane.b32.xlu1 %v8162_v38, %s8001_s28 }
 0x2a0   : > { %554 = vrot.lane.b32.xlu1 %v8172_v44, %s8002_s29 }
 0x2a4   : > { %822 = vrot.lane.b32.xlu1 %v8215_v59, %s8001_s28 }
 0x2a8   : > { %558 = vrot.lane.b32.xlu1 %v8162_v38, %s8002_s29 }
 0x2a9   : > { %816 = vrot.lane.b32.xlu0 %v8138_v25, %s8001_s28 }
 0x2ac   : > { %826 = vrot.lane.b32.xlu1 %v8208_v57, %s8001_s28 }
 0x2ad   : > { %552 = vrot.lane.b32.xlu0 %v8150_v32, %s8002_s29 }
 0x2b0   : > { %562 = vrot.lane.b32.xlu1 %v8215_v59, %s8002_s29 }
 0x2b1   : > { %820 = vrot.lane.b32.xlu0 %v8197_v54, %s8001_s28 }
 0x2b4   : > { %566 = vrot.lane.b32.xlu1 %v8208_v57, %s8002_s29 }
 0x2b5   : > { %556 = vrot.lane.b32.xlu0 %v8138_v25, %s8002_s29 }
 0x2b7   : > { %v1761_v26 = vpop.xlane.xlu0 %1760 }
 0x2b8   : > { %1056 = vrot.lane.b32.xlu1 %v8125_v18, %s8003_s13  ;;  %v1807_v1 = vsub.f32 %v8396_v28, %v1761_v26 }
 0x2b9   : > { %824 = vrot.lane.b32.xlu0 %v8184_v50, %s8001_s28  ;;  %s8008_s28 = smov 104  }
 0x2ba   : > { %v1823_v4 = vmul.f32 1.442695, %v1807_v1 }
 0x2bc   : > { %1060 = vrot.lane.b32.xlu1 %v8122_v14, %s8003_s13  ;;  %7679 = vpow2.f32 %v1823_v4 }
 0x2bd   : > { %560 = vrot.lane.b32.xlu0 %v8197_v54, %s8002_s29 }
 0x2c0   : > { %1062 = vrot.lane.b32.xlu1 %v8133_v23, %s8003_s13 }
 0x2c1   : > { %564 = vrot.lane.b32.xlu0 %v8184_v50, %s8002_s29 }
 0x2c4   : > { %1064 = vrot.lane.b32.xlu1 %v8169_v42, %s8003_s13 }
 0x2c5   : > { %1058 = vrot.lane.b32.xlu0 %v8145_v30, %s8003_s13 }
 0x2c7   : > { %v8524_v43 = vpop.xlane.xlu1 %1784 }
 0x2c8   : > { %1068 = vrot.lane.b32.xlu1 %v8157_v36, %s8003_s13  ;;  %v1815_v41 = vsub.f32 %v8406_v47, %v8524_v43 }
 0x2c9   : > { %1066 = vrot.lane.b32.xlu0 %v8195_v53, %s8003_s13 }
 0x2cb   : > { %v1788_v2 = vpop.xlane.xlu0 %1787  ;;  %v1764_v3 = vpop.xlane.xlu1 %1763 }
 0x2cc   : > { %v1808_v5 = vsub.f32 %v8409_v52, %v1764_v3  ;;  %1070 = vrot.lane.b32.xlu1 %v8179_v48, %s8003_s13  ;;  %v1816_v35 = vsub.f32 %v8414_v60, %v1788_v2  ;;  %v7592_v2 = vld [vmem:[#allocation2 + $0x218] sm:$0xff]  }
 0x2cd   : > { %1072 = vrot.lane.b32.xlu0 %v8150_v32, %s8003_s13 }
 0x2ce   : > { %v1825_v7 = vmul.f32 1.442695, %v1808_v5  ;;  %v1841_v60 = vmul.f32 1.442695, %v1816_v35  ;;  %v7593_v5 = vld [vmem:[#allocation2 + $0x220] sm:$0xff]  }
 0x2cf   : > { %v1767_v8 = vpop.xlane.xlu0 %1766 }
 0x2d0   : > { %1074 = vrot.lane.b32.xlu1 %v8172_v44, %s8003_s13  ;;  %7681 = vpow2.f32 %v1825_v7  ;;  %v1809_v28 = vsub.f32 %v8417_v63, %v1767_v8 }
 0x2d1   : > { %1076 = vrot.lane.b32.xlu0 %v8138_v25, %s8003_s13 }
 0x2d2   : > { %v1827_v11 = vmul.f32 1.442695, %v1809_v28 }
 0x2d3   : > { %v1800_v9 = vpop.xlane.xlu1 %1799  ;;  %v1797_v52 = vpop.xlane.xlu0 %1796 }
 0x2d4   : > { %1078 = vrot.lane.b32.xlu1 %v8162_v38, %s8003_s13  ;;  %7683 = vpow2.f32 %v1827_v11  ;;  %v1820_v58 = vsub.f32 %v8429_v10, %v1800_v9  ;;  %v1819_v62 = vsub.f32 %v8424_v6, %v1797_v52  ;;  %v7594_v52 = vld [vmem:[#allocation2 + $0x228] sm:$0xff]  }
 0x2d5   : > { %1080 = vrot.lane.b32.xlu0 %v8197_v54, %s8003_s13 }
 0x2d6   : > { %v1849_v43 = vmul.f32 1.442695, %v1820_v58  ;;  %v1847_v10 = vmul.f32 1.442695, %v1819_v62 }
 0x2d7   : > { %v1770_v12 = vpop.xlane.xlu0 %1769  ;;  %v1773_v16 = vpop.xlane.xlu1 %1772 }
 0x2d8   : > { %v1810_v17 = vsub.f32 %v8432_v13, %v1770_v12  ;;  %v1811_v19 = vsub.f32 %v8435_v15, %v1773_v16  ;;  %1082 = vrot.lane.b32.xlu1 %v8215_v59, %s8003_s13  ;;  %v8555_v13 = vpop.eup %7679  ;;  %v7595_v16 = vld [vmem:[#allocation2 + $0x230] sm:$0xff]  }
 0x2d9   : > { %1084 = vrot.lane.b32.xlu0 %v8184_v50, %s8003_s13 }
 0x2da   : > { %v1829_v63 = vmul.f32 1.442695, %v1810_v17  ;;  %v1831_v20 = vmul.f32 1.442695, %v1811_v19 }
 0x2db   : > { %v1776_v24 = vpop.xlane.xlu0 %1775  ;;  %v1779_v27 = vpop.xlane.xlu1 %1778 }
 0x2dc   : > { %7685 = vpow2.f32 %v1829_v63  ;;  %v1812_v31 = vsub.f32 %v8442_v21, %v1776_v24  ;;  %v1813_v33 = vsub.f32 %v8445_v22, %v1779_v27  ;;  %1086 = vrot.lane.b32.xlu1 %v8208_v57, %s8003_s13  ;;  %v7596_v63 = vld [vmem:[#allocation2 + $0x140] sm:$0xff]   ;;  %v7598_v27 = vld [vmem:[#allocation2 + $0x150] sm:$0xff]   ;;  %s10136_s13 = scalar_lea.vmem [#allocation5], %s6558_s10 }
 0x2dd   : > { %861 = vrot.lane.b32.xlu0 %v8125_v18, %s8004_s14  ;;  %v8559_v15 = vpop.eup %7681  ;;  %7687 = vpow2.f32 %v1831_v20  ;;  %v2488_v24 = vsel %vm1311_vm3, %v7596_v63, 0 }
 0x2de   : > { %10230 = vst [vmem:[#allocation8_spill] sm:$0xff] %v8559_v15  ;;  %v1833_v37 = vmul.f32 1.442695, %v1812_v31  ;;  %v1835_v39 = vmul.f32 1.442695, %v1813_v33  ;;  %v1903_v22 = vpack.c.bf16 %v8559_v15, %v8555_v13  ;;  %v7597_v31 = vld [vmem:[#allocation2 + $0x40] sm:$0xff]  }
 0x2df   : > { %v815_v40 = vpop.permute.xlu1 %814  ;;  %v1782_v21 = vpop.xlane.xlu0 %1781  ;;  %v2602_v33 = vsel %vm1311_vm3, %v7598_v27, 0  ;;  %v7603_v27 = vld [vmem:[#allocation2 + $0x148] sm:$0xff]  }
 0x2e0   : > { %7689 = vpow2.f32 %v1833_v37  ;;  %854 = vst.msk [vmem:[#allocation2 + $0x164] sm:$0xf] %vm519_vm1, %v815_v40  ;;  %v1814_v45 = vsub.f32 %v8452_v34, %v1782_v21  ;;  %863 = vrot.lane.b32.xlu1 %v8145_v30, %s8004_s14  ;;  %7150 = vmatmul.mubr.msk.bf16.vlgmr.msra.gmra.mxu0 %vm1758_vm4, %v1903_v22  ;;  %v1839_v34 = vmul.f32 1.442695, %v1815_v41  ;;  %v7599_v37 = vld [vmem:[#allocation2 + $0x50] sm:$0xff]  }
 0x2e1   : > { %865 = vrot.lane.b32.xlu0 %v8122_v14, %s8004_s14  ;;  %7160 = vmatpush3.bf16.msra.mxu0 %v7591_v46  ;;  %7691 = vpow2.f32 %v1835_v39  ;;  %v8583_v0 = vpop.eup %7683 }
 0x2e2   : > { %v1837_v55 = vmul.f32 1.442695, %v1814_v45  ;;  %7161 = vmatprep.mubr.msk.bf16.mxu0 %vm7999_vm2, %v10213_v29  ;;  %7171 = vmatprep.subr.bf16.mxu0 %v10213_v29 }
 0x2e3   : > { %v549_v47 = vpop.permute.xlu0 %548 }
 0x2e4   : > { %7693 = vpow2.f32 %v1837_v55  ;;  %591 = vst.msk [vmem:[#allocation2 + $0x58] sm:$0xf] %vm519_vm1, %v549_v47  ;;  %867 = vrot.lane.b32.xlu1 %v8133_v23, %s8004_s14 }
 0x2e5   : > { %601 = vrot.lane.b32.xlu0 %v8125_v18, %s8005_s15  ;;  %7695 = vpow2.f32 %v1841_v60 }
 0x2e6   : > { %7697 = vpow2.f32 %v1839_v34 }
 0x2e7   : > { %7699 = vpow2.f32 %v1849_v43  ;;  %v7600_v35 = vld [vmem:[#allocation2 + $0x160] sm:$0xff]  }
 0x2e8   : > { %603 = vrot.lane.b32.xlu1 %v8145_v30, %s8005_s15  ;;  %7701 = vpow2.f32 %v1847_v10  ;;  %v2716_v39 = vsel %vm1311_vm3, %v7600_v35, 0 }
 0x2e9   : > { %v8587_v26 = vpop.eup %7685  ;;  %869 = vrot.lane.b32.xlu0 %v8169_v42, %s8004_s14 }
 0x2ea   : > { %10231 = vst [vmem:[#allocation9_spill] sm:$0xff] %v8587_v26  ;;  %v1904_v1 = vpack.c.bf16 %v8587_v26, %v8583_v0  ;;  %v8593_v3 = vpop.eup %7687 }
 0x2ec   : > { %7156 = vmatmul.mubr.msk.bf16.vlgmr.msra.gmra.mxu1 %vm1758_vm4, %v1904_v1  ;;  %871 = vrot.lane.b32.xlu1 %v8195_v53, %s8004_s14 }
 0x2ed   : > { %v8598_v6 = vpop.eup %7689  ;;  %7166 = vmatpush3.bf16.msra.mxu1 %v7592_v2  ;;  %605 = vrot.lane.b32.xlu0 %v8122_v14, %s8005_s15 }
 0x2ee   : > { %10232 = vst [vmem:[#allocation10_spill] sm:$0xff] %v8598_v6  ;;  %v1905_v4 = vpack.c.bf16 %v8598_v6, %v8593_v3  ;;  %7167 = vmatprep.mubr.msk.bf16.mxu1 %vm7999_vm2, %v10213_v29  ;;  %7177 = vmatprep.subr.bf16.mxu1 %v10213_v29  ;;  %v8607_v7 = vpop.eup %7691 }
 0x2f0   : > { %7162 = vmatmul.mubr.msk.bf16.vlgmr.msra.gmra.mxu0 %vm1758_vm4, %v1905_v4  ;;  %607 = vrot.lane.b32.xlu1 %v8133_v23, %s8005_s15 }
 0x2f1   : > { %v8612_v8 = vpop.eup %7693  ;;  %7172 = vmatpush3.bf16.msra.mxu0 %v7593_v5  ;;  %873 = vrot.lane.b32.xlu0 %v8157_v36, %s8004_s14 }
 0x2f2   : > { %10233 = vst [vmem:[#allocation11_spill] sm:$0xff] %v8612_v8  ;;  %v1906_v28 = vpack.c.bf16 %v8612_v8, %v8607_v7  ;;  %7173 = vmatprep.mubr.msk.bf16.mxu0 %vm7999_vm2, %v10213_v29  ;;  %7183 = vmatprep.subr.bf16.mxu0 %v10213_v29  ;;  %v8621_v9 = vpop.eup %7695 }
 0x2f3   : > { %10234 = vst [vmem:[#allocation12_spill] sm:$0xff] %v8621_v9  ;;  %v8626_v11 = vpop.eup %7697 }
 0x2f4   : > { %7168 = vmatmul.mubr.msk.bf16.vlgmr.msra.gmra.mxu1 %vm1758_vm4, %v1906_v28  ;;  %875 = vrot.lane.b32.xlu1 %v8179_v48, %s8004_s14  ;;  %v1907_v12 = vpack.c.bf16 %v8621_v9, %v8626_v11  ;;  %v8640_v17 = vpop.eup %7699 }
 0x2f5   : > { %7178 = vmatpush3.bf16.msra.mxu1 %v7594_v52  ;;  %609 = vrot.lane.b32.xlu0 %v8169_v42, %s8005_s15  ;;  %10235 = vst [vmem:[#allocation13_spill] sm:$0xff] %v8640_v17  ;;  %v8645_v19 = vpop.eup %7701 }
 0x2f6   : > { %7179 = vmatprep.mubr.msk.bf16.mxu1 %vm7999_vm2, %v10213_v29  ;;  %7189 = vmatprep.subr.bf16.mxu1 %v10213_v29  ;;  %10236 = vst [vmem:[#allocation14_spill] sm:$0xff] %v8645_v19  ;;  %v1909_v20 = vpack.c.bf16 %v8640_v17, %v8645_v19 }
 0x2f8   : > { %7174 = vmatmul.mubr.msk.bf16.vlgmr.msra.gmra.mxu0 %vm1758_vm4, %v1907_v12  ;;  %611 = vrot.lane.b32.xlu1 %v8195_v53, %s8005_s15  ;;  %v7601_v12 = vld [vmem:[#allocation2 + $0x238] sm:$0xff]  }
 0x2f9   : > { %7184 = vmatpush3.bf16.msra.mxu0 %v7595_v16  ;;  %877 = vrot.lane.b32.xlu0 %v8150_v32, %s8004_s14 }
 0x2fa   : > { %7185 = vmatprep.mubr.msk.bf16.mxu0 %vm7999_vm2, %v10213_v29  ;;  %7195 = vmatprep.subr.bf16.mxu0 %v10213_v29 }
 0x2fc   : > { %879 = vrot.lane.b32.xlu1 %v8172_v44, %s8004_s14 }
 0x2fd   : > { %613 = vrot.lane.b32.xlu0 %v8157_v36, %s8005_s15 }
 0x300   : > { %7186 = vmatmul.mubr.msk.bf16.vlgmr.msra.gmra.mxu0 %vm1758_vm4, %v1909_v20  ;;  %615 = vrot.lane.b32.xlu1 %v8179_v48, %s8005_s15 }
 0x301   : > { %7196 = vmatpush3.bf16.xpose.msra.mxu0 %v2488_v24  ;;  %7197 = vmatprep.mubr.msk.bf16.mxu0 %vm7999_vm2, %v10213_v29 }
 0x302   : > { %7207 = vmatprep.subr.bf16.mxu0 %v10213_v29 }
 0x308   : > { %7198 = vmatmul.mubr.msk.bf16.vlgmr.msra.gmra.mxu0 %vm1311_vm3, %v7597_v31 }
 0x309   : > { %7208 = vmatpush3.bf16.xpose.msra.mxu0 %v2602_v33  ;;  %7209 = vmatprep.mubr.msk.bf16.mxu0 %vm7999_vm2, %v10213_v29 }
 0x30a   : > { %7219 = vmatprep.subr.bf16.mxu0 %v10213_v29 }
 0x310   : > { %7210 = vmatmul.mubr.msk.bf16.vlgmr.msra.gmra.mxu0 %vm1311_vm3, %v7599_v37  ;;  %v1791_v40 = vpop.xlane.xlu1 %1790 }
 0x311   : > { %7220 = vmatpush3.bf16.xpose.msra.mxu0 %v2716_v39  ;;  %v1817_v21 = vsub.f32 %v8465_v49, %v1791_v40  ;;  %7221 = vmatprep.mubr.msk.bf16.mxu0 %vm7999_vm2, %v10213_v29  ;;  %v2545_v40 = vsel %vm1311_vm3, %v7603_v27, 0 }
 0x312   : > { %7231 = vmatprep.subr.bf16.mxu0 %v10213_v29 }
 0x313   : > { %v1843_v22 = vmul.f32 1.442695, %v1817_v21 }
 0x314   : > { %v551_v41 = vpop.permute.xlu1 %550  ;;  %v1794_v45 = vpop.xlane.xlu0 %1793 }
 0x315   : > { %592 = vst.msk [vmem:[#allocation2 + $0x5c] sm:$0xf] %vm519_vm1, %v551_v41  ;;  %v1818_v46 = vsub.f32 %v8468_v51, %v1794_v45  ;;  %7703 = vpow2.f32 %v1843_v22  ;;  %v7606_v45 = vld [vmem:[#allocation2 + $0x158] sm:$0xff]  }
 0x317   : > { %v1845_v60 = vmul.f32 1.442695, %v1818_v46  ;;  %v7605_v46 = vld [vmem:[#allocation2 + $0x48] sm:$0xff]  }
 0x318   : > { %v819_v55 = vpop.permute.xlu1 %818  ;;  %v1803_v47 = vpop.xlane.xlu0 %1802 }
 0x319   : > { %7705 = vpow2.f32 %v1845_v60  ;;  %856 = vst.msk [vmem:[#allocation2 + $0x16c] sm:$0xf] %vm519_vm1, %v819_v55  ;;  %v1821_v49 = vsub.f32 %v8473_v56, %v1803_v47  ;;  %v2659_v47 = vsel %vm1311_vm3, %v7606_v45, 0 }
 0x31b   : > { %v1851_v34 = vmul.f32 1.442695, %v1821_v49 }
 0x31c   : > { %v555_v58 = vpop.permute.xlu1 %554  ;;  %v1806_v62 = vpop.xlane.xlu0 %1805 }
 0x31d   : > { %594 = vst.msk [vmem:[#allocation2 + $0x64] sm:$0xf] %vm519_vm1, %v555_v58  ;;  %v1822_v43 = vsub.f32 %v8478_v61, %v1806_v62  ;;  %7707 = vpow2.f32 %v1851_v34 }
 0x31f   : > { %v1853_v10 = vmul.f32 1.442695, %v1822_v43  ;;  %v7608_v43 = vld [vmem:[#allocation2 + $0x58] sm:$0xff]  }
 0x320   : > { %v823_v1 = vpop.permute.xlu1 %822  ;;  %v817_v51 = vpop.permute.xlu0 %816 }
 0x321   : > { %7709 = vpow2.f32 %v1853_v10  ;;  %858 = vst.msk [vmem:[#allocation2 + $0x174] sm:$0xf] %vm519_vm1, %v823_v1  ;;  %855 = vst.msk [vmem:[#allocation2 + $0x168] sm:$0xf] %vm519_vm1, %v817_v51 }
 0x322   : > { %v8679_v5 = vpop.eup %7703 }
 0x323   : > { %10237 = vst [vmem:[#allocation15_spill] sm:$0xff] %v8679_v5 }
 0x324   : > { %v559_v2 = vpop.permute.xlu1 %558  ;;  %v553_v4 = vpop.permute.xlu0 %552 }
 0x325   : > { %596 = vst.msk [vmem:[#allocation2 + $0x6c] sm:$0xf] %vm519_vm1, %v559_v2  ;;  %593 = vst.msk [vmem:[#allocation2 + $0x60] sm:$0xf] %vm519_vm1, %v553_v4 }
 0x326   : > { %v8683_v56 = vpop.eup %7705 }
 0x327   : > { %10238 = vst [vmem:[#allocation16_spill] sm:$0xff] %v8683_v56  ;;  %v1908_v61 = vpack.c.bf16 %v8683_v56, %v8679_v5 }
 0x328   : > { %v827_v28 = vpop.permute.xlu1 %826  ;;  %v821_v52 = vpop.permute.xlu0 %820  ;;  %v7609_v62 = vld [vmem:[#allocation2 + $0x168] sm:$0xff]  }
 0x329   : > { %860 = vst.msk [vmem:[#allocation2 + $0x17c] sm:$0xf] %vm519_vm1, %v827_v28  ;;  %857 = vst.msk [vmem:[#allocation2 + $0x170] sm:$0xf] %vm519_vm1, %v821_v52  ;;  %7180 = vmatmul.mubr.msk.bf16.vlgmr.msra.gmra.mxu1 %vm1758_vm4, %v1908_v61  ;;  %v2773_v51 = vsel %vm1311_vm3, %v7609_v62, 0 }
 0x32a   : > { %7190 = vmatpush3.bf16.msra.mxu1 %v7601_v12  ;;  %7191 = vmatprep.mubr.msk.bf16.mxu1 %vm7999_vm2, %v10213_v29  ;;  %v8693_v24 = vpop.eup %7707 }
 0x32b   : > { %7201 = vmatprep.subr.bf16.mxu1 %v10213_v29  ;;  %10239 = vst [vmem:[#allocation17_spill] sm:$0xff] %v8693_v24 }
 0x32c   : > { %v563_v16 = vpop.permute.xlu1 %562  ;;  %v557_v63 = vpop.permute.xlu0 %556  ;;  %v7602_v20 = vld [vmem:[#allocation2 + $0x60] sm:$0xff]  }
 0x32d   : > { %598 = vst.msk [vmem:[#allocation2 + $0x74] sm:$0xf] %vm519_vm1, %v563_v16  ;;  %595 = vst.msk [vmem:[#allocation2 + $0x68] sm:$0xf] %vm519_vm1, %v557_v63  ;;  %7222 = vmatmul.mubr.msk.bf16.vlgmr.msra.gmra.mxu0 %vm1311_vm3, %v7602_v20 }
 0x32e   : > { %v8697_v31 = vpop.eup %7709  ;;  %7233 = vmatprep.mubr.msk.bf16.mxu0 %vm7999_vm2, %v10213_v29 }
 0x32f   : > { %10240 = vst [vmem:[#allocation18_spill] sm:$0xff] %v8697_v31  ;;  %v1910_v33 = vpack.c.bf16 %v8697_v31, %v8693_v24 }
 0x330   : > { %v567_v35 = vpop.permute.xlu1 %566  ;;  %v825_v37 = vpop.permute.xlu0 %824  ;;  %v7604_v39 = vld [vmem:[#allocation2 + $0x170] sm:$0xff]  }
 0x331   : > { %600 = vst.msk [vmem:[#allocation2 + $0x7c] sm:$0xf] %vm519_vm1, %v567_v35  ;;  %859 = vst.msk [vmem:[#allocation2 + $0x178] sm:$0xf] %vm519_vm1, %v825_v37  ;;  %7192 = vmatmul.mubr.msk.bf16.vlgmr.msra.gmra.mxu1 %vm1758_vm4, %v1910_v33  ;;  %v2830_v21 = vsel %vm1311_vm3, %v7604_v39, 0 }
 0x332   : > { %7202 = vmatpush3.bf16.xpose.msra.mxu1 %v2545_v40  ;;  %7203 = vmatprep.mubr.msk.bf16.mxu1 %vm7999_vm2, %v10213_v29 }
 0x333   : > { %7232 = vmatpush3.bf16.xpose.msra.mxu0 %v2830_v21  ;;  %7213 = vmatprep.subr.bf16.mxu1 %v10213_v29 }
 0x334   : > { %v1057_v22 = vpop.permute.xlu1 %1056  ;;  %v561_v41 = vpop.permute.xlu0 %560  ;;  %7243 = vmatprep.subr.bf16.mxu0 %v10213_v29  ;;  %v7611_v52 = vld [vmem:[#allocation2 + $0x68] sm:$0xff]  }
 0x335   : > { %1105 = vst.msk [vmem:[#allocation2 + $0x240] sm:$0xf] %vm519_vm1, %v1057_v22  ;;  %597 = vst.msk [vmem:[#allocation2 + $0x70] sm:$0xf] %vm519_vm1, %v561_v41 }
 0x338   : > { %v1061_v60 = vpop.permute.xlu1 %1060  ;;  %v565_v55 = vpop.permute.xlu0 %564  ;;  %v7612_v28 = vld [vmem:[#allocation2 + $0x178] sm:$0xff]  }
 0x339   : > { %1107 = vst.msk [vmem:[#allocation2 + $0x248] sm:$0xf] %vm519_vm1, %v1061_v60  ;;  %599 = vst.msk [vmem:[#allocation2 + $0x78] sm:$0xf] %vm519_vm1, %v565_v55  ;;  %7204 = vmatmul.mubr.msk.bf16.vlgmr.msra.gmra.mxu1 %vm1311_vm3, %v7605_v46  ;;  %v2887_v63 = vsel %vm1311_vm3, %v7612_v28, 0 }
 0x33a   : > { %7214 = vmatpush3.bf16.xpose.msra.mxu1 %v2659_v47  ;;  %7215 = vmatprep.mubr.msk.bf16.mxu1 %vm7999_vm2, %v10213_v29 }
 0x33b   : > { %7225 = vmatprep.subr.bf16.mxu1 %v10213_v29 }
 0x33c   : > { %v1063_v49 = vpop.permute.xlu1 %1062  ;;  %v1059_v34 = vpop.permute.xlu0 %1058  ;;  %v7607_v58 = vld [vmem:[#allocation2 + $0x70] sm:$0xff]  }
 0x33d   : > { %1108 = vst.msk [vmem:[#allocation2 + $0x24c] sm:$0xf] %vm519_vm1, %v1063_v49  ;;  %1106 = vst.msk [vmem:[#allocation2 + $0x244] sm:$0xf] %vm519_vm1, %v1059_v34  ;;  %7234 = vmatmul.mubr.msk.bf16.vlgmr.msra.gmra.mxu0 %vm1311_vm3, %v7607_v58 }
 0x33e   : > { %7245 = vmatprep.mubr.msk.bf16.mxu0 %vm7999_vm2, %v10213_v29 }
 0x340   : > { %v1065_v10 = vpop.permute.xlu1 %1064  ;;  %v1067_v1 = vpop.permute.xlu0 %1066  ;;  %v7613_v33 = vld [vmem:[#allocation2 + $0x78] sm:$0xff]  }
 0x341   : > { %1109 = vst.msk [vmem:[#allocation2 + $0x250] sm:$0xf] %vm519_vm1, %v1065_v10  ;;  %1110 = vst.msk [vmem:[#allocation2 + $0x254] sm:$0xf] %vm519_vm1, %v1067_v1  ;;  %7216 = vmatmul.mubr.msk.bf16.vlgmr.msra.gmra.mxu1 %vm1311_vm3, %v7608_v43 }
 0x342   : > { %7226 = vmatpush3.bf16.xpose.msra.mxu1 %v2773_v51  ;;  %7227 = vmatprep.mubr.msk.bf16.mxu1 %vm7999_vm2, %v10213_v29 }
 0x343   : > { %7237 = vmatprep.subr.bf16.mxu1 %v10213_v29 }
 0x344   : > { %v1069_v2 = vpop.permute.xlu1 %1068  ;;  %v1073_v4 = vpop.permute.xlu0 %1072  ;;  %v7610_v61 = vld [vmem:[#allocation2 + $0x240] sm:$0xff]   ;;  %v7614_v39 = vld [vmem:[#allocation2 + $0x248] sm:$0xff]  }
 0x345   : > { %1111 = vst.msk [vmem:[#allocation2 + $0x258] sm:$0xf] %vm519_vm1, %v1069_v2  ;;  %1113 = vst.msk [vmem:[#allocation2 + $0x260] sm:$0xf] %vm519_vm1, %v1073_v4  ;;  %7244 = vmatpush3.bf16.msra.mxu0 %v7610_v61 }
 0x346   : > { %7255 = vmatprep.subr.bf16.mxu0 %v10213_v29 }
 0x348   : > { %v1071_v12 = vpop.permute.xlu1 %1070  ;;  %v1077_v16 = vpop.permute.xlu0 %1076 }
 0x349   : > { %1112 = vst.msk [vmem:[#allocation2 + $0x25c] sm:$0xf] %vm519_vm1, %v1071_v12  ;;  %1115 = vst.msk [vmem:[#allocation2 + $0x268] sm:$0xf] %vm519_vm1, %v1077_v16  ;;  %7228 = vmatmul.mubr.msk.bf16.vlgmr.msra.gmra.mxu1 %vm1311_vm3, %v7611_v52 }
 0x34a   : > { %7238 = vmatpush3.bf16.xpose.msra.mxu1 %v2887_v63  ;;  %7239 = vmatprep.mubr.msk.bf16.mxu1 %vm7999_vm2, %v10213_v29 }
 0x34b   : > { %7249 = vmatprep.subr.bf16.mxu1 %v10213_v29 }
 0x34c   : > { %v1075_v20 = vpop.permute.xlu1 %1074  ;;  %v1081_v27 = vpop.permute.xlu0 %1080 }
 0x34d   : > { %1114 = vst.msk [vmem:[#allocation2 + $0x264] sm:$0xf] %vm519_vm1, %v1075_v20  ;;  %1117 = vst.msk [vmem:[#allocation2 + $0x270] sm:$0xf] %vm519_vm1, %v1081_v27 }
 0x350   : > { %v1079_v35 = vpop.permute.xlu1 %1078  ;;  %v1085_v37 = vpop.permute.xlu0 %1084 }
 0x351   : > { %1116 = vst.msk [vmem:[#allocation2 + $0x26c] sm:$0xf] %vm519_vm1, %v1079_v35  ;;  %1119 = vst.msk [vmem:[#allocation2 + $0x278] sm:$0xf] %vm519_vm1, %v1085_v37  ;;  %7240 = vmatmul.mubr.msk.bf16.vlgmr.msra.gmra.mxu1 %vm1311_vm3, %v7613_v33 }
 0x352   : > { %7250 = vmatpush3.bf16.msra.mxu1 %v7614_v39  ;;  %7251 = vmatprep.mubr.msk.bf16.mxu1 %vm7999_vm2, %v10213_v29 }
 0x353   : > { %7261 = vmatprep.subr.bf16.mxu1 %v10213_v29 }
 0x354   : > { %v1083_v40 = vpop.permute.xlu1 %1082  ;;  %v862_v21 = vpop.permute.xlu0 %861 }
 0x355   : > { %1118 = vst.msk [vmem:[#allocation2 + $0x274] sm:$0xf] %vm519_vm1, %v1083_v40  ;;  %910 = vst.msk [vmem:[#allocation2 + $0x180] sm:$0xf] %vm519_vm1, %v862_v21 }
 0x358   : > { %v1087_v22 = vpop.permute.xlu1 %1086  ;;  %v866_v41 = vpop.permute.xlu0 %865 }
 0x359   : > { %1120 = vst.msk [vmem:[#allocation2 + $0x27c] sm:$0xf] %vm519_vm1, %v1087_v22  ;;  %912 = vst.msk [vmem:[#allocation2 + $0x188] sm:$0xf] %vm519_vm1, %v866_v41 }
 0x35c   : > { %v864_v45 = vpop.permute.xlu1 %863  ;;  %v602_v46 = vpop.permute.xlu0 %601 }
 0x35d   : > { %911 = vst.msk [vmem:[#allocation2 + $0x184] sm:$0xf] %vm519_vm1, %v864_v45  ;;  %650 = vst.msk [vmem:[#allocation2 + $0x80] sm:$0xf] %vm519_vm1, %v602_v46 }
 0x360   : > { %v868_v60 = vpop.permute.xlu1 %867  ;;  %v870_v55 = vpop.permute.xlu0 %869 }
 0x361   : > { %913 = vst.msk [vmem:[#allocation2 + $0x18c] sm:$0xf] %vm519_vm1, %v868_v60  ;;  %914 = vst.msk [vmem:[#allocation2 + $0x190] sm:$0xf] %vm519_vm1, %v870_v55 }
 0x364   : > { %v604_v47 = vpop.permute.xlu1 %603  ;;  %v606_v49 = vpop.permute.xlu0 %605 }
 0x365   : > { %651 = vst.msk [vmem:[#allocation2 + $0x84] sm:$0xf] %vm519_vm1, %v604_v47  ;;  %652 = vst.msk [vmem:[#allocation2 + $0x88] sm:$0xf] %vm519_vm1, %v606_v49 }
 0x368   : > { %v872_v34 = vpop.permute.xlu1 %871  ;;  %v874_v58 = vpop.permute.xlu0 %873 }
 0x369   : > { %915 = vst.msk [vmem:[#allocation2 + $0x194] sm:$0xf] %vm519_vm1, %v872_v34  ;;  %916 = vst.msk [vmem:[#allocation2 + $0x198] sm:$0xf] %vm519_vm1, %v874_v58 }
 0x36c   : > { %v608_v62 = vpop.permute.xlu1 %607  ;;  %v610_v43 = vpop.permute.xlu0 %609 }
 0x36d   : > { %653 = vst.msk [vmem:[#allocation2 + $0x8c] sm:$0xf] %vm519_vm1, %v608_v62  ;;  %654 = vst.msk [vmem:[#allocation2 + $0x90] sm:$0xf] %vm519_vm1, %v610_v43  ;;  %v8799_v43 = vld [vmem:[%s10209_s3 + $0x10] sm:$0xff] }
 0x370   : > { %v876_v10 = vpop.permute.xlu1 %875  ;;  %v878_v1 = vpop.permute.xlu0 %877 }
 0x371   : > { %917 = vst.msk [vmem:[#allocation2 + $0x19c] sm:$0xf] %vm519_vm1, %v876_v10  ;;  %918 = vst.msk [vmem:[#allocation2 + $0x1a0] sm:$0xf] %vm519_vm1, %v878_v1 }
 0x374   : > { %v612_v51 = vpop.permute.xlu1 %611  ;;  %v614_v2 = vpop.permute.xlu0 %613 }
 0x375   : > { %655 = vst.msk [vmem:[#allocation2 + $0x94] sm:$0xf] %vm519_vm1, %v612_v51  ;;  %656 = vst.msk [vmem:[#allocation2 + $0x98] sm:$0xf] %vm519_vm1, %v614_v2  ;;  %v8807_v2 = vld [vmem:[%s10209_s3 + $0x18] sm:$0xff] }
 0x378   : > { %v880_v4 = vpop.permute.xlu1 %879 }
 0x379   : > { %919 = vst.msk [vmem:[#allocation2 + $0x1a4] sm:$0xf] %vm519_vm1, %v880_v4 }
 0x37c   : > { %v616_v61 = vpop.permute.xlu1 %615 }
 0x37d   : > { %657 = vst.msk [vmem:[#allocation2 + $0x9c] sm:$0xf] %vm519_vm1, %v616_v61 }
 0x3a0   : > { %v8772_v28 = vpop.f32.mrf.mxu0 }
 0x3a1   : > { %10241 = vst [vmem:[#allocation19_spill] sm:$0xff] %v8772_v28 }
 0x3a2   : > { %v7151_v52 = vpop.f32.mrf.mxu0 }
 0x3a4   : > { %v8774_v12 = vpop.f32.mrf.mxu0 }
 0x3a5   : > { %10242 = vst [vmem:[#allocation20_spill] sm:$0xff] %v8774_v12 }
 0x3a6   : > { %v7152_v16 = vpop.f32.mrf.mxu0 }
 0x3ac   : > { %v8776_v63 = vpop.f32.mrf.mxu1 }
 0x3ad   : > { %10243 = vst [vmem:[#allocation21_spill] sm:$0xff] %v8776_v63 }
 0x3ae   : > { %v7157_v20 = vpop.f32.mrf.mxu1 }
 0x3b0   : > { %v8778_v27 = vpop.f32.mrf.mxu1  ;;  %v8780_v33 = vpop.f32.mrf.mxu0 }
 0x3b1   : > { %10244 = vst [vmem:[#allocation22_spill] sm:$0xff] %v8778_v27  ;;  %10245 = vst [vmem:[#allocation23_spill] sm:$0xff] %v8780_v33 }
 0x3b2   : > { %v7158_v35 = vpop.f32.mrf.mxu1  ;;  %v7163_v37 = vpop.f32.mrf.mxu0 }
 0x3b4   : > { %v8782_v39 = vpop.f32.mrf.mxu0  ;;  %v8784_v40 = vpop.f32.mrf.mxu1 }
 0x3b5   : > { %10246 = vst [vmem:[#allocation24_spill] sm:$0xff] %v8782_v39  ;;  %10247 = vst [vmem:[#allocation25_spill] sm:$0xff] %v8784_v40 }
 0x3b6   : > { %v7164_v21 = vpop.f32.mrf.mxu0  ;;  %v7169_v22 = vpop.f32.mrf.mxu1 }
 0x3b8   : > { %v8786_v41 = vpop.f32.mrf.mxu1  ;;  %v8788_v45 = vpop.f32.mrf.mxu0 }
 0x3b9   : > { %10248 = vst [vmem:[#allocation26_spill] sm:$0xff] %v8786_v41  ;;  %10249 = vst [vmem:[#allocation27_spill] sm:$0xff] %v8788_v45 }
 0x3ba   : > { %v7170_v46 = vpop.f32.mrf.mxu1  ;;  %v7175_v60 = vpop.f32.mrf.mxu0 }
 0x3bc   : > { %v8790_v55 = vpop.f32.mrf.mxu0 }
 0x3bd   : > { %10250 = vst [vmem:[#allocation28_spill] sm:$0xff] %v8790_v55 }
 0x3be   : > { %v7176_v47 = vpop.f32.mrf.mxu0 }
 0x3c0   : > { %v8792_v49 = vpop.f32.mrf.mxu0 }
 0x3c1   : > { %10251 = vst [vmem:[#allocation29_spill] sm:$0xff] %v8792_v49 }
 0x3c2   : > { %v7187_v34 = vpop.f32.mrf.mxu0 }
 0x3c4   : > { %v8794_v58 = vpop.f32.mrf.mxu0 }
 0x3c5   : > { %10252 = vst [vmem:[#allocation30_spill] sm:$0xff] %v8794_v58 }
 0x3c6   : > { %v7188_v62 = vpop.f32.mrf.mxu0 }
 0x3c8   : > { %v2524_v10 = vpop.f32.mrf.mxu0 }
 0x3c9   : > { %v8802_v1 = vadd.f32 %v8799_v43, %v2524_v10 }
 0x3ca   : > { %v7199_v51 = vpop.f32.mrf.mxu0 }
 0x3cb   : > { %v2930_v4 = vsel %vm1758_vm4, %v8802_v1, -inf }
 0x3cc   : > { %v2527_v61 = vpop.f32.mrf.mxu0  ;;  %2931 = vmax.xlane.f32.xlu0 %v2930_v4 }
 0x3cd   : > { %v8812_v52 = vadd.f32 %v8807_v2, %v2527_v61 }
 0x3ce   : > { %v7200_v16 = vpop.f32.mrf.mxu0 }
 0x3cf   : > { %v2933_v20 = vsel %vm1758_vm4, %v8812_v52, -inf }
 0x3d0   : > { %v2638_v35 = vpop.f32.mrf.mxu0  ;;  %2934 = vmax.xlane.f32.xlu1 %v2933_v20 }
 0x3d1   : > { %v8817_v37 = vadd.f32 %v8799_v43, %v2638_v35 }
 0x3d2   : > { %v7211_v21 = vpop.f32.mrf.mxu0 }
 0x3d3   : > { %v2942_v22 = vsel %vm1758_vm4, %v8817_v37, -inf }
 0x3d4   : > { %v2641_v46 = vpop.f32.mrf.mxu0  ;;  %2943 = vmax.xlane.f32.xlu1 %v2942_v22 }
 0x3d6   : > { %v7212_v60 = vpop.f32.mrf.mxu0 }
 0x3e9   : > { %v8821_v47 = vpop.f32.mrf.mxu1 }
 0x3ea   : > { %10253 = vst [vmem:[#allocation31_spill] sm:$0xff] %v8821_v47 }
 0x3eb   : > { %v7181_v34 = vpop.f32.mrf.mxu1 }
 0x3ed   : > { %v8823_v62 = vpop.f32.mrf.mxu1  ;;  %v2752_v10 = vpop.f32.mrf.mxu0 }
 0x3ee   : > { %10254 = vst [vmem:[#allocation32_spill] sm:$0xff] %v8823_v62  ;;  %v8846_v41 = vadd.f32 %v8799_v43, %v2752_v10 }
 0x3ef   : > { %v7182_v51 = vpop.f32.mrf.mxu1  ;;  %v7223_v4 = vpop.f32.mrf.mxu0 }
 0x3f0   : > { %v2954_v10 = vsel %vm1758_vm4, %v8846_v41, -inf }
 0x3f1   : > { %v8825_v61 = vpop.f32.mrf.mxu1  ;;  %v2755_v16 = vpop.f32.mrf.mxu0 }
 0x3f2   : > { %10255 = vst [vmem:[#allocation33_spill] sm:$0xff] %v8825_v61  ;;  %v8856_v39 = vadd.f32 %v8807_v2, %v2755_v16 }
 0x3f3   : > { %v7193_v20 = vpop.f32.mrf.mxu1  ;;  %v7224_v35 = vpop.f32.mrf.mxu0 }
 0x3f4   : > { %v8838_v20 = vadd.f32 %v8807_v2, %v2641_v46  ;;  %v2957_v16 = vsel %vm1758_vm4, %v8856_v39, -inf }
 0x3f5   : > { %v8827_v21 = vpop.f32.mrf.mxu1 }
 0x3f6   : > { %10256 = vst [vmem:[#allocation34_spill] sm:$0xff] %v8827_v21 }
 0x3f7   : > { %v7194_v29 = vpop.f32.mrf.mxu1 }
 0x3f9   : > { %v2581_v58 = vpop.f32.mrf.mxu1 }
 0x3fa   : > { %v8830_v22 = vadd.f32 %v8799_v43, %v2581_v58 }
 0x3fb   : > { %v7205_v60 = vpop.f32.mrf.mxu1 }
 0x3fc   : > { %v2936_v34 = vsel %vm1758_vm4, %v8830_v22, -inf }
 0x3fd   : > { %2937 = vmax.xlane.f32.xlu0 %v2936_v34  ;;  %v2584_v62 = vpop.f32.mrf.mxu1  ;;  %v2866_v4 = vpop.f32.mrf.mxu0 }
 0x3fe   : > { %v8835_v51 = vadd.f32 %v8807_v2, %v2584_v62 }
 0x3ff   : > { %v7206_v55 = vpop.f32.mrf.mxu1  ;;  %v7235_v35 = vpop.f32.mrf.mxu0 }
 0x400   : > { %v2939_v29 = vsel %vm1758_vm4, %v8835_v51, -inf  ;;  %v2945_v55 = vsel %vm1758_vm4, %v8838_v20, -inf }
 0x401   : > { %2940 = vmax.xlane.f32.xlu0 %v2939_v29  ;;  %v2695_v58 = vpop.f32.mrf.mxu1  ;;  %v2869_v21 = vpop.f32.mrf.mxu0 }
 0x402   : > { %v8843_v60 = vadd.f32 %v8799_v43, %v2695_v58 }
 0x403   : > { %v7217_v34 = vpop.f32.mrf.mxu1  ;;  %v7236_v62 = vpop.f32.mrf.mxu0 }
 0x404   : > { %v2948_v46 = vsel %vm1758_vm4, %v8843_v60, -inf }
 0x405   : > { %2946 = vmax.xlane.f32.xlu0 %v2945_v55  ;;  %2949 = vmax.xlane.f32.xlu1 %v2948_v46  ;;  %v2698_v35 = vpop.f32.mrf.mxu1 }
 0x406   : > { %v8853_v29 = vadd.f32 %v8807_v2, %v2698_v35  ;;  %v8866_v35 = vadd.f32 %v8799_v43, %v2866_v4 }
 0x407   : > { %v7218_v58 = vpop.f32.mrf.mxu1 }
 0x408   : > { %v2951_v34 = vsel %vm1758_vm4, %v8853_v29, -inf  ;;  %v8869_v58 = vadd.f32 %v8807_v2, %v2869_v21  ;;  %v2966_v4 = vsel %vm1758_vm4, %v8866_v35, -inf }
 0x409   : > { %2955 = vmax.xlane.f32.xlu1 %v2954_v10  ;;  %2952 = vmax.xlane.f32.xlu0 %v2951_v34  ;;  %v2809_v62 = vpop.f32.mrf.mxu1 }
 0x40a   : > { %v8863_v55 = vadd.f32 %v8799_v43, %v2809_v62  ;;  %v2969_v21 = vsel %vm1758_vm4, %v8869_v58, -inf }
 0x40b   : > { %v7229_v46 = vpop.f32.mrf.mxu1 }
 0x40c   : > { %v2960_v61 = vsel %vm1758_vm4, %v8863_v55, -inf }
 0x40d   : > { %2958 = vmax.xlane.f32.xlu0 %v2957_v16  ;;  %2961 = vmax.xlane.f32.xlu1 %v2960_v61  ;;  %v2812_v10 = vpop.f32.mrf.mxu1 }
 0x40e   : > { %v8876_v62 = vadd.f32 %v8807_v2, %v2812_v10 }
 0x40f   : > { %v7230_v34 = vpop.f32.mrf.mxu1 }
 0x410   : > { %v2963_v61 = vsel %vm1758_vm4, %v8876_v62, -inf }
 0x411   : > { %2967 = vmax.xlane.f32.xlu0 %v2966_v4  ;;  %2970 = vmax.xlane.f32.xlu1 %v2969_v21  ;;  %v2923_v46 = vpop.f32.mrf.mxu1 }
 0x412   : > { %v8883_v49 = vadd.f32 %v8799_v43, %v2923_v46 }
 0x413   : > { %v7241_v27 = vpop.f32.mrf.mxu1 }
 0x414   : > { %v2972_v12 = vsel %vm1758_vm4, %v8883_v49, -inf }
 0x415   : > { %2964 = vmax.xlane.f32.xlu0 %v2963_v61  ;;  %v2926_v16 = vpop.f32.mrf.mxu1 }
 0x416   : > { %v8888_v34 = vadd.f32 %v8807_v2, %v2926_v16  ;;  %v7615_v16 = vld [vmem:[#allocation2 + $0x250] sm:$0xff]  }
 0x417   : > { %v7242_v10 = vpop.f32.mrf.mxu1 }
 0x418   : > { %v2975_v4 = vsel %vm1758_vm4, %v8888_v34, -inf  ;;  %v10257_v10 = vmov 0.0  }
 0x419   : > { %2973 = vmax.xlane.f32.xlu0 %v2972_v12 }
 0x41d   : > { %2976 = vmax.xlane.f32.xlu0 %v2975_v4 }
 0x422   : > { %883 = vrot.lane.b32.xlu1 %v8162_v38, %s8004_s14 }
 0x426   : > { %619 = vrot.lane.b32.xlu1 %v8172_v44, %s8005_s15 }
 0x42a   : > { %887 = vrot.lane.b32.xlu1 %v8215_v59, %s8004_s14 }
 0x42e   : > { %623 = vrot.lane.b32.xlu1 %v8162_v38, %s8005_s15 }
 0x432   : > { %891 = vrot.lane.b32.xlu1 %v8208_v57, %s8004_s14 }
 0x433   : > { %881 = vrot.lane.b32.xlu0 %v8138_v25, %s8004_s14 }
 0x436   : > { %627 = vrot.lane.b32.xlu1 %v8215_v59, %s8005_s15 }
 0x437   : > { %617 = vrot.lane.b32.xlu0 %v8150_v32, %s8005_s15 }
 0x43a   : > { %631 = vrot.lane.b32.xlu1 %v8208_v57, %s8005_s15 }
 0x43b   : > { %885 = vrot.lane.b32.xlu0 %v8197_v54, %s8004_s14 }
 0x43e   : > { %1121 = vrot.lane.b32.xlu1 %v8125_v18, %s8006_s20 }
 0x43f   : > { %621 = vrot.lane.b32.xlu0 %v8138_v25, %s8005_s15 }
 0x442   : > { %1125 = vrot.lane.b32.xlu1 %v8122_v14, %s8006_s20 }
 0x443   : > { %889 = vrot.lane.b32.xlu0 %v8184_v50, %s8004_s14  ;;  %s6930_s14 = sshll.u32 %s8071_s25, 11  ;;  %s10165_s25 = scalar_lea.sflag [#allocation6], %s243_s9 }
 0x446   : > { %1127 = vrot.lane.b32.xlu1 %v8133_v23, %s8006_s20 }
 0x447   : > { %625 = vrot.lane.b32.xlu0 %v8197_v54, %s8005_s15 }
 0x44a   : > { %1129 = vrot.lane.b32.xlu1 %v8169_v42, %s8006_s20 }
 0x44b   : > { %629 = vrot.lane.b32.xlu0 %v8184_v50, %s8005_s15  ;;  %s6492_s15 = sshll.u32 %s10136_s13, 4  ;;  %s10160_s15 = int_to_ptr.vmem [resolvable:$true] %s6492_s15 }
 0x44e   : > { %1133 = vrot.lane.b32.xlu1 %v8157_v36, %s8006_s20 }
 0x44f   : > { %1123 = vrot.lane.b32.xlu0 %v8145_v30, %s8006_s20 }
 0x452   : > { %1135 = vrot.lane.b32.xlu1 %v8179_v48, %s8006_s20 }
 0x453   : > { %1131 = vrot.lane.b32.xlu0 %v8195_v53, %s8006_s20 }
 0x455   : > { %v2932_v12 = vpop.xlane.xlu0 %2931 }
 0x456   : > { %v2978_v27 = vsub.f32 %v8802_v1, %v2932_v12  ;;  %1139 = vrot.lane.b32.xlu1 %v8172_v44, %s8006_s20 }
 0x457   : > { %1137 = vrot.lane.b32.xlu0 %v8150_v32, %s8006_s20 }
 0x458   : > { %v2994_v43 = vmul.f32 1.442695, %v2978_v27 }
 0x459   : > { %v2935_v2 = vpop.xlane.xlu1 %2934 }
 0x45a   : > { %v2979_v21 = vsub.f32 %v8812_v52, %v2935_v2  ;;  %1143 = vrot.lane.b32.xlu1 %v8162_v38, %s8006_s20  ;;  %7711 = vpow2.f32 %v2994_v43 }
 0x45b   : > { %1141 = vrot.lane.b32.xlu0 %v8138_v25, %s8006_s20 }
 0x45c   : > { %v2996_v46 = vmul.f32 1.442695, %v2979_v21 }
 0x45d   : > { %v2944_v12 = vpop.xlane.xlu1 %2943 }
 0x45e   : > { %7713 = vpow2.f32 %v2996_v46  ;;  %1147 = vrot.lane.b32.xlu1 %v8215_v59, %s8006_s20  ;;  %v2982_v43 = vsub.f32 %v8817_v37, %v2944_v12 }
 0x45f   : > { %1145 = vrot.lane.b32.xlu0 %v8197_v54, %s8006_s20 }
 0x462   : > { %1151 = vrot.lane.b32.xlu1 %v8208_v57, %s8006_s20 }
 0x463   : > { %1149 = vrot.lane.b32.xlu0 %v8184_v50, %s8006_s20  ;;  %s7935_s20 = scalar_lea.vmem %s10160_s15, 2048 }
 0x464   : > { %p7936_p11 = scmp.ne.s32.totalorder %s10160_s15, %s7935_s20 }
 0x466   : > { %928 = vrot.lane.b32.xlu1 %v8145_v30, %s8007_s26  ;;  %p7937_p12 = pnand %p7936_p11, %p8088_p5 }
 0x467   : > { %926 = vrot.lane.b32.xlu0 %v8125_v18, %s8007_s26  ;;  %v8944_v1 = vpop.eup %7711 }
 0x468   : > { %p7938_p13 = pneg %p7937_p12 }
 0x46a   : > { %932 = vrot.lane.b32.xlu1 %v8133_v23, %s8007_s26 }
 0x46b   : > { %v8948_v52 = vpop.eup %7713  ;;  %930 = vrot.lane.b32.xlu0 %v8122_v14, %s8007_s26 }
 0x46c   : > { %v3074_v61 = vpack.c.bf16 %v8948_v52, %v8944_v1 }
 0x46e   : > { %7246 = vmatmul.mubr.msk.bf16.vlgmr.msra.gmra.mxu0 %vm1758_vm4, %v3074_v61  ;;  %668 = vrot.lane.b32.xlu1 %v8145_v30, %s8008_s28 }
 0x46f   : > { %7256 = vmatpush3.bf16.msra.mxu0 %v7615_v16  ;;  %666 = vrot.lane.b32.xlu0 %v8125_v18, %s8008_s28  ;;  %v3002_v16 = vmul.f32 1.442695, %v2982_v43 }
 0x470   : > { %7257 = vmatprep.mubr.msk.bf16.mxu0 %vm7999_vm2, %v10257_v10  ;;  %7267 = vmatprep.subr.bf16.mxu0 %v10257_v10 }
 0x472   : > { %936 = vrot.lane.b32.xlu1 %v8195_v53, %s8007_s26 }
 0x473   : > { %934 = vrot.lane.b32.xlu0 %v8169_v42, %s8007_s26 }
 0x476   : > { %672 = vrot.lane.b32.xlu1 %v8133_v23, %s8008_s28 }
 0x477   : > { %670 = vrot.lane.b32.xlu0 %v8122_v14, %s8008_s28 }
 0x47a   : > { %940 = vrot.lane.b32.xlu1 %v8179_v48, %s8007_s26 }
 0x47b   : > { %938 = vrot.lane.b32.xlu0 %v8157_v36, %s8007_s26 }
 0x47e   : > { %676 = vrot.lane.b32.xlu1 %v8195_v53, %s8008_s28 }
 0x47f   : > { %674 = vrot.lane.b32.xlu0 %v8169_v42, %s8008_s28 }
 0x482   : > { %944 = vrot.lane.b32.xlu1 %v8172_v44, %s8007_s26 }
 0x483   : > { %942 = vrot.lane.b32.xlu0 %v8150_v32, %s8007_s26 }
 0x486   : > { %v2938_v4 = vpop.xlane.xlu0 %2937  ;;  %680 = vrot.lane.b32.xlu1 %v8179_v48, %s8008_s28 }
 0x487   : > { %v2980_v27 = vsub.f32 %v8830_v22, %v2938_v4  ;;  %678 = vrot.lane.b32.xlu0 %v8157_v36, %s8008_s28 }
 0x489   : > { %v2998_v2 = vmul.f32 1.442695, %v2980_v27 }
 0x48a   : > { %v2941_v21 = vpop.xlane.xlu0 %2940 }
 0x48b   : > { %v2981_v46 = vsub.f32 %v8835_v51, %v2941_v21  ;;  %7715 = vpow2.f32 %v2998_v2 }
 0x48d   : > { %v3000_v61 = vmul.f32 1.442695, %v2981_v46 }
 0x48e   : > { %v2947_v47 = vpop.xlane.xlu0 %2946  ;;  %v2950_v45 = vpop.xlane.xlu1 %2949 }
 0x48f   : > { %7717 = vpow2.f32 %v3000_v61  ;;  %v2983_v40 = vsub.f32 %v8838_v20, %v2947_v47  ;;  %v2984_v33 = vsub.f32 %v8843_v60, %v2950_v45 }
 0x490   : > { %7719 = vpow2.f32 %v3002_v16 }
 0x491   : > { %v3004_v22 = vmul.f32 1.442695, %v2983_v40  ;;  %v3006_v37 = vmul.f32 1.442695, %v2984_v33 }
 0x492   : > { %v2956_v4 = vpop.xlane.xlu1 %2955  ;;  %v2953_v63 = vpop.xlane.xlu0 %2952 }
 0x493   : > { %7721 = vpow2.f32 %v3004_v22  ;;  %v2986_v12 = vsub.f32 %v8846_v41, %v2956_v4  ;;  %v2985_v51 = vsub.f32 %v8853_v29, %v2953_v63 }
 0x494   : > { %7723 = vpow2.f32 %v3006_v37 }
 0x495   : > { %v3008_v27 = vmul.f32 1.442695, %v2985_v51  ;;  %v3010_v43 = vmul.f32 1.442695, %v2986_v12 }
 0x496   : > { %v2959_v2 = vpop.xlane.xlu0 %2958  ;;  %v2962_v21 = vpop.xlane.xlu1 %2961 }
 0x497   : > { %v2987_v46 = vsub.f32 %v8856_v39, %v2959_v2  ;;  %7725 = vpow2.f32 %v3008_v27  ;;  %v2988_v40 = vsub.f32 %v8863_v55, %v2962_v21  ;;  %v7616_v55 = vld [vmem:[#allocation2 + $0x258] sm:$0xff]  }
 0x498   : > { %7727 = vpow2.f32 %v3010_v43  ;;  %v8995_v60 = vpop.eup %7715 }
 0x499   : > { %v3012_v47 = vmul.f32 1.442695, %v2987_v46  ;;  %v3014_v16 = vmul.f32 1.442695, %v2988_v40 }
 0x49a   : > { %v2968_v45 = vpop.xlane.xlu0 %2967  ;;  %v2971_v20 = vpop.xlane.xlu1 %2970 }
 0x49b   : > { %7729 = vpow2.f32 %v3012_v47  ;;  %v2990_v33 = vsub.f32 %v8866_v35, %v2968_v45  ;;  %v2991_v63 = vsub.f32 %v8869_v58, %v2971_v20 }
 0x49c   : > { %v8999_v41 = vpop.eup %7717 }
 0x49d   : > { %v3018_v29 = vmul.f32 1.442695, %v2990_v33  ;;  %v3020_v61 = vmul.f32 1.442695, %v2991_v63  ;;  %v3075_v39 = vpack.c.bf16 %v8999_v41, %v8995_v60  ;;  %v9003_v37 = vpop.eup %7719  ;;  %v7618_v63 = vld [vmem:[#allocation2 + $0x268] sm:$0xff]  }
 0x49e   : > { %v884_v22 = vpop.permute.xlu1 %883  ;;  %v2965_v4 = vpop.xlane.xlu0 %2964 }
 0x49f   : > { %921 = vst.msk [vmem:[#allocation2 + $0x1ac] sm:$0xf] %vm519_vm1, %v884_v22  ;;  %v2989_v12 = vsub.f32 %v8876_v62, %v2965_v4  ;;  %7252 = vmatmul.mubr.msk.bf16.vlgmr.msra.gmra.mxu1 %vm1758_vm4, %v3075_v39  ;;  %7731 = vpow2.f32 %v3018_v29  ;;  %v7617_v62 = vld [vmem:[#allocation2 + $0x260] sm:$0xff]   ;;  %v7619_v4 = vld [vmem:[#allocation2 + $0x270] sm:$0xff]  }
 0x4a0   : > { %v9008_v35 = vpop.eup %7721  ;;  %7262 = vmatpush3.bf16.msra.mxu1 %v7616_v55  ;;  %7263 = vmatprep.mubr.msk.bf16.mxu1 %vm7999_vm2, %v10257_v10  ;;  %7733 = vpow2.f32 %v3020_v61 }
 0x4a1   : > { %v3016_v58 = vmul.f32 1.442695, %v2989_v12  ;;  %v3076_v51 = vpack.c.bf16 %v9008_v35, %v9003_v37  ;;  %7273 = vmatprep.subr.bf16.mxu1 %v10257_v10  ;;  %7735 = vpow2.f32 %v3014_v16  ;;  %v9018_v21 = vpop.eup %7723 }
 0x4a2   : > { %v620_v27 = vpop.permute.xlu1 %619  ;;  %v2974_v43 = vpop.xlane.xlu0 %2973 }
 0x4a3   : > { %7737 = vpow2.f32 %v3016_v58  ;;  %659 = vst.msk [vmem:[#allocation2 + $0xa4] sm:$0xf] %vm519_vm1, %v620_v27  ;;  %v2992_v2 = vsub.f32 %v8883_v49, %v2974_v43  ;;  %7258 = vmatmul.mubr.msk.bf16.vlgmr.msra.gmra.mxu0 %vm1758_vm4, %v3076_v51  ;;  %v7621_v27 = vld [vmem:[#allocation2 + $0x180] sm:$0xff]  }
 0x4a4   : > { %7268 = vmatpush3.bf16.msra.mxu0 %v7617_v62  ;;  %7269 = vmatprep.mubr.msk.bf16.mxu0 %vm7999_vm2, %v10257_v10  ;;  %v9022_v46 = vpop.eup %7725 }
 0x4a5   : > { %7279 = vmatprep.subr.bf16.mxu0 %v10257_v10  ;;  %v3022_v47 = vmul.f32 1.442695, %v2992_v2  ;;  %v3077_v20 = vpack.c.bf16 %v9022_v46, %v9018_v21  ;;  %v9027_v33 = vpop.eup %7727 }
 0x4a6   : > { %v888_v40 = vpop.permute.xlu1 %887  ;;  %v2977_v45 = vpop.xlane.xlu0 %2976 }
 0x4a7   : > { %923 = vst.msk [vmem:[#allocation2 + $0x1b4] sm:$0xf] %vm519_vm1, %v888_v40  ;;  %v2993_v49 = vsub.f32 %v8888_v34, %v2977_v45  ;;  %7264 = vmatmul.mubr.msk.bf16.vlgmr.msra.gmra.mxu1 %vm1758_vm4, %v3077_v20  ;;  %7739 = vpow2.f32 %v3022_v47  ;;  %v7620_v45 = vld [vmem:[#allocation2 + $0x278] sm:$0xff]   ;;  %v3660_v20 = vsel %vm1311_vm3, %v7621_v27, 0 }
 0x4a8   : > { %v9031_v29 = vpop.eup %7729  ;;  %7274 = vmatpush3.bf16.msra.mxu1 %v7618_v63  ;;  %7275 = vmatprep.mubr.msk.bf16.mxu1 %vm7999_vm2, %v10257_v10 }
 0x4a9   : > { %v3024_v61 = vmul.f32 1.442695, %v2993_v49  ;;  %v3078_v39 = vpack.c.bf16 %v9031_v29, %v9027_v33  ;;  %7285 = vmatprep.subr.bf16.mxu1 %v10257_v10 }
 0x4aa   : > { %v624_v16 = vpop.permute.xlu1 %623  ;;  %v882_v22 = vpop.permute.xlu0 %881 }
 0x4ab   : > { %7741 = vpow2.f32 %v3024_v61  ;;  %661 = vst.msk [vmem:[#allocation2 + $0xac] sm:$0xf] %vm519_vm1, %v624_v16  ;;  %920 = vst.msk [vmem:[#allocation2 + $0x1a8] sm:$0xf] %vm519_vm1, %v882_v22  ;;  %7270 = vmatmul.mubr.msk.bf16.vlgmr.msra.gmra.mxu0 %vm1758_vm4, %v3078_v39  ;;  %v7623_v39 = vld [vmem:[#allocation2 + $0x188] sm:$0xff]   ;;  %v7624_v16 = vld [vmem:[#allocation2 + $0x190] sm:$0xff]  }
 0x4ac   : > { %7280 = vmatpush3.bf16.msra.mxu0 %v7619_v4  ;;  %7281 = vmatprep.mubr.msk.bf16.mxu0 %vm7999_vm2, %v10257_v10  ;;  %v9044_v34 = vpop.eup %7731 }
 0x4ad   : > { %7291 = vmatprep.subr.bf16.mxu0 %v10257_v10  ;;  %v9047_v55 = vpop.eup %7733 }
 0x4ae   : > { %v892_v12 = vpop.permute.xlu1 %891  ;;  %v618_v58 = vpop.permute.xlu0 %617  ;;  %v3080_v2 = vpack.c.bf16 %v9047_v55, %v9044_v34 }
 0x4af   : > { %v9049_v51 = vpop.eup %7735  ;;  %925 = vst.msk [vmem:[#allocation2 + $0x1bc] sm:$0xf] %vm519_vm1, %v892_v12  ;;  %658 = vst.msk [vmem:[#allocation2 + $0xa0] sm:$0xf] %vm519_vm1, %v618_v58  ;;  %v7622_v12 = vld [vmem:[#allocation2 + $0x80] sm:$0xff]  }
 0x4b0   : > { %v9053_v43 = vpop.eup %7737 }
 0x4b1   : > { %v3079_v62 = vpack.c.bf16 %v9053_v43, %v9049_v51 }
 0x4b2   : > { %v628_v47 = vpop.permute.xlu1 %627  ;;  %v886_v40 = vpop.permute.xlu0 %885 }
 0x4b3   : > { %663 = vst.msk [vmem:[#allocation2 + $0xb4] sm:$0xf] %vm519_vm1, %v628_v47  ;;  %922 = vst.msk [vmem:[#allocation2 + $0x1b0] sm:$0xf] %vm519_vm1, %v886_v40  ;;  %7276 = vmatmul.mubr.msk.bf16.vlgmr.msra.gmra.mxu1 %vm1758_vm4, %v3079_v62  ;;  %7282 = vmatmul.mubr.msk.bf16.vlgmr.msra.gmra.mxu0 %vm1758_vm4, %v3080_v2  ;;  %v3717_v62 = vsel %vm1311_vm3, %v7623_v39, 0  ;;  %v3774_v2 = vsel %vm1311_vm3, %v7624_v16, 0 }
 0x4b4   : > { %7286 = vmatpush3.bf16.msra.mxu1 %v7620_v45  ;;  %7292 = vmatpush3.bf16.xpose.msra.mxu0 %v3660_v20  ;;  %v9070_v61 = vpop.eup %7739  ;;  %v7627_v45 = vld [vmem:[#allocation2 + $0x198] sm:$0xff]   ;;  %v7628_v20 = vld [vmem:[#allocation2 + $0x1a0] sm:$0xff]  }
 0x4b5   : > { %7293 = vmatprep.mubr.msk.bf16.mxu0 %vm7999_vm2, %v10257_v10  ;;  %7303 = vmatprep.subr.bf16.mxu0 %v10257_v10 }
 0x4b6   : > { %v632_v49 = vpop.permute.xlu1 %631  ;;  %v622_v63 = vpop.permute.xlu0 %621  ;;  %7287 = vmatprep.mubr.msk.bf16.mxu1 %vm7999_vm2, %v10257_v10  ;;  %7297 = vmatprep.subr.bf16.mxu1 %v10257_v10 }
 0x4b7   : > { %665 = vst.msk [vmem:[#allocation2 + $0xbc] sm:$0xf] %vm519_vm1, %v632_v49  ;;  %660 = vst.msk [vmem:[#allocation2 + $0xa8] sm:$0xf] %vm519_vm1, %v622_v63  ;;  %v7625_v49 = vld [vmem:[#allocation2 + $0x88] sm:$0xff]   ;;  %v7626_v63 = vld [vmem:[#allocation2 + $0x90] sm:$0xff]  }
 0x4b8   : > { %v9074_v22 = vpop.eup %7741 }
 0x4b9   : > { %v3081_v4 = vpack.c.bf16 %v9074_v22, %v9070_v61 }
 0x4ba   : > { %v1122_v58 = vpop.permute.xlu1 %1121  ;;  %v890_v27 = vpop.permute.xlu0 %889 }
 0x4bb   : > { %1170 = vst.msk [vmem:[#allocation2 + $0x280] sm:$0xf] %vm519_vm1, %v1122_v58  ;;  %924 = vst.msk [vmem:[#allocation2 + $0x1b8] sm:$0xf] %vm519_vm1, %v890_v27  ;;  %7288 = vmatmul.mubr.msk.bf16.vlgmr.msra.gmra.mxu1 %vm1758_vm4, %v3081_v4  ;;  %7294 = vmatmul.mubr.msk.bf16.vlgmr.msra.gmra.mxu0 %vm1311_vm3, %v7622_v12  ;;  %v3831_v4 = vsel %vm1311_vm3, %v7627_v45, 0  ;;  %v3888_v12 = vsel %vm1311_vm3, %v7628_v20, 0 }
 0x4bc   : > { %7298 = vmatpush3.bf16.xpose.msra.mxu1 %v3717_v62  ;;  %7304 = vmatpush3.bf16.xpose.msra.mxu0 %v3774_v2  ;;  %v7631_v62 = vld [vmem:[#allocation2 + $0x1a8] sm:$0xff]   ;;  %v7632_v2 = vld [vmem:[#allocation2 + $0x1b0] sm:$0xff]  }
 0x4bd   : > { %7305 = vmatprep.mubr.msk.bf16.mxu0 %vm7999_vm2, %v10257_v10  ;;  %7315 = vmatprep.subr.bf16.mxu0 %v10257_v10 }
 0x4be   : > { %v1126_v47 = vpop.permute.xlu1 %1125  ;;  %v626_v40 = vpop.permute.xlu0 %625  ;;  %7299 = vmatprep.mubr.msk.bf16.mxu1 %vm7999_vm2, %v10257_v10  ;;  %7309 = vmatprep.subr.bf16.mxu1 %v10257_v10 }
 0x4bf   : > { %1172 = vst.msk [vmem:[#allocation2 + $0x288] sm:$0xf] %vm519_vm1, %v1126_v47  ;;  %662 = vst.msk [vmem:[#allocation2 + $0xb0] sm:$0xf] %vm519_vm1, %v626_v40  ;;  %v7629_v47 = vld [vmem:[#allocation2 + $0x98] sm:$0xff]   ;;  %v7630_v40 = vld [vmem:[#allocation2 + $0xa0] sm:$0xff]  }
 0x4c2   : > { %v1128_v39 = vpop.permute.xlu1 %1127  ;;  %v630_v16 = vpop.permute.xlu0 %629 }
 0x4c3   : > { %1173 = vst.msk [vmem:[#allocation2 + $0x28c] sm:$0xf] %vm519_vm1, %v1128_v39  ;;  %664 = vst.msk [vmem:[#allocation2 + $0xb8] sm:$0xf] %vm519_vm1, %v630_v16  ;;  %7300 = vmatmul.mubr.msk.bf16.vlgmr.msra.gmra.mxu1 %vm1311_vm3, %v7625_v49  ;;  %7306 = vmatmul.mubr.msk.bf16.vlgmr.msra.gmra.mxu0 %vm1311_vm3, %v7626_v63  ;;  %v3945_v49 = vsel %vm1311_vm3, %v7631_v62, 0  ;;  %v4002_v63 = vsel %vm1311_vm3, %v7632_v2, 0 }
 0x4c4   : > { %7310 = vmatpush3.bf16.xpose.msra.mxu1 %v3831_v4  ;;  %7316 = vmatpush3.bf16.xpose.msra.mxu0 %v3888_v12  ;;  %v7635_v4 = vld [vmem:[#allocation2 + $0x1b8] sm:$0xff]   ;;  %v7633_v12 = vld [vmem:[#allocation2 + $0xa8] sm:$0xff]  }
 0x4c5   : > { %7317 = vmatprep.mubr.msk.bf16.mxu0 %vm7999_vm2, %v10257_v10  ;;  %7327 = vmatprep.subr.bf16.mxu0 %v10257_v10 }
 0x4c6   : > { %v1130_v58 = vpop.permute.xlu1 %1129  ;;  %v1124_v27 = vpop.permute.xlu0 %1123  ;;  %7311 = vmatprep.mubr.msk.bf16.mxu1 %vm7999_vm2, %v10257_v10  ;;  %7321 = vmatprep.subr.bf16.mxu1 %v10257_v10 }
 0x4c7   : > { %1174 = vst.msk [vmem:[#allocation2 + $0x290] sm:$0xf] %vm519_vm1, %v1130_v58  ;;  %1171 = vst.msk [vmem:[#allocation2 + $0x284] sm:$0xf] %vm519_vm1, %v1124_v27  ;;  %v7634_v58 = vld [vmem:[#allocation2 + $0xb0] sm:$0xff]  }
 0x4ca   : > { %v1134_v45 = vpop.permute.xlu1 %1133  ;;  %v1132_v20 = vpop.permute.xlu0 %1131 }
 0x4cb   : > { %1176 = vst.msk [vmem:[#allocation2 + $0x298] sm:$0xf] %vm519_vm1, %v1134_v45  ;;  %1175 = vst.msk [vmem:[#allocation2 + $0x294] sm:$0xf] %vm519_vm1, %v1132_v20  ;;  %7312 = vmatmul.mubr.msk.bf16.vlgmr.msra.gmra.mxu1 %vm1311_vm3, %v7629_v47  ;;  %7318 = vmatmul.mubr.msk.bf16.vlgmr.msra.gmra.mxu0 %vm1311_vm3, %v7630_v40  ;;  %v4059_v47 = vsel %vm1311_vm3, %v7635_v4, 0  ;;  %v7637_v20 = vld [vmem:[#allocation2 + $0xb8] sm:$0xff]  }
 0x4cc   : > { %7322 = vmatpush3.bf16.xpose.msra.mxu1 %v3945_v49  ;;  %7328 = vmatpush3.bf16.xpose.msra.mxu0 %v4002_v63 }
 0x4cd   : > { %7323 = vmatprep.mubr.msk.bf16.mxu1 %vm7999_vm2, %v10257_v10  ;;  %7329 = vmatprep.mubr.msk.bf16.mxu0 %vm7999_vm2, %v10257_v10 }
 0x4ce   : > { %v1136_v39 = vpop.permute.xlu1 %1135  ;;  %v1138_v16 = vpop.permute.xlu0 %1137  ;;  %7333 = vmatprep.subr.bf16.mxu1 %v10257_v10  ;;  %7339 = vmatprep.subr.bf16.mxu0 %v10257_v10  ;;  %v7636_v2 = vld [vmem:[#allocation2 + $0x280] sm:$0xff]  }
 0x4cf   : > { %1177 = vst.msk [vmem:[#allocation2 + $0x29c] sm:$0xf] %vm519_vm1, %v1136_v39  ;;  %1178 = vst.msk [vmem:[#allocation2 + $0x2a0] sm:$0xf] %vm519_vm1, %v1138_v16  ;;  %v7638_v39 = vld [vmem:[#allocation2 + $0x288] sm:$0xff]  }
 0x4d2   : > { %v1140_v27 = vpop.permute.xlu1 %1139  ;;  %v1142_v62 = vpop.permute.xlu0 %1141 }
 0x4d3   : > { %1179 = vst.msk [vmem:[#allocation2 + $0x2a4] sm:$0xf] %vm519_vm1, %v1140_v27  ;;  %1180 = vst.msk [vmem:[#allocation2 + $0x2a8] sm:$0xf] %vm519_vm1, %v1142_v62  ;;  %7324 = vmatmul.mubr.msk.bf16.vlgmr.msra.gmra.mxu1 %vm1311_vm3, %v7633_v12  ;;  %7330 = vmatmul.mubr.msk.bf16.vlgmr.msra.gmra.mxu0 %vm1311_vm3, %v7634_v58 }
 0x4d4   : > { %7334 = vmatpush3.bf16.xpose.msra.mxu1 %v4059_v47  ;;  %7340 = vmatpush3.bf16.msra.mxu0 %v7636_v2 }
 0x4d5   : > { %7335 = vmatprep.mubr.msk.bf16.mxu1 %vm7999_vm2, %v10257_v10  ;;  %7345 = vmatprep.subr.bf16.mxu1 %v10257_v10 }
 0x4d6   : > { %v1144_v40 = vpop.permute.xlu1 %1143  ;;  %v1146_v45 = vpop.permute.xlu0 %1145  ;;  %7341 = vmatprep.mubr.msk.bf16.mxu0 %vm7999_vm2, %v10257_v10  ;;  %7351 = vmatprep.subr.bf16.mxu0 %v10257_v10 }
 0x4d7   : > { %1181 = vst.msk [vmem:[#allocation2 + $0x2ac] sm:$0xf] %vm519_vm1, %v1144_v40  ;;  %1182 = vst.msk [vmem:[#allocation2 + $0x2b0] sm:$0xf] %vm519_vm1, %v1146_v45 }
 0x4da   : > { %v1148_v49 = vpop.permute.xlu1 %1147  ;;  %v1150_v63 = vpop.permute.xlu0 %1149 }
 0x4db   : > { %1183 = vst.msk [vmem:[#allocation2 + $0x2b4] sm:$0xf] %vm519_vm1, %v1148_v49  ;;  %1184 = vst.msk [vmem:[#allocation2 + $0x2b8] sm:$0xf] %vm519_vm1, %v1150_v63  ;;  %7336 = vmatmul.mubr.msk.bf16.vlgmr.msra.gmra.mxu1 %vm1311_vm3, %v7637_v20 }
 0x4dc   : > { %7346 = vmatpush3.bf16.msra.mxu1 %v7638_v39  ;;  %7347 = vmatprep.mubr.msk.bf16.mxu1 %vm7999_vm2, %v10257_v10 }
 0x4dd   : > { %7357 = vmatprep.subr.bf16.mxu1 %v10257_v10 }
 0x4de   : > { %v1152_v16 = vpop.permute.xlu1 %1151  ;;  %v927_v4 = vpop.permute.xlu0 %926 }
 0x4df   : > { %1185 = vst.msk [vmem:[#allocation2 + $0x2bc] sm:$0xf] %vm519_vm1, %v1152_v16  ;;  %975 = vst.msk [vmem:[#allocation2 + $0x1c0] sm:$0xf] %vm519_vm1, %v927_v4 }
 0x4e2   : > { %v929_v12 = vpop.permute.xlu1 %928  ;;  %v931_v58 = vpop.permute.xlu0 %930 }
 0x4e3   : > { %976 = vst.msk [vmem:[#allocation2 + $0x1c4] sm:$0xf] %vm519_vm1, %v929_v12  ;;  %977 = vst.msk [vmem:[#allocation2 + $0x1c8] sm:$0xf] %vm519_vm1, %v931_v58 }
 0x4e6   : > { %v933_v27 = vpop.permute.xlu1 %932  ;;  %v667_v62 = vpop.permute.xlu0 %666 }
 0x4e7   : > { %978 = vst.msk [vmem:[#allocation2 + $0x1cc] sm:$0xf] %vm519_vm1, %v933_v27  ;;  %715 = vst.msk [vmem:[#allocation2 + $0xc0] sm:$0xf] %vm519_vm1, %v667_v62 }
 0x4ea   : > { %v669_v2 = vpop.permute.xlu1 %668  ;;  %v935_v47 = vpop.permute.xlu0 %934 }
 0x4eb   : > { %716 = vst.msk [vmem:[#allocation2 + $0xc4] sm:$0xf] %vm519_vm1, %v669_v2  ;;  %979 = vst.msk [vmem:[#allocation2 + $0x1d0] sm:$0xf] %vm519_vm1, %v935_v47 }
 0x4ee   : > { %v937_v40 = vpop.permute.xlu1 %936  ;;  %v671_v45 = vpop.permute.xlu0 %670 }
 0x4ef   : > { %980 = vst.msk [vmem:[#allocation2 + $0x1d4] sm:$0xf] %vm519_vm1, %v937_v40  ;;  %717 = vst.msk [vmem:[#allocation2 + $0xc8] sm:$0xf] %vm519_vm1, %v671_v45 }
 0x4f2   : > { %v673_v20 = vpop.permute.xlu1 %672  ;;  %v939_v49 = vpop.permute.xlu0 %938 }
 0x4f3   : > { %718 = vst.msk [vmem:[#allocation2 + $0xcc] sm:$0xf] %vm519_vm1, %v673_v20  ;;  %981 = vst.msk [vmem:[#allocation2 + $0x1d8] sm:$0xf] %vm519_vm1, %v939_v49 }
 0x4f6   : > { %v941_v63 = vpop.permute.xlu1 %940  ;;  %v675_v39 = vpop.permute.xlu0 %674 }
 0x4f7   : > { %982 = vst.msk [vmem:[#allocation2 + $0x1dc] sm:$0xf] %vm519_vm1, %v941_v63  ;;  %719 = vst.msk [vmem:[#allocation2 + $0xd0] sm:$0xf] %vm519_vm1, %v675_v39 }
 0x4fa   : > { %v677_v16 = vpop.permute.xlu1 %676  ;;  %v943_v4 = vpop.permute.xlu0 %942 }
 0x4fb   : > { %720 = vst.msk [vmem:[#allocation2 + $0xd4] sm:$0xf] %vm519_vm1, %v677_v16  ;;  %983 = vst.msk [vmem:[#allocation2 + $0x1e0] sm:$0xf] %vm519_vm1, %v943_v4 }
 0x4fe   : > { %v945_v12 = vpop.permute.xlu1 %944  ;;  %v679_v58 = vpop.permute.xlu0 %678 }
 0x4ff   : > { %984 = vst.msk [vmem:[#allocation2 + $0x1e4] sm:$0xf] %vm519_vm1, %v945_v12  ;;  %721 = vst.msk [vmem:[#allocation2 + $0xd8] sm:$0xf] %vm519_vm1, %v679_v58 }
 0x502   : > { %v681_v27 = vpop.permute.xlu1 %680 }
 0x503   : > { %722 = vst.msk [vmem:[#allocation2 + $0xdc] sm:$0xf] %vm519_vm1, %v681_v27 }
 0x52e   : > { %v9158_v62 = vpop.f32.mrf.mxu0 }
 0x52f   : > { %10258 = vst [vmem:[#allocation35_spill] sm:$0xff] %v9158_v62 }
 0x530   : > { %v7247_v2 = vpop.f32.mrf.mxu0 }
 0x532   : > { %v9160_v47 = vpop.f32.mrf.mxu0 }
 0x533   : > { %10259 = vst [vmem:[#allocation36_spill] sm:$0xff] %v9160_v47 }
 0x534   : > { %v7248_v40 = vpop.f32.mrf.mxu0 }
 0x55f   : > { %v9162_v45 = vpop.f32.mrf.mxu1 }
 0x560   : > { %10260 = vst [vmem:[#allocation37_spill] sm:$0xff] %v9162_v45 }
 0x561   : > { %v7253_v20 = vpop.f32.mrf.mxu1 }
 0x563   : > { %v9164_v49 = vpop.f32.mrf.mxu1  ;;  %v9166_v63 = vpop.f32.mrf.mxu0 }
 0x564   : > { %10261 = vst [vmem:[#allocation38_spill] sm:$0xff] %v9164_v49  ;;  %10262 = vst [vmem:[#allocation39_spill] sm:$0xff] %v9166_v63 }
 0x565   : > { %v7254_v39 = vpop.f32.mrf.mxu1  ;;  %v7259_v16 = vpop.f32.mrf.mxu0 }
 0x567   : > { %v9168_v4 = vpop.f32.mrf.mxu0  ;;  %v9170_v12 = vpop.f32.mrf.mxu1 }
 0x568   : > { %10263 = vst [vmem:[#allocation40_spill] sm:$0xff] %v9168_v4  ;;  %10264 = vst [vmem:[#allocation41_spill] sm:$0xff] %v9170_v12 }
 0x569   : > { %v7260_v58 = vpop.f32.mrf.mxu0  ;;  %v7265_v27 = vpop.f32.mrf.mxu1 }
 0x56b   : > { %v9172_v28 = vpop.f32.mrf.mxu0  ;;  %v9174_v2 = vpop.f32.mrf.mxu1 }
 0x56c   : > { %10265 = vst [vmem:[#allocation42_spill] sm:$0xff] %v9172_v28  ;;  %10266 = vst [vmem:[#allocation43_spill] sm:$0xff] %v9174_v2 }
 0x56d   : > { %v7271_v40 = vpop.f32.mrf.mxu0  ;;  %v7266_v62 = vpop.f32.mrf.mxu1 }
 0x56e   : > { %v9189_v40 = vld [vmem:[%s10209_s3 + $0x20] sm:$0xff] }
 0x56f   : > { %v9176_v45 = vpop.f32.mrf.mxu0 }
 0x570   : > { %10267 = vst [vmem:[#allocation44_spill] sm:$0xff] %v9176_v45 }
 0x571   : > { %v7272_v20 = vpop.f32.mrf.mxu0 }
 0x573   : > { %v9178_v49 = vpop.f32.mrf.mxu1  ;;  %v9180_v63 = vpop.f32.mrf.mxu0 }
 0x574   : > { %10268 = vst [vmem:[#allocation45_spill] sm:$0xff] %v9178_v49  ;;  %10269 = vst [vmem:[#allocation46_spill] sm:$0xff] %v9180_v63 }
 0x575   : > { %v7277_v39 = vpop.f32.mrf.mxu1  ;;  %v7283_v16 = vpop.f32.mrf.mxu0 }
 0x576   : > { %v9199_v16 = vld [vmem:[%s10209_s3 + $0x28] sm:$0xff] }
 0x577   : > { %v9182_v4 = vpop.f32.mrf.mxu1  ;;  %v9184_v12 = vpop.f32.mrf.mxu0 }
 0x578   : > { %10270 = vst [vmem:[#allocation47_spill] sm:$0xff] %v9182_v4  ;;  %10271 = vst [vmem:[#allocation48_spill] sm:$0xff] %v9184_v12 }
 0x579   : > { %v7278_v58 = vpop.f32.mrf.mxu1  ;;  %v7284_v27 = vpop.f32.mrf.mxu0 }
 0x57b   : > { %v9191_v62 = vpop.f32.mrf.mxu1  ;;  %v3696_v20 = vpop.f32.mrf.mxu0 }
 0x57c   : > { %10272 = vst [vmem:[#allocation49_spill] sm:$0xff] %v9191_v62  ;;  %v9194_v45 = vadd.f32 %v9189_v40, %v3696_v20 }
 0x57d   : > { %v7289_v63 = vpop.f32.mrf.mxu1  ;;  %v7295_v39 = vpop.f32.mrf.mxu0 }
 0x57e   : > { %v4102_v58 = vsel %vm1758_vm4, %v9194_v45, -inf }
 0x57f   : > { %v3699_v27 = vpop.f32.mrf.mxu0  ;;  %4103 = vmax.xlane.f32.xlu0 %v4102_v58  ;;  %v9203_v12 = vpop.f32.mrf.mxu1 }
 0x580   : > { %10273 = vst [vmem:[#allocation50_spill] sm:$0xff] %v9203_v12  ;;  %v9206_v4 = vadd.f32 %v9199_v16, %v3699_v27 }
 0x581   : > { %v7290_v62 = vpop.f32.mrf.mxu1  ;;  %v7296_v20 = vpop.f32.mrf.mxu0 }
 0x582   : > { %v4105_v63 = vsel %vm1758_vm4, %v9206_v4, -inf }
 0x583   : > { %4106 = vmax.xlane.f32.xlu1 %v4105_v63  ;;  %v3753_v39 = vpop.f32.mrf.mxu1  ;;  %v3810_v2 = vpop.f32.mrf.mxu0 }
 0x584   : > { %v9211_v49 = vadd.f32 %v9189_v40, %v3753_v39  ;;  %v9214_v28 = vadd.f32 %v9189_v40, %v3810_v2 }
 0x585   : > { %v7301_v58 = vpop.f32.mrf.mxu1  ;;  %v7307_v47 = vpop.f32.mrf.mxu0 }
 0x586   : > { %v4114_v27 = vsel %vm1758_vm4, %v9214_v28, -inf  ;;  %v4108_v62 = vsel %vm1758_vm4, %v9211_v49, -inf }
 0x587   : > { %4115 = vmax.xlane.f32.xlu1 %v4114_v27  ;;  %v3813_v20 = vpop.f32.mrf.mxu0  ;;  %4109 = vmax.xlane.f32.xlu0 %v4108_v62  ;;  %v3756_v63 = vpop.f32.mrf.mxu1 }
 0x588   : > { %v9221_v12 = vadd.f32 %v9199_v16, %v3756_v63  ;;  %v9224_v2 = vadd.f32 %v9199_v16, %v3813_v20 }
 0x589   : > { %v7302_v39 = vpop.f32.mrf.mxu1  ;;  %v7308_v31 = vpop.f32.mrf.mxu0 }
 0x58a   : > { %v4111_v47 = vsel %vm1758_vm4, %v9221_v12, -inf  ;;  %v4117_v31 = vsel %vm1758_vm4, %v9224_v2, -inf }
 0x58b   : > { %v3924_v58 = vpop.f32.mrf.mxu0  ;;  %4112 = vmax.xlane.f32.xlu0 %v4111_v47  ;;  %v3867_v17 = vpop.f32.mrf.mxu1 }
 0x58c   : > { %v9229_v56 = vadd.f32 %v9189_v40, %v3867_v17  ;;  %v9232_v9 = vadd.f32 %v9189_v40, %v3924_v58 }
 0x58d   : > { %v7313_v27 = vpop.f32.mrf.mxu1  ;;  %v7319_v62 = vpop.f32.mrf.mxu0 }
 0x58e   : > { %v4120_v20 = vsel %vm1758_vm4, %v9229_v56, -inf  ;;  %v4126_v58 = vsel %vm1758_vm4, %v9232_v9, -inf }
 0x58f   : > { %v3927_v63 = vpop.f32.mrf.mxu0  ;;  %4118 = vmax.xlane.f32.xlu0 %v4117_v31  ;;  %4121 = vmax.xlane.f32.xlu1 %v4120_v20  ;;  %v3870_v39 = vpop.f32.mrf.mxu1 }
 0x590   : > { %v9239_v47 = vadd.f32 %v9199_v16, %v3870_v39  ;;  %v9242_v27 = vadd.f32 %v9199_v16, %v3927_v63 }
 0x591   : > { %v7314_v17 = vpop.f32.mrf.mxu1  ;;  %v7320_v8 = vpop.f32.mrf.mxu0 }
 0x592   : > { %v4123_v62 = vsel %vm1758_vm4, %v9239_v47, -inf  ;;  %v4129_v63 = vsel %vm1758_vm4, %v9242_v27, -inf }
 0x593   : > { %v4038_v24 = vpop.f32.mrf.mxu0  ;;  %4127 = vmax.xlane.f32.xlu1 %v4126_v58  ;;  %4124 = vmax.xlane.f32.xlu0 %v4123_v62  ;;  %v3981_v31 = vpop.f32.mrf.mxu1 }
 0x594   : > { %v9249_v20 = vadd.f32 %v9189_v40, %v3981_v31  ;;  %v9252_v8 = vadd.f32 %v9189_v40, %v4038_v24 }
 0x595   : > { %v7325_v39 = vpop.f32.mrf.mxu1  ;;  %v7331_v6 = vpop.f32.mrf.mxu0 }
 0x596   : > { %v4132_v17 = vsel %vm1758_vm4, %v9249_v20, -inf  ;;  %v4138_v24 = vsel %vm1758_vm4, %v9252_v8, -inf }
 0x597   : > { %v4041_v26 = vpop.f32.mrf.mxu0  ;;  %4130 = vmax.xlane.f32.xlu0 %v4129_v63  ;;  %4133 = vmax.xlane.f32.xlu1 %v4132_v17  ;;  %v3984_v58 = vpop.f32.mrf.mxu1 }
 0x598   : > { %v9259_v62 = vadd.f32 %v9199_v16, %v4041_v26  ;;  %v9262_v6 = vadd.f32 %v9199_v16, %v3984_v58 }
 0x599   : > { %v7326_v31 = vpop.f32.mrf.mxu1  ;;  %v7332_v19 = vpop.f32.mrf.mxu0 }
 0x59a   : > { %v4141_v39 = vsel %vm1758_vm4, %v9259_v62, -inf  ;;  %v4135_v26 = vsel %vm1758_vm4, %v9262_v6, -inf }
 0x59b   : > { %4139 = vmax.xlane.f32.xlu0 %v4138_v24  ;;  %4142 = vmax.xlane.f32.xlu1 %v4141_v39  ;;  %v4095_v15 = vpop.f32.mrf.mxu1 }
 0x59c   : > { %v9269_v17 = vadd.f32 %v9189_v40, %v4095_v15 }
 0x59d   : > { %v7337_v63 = vpop.f32.mrf.mxu1 }
 0x59e   : > { %v4144_v5 = vsel %vm1758_vm4, %v9269_v17, -inf }
 0x59f   : > { %4136 = vmax.xlane.f32.xlu0 %v4135_v26  ;;  %v4098_v19 = vpop.f32.mrf.mxu1 }
 0x5a0   : > { %v9274_v31 = vadd.f32 %v9199_v16, %v4098_v19 }
 0x5a1   : > { %v7338_v58 = vpop.f32.mrf.mxu1 }
 0x5a2   : > { %v4147_v24 = vsel %vm1758_vm4, %v9274_v31, -inf }
 0x5a3   : > { %4145 = vmax.xlane.f32.xlu0 %v4144_v5 }
 0x5a7   : > { %4148 = vmax.xlane.f32.xlu0 %v4147_v24 }
 0x5ac   : > { %948 = vrot.lane.b32.xlu1 %v8162_v38, %s8007_s26 }
 0x5b0   : > { %684 = vrot.lane.b32.xlu1 %v8172_v44, %s8008_s28 }
 0x5b4   : > { %952 = vrot.lane.b32.xlu1 %v8215_v59, %s8007_s26 }
 0x5b8   : > { %688 = vrot.lane.b32.xlu1 %v8162_v38, %s8008_s28 }
 0x5bc   : > { %956 = vrot.lane.b32.xlu1 %v8208_v57, %s8007_s26 }
 0x5bd   : > { %946 = vrot.lane.b32.xlu0 %v8138_v25, %s8007_s26 }
 0x5c0   : > { %692 = vrot.lane.b32.xlu1 %v8215_v59, %s8008_s28 }
 0x5c1   : > { %682 = vrot.lane.b32.xlu0 %v8150_v32, %s8008_s28 }
 0x5c4   : > { %696 = vrot.lane.b32.xlu1 %v8208_v57, %s8008_s28 }
 0x5c5   : > { %950 = vrot.lane.b32.xlu0 %v8197_v54, %s8007_s26 }
 0x5c8   : > { %1186 = vrot.lane.b32.xlu1 %v8125_v18, %s8009_s12 }
 0x5c9   : > { %686 = vrot.lane.b32.xlu0 %v8138_v25, %s8008_s28 }
 0x5cc   : > { %1190 = vrot.lane.b32.xlu1 %v8122_v14, %s8009_s12 }
 0x5cd   : > { %954 = vrot.lane.b32.xlu0 %v8184_v50, %s8007_s26  ;;  %s8013_s26 = smov [#allocation5]  }
 0x5d0   : > { %1192 = vrot.lane.b32.xlu1 %v8133_v23, %s8009_s12 }
 0x5d1   : > { %690 = vrot.lane.b32.xlu0 %v8197_v54, %s8008_s28 }
 0x5d4   : > { %1194 = vrot.lane.b32.xlu1 %v8169_v42, %s8009_s12 }
 0x5d5   : > { %694 = vrot.lane.b32.xlu0 %v8184_v50, %s8008_s28  ;;  %s7939_s28 = sshll.u32 %s8013_s26, 4  ;;  %s7940_s28 = int_to_ptr.vmem [resolvable:$false] %s7939_s28 }
 0x5d6   : > { %s7941_s29 = scalar_lea.vmem %s7940_s28, 4096  ;;  %p7942_p0 = scmp.lt.s32.totalorder %s10160_s15, %s7940_s28 }
 0x5d7   : > { %p7943_p1 = scmp.lt.s32.totalorder %s7941_s29, %s7935_s20 }
 0x5d8   : > { %1198 = vrot.lane.b32.xlu1 %v8157_v36, %s8009_s12 }
 0x5d9   : > { %1188 = vrot.lane.b32.xlu0 %v8145_v30, %s8009_s12  ;;  %p7944_p2 = por %p7943_p1, %p7942_p0 }
 0x5db   : > { %p7945_p3 = pnand %p7944_p2, %p7938_p13 }
 0x5dc   : > { %1200 = vrot.lane.b32.xlu1 %v8179_v48, %s8009_s12 }
 0x5dd   : > { %1196 = vrot.lane.b32.xlu0 %v8195_v53, %s8009_s12 }
 0x5e0   : > { %1204 = vrot.lane.b32.xlu1 %v8172_v44, %s8009_s12 }
 0x5e1   : > { %1202 = vrot.lane.b32.xlu0 %v8150_v32, %s8009_s12 }
 0x5e4   : > { %1208 = vrot.lane.b32.xlu1 %v8162_v38, %s8009_s12 }
 0x5e5   : > { %1206 = vrot.lane.b32.xlu0 %v8138_v25, %s8009_s12 }
 0x5e8   : > { %1212 = vrot.lane.b32.xlu1 %v8215_v59, %s8009_s12 }
 0x5e9   : > { %1210 = vrot.lane.b32.xlu0 %v8197_v54, %s8009_s12 }
 0x608   : > { %v4104_v14 = vpop.xlane.xlu0 %4103 }
 0x609   : > { %v4150_v18 = vsub.f32 %v9194_v45, %v4104_v14 }
 0x60b   : > { %v4166_v23 = vmul.f32 1.442695, %v4150_v18  ;;  %v7639_v18 = vld [vmem:[#allocation2 + $0x290] sm:$0xff]  }
 0x60c   : > { %v4107_v30 = vpop.xlane.xlu1 %4106 }
 0x60d   : > { %v4151_v36 = vsub.f32 %v9206_v4, %v4107_v30  ;;  %7743 = vpow2.f32 %v4166_v23 }
 0x60f   : > { %v4168_v32 = vmul.f32 1.442695, %v4151_v36 }
 0x610   : > { %v4110_v42 = vpop.xlane.xlu0 %4109  ;;  %v4116_v38 = vpop.xlane.xlu1 %4115 }
 0x611   : > { %7745 = vpow2.f32 %v4168_v32  ;;  %v4152_v25 = vsub.f32 %v9211_v49, %v4110_v42  ;;  %v4154_v44 = vsub.f32 %v9214_v28, %v4116_v38 }
 0x613   : > { %v4170_v48 = vmul.f32 1.442695, %v4152_v25  ;;  %v4174_v15 = vmul.f32 1.442695, %v4154_v44 }
 0x614   : > { %v4113_v53 = vpop.xlane.xlu0 %4112 }
 0x615   : > { %v4153_v54 = vsub.f32 %v9221_v12, %v4113_v53  ;;  %7747 = vpow2.f32 %v4170_v48 }
 0x617   : > { %v4172_v59 = vmul.f32 1.442695, %v4153_v54 }
 0x618   : > { %v4119_v5 = vpop.xlane.xlu0 %4118  ;;  %v4122_v45 = vpop.xlane.xlu1 %4121 }
 0x619   : > { %7749 = vpow2.f32 %v4172_v59  ;;  %v4155_v4 = vsub.f32 %v9224_v2, %v4119_v5  ;;  %v4156_v40 = vsub.f32 %v9229_v56, %v4122_v45 }
 0x61a   : > { %7751 = vpow2.f32 %v4174_v15  ;;  %v9343_v63 = vpop.eup %7743 }
 0x61b   : > { %v4176_v16 = vmul.f32 1.442695, %v4155_v4  ;;  %v4178_v28 = vmul.f32 1.442695, %v4156_v40 }
 0x61c   : > { %v4128_v39 = vpop.xlane.xlu1 %4127  ;;  %v4125_v49 = vpop.xlane.xlu0 %4124 }
 0x61d   : > { %7753 = vpow2.f32 %v4176_v16  ;;  %v4158_v12 = vsub.f32 %v9232_v9, %v4128_v39  ;;  %v4157_v26 = vsub.f32 %v9239_v47, %v4125_v49 }
 0x61e   : > { %v9347_v19 = vpop.eup %7745  ;;  %7755 = vpow2.f32 %v4178_v28 }
 0x61f   : > { %v4180_v58 = vmul.f32 1.442695, %v4157_v26  ;;  %v4246_v2 = vpack.c.bf16 %v9347_v19, %v9343_v63  ;;  %v4182_v24 = vmul.f32 1.442695, %v4158_v12 }
 0x620   : > { %v4131_v56 = vpop.xlane.xlu0 %4130  ;;  %v4134_v14 = vpop.xlane.xlu1 %4133 }
 0x621   : > { %v4159_v23 = vsub.f32 %v9242_v27, %v4131_v56  ;;  %7342 = vmatmul.mubr.msk.bf16.vlgmr.msra.gmra.mxu0 %vm1758_vm4, %v4246_v2  ;;  %7757 = vpow2.f32 %v4180_v58  ;;  %v4160_v47 = vsub.f32 %v9249_v20, %v4134_v14  ;;  %v7640_v20 = vld [vmem:[#allocation2 + $0x298] sm:$0xff]  }
 0x622   : > { %7352 = vmatpush3.bf16.msra.mxu0 %v7639_v18  ;;  %7353 = vmatprep.mubr.msk.bf16.mxu0 %vm7999_vm2, %v10257_v10  ;;  %7759 = vpow2.f32 %v4182_v24  ;;  %v9357_v32 = vpop.eup %7747  ;;  %v7642_v24 = vld [vmem:[#allocation2 + $0x2a8] sm:$0xff]  }
 0x623   : > { %v4184_v9 = vmul.f32 1.442695, %v4159_v23  ;;  %7363 = vmatprep.subr.bf16.mxu0 %v10257_v10  ;;  %v4186_v53 = vmul.f32 1.442695, %v4160_v47  ;;  %v7643_v47 = vld [vmem:[#allocation2 + $0x2b0] sm:$0xff]  }
 0x624   : > { %v4140_v30 = vpop.xlane.xlu0 %4139  ;;  %v4143_v36 = vpop.xlane.xlu1 %4142 }
 0x625   : > { %7761 = vpow2.f32 %v4184_v9  ;;  %v4162_v27 = vsub.f32 %v9252_v8, %v4140_v30  ;;  %v4163_v42 = vsub.f32 %v9259_v62, %v4143_v36 }
 0x626   : > { %v9361_v38 = vpop.eup %7749 }
 0x627   : > { %v4190_v25 = vmul.f32 1.442695, %v4162_v27  ;;  %v4192_v44 = vmul.f32 1.442695, %v4163_v42  ;;  %v4247_v48 = vpack.c.bf16 %v9361_v38, %v9357_v32  ;;  %v9365_v15 = vpop.eup %7751 }
 0x628   : > { %v949_v54 = vpop.permute.xlu1 %948  ;;  %v4137_v59 = vpop.xlane.xlu0 %4136 }
 0x629   : > { %986 = vst.msk [vmem:[#allocation2 + $0x1ec] sm:$0xf] %vm519_vm1, %v949_v54  ;;  %v4161_v5 = vsub.f32 %v9262_v6, %v4137_v59  ;;  %7348 = vmatmul.mubr.msk.bf16.vlgmr.msra.gmra.mxu1 %vm1758_vm4, %v4247_v48  ;;  %7763 = vpow2.f32 %v4190_v25  ;;  %v7641_v6 = vld [vmem:[#allocation2 + $0x2a0] sm:$0xff]  }
 0x62a   : > { %v9370_v8 = vpop.eup %7753  ;;  %7358 = vmatpush3.bf16.msra.mxu1 %v7640_v20  ;;  %7359 = vmatprep.mubr.msk.bf16.mxu1 %vm7999_vm2, %v10257_v10  ;;  %7765 = vpow2.f32 %v4192_v44  ;;  %v7645_v25 = vld [vmem:[#allocation2 + $0x1c0] sm:$0xff]   ;;  %v7644_v20 = vld [vmem:[#allocation2 + $0x2b8] sm:$0xff]  }
 0x62b   : > { %v4188_v62 = vmul.f32 1.442695, %v4161_v5  ;;  %v4248_v45 = vpack.c.bf16 %v9370_v8, %v9365_v15  ;;  %7369 = vmatprep.subr.bf16.mxu1 %v10257_v10  ;;  %7767 = vpow2.f32 %v4186_v53  ;;  %v9380_v39 = vpop.eup %7755  ;;  %v4832_v5 = vsel %vm1311_vm3, %v7645_v25, 0 }
 0x62c   : > { %v685_v4 = vpop.permute.xlu1 %684  ;;  %v4146_v40 = vpop.xlane.xlu0 %4145 }
 0x62d   : > { %7769 = vpow2.f32 %v4188_v62  ;;  %724 = vst.msk [vmem:[#allocation2 + $0xe4] sm:$0xf] %vm519_vm1, %v685_v4  ;;  %v4164_v16 = vsub.f32 %v9269_v17, %v4146_v40  ;;  %7354 = vmatmul.mubr.msk.bf16.vlgmr.msra.gmra.mxu0 %vm1758_vm4, %v4248_v45  ;;  %v7647_v40 = vld [vmem:[#allocation2 + $0x1c8] sm:$0xff]  }
 0x62e   : > { %7364 = vmatpush3.bf16.msra.mxu0 %v7641_v6  ;;  %7365 = vmatprep.mubr.msk.bf16.mxu0 %vm7999_vm2, %v10257_v10  ;;  %v9384_v49 = vpop.eup %7757  ;;  %v7648_v6 = vld [vmem:[#allocation2 + $0x1d0] sm:$0xff]  }
 0x62f   : > { %7375 = vmatprep.subr.bf16.mxu0 %v10257_v10  ;;  %v4194_v28 = vmul.f32 1.442695, %v4164_v16  ;;  %v4249_v58 = vpack.c.bf16 %v9384_v49, %v9380_v39  ;;  %v9389_v2 = vpop.eup %7759 }
 0x630   : > { %v953_v12 = vpop.permute.xlu1 %952  ;;  %v4149_v26 = vpop.xlane.xlu0 %4148 }
 0x631   : > { %988 = vst.msk [vmem:[#allocation2 + $0x1f4] sm:$0xf] %vm519_vm1, %v953_v12  ;;  %v4165_v17 = vsub.f32 %v9274_v31, %v4149_v26  ;;  %7360 = vmatmul.mubr.msk.bf16.vlgmr.msra.gmra.mxu1 %vm1758_vm4, %v4249_v58  ;;  %7771 = vpow2.f32 %v4194_v28  ;;  %v7646_v12 = vld [vmem:[#allocation2 + $0xc0] sm:$0xff]  }
 0x632   : > { %v9393_v56 = vpop.eup %7761  ;;  %7370 = vmatpush3.bf16.msra.mxu1 %v7642_v24  ;;  %7371 = vmatprep.mubr.msk.bf16.mxu1 %vm7999_vm2, %v10257_v10  ;;  %v4946_v24 = vsel %vm1311_vm3, %v7648_v6, 0 }
 0x633   : > { %v4196_v14 = vmul.f32 1.442695, %v4165_v17  ;;  %v4250_v18 = vpack.c.bf16 %v9393_v56, %v9389_v2  ;;  %7381 = vmatprep.subr.bf16.mxu1 %v10257_v10  ;;  %v4889_v17 = vsel %vm1311_vm3, %v7647_v40, 0 }
 0x634   : > { %v689_v23 = vpop.permute.xlu1 %688  ;;  %v947_v9 = vpop.permute.xlu0 %946 }
 0x635   : > { %7773 = vpow2.f32 %v4196_v14  ;;  %726 = vst.msk [vmem:[#allocation2 + $0xec] sm:$0xf] %vm519_vm1, %v689_v23  ;;  %985 = vst.msk [vmem:[#allocation2 + $0x1e8] sm:$0xf] %vm519_vm1, %v947_v9  ;;  %7366 = vmatmul.mubr.msk.bf16.vlgmr.msra.gmra.mxu0 %vm1758_vm4, %v4250_v18  ;;  %v7651_v23 = vld [vmem:[#allocation2 + $0x1d8] sm:$0xff]   ;;  %v7652_v9 = vld [vmem:[#allocation2 + $0x1e0] sm:$0xff]  }
 0x636   : > { %7376 = vmatpush3.bf16.msra.mxu0 %v7643_v47  ;;  %7377 = vmatprep.mubr.msk.bf16.mxu0 %vm7999_vm2, %v10257_v10  ;;  %v9406_v31 = vpop.eup %7763  ;;  %v7649_v47 = vld [vmem:[#allocation2 + $0xc8] sm:$0xff]  }
 0x637   : > { %7387 = vmatprep.subr.bf16.mxu0 %v10257_v10  ;;  %v9409_v30 = vpop.eup %7765 }
 0x638   : > { %v957_v36 = vpop.permute.xlu1 %956  ;;  %v683_v27 = vpop.permute.xlu0 %682  ;;  %v4252_v53 = vpack.c.bf16 %v9409_v30, %v9406_v31 }
 0x639   : > { %v9411_v42 = vpop.eup %7767  ;;  %990 = vst.msk [vmem:[#allocation2 + $0x1fc] sm:$0xf] %vm519_vm1, %v957_v36  ;;  %723 = vst.msk [vmem:[#allocation2 + $0xe0] sm:$0xf] %vm519_vm1, %v683_v27  ;;  %v7650_v36 = vld [vmem:[#allocation2 + $0xd0] sm:$0xff]  }
 0x63a   : > { %v9415_v44 = vpop.eup %7769 }
 0x63b   : > { %v4251_v48 = vpack.c.bf16 %v9415_v44, %v9411_v42 }
 0x63c   : > { %v693_v54 = vpop.permute.xlu1 %692  ;;  %v951_v59 = vpop.permute.xlu0 %950 }
 0x63d   : > { %728 = vst.msk [vmem:[#allocation2 + $0xf4] sm:$0xf] %vm519_vm1, %v693_v54  ;;  %987 = vst.msk [vmem:[#allocation2 + $0x1f0] sm:$0xf] %vm519_vm1, %v951_v59  ;;  %7372 = vmatmul.mubr.msk.bf16.vlgmr.msra.gmra.mxu1 %vm1758_vm4, %v4251_v48  ;;  %7378 = vmatmul.mubr.msk.bf16.vlgmr.msra.gmra.mxu0 %vm1758_vm4, %v4252_v53  ;;  %v5003_v48 = vsel %vm1311_vm3, %v7651_v23, 0  ;;  %v5060_v53 = vsel %vm1311_vm3, %v7652_v9, 0 }
 0x63e   : > { %7382 = vmatpush3.bf16.msra.mxu1 %v7644_v20  ;;  %7388 = vmatpush3.bf16.xpose.msra.mxu0 %v4832_v5  ;;  %v9432_v4 = vpop.eup %7771  ;;  %v7655_v20 = vld [vmem:[#allocation2 + $0x1e8] sm:$0xff]  }
 0x63f   : > { %7389 = vmatprep.mubr.msk.bf16.mxu0 %vm7999_vm2, %v10257_v10  ;;  %7399 = vmatprep.subr.bf16.mxu0 %v10257_v10 }
 0x640   : > { %v697_v62 = vpop.permute.xlu1 %696  ;;  %v687_v45 = vpop.permute.xlu0 %686  ;;  %7383 = vmatprep.mubr.msk.bf16.mxu1 %vm7999_vm2, %v10257_v10  ;;  %7393 = vmatprep.subr.bf16.mxu1 %v10257_v10 }
 0x641   : > { %730 = vst.msk [vmem:[#allocation2 + $0xfc] sm:$0xf] %vm519_vm1, %v697_v62  ;;  %725 = vst.msk [vmem:[#allocation2 + $0xe8] sm:$0xf] %vm519_vm1, %v687_v45  ;;  %v7653_v62 = vld [vmem:[#allocation2 + $0xd8] sm:$0xff]   ;;  %v7654_v45 = vld [vmem:[#allocation2 + $0xe0] sm:$0xff]  }
 0x642   : > { %v9436_v16 = vpop.eup %7773 }
 0x643   : > { %v4253_v28 = vpack.c.bf16 %v9436_v16, %v9432_v4 }
 0x644   : > { %v1187_v26 = vpop.permute.xlu1 %1186  ;;  %v955_v58 = vpop.permute.xlu0 %954  ;;  %v7656_v5 = vld [vmem:[#allocation2 + $0x1f0] sm:$0xff]  }
 0x645   : > { %1235 = vst.msk [vmem:[#allocation2 + $0x2c0] sm:$0xf] %vm519_vm1, %v1187_v26  ;;  %989 = vst.msk [vmem:[#allocation2 + $0x1f8] sm:$0xf] %vm519_vm1, %v955_v58  ;;  %7384 = vmatmul.mubr.msk.bf16.vlgmr.msra.gmra.mxu1 %vm1758_vm4, %v4253_v28  ;;  %7390 = vmatmul.mubr.msk.bf16.vlgmr.msra.gmra.mxu0 %vm1311_vm3, %v7646_v12  ;;  %v5117_v28 = vsel %vm1311_vm3, %v7655_v20, 0  ;;  %v5174_v12 = vsel %vm1311_vm3, %v7656_v5, 0 }
 0x646   : > { %7394 = vmatpush3.bf16.xpose.msra.mxu1 %v4889_v17  ;;  %7400 = vmatpush3.bf16.xpose.msra.mxu0 %v4946_v24 }
 0x647   : > { %7401 = vmatprep.mubr.msk.bf16.mxu0 %vm7999_vm2, %v10257_v10  ;;  %7411 = vmatprep.subr.bf16.mxu0 %v10257_v10 }
 0x648   : > { %v1191_v14 = vpop.permute.xlu1 %1190  ;;  %v691_v18 = vpop.permute.xlu0 %690  ;;  %7395 = vmatprep.mubr.msk.bf16.mxu1 %vm7999_vm2, %v10257_v10  ;;  %7405 = vmatprep.subr.bf16.mxu1 %v10257_v10  ;;  %v7657_v24 = vld [vmem:[#allocation2 + $0xe8] sm:$0xff]  }
 0x649   : > { %1237 = vst.msk [vmem:[#allocation2 + $0x2c8] sm:$0xf] %vm519_vm1, %v1191_v14  ;;  %727 = vst.msk [vmem:[#allocation2 + $0xf0] sm:$0xf] %vm519_vm1, %v691_v18 }
 0x64c   : > { %v1193_v27 = vpop.permute.xlu1 %1192  ;;  %v695_v25 = vpop.permute.xlu0 %694  ;;  %v7659_v17 = vld [vmem:[#allocation2 + $0x1f8] sm:$0xff]  }
 0x64d   : > { %1238 = vst.msk [vmem:[#allocation2 + $0x2cc] sm:$0xf] %vm519_vm1, %v1193_v27  ;;  %729 = vst.msk [vmem:[#allocation2 + $0xf8] sm:$0xf] %vm519_vm1, %v695_v25  ;;  %7396 = vmatmul.mubr.msk.bf16.vlgmr.msra.gmra.mxu1 %vm1311_vm3, %v7649_v47  ;;  %7402 = vmatmul.mubr.msk.bf16.vlgmr.msra.gmra.mxu0 %vm1311_vm3, %v7650_v36  ;;  %v5231_v47 = vsel %vm1311_vm3, %v7659_v17, 0 }
 0x64e   : > { %7406 = vmatpush3.bf16.xpose.msra.mxu1 %v5003_v48  ;;  %7412 = vmatpush3.bf16.xpose.msra.mxu0 %v5060_v53 }
 0x64f   : > { %7413 = vmatprep.mubr.msk.bf16.mxu0 %vm7999_vm2, %v10257_v10  ;;  %7423 = vmatprep.subr.bf16.mxu0 %v10257_v10 }
 0x650   : > { %v1195_v54 = vpop.permute.xlu1 %1194  ;;  %v1189_v59 = vpop.permute.xlu0 %1188  ;;  %7407 = vmatprep.mubr.msk.bf16.mxu1 %vm7999_vm2, %v10257_v10  ;;  %7417 = vmatprep.subr.bf16.mxu1 %v10257_v10  ;;  %v7658_v14 = vld [vmem:[#allocation2 + $0xf0] sm:$0xff]  }
 0x651   : > { %1239 = vst.msk [vmem:[#allocation2 + $0x2d0] sm:$0xf] %vm519_vm1, %v1195_v54  ;;  %1236 = vst.msk [vmem:[#allocation2 + $0x2c4] sm:$0xf] %vm519_vm1, %v1189_v59 }
 0x654   : > { %v1199_v40 = vpop.permute.xlu1 %1198  ;;  %v1197_v6 = vpop.permute.xlu0 %1196  ;;  %v7661_v25 = vld [vmem:[#allocation2 + $0xf8] sm:$0xff]   ;;  %v7662_v53 = vld [vmem:[#allocation2 + $0x2c8] sm:$0xff]  }
 0x655   : > { %1241 = vst.msk [vmem:[#allocation2 + $0x2d8] sm:$0xf] %vm519_vm1, %v1199_v40  ;;  %1240 = vst.msk [vmem:[#allocation2 + $0x2d4] sm:$0xf] %vm519_vm1, %v1197_v6  ;;  %7408 = vmatmul.mubr.msk.bf16.vlgmr.msra.gmra.mxu1 %vm1311_vm3, %v7653_v62  ;;  %7414 = vmatmul.mubr.msk.bf16.vlgmr.msra.gmra.mxu0 %vm1311_vm3, %v7654_v45 }
 0x656   : > { %7418 = vmatpush3.bf16.xpose.msra.mxu1 %v5117_v28  ;;  %7424 = vmatpush3.bf16.xpose.msra.mxu0 %v5174_v12 }
 0x657   : > { %7419 = vmatprep.mubr.msk.bf16.mxu1 %vm7999_vm2, %v10257_v10  ;;  %7425 = vmatprep.mubr.msk.bf16.mxu0 %vm7999_vm2, %v10257_v10 }
 0x658   : > { %v1201_v26 = vpop.permute.xlu1 %1200  ;;  %v1203_v58 = vpop.permute.xlu0 %1202  ;;  %7429 = vmatprep.subr.bf16.mxu1 %v10257_v10  ;;  %7435 = vmatprep.subr.bf16.mxu0 %v10257_v10  ;;  %v7660_v9 = vld [vmem:[#allocation2 + $0x2c0] sm:$0xff]  }
 0x659   : > { %1242 = vst.msk [vmem:[#allocation2 + $0x2dc] sm:$0xf] %vm519_vm1, %v1201_v26  ;;  %1243 = vst.msk [vmem:[#allocation2 + $0x2e0] sm:$0xf] %vm519_vm1, %v1203_v58 }
 0x65c   : > { %v1205_v18 = vpop.permute.xlu1 %1204  ;;  %v1207_v23 = vpop.permute.xlu0 %1206 }
 0x65d   : > { %1244 = vst.msk [vmem:[#allocation2 + $0x2e4] sm:$0xf] %vm519_vm1, %v1205_v18  ;;  %1245 = vst.msk [vmem:[#allocation2 + $0x2e8] sm:$0xf] %vm519_vm1, %v1207_v23  ;;  %7420 = vmatmul.mubr.msk.bf16.vlgmr.msra.gmra.mxu1 %vm1311_vm3, %v7657_v24  ;;  %7426 = vmatmul.mubr.msk.bf16.vlgmr.msra.gmra.mxu0 %vm1311_vm3, %v7658_v14 }
 0x65e   : > { %7430 = vmatpush3.bf16.xpose.msra.mxu1 %v5231_v47  ;;  %7436 = vmatpush3.bf16.msra.mxu0 %v7660_v9 }
 0x65f   : > { %7431 = vmatprep.mubr.msk.bf16.mxu1 %vm7999_vm2, %v10257_v10  ;;  %7441 = vmatprep.subr.bf16.mxu1 %v10257_v10 }
 0x660   : > { %v1209_v36 = vpop.permute.xlu1 %1208  ;;  %v1211_v27 = vpop.permute.xlu0 %1210  ;;  %7437 = vmatprep.mubr.msk.bf16.mxu0 %vm7999_vm2, %v10257_v10  ;;  %7447 = vmatprep.subr.bf16.mxu0 %v10257_v10 }
 0x661   : > { %1246 = vst.msk [vmem:[#allocation2 + $0x2ec] sm:$0xf] %vm519_vm1, %v1209_v36  ;;  %1247 = vst.msk [vmem:[#allocation2 + $0x2f0] sm:$0xf] %vm519_vm1, %v1211_v27 }
 0x664   : > { %v1213_v48 = vpop.permute.xlu1 %1212 }
 0x665   : > { %1248 = vst.msk [vmem:[#allocation2 + $0x2f4] sm:$0xf] %vm519_vm1, %v1213_v48  ;;  %7432 = vmatmul.mubr.msk.bf16.vlgmr.msra.gmra.mxu1 %vm1311_vm3, %v7661_v25 }
 0x666   : > { %7442 = vmatpush3.bf16.msra.mxu1 %v7662_v53  ;;  %7443 = vmatprep.mubr.msk.bf16.mxu1 %vm7999_vm2, %v10257_v10 }
 0x667   : > { %7453 = vmatprep.subr.bf16.mxu1 %v10257_v10 }
 0x6e1   : > { %v9500_v54 = vpop.f32.mrf.mxu0 }
 0x6e2   : > { %10274 = vst [vmem:[#allocation51_spill] sm:$0xff] %v9500_v54 }
 0x6e3   : > { %v7343_v59 = vpop.f32.mrf.mxu0 }
 0x6e5   : > { %v9502_v20 = vpop.f32.mrf.mxu0 }
 0x6e6   : > { %10275 = vst [vmem:[#allocation52_spill] sm:$0xff] %v9502_v20 }
 0x6e7   : > { %v7344_v5 = vpop.f32.mrf.mxu0 }
 0x6e9   : > { %v9504_v62 = vpop.f32.mrf.mxu1 }
 0x6ea   : > { %10276 = vst [vmem:[#allocation53_spill] sm:$0xff] %v9504_v62 }
 0x6eb   : > { %v7349_v45 = vpop.f32.mrf.mxu1 }
 0x6ed   : > { %v9506_v40 = vpop.f32.mrf.mxu1  ;;  %v9508_v6 = vpop.f32.mrf.mxu0 }
 0x6ee   : > { %10277 = vst [vmem:[#allocation54_spill] sm:$0xff] %v9506_v40  ;;  %10278 = vst [vmem:[#allocation55_spill] sm:$0xff] %v9508_v6 }
 0x6ef   : > { %v7350_v28 = vpop.f32.mrf.mxu1  ;;  %v7355_v12 = vpop.f32.mrf.mxu0 }
 0x6f0   : > { %v9531_v12 = vld [vmem:[%s10209_s3 + $0x30] sm:$0xff] }
 0x6f1   : > { %v9510_v26 = vpop.f32.mrf.mxu0  ;;  %v9512_v58 = vpop.f32.mrf.mxu1 }
 0x6f2   : > { %10279 = vst [vmem:[#allocation56_spill] sm:$0xff] %v9510_v26  ;;  %10280 = vst [vmem:[#allocation57_spill] sm:$0xff] %v9512_v58 }
 0x6f3   : > { %v7356_v17 = vpop.f32.mrf.mxu0  ;;  %v7361_v24 = vpop.f32.mrf.mxu1 }
 0x6f5   : > { %v9514_v14 = vpop.f32.mrf.mxu0  ;;  %v9516_v18 = vpop.f32.mrf.mxu1 }
 0x6f6   : > { %10281 = vst [vmem:[#allocation58_spill] sm:$0xff] %v9514_v14  ;;  %10282 = vst [vmem:[#allocation59_spill] sm:$0xff] %v9516_v18 }
 0x6f7   : > { %v7367_v23 = vpop.f32.mrf.mxu0  ;;  %v7362_v9 = vpop.f32.mrf.mxu1 }
 0x6f9   : > { %v9518_v47 = vpop.f32.mrf.mxu0 }
 0x6fa   : > { %10283 = vst [vmem:[#allocation60_spill] sm:$0xff] %v9518_v47 }
 0x6fb   : > { %v7368_v36 = vpop.f32.mrf.mxu0 }
 0x6fd   : > { %v9520_v27 = vpop.f32.mrf.mxu1  ;;  %v9522_v25 = vpop.f32.mrf.mxu0 }
 0x6fe   : > { %10284 = vst [vmem:[#allocation61_spill] sm:$0xff] %v9520_v27  ;;  %10285 = vst [vmem:[#allocation62_spill] sm:$0xff] %v9522_v25 }
 0x6ff   : > { %v7373_v48 = vpop.f32.mrf.mxu1  ;;  %v7379_v53 = vpop.f32.mrf.mxu0 }
 0x700   : > { %v9541_v48 = vld [vmem:[%s10209_s3 + $0x38] sm:$0xff] }
 0x701   : > { %v9524_v59 = vpop.f32.mrf.mxu1  ;;  %v9526_v5 = vpop.f32.mrf.mxu0 }
 0x702   : > { %10286 = vst [vmem:[#allocation63_spill] sm:$0xff] %v9524_v59  ;;  %10287 = vst [vmem:[#allocation64_spill] sm:$0xff] %v9526_v5 }
 0x703   : > { %v7374_v45 = vpop.f32.mrf.mxu1  ;;  %v7380_v28 = vpop.f32.mrf.mxu0 }
 0x705   : > { %v9533_v17 = vpop.f32.mrf.mxu1  ;;  %v4868_v24 = vpop.f32.mrf.mxu0 }
 0x706   : > { %10288 = vst [vmem:[#allocation65_spill] sm:$0xff] %v9533_v17  ;;  %v9536_v23 = vadd.f32 %v9531_v12, %v4868_v24 }
 0x707   : > { %v7385_v9 = vpop.f32.mrf.mxu1  ;;  %v7391_v36 = vpop.f32.mrf.mxu0 }
 0x708   : > { %v5274_v53 = vsel %vm1758_vm4, %v9536_v23, -inf }
 0x709   : > { %v4871_v45 = vpop.f32.mrf.mxu0  ;;  %5275 = vmax.xlane.f32.xlu0 %v5274_v53  ;;  %v9545_v28 = vpop.f32.mrf.mxu1 }
 0x70a   : > { %10289 = vst [vmem:[#allocation66_spill] sm:$0xff] %v9545_v28  ;;  %v9548_v5 = vadd.f32 %v9541_v48, %v4871_v45 }
 0x70b   : > { %v7386_v59 = vpop.f32.mrf.mxu1  ;;  %v7392_v24 = vpop.f32.mrf.mxu0 }
 0x70c   : > { %v5277_v9 = vsel %vm1758_vm4, %v9548_v5, -inf }
 0x70d   : > { %5278 = vmax.xlane.f32.xlu1 %v5277_v9  ;;  %v4925_v36 = vpop.f32.mrf.mxu1  ;;  %v4982_v47 = vpop.f32.mrf.mxu0 }
 0x70e   : > { %v9553_v17 = vadd.f32 %v9531_v12, %v4925_v36  ;;  %v9556_v25 = vadd.f32 %v9531_v12, %v4982_v47 }
 0x70f   : > { %v7397_v53 = vpop.f32.mrf.mxu1  ;;  %v7403_v18 = vpop.f32.mrf.mxu0 }
 0x710   : > { %v5286_v45 = vsel %vm1758_vm4, %v9556_v25, -inf  ;;  %v5280_v59 = vsel %vm1758_vm4, %v9553_v17, -inf }
 0x711   : > { %5287 = vmax.xlane.f32.xlu1 %v5286_v45  ;;  %v4985_v24 = vpop.f32.mrf.mxu0  ;;  %5281 = vmax.xlane.f32.xlu0 %v5280_v59  ;;  %v4928_v9 = vpop.f32.mrf.mxu1 }
 0x712   : > { %v9563_v28 = vadd.f32 %v9541_v48, %v4928_v9  ;;  %v9566_v47 = vadd.f32 %v9541_v48, %v4985_v24 }
 0x713   : > { %v7398_v36 = vpop.f32.mrf.mxu1  ;;  %v7404_v26 = vpop.f32.mrf.mxu0 }
 0x714   : > { %v5283_v18 = vsel %vm1758_vm4, %v9563_v28, -inf  ;;  %v5289_v26 = vsel %vm1758_vm4, %v9566_v47, -inf }
 0x715   : > { %v5096_v53 = vpop.f32.mrf.mxu0  ;;  %5284 = vmax.xlane.f32.xlu0 %v5283_v18  ;;  %v5039_v27 = vpop.f32.mrf.mxu1 }
 0x716   : > { %v9571_v14 = vadd.f32 %v9531_v12, %v5039_v27  ;;  %v9574_v40 = vadd.f32 %v9531_v12, %v5096_v53 }
 0x717   : > { %v7409_v45 = vpop.f32.mrf.mxu1  ;;  %v7415_v59 = vpop.f32.mrf.mxu0 }
 0x718   : > { %v5292_v24 = vsel %vm1758_vm4, %v9571_v14, -inf  ;;  %v5298_v53 = vsel %vm1758_vm4, %v9574_v40, -inf }
 0x719   : > { %v5099_v9 = vpop.f32.mrf.mxu0  ;;  %5290 = vmax.xlane.f32.xlu0 %v5289_v26  ;;  %5293 = vmax.xlane.f32.xlu1 %v5292_v24  ;;  %v5042_v36 = vpop.f32.mrf.mxu1 }
 0x71a   : > { %v9581_v18 = vadd.f32 %v9541_v48, %v5042_v36  ;;  %v9584_v45 = vadd.f32 %v9541_v48, %v5099_v9 }
 0x71b   : > { %v7410_v27 = vpop.f32.mrf.mxu1  ;;  %v7416_v20 = vpop.f32.mrf.mxu0 }
 0x71c   : > { %v5295_v59 = vsel %vm1758_vm4, %v9581_v18, -inf  ;;  %v5301_v9 = vsel %vm1758_vm4, %v9584_v45, -inf }
 0x71d   : > { %v5210_v58 = vpop.f32.mrf.mxu0  ;;  %5299 = vmax.xlane.f32.xlu1 %v5298_v53  ;;  %5296 = vmax.xlane.f32.xlu0 %v5295_v59  ;;  %v5153_v26 = vpop.f32.mrf.mxu1 }
 0x71e   : > { %v9591_v24 = vadd.f32 %v9531_v12, %v5153_v26  ;;  %v9594_v20 = vadd.f32 %v9531_v12, %v5210_v58 }
 0x71f   : > { %v7421_v36 = vpop.f32.mrf.mxu1  ;;  %v7427_v6 = vpop.f32.mrf.mxu0 }
 0x720   : > { %10290 = vst [vmem:[#allocation67_spill] sm:$0xff] %v9591_v24  ;;  %10291 = vst [vmem:[#allocation68_spill] sm:$0xff] %v9594_v20  ;;  %v5304_v27 = vsel %vm1758_vm4, %v9591_v24, -inf  ;;  %v5310_v58 = vsel %vm1758_vm4, %v9594_v20, -inf }
 0x721   : > { %v5213_v62 = vpop.f32.mrf.mxu0  ;;  %5302 = vmax.xlane.f32.xlu0 %v5301_v9  ;;  %5305 = vmax.xlane.f32.xlu1 %v5304_v27  ;;  %v5156_v53 = vpop.f32.mrf.mxu1 }
 0x722   : > { %v9601_v59 = vadd.f32 %v9541_v48, %v5213_v62  ;;  %v9604_v6 = vadd.f32 %v9541_v48, %v5156_v53 }
 0x723   : > { %v7422_v26 = vpop.f32.mrf.mxu1  ;;  %v7428_v54 = vpop.f32.mrf.mxu0 }
 0x724   : > { %v5313_v36 = vsel %vm1758_vm4, %v9601_v59, -inf  ;;  %v5307_v62 = vsel %vm1758_vm4, %v9604_v6, -inf }
 0x725   : > { %5311 = vmax.xlane.f32.xlu0 %v5310_v58  ;;  %5314 = vmax.xlane.f32.xlu1 %v5313_v36  ;;  %v5267_v24 = vpop.f32.mrf.mxu1  ;;  %v1855_v36 = vsel %vm1758_vm4, %v8555_v13, 0.0 }
 0x726   : > { %v9611_v27 = vadd.f32 %v9531_v12, %v5267_v24  ;;  %v3029_v12 = vsel %vm1758_vm4, %v8948_v52, 0.0  ;;  %v4204_v24 = vsel %vm1758_vm4, %v9357_v32, 0.0  ;;  %v3032_v52 = vsel %vm1758_vm4, %v8995_v60, 0.0 }
 0x727   : > { %v7433_v9 = vpop.f32.mrf.mxu1  ;;  %v3035_v32 = vsel %vm1758_vm4, %v8999_v41, 0.0  ;;  %v3050_v60 = vsel %vm1758_vm4, %v9027_v33, 0.0  ;;  %v3056_v41 = vsel %vm1758_vm4, %v9049_v51, 0.0  ;;  %v4228_v33 = vsel %vm1758_vm4, %v9411_v42, 0.0 }
 0x728   : > { %v5316_v20 = vsel %vm1758_vm4, %v9611_v27, -inf  ;;  %v4219_v51 = vsel %vm1758_vm4, %v9384_v49, 0.0  ;;  %v3059_v42 = vsel %vm1758_vm4, %v9053_v43, 0.0  ;;  %v4225_v49 = vsel %vm1758_vm4, %v9393_v56, 0.0 }
 0x729   : > { %5308 = vmax.xlane.f32.xlu0 %v5307_v62  ;;  %v5270_v54 = vpop.f32.mrf.mxu1  ;;  %v1861_v56 = vsel %vm1758_vm4, %v8583_v0, 0.0 }
 0x72a   : > { %v9616_v26 = vadd.f32 %v9541_v48, %v5270_v54  ;;  %v4198_v48 = vsel %vm1758_vm4, %v9343_v63, 0.0  ;;  %v4210_v63 = vsel %vm1758_vm4, %v9365_v15, 0.0  ;;  %v3041_v15 = vsel %vm1758_vm4, %v9008_v35, 0.0 }
 0x72b   : > { %v7434_v53 = vpop.f32.mrf.mxu1  ;;  %v3062_v35 = vsel %vm1758_vm4, %v9044_v34, 0.0  ;;  %v4240_v34 = vsel %vm1758_vm4, %v9432_v4, 0.0  ;;  %v3065_v54 = vsel %vm1758_vm4, %v9047_v55, 0.0 }
 0x72c   : > { %v5319_v58 = vsel %vm1758_vm4, %v9616_v26, -inf  ;;  %v1867_v53 = vsel %vm1758_vm4, %v8593_v3, 0.0 }
 0x72d   : > { %5317 = vmax.xlane.f32.xlu0 %v5316_v20  ;;  %v3038_v20 = vsel %vm1758_vm4, %v9003_v37, 0.0  ;;  %v4201_v37 = vsel %vm1758_vm4, %v9347_v19, 0.0  ;;  %v4222_v19 = vsel %vm1758_vm4, %v9389_v2, 0.0  ;;  %v3053_v2 = vsel %vm1758_vm4, %v9031_v29, 0.0 }
 0x731   : > { %5320 = vmax.xlane.f32.xlu0 %v5319_v58 }
 0x736   : > { %1216 = vrot.lane.b32.xlu1 %v8208_v57, %s8009_s12  ;;  %v3026_v57 = vsel %vm1758_vm4, %v8944_v1, 0.0  ;;  %v4216_v1 = vsel %vm1758_vm4, %v9380_v39, 0.0  ;;  %v3047_v39 = vsel %vm1758_vm4, %v9022_v46, 0.0  ;;  %v3068_v46 = vsel %vm1758_vm4, %v9070_v61, 0.0 }
 0x747   : > { %1214 = vrot.lane.b32.xlu0 %v8184_v50, %s8009_s12  ;;  %v3044_v50 = vsel %vm1758_vm4, %v9018_v21, 0.0  ;;  %v4207_v21 = vsel %vm1758_vm4, %v9361_v38, 0.0  ;;  %v4213_v38 = vsel %vm1758_vm4, %v9370_v8, 0.0  ;;  %v4234_v8 = vsel %vm1758_vm4, %v9406_v31, 0.0 }
 0x748   : > { %v4231_v31 = vsel %vm1758_vm4, %v9415_v44, 0.0 }
 0x75a   : > { %3030 = vadd.xlane.f32.xlu1 %v3029_v12 }
 0x75e   : > { %4199 = vadd.xlane.f32.xlu1 %v4198_v48 }
 0x762   : > { %4205 = vadd.xlane.f32.xlu1 %v4204_v24  ;;  %v1873_v24 = vsel %vm1758_vm4, %v8607_v7, 0.0  ;;  %v4243_v7 = vsel %vm1758_vm4, %v9436_v16, 0.0  ;;  %v10292_v16 = vld [vmem:[#allocation15_spill] sm:$0xff] }
 0x766   : > { %3039 = vadd.xlane.f32.xlu1 %v3038_v20  ;;  %3027 = vadd.xlane.f32.xlu0 %v3026_v57 }
 0x76a   : > { %3045 = vadd.xlane.f32.xlu1 %v3044_v50  ;;  %3033 = vadd.xlane.f32.xlu0 %v3032_v52 }
 0x76e   : > { %4211 = vadd.xlane.f32.xlu1 %v4210_v63  ;;  %3036 = vadd.xlane.f32.xlu0 %v3035_v32 }
 0x772   : > { %4217 = vadd.xlane.f32.xlu1 %v4216_v1  ;;  %4202 = vadd.xlane.f32.xlu0 %v4201_v37 }
 0x776   : > { %3051 = vadd.xlane.f32.xlu1 %v3050_v60  ;;  %4208 = vadd.xlane.f32.xlu0 %v4207_v21  ;;  %v1885_v60 = vsel %vm1758_vm4, %v10292_v16, 0.0  ;;  %v10293_v21 = vld [vmem:[#allocation8_spill] sm:$0xff] }
 0x77a   : > { %3057 = vadd.xlane.f32.xlu1 %v3056_v41  ;;  %3042 = vadd.xlane.f32.xlu0 %v3041_v15  ;;  %v1858_v41 = vsel %vm1758_vm4, %v10293_v21, 0.0 }
 0x77e   : > { %4223 = vadd.xlane.f32.xlu1 %v4222_v19  ;;  %3048 = vadd.xlane.f32.xlu0 %v3047_v39 }
 0x782   : > { %4229 = vadd.xlane.f32.xlu1 %v4228_v33  ;;  %4214 = vadd.xlane.f32.xlu0 %v4213_v38  ;;  %v10294_v38 = vld [vmem:[#allocation14_spill] sm:$0xff] }
 0x786   : > { %3063 = vadd.xlane.f32.xlu1 %v3062_v35  ;;  %4220 = vadd.xlane.f32.xlu0 %v4219_v51  ;;  %v1891_v35 = vsel %vm1758_vm4, %v10294_v38, 0.0  ;;  %v10295_v51 = vld [vmem:[#allocation9_spill] sm:$0xff] }
 0x78a   : > { %3069 = vadd.xlane.f32.xlu1 %v3068_v46  ;;  %3054 = vadd.xlane.f32.xlu0 %v3053_v2  ;;  %v1864_v46 = vsel %vm1758_vm4, %v10295_v51, 0.0  ;;  %v10296_v2 = vld [vmem:[#allocation67_spill] sm:$0xff] }
 0x78e   : > { %4235 = vadd.xlane.f32.xlu1 %v4234_v8  ;;  %3060 = vadd.xlane.f32.xlu0 %v3059_v42 }
 0x792   : > { %v5276_v61 = vpop.xlane.xlu0 %5275  ;;  %4241 = vadd.xlane.f32.xlu1 %v4240_v34  ;;  %4226 = vadd.xlane.f32.xlu0 %v4225_v49  ;;  %v10297_v49 = vld [vmem:[#allocation68_spill] sm:$0xff] }
 0x793   : > { %v5322_v29 = vsub.f32 %v9536_v23, %v5276_v61 }
 0x795   : > { %v5338_v43 = vmul.f32 1.442695, %v5322_v29 }
 0x796   : > { %v5279_v9 = vpop.xlane.xlu1 %5278  ;;  %1856 = vadd.xlane.f32.xlu1 %v1855_v36  ;;  %4232 = vadd.xlane.f32.xlu0 %v4231_v31  ;;  %v10298_v31 = vld [vmem:[#allocation10_spill] sm:$0xff] }
 0x797   : > { %v5323_v4 = vsub.f32 %v9548_v5, %v5279_v9  ;;  %7775 = vpow2.f32 %v5338_v43  ;;  %v3071_v5 = vsel %vm1758_vm4, %v9074_v22, 0.0  ;;  %v1870_v43 = vsel %vm1758_vm4, %v10298_v31, 0.0 }
 0x799   : > { %v5340_v62 = vmul.f32 1.442695, %v5323_v4 }
 0x79a   : > { %v5282_v23 = vpop.xlane.xlu0 %5281  ;;  %1862 = vadd.xlane.f32.xlu1 %v1861_v56  ;;  %3066 = vadd.xlane.f32.xlu0 %v3065_v54  ;;  %v5288_v13 = vpop.xlane.xlu1 %5287  ;;  %v10299_v56 = vld [vmem:[#allocation17_spill] sm:$0xff] }
 0x79b   : > { %7777 = vpow2.f32 %v5340_v62  ;;  %v5324_v44 = vsub.f32 %v9553_v17, %v5282_v23  ;;  %v5326_v58 = vsub.f32 %v9556_v25, %v5288_v13  ;;  %v4237_v17 = vsel %vm1758_vm4, %v9409_v30, 0.0 }
 0x79c   : > { %v1897_v54 = vsel %vm1758_vm4, %v10299_v56, 0.0 }
 0x79d   : > { %v5342_v0 = vmul.f32 1.442695, %v5324_v44  ;;  %v5346_v20 = vmul.f32 1.442695, %v5326_v58 }
 0x79e   : > { %v5285_v12 = vpop.xlane.xlu0 %5284  ;;  %1868 = vadd.xlane.f32.xlu1 %v1867_v53  ;;  %3072 = vadd.xlane.f32.xlu0 %v3071_v5  ;;  %v7664_v53 = vld [vmem:[#allocation2 + $0x2d8] sm:$0xff]  }
 0x79f   : > { %v5325_v55 = vsub.f32 %v9563_v28, %v5285_v12  ;;  %7779 = vpow2.f32 %v5342_v0  ;;  %v1879_v28 = vsel %vm1758_vm4, %v8626_v11, 0.0 }
 0x7a1   : > { %v5344_v48 = vmul.f32 1.442695, %v5325_v55  ;;  %v10300_v55 = vld [vmem:[#allocation11_spill] sm:$0xff] }
 0x7a2   : > { %v5291_v3 = vpop.xlane.xlu0 %5290  ;;  %v5294_v57 = vpop.xlane.xlu1 %5293  ;;  %1874 = vadd.xlane.f32.xlu1 %v1873_v24  ;;  %4238 = vadd.xlane.f32.xlu0 %v4237_v17  ;;  %v7665_v24 = vld [vmem:[#allocation2 + $0x2e0] sm:$0xff]  }
 0x7a3   : > { %7781 = vpow2.f32 %v5344_v48  ;;  %v5327_v22 = vsub.f32 %v9566_v47, %v5291_v3  ;;  %v5328_v25 = vsub.f32 %v9571_v14, %v5294_v57  ;;  %v1876_v48 = vsel %vm1758_vm4, %v10300_v55, 0.0  ;;  %v10301_v57 = vld [vmem:[#allocation12_spill] sm:$0xff] }
 0x7a4   : > { %7783 = vpow2.f32 %v5346_v20  ;;  %v9707_v63 = vpop.eup %7775 }
 0x7a5   : > { %v5348_v50 = vmul.f32 1.442695, %v5327_v22  ;;  %v5350_v32 = vmul.f32 1.442695, %v5328_v25  ;;  %v1882_v22 = vsel %vm1758_vm4, %v10301_v57, 0.0 }
 0x7a6   : > { %v5300_v30 = vpop.xlane.xlu1 %5299  ;;  %v5297_v52 = vpop.xlane.xlu0 %5296  ;;  %1880 = vadd.xlane.f32.xlu1 %v1879_v28  ;;  %4244 = vadd.xlane.f32.xlu0 %v4243_v7 }
 0x7a7   : > { %7785 = vpow2.f32 %v5348_v50  ;;  %v5330_v47 = vsub.f32 %v9574_v40, %v5300_v30  ;;  %v5329_v14 = vsub.f32 %v9581_v18, %v5297_v52  ;;  %v7663_v40 = vld [vmem:[#allocation2 + $0x2d0] sm:$0xff]   ;;  %v7666_v30 = vld [vmem:[#allocation2 + $0x2e8] sm:$0xff]  }
 0x7a8   : > { %v9711_v1 = vpop.eup %7777  ;;  %7787 = vpow2.f32 %v5350_v32 }
 0x7a9   : > { %v5418_v11 = vpack.c.bf16 %v9711_v1, %v9707_v63  ;;  %v5352_v37 = vmul.f32 1.442695, %v5329_v14  ;;  %v5354_v15 = vmul.f32 1.442695, %v5330_v47  ;;  %v10302_v14 = vld [vmem:[#allocation16_spill] sm:$0xff] }
 0x7aa   : > { %v5303_v19 = vpop.xlane.xlu0 %5302  ;;  %1886 = vadd.xlane.f32.xlu1 %v1885_v60  ;;  %v5306_v39 = vpop.xlane.xlu1 %5305  ;;  %1859 = vadd.xlane.f32.xlu0 %v1858_v41  ;;  %v10303_v60 = vld [vmem:[#allocation13_spill] sm:$0xff] }
 0x7ab   : > { %v5331_v18 = vsub.f32 %v9584_v45, %v5303_v19  ;;  %7438 = vmatmul.mubr.msk.bf16.vlgmr.msra.gmra.mxu0 %vm1758_vm4, %v5418_v11  ;;  %7789 = vpow2.f32 %v5352_v37  ;;  %v5332_v8 = vsub.f32 %v10296_v2, %v5306_v39  ;;  %v1888_v11 = vsel %vm1758_vm4, %v10302_v14, 0.0 }
 0x7ac   : > { %7448 = vmatpush3.bf16.msra.mxu0 %v7663_v40  ;;  %7449 = vmatprep.mubr.msk.bf16.mxu0 %vm7999_vm2, %v10257_v10  ;;  %7791 = vpow2.f32 %v5354_v15  ;;  %v9729_v34 = vpop.eup %7779  ;;  %v1894_v21 = vsel %vm1758_vm4, %v10303_v60, 0.0 }
 0x7ad   : > { %v5356_v33 = vmul.f32 1.442695, %v5331_v18  ;;  %7459 = vmatprep.subr.bf16.mxu0 %v10257_v10  ;;  %v5358_v23 = vmul.f32 1.442695, %v5332_v8  ;;  %v10304_v18 = vld [vmem:[#allocation18_spill] sm:$0xff] }
 0x7ae   : > { %v5312_v45 = vpop.xlane.xlu0 %5311  ;;  %1892 = vadd.xlane.f32.xlu1 %v1891_v35  ;;  %v5315_v42 = vpop.xlane.xlu1 %5314  ;;  %1865 = vadd.xlane.f32.xlu0 %v1864_v46 }
 0x7af   : > { %7793 = vpow2.f32 %v5356_v33  ;;  %v5334_v61 = vsub.f32 %v10297_v49, %v5312_v45  ;;  %v5335_v29 = vsub.f32 %v9601_v59, %v5315_v42  ;;  %v1900_v33 = vsel %vm1758_vm4, %v10304_v18, 0.0 }
 0x7b0   : > { %v9733_v36 = vpop.eup %7781 }
 0x7b1   : > { %v5419_v9 = vpack.c.bf16 %v9733_v36, %v9729_v34  ;;  %v5362_v4 = vmul.f32 1.442695, %v5334_v61  ;;  %v5364_v62 = vmul.f32 1.442695, %v5335_v29  ;;  %v9741_v59 = vpop.eup %7783 }
 0x7b2   : > { %1898 = vadd.xlane.f32.xlu1 %v1897_v54  ;;  %v1217_v13 = vpop.permute.xlu1 %1216  ;;  %v5309_v44 = vpop.xlane.xlu0 %5308  ;;  %1871 = vadd.xlane.f32.xlu0 %v1870_v43 }
 0x7b3   : > { %1250 = vst.msk [vmem:[#allocation2 + $0x2fc] sm:$0xf] %vm519_vm1, %v1217_v13  ;;  %v5333_v5 = vsub.f32 %v9604_v6, %v5309_v44  ;;  %7444 = vmatmul.mubr.msk.bf16.vlgmr.msra.gmra.mxu1 %vm1758_vm4, %v5419_v9  ;;  %7795 = vpow2.f32 %v5362_v4 }
 0x7b4   : > { %v9746_v58 = vpop.eup %7785  ;;  %7454 = vmatpush3.bf16.msra.mxu1 %v7664_v53  ;;  %7455 = vmatprep.mubr.msk.bf16.mxu1 %vm7999_vm2, %v10257_v10  ;;  %7797 = vpow2.f32 %v5364_v62  ;;  %v10306_v62 = vld [vmem:[#allocation51_spill] sm:$0xff]  ;;  %v10307_v53 = vld [vmem:[#allocation53_spill] sm:$0xff] }
 0x7b5   : > { %v5420_v0 = vpack.c.bf16 %v9746_v58, %v9741_v59  ;;  %v5360_v12 = vmul.f32 1.442695, %v5333_v5  ;;  %7465 = vmatprep.subr.bf16.mxu1 %v10257_v10  ;;  %7799 = vpow2.f32 %v5358_v23  ;;  %v9757_v20 = vpop.eup %7787 }
 0x7b6   : > { %v5318_v6 = vpop.xlane.xlu0 %5317  ;;  %1877 = vadd.xlane.f32.xlu0 %v1876_v48 }
 0x7b7   : > { %7801 = vpow2.f32 %v5360_v12  ;;  %v5336_v17 = vsub.f32 %v9611_v27, %v5318_v6  ;;  %7450 = vmatmul.mubr.msk.bf16.vlgmr.msra.gmra.mxu0 %vm1758_vm4, %v5420_v0 }
 0x7b8   : > { %7460 = vmatpush3.bf16.msra.mxu0 %v7665_v24  ;;  %7461 = vmatprep.mubr.msk.bf16.mxu0 %vm7999_vm2, %v10257_v10  ;;  %v9761_v3 = vpop.eup %7789 }
 0x7b9   : > { %7471 = vmatprep.subr.bf16.mxu0 %v10257_v10  ;;  %v5421_v25 = vpack.c.bf16 %v9761_v3, %v9757_v20  ;;  %v5366_v50 = vmul.f32 1.442695, %v5336_v17  ;;  %v9768_v28 = vpop.eup %7791  ;;  %v10308_v17 = vld [vmem:[#allocation39_spill] sm:$0xff] }
 0x7ba   : > { %1883 = vadd.xlane.f32.xlu0 %v1882_v22  ;;  %v5321_v27 = vpop.xlane.xlu0 %5320  ;;  %v10309_v22 = vld [vmem:[#allocation35_spill] sm:$0xff] }
 0x7bb   : > { %v5337_v7 = vsub.f32 %v9616_v26, %v5321_v27  ;;  %7456 = vmatmul.mubr.msk.bf16.vlgmr.msra.gmra.mxu1 %vm1758_vm4, %v5421_v25  ;;  %7803 = vpow2.f32 %v5366_v50  ;;  %v7667_v26 = vld [vmem:[#allocation2 + $0x2f0] sm:$0xff]  }
 0x7bc   : > { %v9771_v52 = vpop.eup %7793  ;;  %7466 = vmatpush3.bf16.msra.mxu1 %v7666_v30  ;;  %7467 = vmatprep.mubr.msk.bf16.mxu1 %vm7999_vm2, %v10257_v10 }
 0x7bd   : > { %v5422_v32 = vpack.c.bf16 %v9771_v52, %v9768_v28  ;;  %v5368_v47 = vmul.f32 1.442695, %v5337_v7  ;;  %7477 = vmatprep.subr.bf16.mxu1 %v10257_v10 }
 0x7be   : > { %1889 = vadd.xlane.f32.xlu0 %v1888_v11  ;;  %v1215_v37 = vpop.permute.xlu0 %1214  ;;  %v10310_v11 = vld [vmem:[#allocation41_spill] sm:$0xff] }
 0x7bf   : > { %7805 = vpow2.f32 %v5368_v47  ;;  %1249 = vst.msk [vmem:[#allocation2 + $0x2f8] sm:$0xf] %vm519_vm1, %v1215_v37  ;;  %7462 = vmatmul.mubr.msk.bf16.vlgmr.msra.gmra.mxu0 %vm1758_vm4, %v5422_v32 }
 0x7c0   : > { %7472 = vmatpush3.bf16.msra.mxu0 %v7667_v26  ;;  %7473 = vmatprep.mubr.msk.bf16.mxu0 %vm7999_vm2, %v10257_v10  ;;  %v9785_v16 = vpop.eup %7795  ;;  %v10311_v26 = vld [vmem:[#allocation37_spill] sm:$0xff] }
 0x7c1   : > { %v9789_v41 = vpop.eup %7797 }
 0x7c2   : > { %1895 = vadd.xlane.f32.xlu0 %v1894_v21  ;;  %v9791_v15 = vpop.eup %7799  ;;  %v5424_v39 = vpack.c.bf16 %v9789_v41, %v9785_v16 }
 0x7c4   : > { %v9793_v19 = vpop.eup %7801 }
 0x7c5   : > { %v5423_v40 = vpack.c.bf16 %v9793_v19, %v9791_v15 }
 0x7c6   : > { %1901 = vadd.xlane.f32.xlu0 %v1900_v33  ;;  %v7668_v38 = vld [vmem:[#allocation2 + $0x2f8] sm:$0xff]  }
 0x7c7   : > { %7468 = vmatmul.mubr.msk.bf16.vlgmr.msra.gmra.mxu1 %vm1758_vm4, %v5423_v40  ;;  %7474 = vmatmul.mubr.msk.bf16.vlgmr.msra.gmra.mxu0 %vm1758_vm4, %v5424_v39 }
 0x7c8   : > { %7478 = vmatpush3.bf16.msra.mxu1 %v7668_v38  ;;  %7479 = vmatprep.mubr.msk.bf16.mxu1 %vm7999_vm2, %v10257_v10  ;;  %v9805_v35 = vpop.eup %7803  ;;  %v10305_v10 = vld [vmem:[#allocation36_spill] sm:$0xff] }
 0x7cc   : > { %v9807_v51 = vpop.eup %7805 }
 0x7cd   : > { %v5425_v46 = vpack.c.bf16 %v9807_v51, %v9805_v35 }
 0x7cf   : > { %7480 = vmatmul.mubr.msk.bf16.vlgmr.msra.gmra.mxu1 %vm1758_vm4, %v5425_v46 }
 0x7e3   : > { %v3031_v2 = vpop.xlane.xlu1 %3030 }
 0x7e4   : > { %7807 = vrcp.f32 %v3031_v2  ;;  %v10312_v2 = vld [vmem:[#allocation55_spill] sm:$0xff] }
 0x7e7   : > { %v4200_v8 = vpop.xlane.xlu1 %4199 }
 0x7e8   : > { %7809 = vrcp.f32 %v4200_v8 }
 0x7eb   : > { %v4206_v45 = vpop.xlane.xlu1 %4205 }
 0x7ec   : > { %7811 = vrcp.f32 %v4206_v45  ;;  %v10313_v45 = vld [vmem:[#allocation38_spill] sm:$0xff] }
 0x7ef   : > { %v3040_v42 = vpop.xlane.xlu1 %3039  ;;  %v3028_v49 = vpop.xlane.xlu0 %3027 }
 0x7f0   : > { %7813 = vrcp.f32 %v3040_v42 }
 0x7f1   : > { %v7808_v61 = vpop.eup %7807  ;;  %7815 = vrcp.f32 %v3028_v49 }
 0x7f2   : > { %v3499_v29 = vmul.f32 %v7808_v61, %v10305_v10 }
 0x7f3   : > { %v3046_v31 = vpop.xlane.xlu1 %3045  ;;  %v3034_v43 = vpop.xlane.xlu0 %3033 }
 0x7f4   : > { %v6883_v9 = vpack.c.bf16 %v3499_v29, %v3499_v29  ;;  %7817 = vrcp.f32 %v3046_v31 }
 0x7f5   : > { %v7810_v4 = vpop.eup %7809  ;;  %7819 = vrcp.f32 %v3034_v43 }
 0x7f6   : > { %3580 = vst.msk [vmem:[#allocation3 + $0x44] sm:$0xf] %vm519_vm1, %v6883_v9  ;;  %v4670_v56 = vmul.f32 %v7810_v4, %v10306_v62  ;;  %v10314_v4 = vld [vmem:[#allocation57_spill] sm:$0xff] }
 0x7f7   : > { %v4212_v54 = vpop.xlane.xlu1 %4211  ;;  %v3037_v23 = vpop.xlane.xlu0 %3036 }
 0x7f8   : > { %v6898_v13 = vpack.c.bf16 %v4670_v56, %v4670_v56  ;;  %7821 = vrcp.f32 %v4212_v54  ;;  %v10315_v54 = vld [vmem:[#allocation52_spill] sm:$0xff] }
 0x7f9   : > { %v7812_v44 = vpop.eup %7811  ;;  %7823 = vrcp.f32 %v3037_v23 }
 0x7fa   : > { %4751 = vst.msk [vmem:[#allocation3 + $0x80] sm:$0xf] %vm519_vm1, %v6898_v13  ;;  %v4672_v5 = vmul.f32 %v7812_v44, %v10307_v53 }
 0x7fb   : > { %v4218_v0 = vpop.xlane.xlu1 %4217  ;;  %v4203_v12 = vpop.xlane.xlu0 %4202 }
 0x7fc   : > { %v6900_v55 = vpack.c.bf16 %v4672_v5, %v4672_v5  ;;  %7825 = vrcp.f32 %v4218_v0 }
 0x7fd   : > { %v7814_v48 = vpop.eup %7813  ;;  %7827 = vrcp.f32 %v4203_v12  ;;  %v5972_v6 = vld [vmem:[#allocation3 + $0x44] sm:$0xf] }
 0x7fe   : > { %v7816_v24 = vpop.eup %7815  ;;  %4753 = vst.msk [vmem:[#allocation3 + $0x88] sm:$0xf] %vm519_vm1, %v6900_v55  ;;  %v3502_v57 = vmul.f32 %v7814_v48, %v10308_v17  ;;  %6005 = vrot.lane.b32.xlu0 %v5972_v6, %s8010_s17  ;;  %v10316_v48 = vld [vmem:[#allocation42_spill] sm:$0xff] }
 0x7ff   : > { %v3498_v25 = vmul.f32 %v7816_v24, %v10309_v22  ;;  %v3052_v50 = vpop.xlane.xlu1 %3051  ;;  %v4209_v27 = vpop.xlane.xlu0 %4208  ;;  %v10317_v17 = vld [vmem:[#allocation54_spill] sm:$0xff] }
 0x800   : > { %v6886_v7 = vpack.c.bf16 %v3502_v57, %v3502_v57  ;;  %7829 = vrcp.f32 %v3052_v50 }
 0x801   : > { %v7818_v30 = vpop.eup %7817  ;;  %v6882_v32 = vpack.c.bf16 %v3498_v25, %v3498_v25  ;;  %7831 = vrcp.f32 %v4209_v27  ;;  %v6068_v47 = vld [vmem:[#allocation3 + $0x80] sm:$0xf] }
 0x802   : > { %v7820_v14 = vpop.eup %7819  ;;  %3583 = vst.msk [vmem:[#allocation3 + $0x50] sm:$0xf] %vm519_vm1, %v6886_v7  ;;  %v3504_v37 = vmul.f32 %v7818_v30, %v10310_v11  ;;  %6100 = vrot.lane.b32.xlu0 %v6068_v47, %s8011_s18  ;;  %v10319_v11 = vld [vmem:[#allocation40_spill] sm:$0xff] }
 0x803   : > { %3579 = vst.msk [vmem:[#allocation3 + $0x40] sm:$0xf] %vm519_vm1, %v6882_v32  ;;  %v3500_v60 = vmul.f32 %v7820_v14, %v10311_v26  ;;  %v3058_v21 = vpop.xlane.xlu1 %3057  ;;  %v3043_v39 = vpop.xlane.xlu0 %3042  ;;  %v10318_v32 = vld [vmem:[#allocation45_spill] sm:$0xff] }
 0x804   : > { %v6888_v40 = vpack.c.bf16 %v3504_v37, %v3504_v37  ;;  %7833 = vrcp.f32 %v3058_v21 }
 0x805   : > { %v7822_v18 = vpop.eup %7821  ;;  %v6884_v33 = vpack.c.bf16 %v3500_v60, %v3500_v60  ;;  %7835 = vrcp.f32 %v3043_v39  ;;  %v6070_v38 = vld [vmem:[#allocation3 + $0x88] sm:$0xf] }
 0x806   : > { %v7824_v46 = vpop.eup %7823  ;;  %3585 = vst.msk [vmem:[#allocation3 + $0x58] sm:$0xf] %vm519_vm1, %v6888_v40  ;;  %v4674_v8 = vmul.f32 %v7822_v18, %v10312_v2  ;;  %6104 = vrot.lane.b32.xlu0 %v6070_v38, %s8011_s18  ;;  %v10321_v2 = vld [vmem:[#allocation43_spill] sm:$0xff] }
 0x807   : > { %3581 = vst.msk [vmem:[#allocation3 + $0x48] sm:$0xf] %vm519_vm1, %v6884_v33  ;;  %v3501_v42 = vmul.f32 %v7824_v46, %v10313_v45  ;;  %v4224_v49 = vpop.xlane.xlu1 %4223  ;;  %v3049_v61 = vpop.xlane.xlu0 %3048  ;;  %v10320_v33 = vld [vmem:[#allocation58_spill] sm:$0xff] }
 0x808   : > { %v6902_v10 = vpack.c.bf16 %v4674_v8, %v4674_v8  ;;  %7837 = vrcp.f32 %v4224_v49 }
 0x809   : > { %v7826_v29 = vpop.eup %7825  ;;  %v6885_v31 = vpack.c.bf16 %v3501_v42, %v3501_v42  ;;  %7839 = vrcp.f32 %v3049_v61  ;;  %v5975_v43 = vld [vmem:[#allocation3 + $0x50] sm:$0xf] }
 0x80a   : > { %v7828_v9 = vpop.eup %7827  ;;  %4755 = vst.msk [vmem:[#allocation3 + $0x90] sm:$0xf] %vm519_vm1, %v6902_v10  ;;  %v4676_v62 = vmul.f32 %v7826_v29, %v10314_v4  ;;  %6011 = vrot.lane.b32.xlu0 %v5975_v43, %s8010_s17  ;;  %v5971_v56 = vld [vmem:[#allocation3 + $0x40] sm:$0xf] }
 0x80b   : > { %3582 = vst.msk [vmem:[#allocation3 + $0x4c] sm:$0xf] %vm519_vm1, %v6885_v31  ;;  %v4671_v23 = vmul.f32 %v7828_v9, %v10315_v54  ;;  %6003 = vrot.lane.b32.xlu1 %v5971_v56, %s8010_s17  ;;  %v4230_v13 = vpop.xlane.xlu1 %4229  ;;  %v4215_v44 = vpop.xlane.xlu0 %4214  ;;  %v10322_v31 = vld [vmem:[#allocation61_spill] sm:$0xff]  ;;  %v10323_v4 = vld [vmem:[#allocation56_spill] sm:$0xff] }
 0x80c   : > { %v6904_v53 = vpack.c.bf16 %v4676_v62, %v4676_v62  ;;  %7841 = vrcp.f32 %v4230_v13 }
 0x80d   : > { %v7830_v5 = vpop.eup %7829  ;;  %v6899_v0 = vpack.c.bf16 %v4671_v23, %v4671_v23  ;;  %7843 = vrcp.f32 %v4215_v44  ;;  %v5977_v12 = vld [vmem:[#allocation3 + $0x58] sm:$0xf] }
 0x80e   : > { %v7832_v55 = vpop.eup %7831  ;;  %4757 = vst.msk [vmem:[#allocation3 + $0x98] sm:$0xf] %vm519_vm1, %v6904_v53  ;;  %v3506_v6 = vmul.f32 %v7830_v5, %v10316_v48  ;;  %6015 = vrot.lane.b32.xlu0 %v5977_v12, %s8010_s17  ;;  %v5973_v24 = vld [vmem:[#allocation3 + $0x48] sm:$0xf]  ;;  %v10324_v5 = vld [vmem:[#allocation46_spill] sm:$0xff] }
 0x80f   : > { %4752 = vst.msk [vmem:[#allocation3 + $0x84] sm:$0xf] %vm519_vm1, %v6899_v0  ;;  %v4673_v57 = vmul.f32 %v7832_v55, %v10317_v17  ;;  %6007 = vrot.lane.b32.xlu1 %v5973_v24, %s8010_s17  ;;  %v3064_v22 = vpop.xlane.xlu1 %3063  ;;  %v4221_v25 = vpop.xlane.xlu0 %4220  ;;  %v10325_v55 = vld [vmem:[#allocation59_spill] sm:$0xff] }
 0x810   : > { %v6890_v50 = vpack.c.bf16 %v3506_v6, %v3506_v6  ;;  %7845 = vrcp.f32 %v3064_v22 }
 0x811   : > { %v7834_v27 = vpop.eup %7833  ;;  %v6901_v7 = vpack.c.bf16 %v4673_v57, %v4673_v57  ;;  %7847 = vrcp.f32 %v4221_v25 }
 0x812   : > { %v7836_v30 = vpop.eup %7835  ;;  %3587 = vst.msk [vmem:[#allocation3 + $0x60] sm:$0xf] %vm519_vm1, %v6890_v50  ;;  %v3508_v47 = vmul.f32 %v7834_v27, %v10318_v32  ;;  %v5974_v14 = vld [vmem:[#allocation3 + $0x4c] sm:$0xf] }
 0x813   : > { %4754 = vst.msk [vmem:[#allocation3 + $0x8c] sm:$0xf] %vm519_vm1, %v6901_v7  ;;  %v3503_v37 = vmul.f32 %v7836_v30, %v10319_v11  ;;  %6009 = vrot.lane.b32.xlu1 %v5974_v14, %s8010_s17  ;;  %v3070_v26 = vpop.xlane.xlu1 %3069  ;;  %v3055_v60 = vpop.xlane.xlu0 %3054  ;;  %v10326_v50 = vld [vmem:[#allocation49_spill] sm:$0xff]  ;;  %v10327_v30 = vld [vmem:[#allocation44_spill] sm:$0xff] }
 0x814   : > { %v6892_v21 = vpack.c.bf16 %v3508_v47, %v3508_v47  ;;  %7849 = vrcp.f32 %v3070_v26 }
 0x815   : > { %v7838_v39 = vpop.eup %7837  ;;  %v6887_v40 = vpack.c.bf16 %v3503_v37, %v3503_v37  ;;  %7851 = vrcp.f32 %v3055_v60 }
 0x816   : > { %v7840_v18 = vpop.eup %7839  ;;  %3589 = vst.msk [vmem:[#allocation3 + $0x68] sm:$0xf] %vm519_vm1, %v6892_v21  ;;  %v4678_v38 = vmul.f32 %v7838_v39, %v10320_v33  ;;  %v6069_v46 = vld [vmem:[#allocation3 + $0x84] sm:$0xf]  ;;  %v10328_v21 = vld [vmem:[#allocation62_spill] sm:$0xff] }
 0x817   : > { %3584 = vst.msk [vmem:[#allocation3 + $0x54] sm:$0xf] %vm519_vm1, %v6887_v40  ;;  %v3505_v8 = vmul.f32 %v7840_v18, %v10321_v2  ;;  %6102 = vrot.lane.b32.xlu1 %v6069_v46, %s8011_s18  ;;  %v4236_v45 = vpop.xlane.xlu1 %4235  ;;  %v3061_v42 = vpop.xlane.xlu0 %3060  ;;  %v10329_v40 = vld [vmem:[#allocation47_spill] sm:$0xff] }
 0x818   : > { %v6906_v49 = vpack.c.bf16 %v4678_v38, %v4678_v38  ;;  %7853 = vrcp.f32 %v4236_v45 }
 0x819   : > { %v7842_v61 = vpop.eup %7841  ;;  %v6889_v10 = vpack.c.bf16 %v3505_v8, %v3505_v8  ;;  %7855 = vrcp.f32 %v3061_v42  ;;  %v10330_v42 = vld [vmem:[#allocation65_spill] sm:$0xff] }
 0x81a   : > { %v7844_v29 = vpop.eup %7843  ;;  %4759 = vst.msk [vmem:[#allocation3 + $0xa0] sm:$0xf] %vm519_vm1, %v6906_v49  ;;  %v4680_v43 = vmul.f32 %v7842_v61, %v10322_v31  ;;  %v6071_v9 = vld [vmem:[#allocation3 + $0x8c] sm:$0xf]  ;;  %v10331_v61 = vld [vmem:[#allocation60_spill] sm:$0xff] }
 0x81b   : > { %3586 = vst.msk [vmem:[#allocation3 + $0x5c] sm:$0xf] %vm519_vm1, %v6889_v10  ;;  %v4675_v62 = vmul.f32 %v7844_v29, %v10323_v4  ;;  %6106 = vrot.lane.b32.xlu1 %v6071_v9, %s8011_s18  ;;  %v4242_v56 = vpop.xlane.xlu1 %4241  ;;  %v4227_v54 = vpop.xlane.xlu0 %4226  ;;  %v5373_v9 = vsel %vm1758_vm4, %v9711_v1, 0.0  ;;  %v5379_v1 = vsel %vm1758_vm4, %v9733_v36, 0.0  ;;  %v5385_v36 = vsel %vm1758_vm4, %v9746_v58, 0.0 }
 0x81c   : > { %v6908_v23 = vpack.c.bf16 %v4680_v43, %v4680_v43  ;;  %7857 = vrcp.f32 %v4242_v56  ;;  %v5391_v58 = vsel %vm1758_vm4, %v9761_v3, 0.0  ;;  %v5397_v3 = vsel %vm1758_vm4, %v9771_v52, 0.0 }
 0x81d   : > { %v7846_v13 = vpop.eup %7845  ;;  %v6903_v44 = vpack.c.bf16 %v4675_v62, %v4675_v62  ;;  %7859 = vrcp.f32 %v4227_v54  ;;  %v10332_v54 = vld [vmem:[#allocation19_spill] sm:$0xff]  ;;  %v5403_v52 = vsel %vm1758_vm4, %v9793_v19, 0.0  ;;  %v5409_v19 = vsel %vm1758_vm4, %v9789_v41, 0.0 }
 0x81e   : > { %v7848_v53 = vpop.eup %7847  ;;  %4761 = vst.msk [vmem:[#allocation3 + $0xa8] sm:$0xf] %vm519_vm1, %v6908_v23  ;;  %v3510_v0 = vmul.f32 %v7846_v13, %v10324_v5  ;;  %v5976_v12 = vld [vmem:[#allocation3 + $0x54] sm:$0xf]  ;;  %v10333_v13 = vld [vmem:[#allocation63_spill] sm:$0xff] }
 0x81f   : > { %4756 = vst.msk [vmem:[#allocation3 + $0x94] sm:$0xf] %vm519_vm1, %v6903_v44  ;;  %v4677_v48 = vmul.f32 %v7848_v53, %v10325_v55  ;;  %6013 = vrot.lane.b32.xlu1 %v5976_v12, %s8010_s17  ;;  %v1857_v6 = vpop.xlane.xlu1 %1856  ;;  %v4233_v24 = vpop.xlane.xlu0 %4232 }
 0x820   : > { %v6894_v17 = vpack.c.bf16 %v3510_v0, %v3510_v0  ;;  %7861 = vrcp.f32 %v1857_v6  ;;  %v10334_v6 = vld [vmem:[#allocation21_spill] sm:$0xff] }
 0x821   : > { %v7850_v57 = vpop.eup %7849  ;;  %v6905_v22 = vpack.c.bf16 %v4677_v48, %v4677_v48  ;;  %7863 = vrcp.f32 %v4233_v24 }
 0x822   : > { %v7852_v25 = vpop.eup %7851  ;;  %3591 = vst.msk [vmem:[#allocation3 + $0x70] sm:$0xf] %vm519_vm1, %v6894_v17  ;;  %v3512_v27 = vmul.f32 %v7850_v57, %v10326_v50  ;;  %v5978_v7 = vld [vmem:[#allocation3 + $0x5c] sm:$0xf]  ;;  %v10335_v17 = vld [vmem:[#allocation48_spill] sm:$0xff] }
 0x823   : > { %4758 = vst.msk [vmem:[#allocation3 + $0x9c] sm:$0xf] %vm519_vm1, %v6905_v22  ;;  %v3507_v32 = vmul.f32 %v7852_v25, %v10327_v30  ;;  %6017 = vrot.lane.b32.xlu1 %v5978_v7, %s8010_s17  ;;  %v1863_v47 = vpop.xlane.xlu1 %1862  ;;  %v3067_v14 = vpop.xlane.xlu0 %3066 }
 0x824   : > { %v6896_v11 = vpack.c.bf16 %v3512_v27, %v3512_v27  ;;  %7865 = vrcp.f32 %v1863_v47 }
 0x825   : > { %v7854_v37 = vpop.eup %7853  ;;  %v6891_v26 = vpack.c.bf16 %v3507_v32, %v3507_v32  ;;  %7867 = vrcp.f32 %v3067_v14  ;;  %v10336_v32 = vld [vmem:[#allocation23_spill] sm:$0xff]  ;;  %v10337_v14 = vld [vmem:[#allocation50_spill] sm:$0xff] }
 0x826   : > { %v7856_v60 = vpop.eup %7855  ;;  %3593 = vst.msk [vmem:[#allocation3 + $0x78] sm:$0xf] %vm519_vm1, %v6896_v11  ;;  %v4682_v39 = vmul.f32 %v7854_v37, %v10328_v21 }
 0x827   : > { %3588 = vst.msk [vmem:[#allocation3 + $0x64] sm:$0xf] %vm519_vm1, %v6891_v26  ;;  %v3509_v18 = vmul.f32 %v7856_v60, %v10329_v40  ;;  %v1869_v33 = vpop.xlane.xlu1 %1868  ;;  %v3073_v38 = vpop.xlane.xlu0 %3072 }
 0x828   : > { %v6910_v46 = vpack.c.bf16 %v4682_v39, %v4682_v39  ;;  %7869 = vrcp.f32 %v1869_v33  ;;  %v10338_v33 = vld [vmem:[#allocation25_spill] sm:$0xff] }
 0x829   : > { %v7858_v2 = vpop.eup %7857  ;;  %v6893_v8 = vpack.c.bf16 %v3509_v18, %v3509_v18  ;;  %7871 = vrcp.f32 %v3073_v38 }
 0x82a   : > { %v7860_v45 = vpop.eup %7859  ;;  %4763 = vst.msk [vmem:[#allocation3 + $0xb0] sm:$0xf] %vm519_vm1, %v6910_v46  ;;  %v4684_v49 = vmul.f32 %v7858_v2, %v10330_v42  ;;  %v10339_v46 = vld [vmem:[#allocation64_spill] sm:$0xff] }
 0x82b   : > { %3590 = vst.msk [vmem:[#allocation3 + $0x6c] sm:$0xf] %vm519_vm1, %v6893_v8  ;;  %v4679_v10 = vmul.f32 %v7860_v45, %v10331_v61  ;;  %v1875_v29 = vpop.xlane.xlu1 %1874  ;;  %v4239_v31 = vpop.xlane.xlu0 %4238 }
 0x82c   : > { %v6912_v43 = vpack.c.bf16 %v4684_v49, %v4684_v49  ;;  %7873 = vrcp.f32 %v1875_v29 }
 0x82d   : > { %v7862_v4 = vpop.eup %7861  ;;  %v6907_v62 = vpack.c.bf16 %v4679_v10, %v4679_v10  ;;  %7875 = vrcp.f32 %v4239_v31  ;;  %5374 = vadd.xlane.f32.xlu0 %v5373_v9  ;;  %v10340_v31 = vld [vmem:[#allocation27_spill] sm:$0xff]  ;;  %v10341_v9 = vld [vmem:[#allocation66_spill] sm:$0xff] }
 0x82e   : > { %v7864_v56 = vpop.eup %7863  ;;  %4765 = vst.msk [vmem:[#allocation3 + $0xb8] sm:$0xf] %vm519_vm1, %v6912_v43  ;;  %v2327_v23 = vmul.f32 %v7862_v4, %v10332_v54 }
 0x82f   : > { %4760 = vst.msk [vmem:[#allocation3 + $0xa4] sm:$0xf] %vm519_vm1, %v6907_v62  ;;  %v4681_v44 = vmul.f32 %v7864_v56, %v10333_v13  ;;  %v1881_v53 = vpop.xlane.xlu1 %1880  ;;  %v4245_v5 = vpop.xlane.xlu0 %4244 }
 0x830   : > { %v6866_v0 = vpack.c.bf16 %v2327_v23, %v2327_v23  ;;  %7877 = vrcp.f32 %v1881_v53  ;;  %v10342_v53 = vld [vmem:[#allocation31_spill] sm:$0xff] }
 0x831   : > { %v7866_v12 = vpop.eup %7865  ;;  %v6909_v55 = vpack.c.bf16 %v4681_v44, %v4681_v44  ;;  %7879 = vrcp.f32 %v4245_v5  ;;  %5380 = vadd.xlane.f32.xlu0 %v5379_v1 }
 0x832   : > { %v7868_v48 = vpop.eup %7867  ;;  %2407 = vst.msk [vmem:[#allocation3] sm:$0xf] %vm519_vm1, %v6866_v0  ;;  %v2329_v24 = vmul.f32 %v7866_v12, %v10334_v6  ;;  %v10343_v0 = vld [vmem:[#allocation20_spill] sm:$0xff] }
 0x833   : > { %4762 = vst.msk [vmem:[#allocation3 + $0xac] sm:$0xf] %vm519_vm1, %v6909_v55  ;;  %v3511_v57 = vmul.f32 %v7868_v48, %v10335_v17  ;;  %v1887_v22 = vpop.xlane.xlu1 %1886  ;;  %v1860_v25 = vpop.xlane.xlu0 %1859 }
 0x834   : > { %v6868_v50 = vpack.c.bf16 %v2329_v24, %v2329_v24  ;;  %7881 = vrcp.f32 %v1887_v22 }
 0x835   : > { %v7870_v27 = vpop.eup %7869  ;;  %v6895_v7 = vpack.c.bf16 %v3511_v57, %v3511_v57  ;;  %7883 = vrcp.f32 %v1860_v25  ;;  %5386 = vadd.xlane.f32.xlu0 %v5385_v36  ;;  %v10344_v57 = vld [vmem:[#allocation29_spill] sm:$0xff]  ;;  %v5370_v25 = vsel %vm1758_vm4, %v9707_v63, 0.0 }
 0x836   : > { %v7872_v30 = vpop.eup %7871  ;;  %2409 = vst.msk [vmem:[#allocation3 + $0x8] sm:$0xf] %vm519_vm1, %v6868_v50  ;;  %v2331_v47 = vmul.f32 %v7870_v27, %v10336_v32  ;;  %v10345_v50 = vld [vmem:[#allocation22_spill] sm:$0xff]  ;;  %v10346_v63 = vld [vmem:[#allocation33_spill] sm:$0xff] }
 0x837   : > { %3592 = vst.msk [vmem:[#allocation3 + $0x74] sm:$0xf] %vm519_vm1, %v6895_v7  ;;  %v3513_v11 = vmul.f32 %v7872_v30, %v10337_v14  ;;  %v1893_v37 = vpop.xlane.xlu1 %1892  ;;  %v1866_v26 = vpop.xlane.xlu0 %1865  ;;  %v5415_v7 = vsel %vm1758_vm4, %v9807_v51, 0.0 }
 0x838   : > { %v6870_v60 = vpack.c.bf16 %v2331_v47, %v2331_v47  ;;  %7885 = vrcp.f32 %v1893_v37  ;;  %v5376_v37 = vsel %vm1758_vm4, %v9729_v34, 0.0  ;;  %v5382_v34 = vsel %vm1758_vm4, %v9741_v59, 0.0 }
 0x839   : > { %v7874_v21 = vpop.eup %7873  ;;  %v6897_v39 = vpack.c.bf16 %v3513_v11, %v3513_v11  ;;  %7887 = vrcp.f32 %v1866_v26  ;;  %5392 = vadd.xlane.f32.xlu0 %v5391_v58  ;;  %v5939_v40 = vld [vmem:[#allocation3] sm:$0xf]  ;;  %v5388_v59 = vsel %vm1758_vm4, %v9757_v20, 0.0 }
 0x83a   : > { %v7876_v18 = vpop.eup %7875  ;;  %2411 = vst.msk [vmem:[#allocation3 + $0x10] sm:$0xf] %vm519_vm1, %v6870_v60  ;;  %v2333_v38 = vmul.f32 %v7874_v21, %v10338_v33  ;;  %5955 = vst.msk [vmem:[#allocation4] sm:$0xf] %vm519_vm1, %v5939_v40  ;;  %v10347_v26 = vld [vmem:[#allocation24_spill] sm:$0xff] }
 0x83b   : > { %3594 = vst.msk [vmem:[#allocation3 + $0x7c] sm:$0xf] %vm519_vm1, %v6897_v39  ;;  %v4683_v2 = vmul.f32 %v7876_v18, %v10339_v46  ;;  %v1899_v8 = vpop.xlane.xlu1 %1898  ;;  %v1872_v45 = vpop.xlane.xlu0 %1871  ;;  %v10348_v18 = vld [vmem:[#allocation26_spill] sm:$0xff] }
 0x83c   : > { %v6872_v42 = vpack.c.bf16 %v2333_v38, %v2333_v38  ;;  %7889 = vrcp.f32 %v1899_v8 }
 0x83d   : > { %v7878_v49 = vpop.eup %7877  ;;  %v6911_v61 = vpack.c.bf16 %v4683_v2, %v4683_v2  ;;  %7891 = vrcp.f32 %v1872_v45  ;;  %5398 = vadd.xlane.f32.xlu0 %v5397_v3  ;;  %v5941_v10 = vld [vmem:[#allocation3 + $0x8] sm:$0xf] }
 0x83e   : > { %v7880_v29 = vpop.eup %7879  ;;  %2413 = vst.msk [vmem:[#allocation3 + $0x18] sm:$0xf] %vm519_vm1, %v6872_v42  ;;  %v2335_v43 = vmul.f32 %v7878_v49, %v10340_v31  ;;  %5957 = vst.msk [vmem:[#allocation4 + $0x8] sm:$0xf] %vm519_vm1, %v5941_v10  ;;  %v10349_v42 = vld [vmem:[#allocation28_spill] sm:$0xff] }
 0x83f   : > { %4764 = vst.msk [vmem:[#allocation3 + $0xb4] sm:$0xf] %vm519_vm1, %v6911_v61  ;;  %v4685_v4 = vmul.f32 %v7880_v29, %v10341_v9  ;;  %v1878_v62 = vpop.xlane.xlu0 %1877  ;;  %v10350_v31 = vld [vmem:[#allocation32_spill] sm:$0xff]  ;;  %v5394_v9 = vsel %vm1758_vm4, %v9768_v28, 0.0 }
 0x840   : > { %v6874_v56 = vpack.c.bf16 %v2335_v43, %v2335_v43  ;;  %7893 = vrcp.f32 %v1878_v62 }
 0x841   : > { %v7882_v54 = vpop.eup %7881  ;;  %v6913_v23 = vpack.c.bf16 %v4685_v4, %v4685_v4  ;;  %5404 = vadd.xlane.f32.xlu0 %v5403_v52  ;;  %v5943_v13 = vld [vmem:[#allocation3 + $0x10] sm:$0xf] }
 0x842   : > { %v7884_v44 = vpop.eup %7883  ;;  %2415 = vst.msk [vmem:[#allocation3 + $0x20] sm:$0xf] %vm519_vm1, %v6874_v56  ;;  %v2337_v5 = vmul.f32 %v7882_v54, %v10342_v53  ;;  %5959 = vst.msk [vmem:[#allocation4 + $0x10] sm:$0xf] %vm519_vm1, %v5943_v13  ;;  %v10351_v52 = vld [vmem:[#allocation30_spill] sm:$0xff] }
 0x843   : > { %4766 = vst.msk [vmem:[#allocation3 + $0xbc] sm:$0xf] %vm519_vm1, %v6913_v23  ;;  %v2328_v1 = vmul.f32 %v7884_v44, %v10343_v0  ;;  %v1884_v12 = vpop.xlane.xlu0 %1883  ;;  %v5400_v23 = vsel %vm1758_vm4, %v9791_v15, 0.0  ;;  %v10352_v53 = vld [vmem:[#allocation34_spill] sm:$0xff]  ;;  %v5406_v0 = vsel %vm1758_vm4, %v9785_v16, 0.0 }
 0x844   : > { %v6876_v55 = vpack.c.bf16 %v2337_v5, %v2337_v5  ;;  %7895 = vrcp.f32 %v1884_v12 }
 0x845   : > { %v7886_v48 = vpop.eup %7885  ;;  %v6867_v6 = vpack.c.bf16 %v2328_v1, %v2328_v1  ;;  %5410 = vadd.xlane.f32.xlu0 %v5409_v19  ;;  %v5945_v24 = vld [vmem:[#allocation3 + $0x18] sm:$0xf]  ;;  %v6072_v1 = vld [vmem:[#allocation3 + $0x90] sm:$0xf] }
 0x846   : > { %v7888_v17 = vpop.eup %7887  ;;  %2417 = vst.msk [vmem:[#allocation3 + $0x28] sm:$0xf] %vm519_vm1, %v6876_v55  ;;  %v2339_v22 = vmul.f32 %v7886_v48, %v10344_v57  ;;  %5961 = vst.msk [vmem:[#allocation4 + $0x18] sm:$0xf] %vm519_vm1, %v5945_v24  ;;  %v5412_v55 = vsel %vm1758_vm4, %v9805_v35, 0.0 }
 0x847   : > { %2408 = vst.msk [vmem:[#allocation3 + $0x4] sm:$0xf] %vm519_vm1, %v6867_v6  ;;  %v2330_v36 = vmul.f32 %v7888_v17, %v10345_v50  ;;  %5371 = vadd.xlane.f32.xlu1 %v5370_v25  ;;  %v1890_v41 = vpop.xlane.xlu0 %1889  ;;  %v6074_v19 = vld [vmem:[#allocation3 + $0x98] sm:$0xf]  ;;  %v5979_v48 = vld [vmem:[#allocation3 + $0x60] sm:$0xf] }
 0x848   : > { %v6878_v27 = vpack.c.bf16 %v2339_v22, %v2339_v22  ;;  %7897 = vrcp.f32 %v1890_v41  ;;  %v5981_v24 = vld [vmem:[#allocation3 + $0x68] sm:$0xf]  ;;  %v6076_v57 = vld [vmem:[#allocation3 + $0xa0] sm:$0xf]  ;;  %v6073_v41 = vld [vmem:[#allocation3 + $0x94] sm:$0xf] }
 0x849   : > { %v7890_v30 = vpop.eup %7889  ;;  %v6869_v32 = vpack.c.bf16 %v2330_v36, %v2330_v36  ;;  %5416 = vadd.xlane.f32.xlu0 %v5415_v7  ;;  %v5947_v47 = vld [vmem:[#allocation3 + $0x20] sm:$0xf]  ;;  %v6078_v36 = vld [vmem:[#allocation3 + $0xa8] sm:$0xf] }
 0x84a   : > { %v7892_v14 = vpop.eup %7891  ;;  %2419 = vst.msk [vmem:[#allocation3 + $0x30] sm:$0xf] %vm519_vm1, %v6878_v27  ;;  %v2341_v11 = vmul.f32 %v7890_v30, %v10346_v63  ;;  %5963 = vst.msk [vmem:[#allocation4 + $0x20] sm:$0xf] %vm519_vm1, %v5947_v47 }
 0x84b   : > { %2410 = vst.msk [vmem:[#allocation3 + $0xc] sm:$0xf] %vm519_vm1, %v6869_v32  ;;  %v2332_v60 = vmul.f32 %v7892_v14, %v10347_v26  ;;  %5377 = vadd.xlane.f32.xlu1 %v5376_v37  ;;  %v1896_v51 = vpop.xlane.xlu0 %1895  ;;  %v5983_v32 = vld [vmem:[#allocation3 + $0x70] sm:$0xf]  ;;  %v6075_v14 = vld [vmem:[#allocation3 + $0x9c] sm:$0xf] }
 0x84c   : > { %v6880_v58 = vpack.c.bf16 %v2341_v11, %v2341_v11  ;;  %7899 = vrcp.f32 %v1896_v51 }
 0x84d   : > { %v7894_v21 = vpop.eup %7893  ;;  %v6871_v39 = vpack.c.bf16 %v2332_v60, %v2332_v60  ;;  %v5949_v40 = vld [vmem:[#allocation3 + $0x28] sm:$0xf]  ;;  %v5985_v60 = vld [vmem:[#allocation3 + $0x78] sm:$0xf] }
 0x84e   : > { %2421 = vst.msk [vmem:[#allocation3 + $0x38] sm:$0xf] %vm519_vm1, %v6880_v58  ;;  %v2334_v33 = vmul.f32 %v7894_v21, %v10348_v18  ;;  %v5940_v38 = vld [vmem:[#allocation3 + $0x4] sm:$0xf]  ;;  %5965 = vst.msk [vmem:[#allocation4 + $0x28] sm:$0xf] %vm519_vm1, %v5949_v40 }
 0x84f   : > { %2412 = vst.msk [vmem:[#allocation3 + $0x14] sm:$0xf] %vm519_vm1, %v6871_v39  ;;  %5383 = vadd.xlane.f32.xlu1 %v5382_v34  ;;  %v1902_v46 = vpop.xlane.xlu0 %1901  ;;  %5956 = vst.msk [vmem:[#allocation4 + $0x4] sm:$0xf] %vm519_vm1, %v5940_v38  ;;  %v5980_v58 = vld [vmem:[#allocation3 + $0x64] sm:$0xf] }
 0x850   : > { %v6873_v2 = vpack.c.bf16 %v2334_v33, %v2334_v33  ;;  %7901 = vrcp.f32 %v1902_v46  ;;  %v6080_v34 = vld [vmem:[#allocation3 + $0xb0] sm:$0xf]  ;;  %v5982_v46 = vld [vmem:[#allocation3 + $0x6c] sm:$0xf] }
 0x851   : > { %v7896_v8 = vpop.eup %7895  ;;  %v5951_v45 = vld [vmem:[#allocation3 + $0x30] sm:$0xf] }
 0x852   : > { %2414 = vst.msk [vmem:[#allocation3 + $0x1c] sm:$0xf] %vm519_vm1, %v6873_v2  ;;  %v2336_v3 = vmul.f32 %v7896_v8, %v10349_v42  ;;  %v5942_v49 = vld [vmem:[#allocation3 + $0xc] sm:$0xf]  ;;  %5967 = vst.msk [vmem:[#allocation4 + $0x30] sm:$0xf] %vm519_vm1, %v5951_v45 }
 0x853   : > { %5389 = vadd.xlane.f32.xlu1 %v5388_v59  ;;  %5958 = vst.msk [vmem:[#allocation4 + $0xc] sm:$0xf] %vm519_vm1, %v5942_v49  ;;  %v6082_v59 = vld [vmem:[#allocation3 + $0xb8] sm:$0xf] }
 0x854   : > { %v6875_v61 = vpack.c.bf16 %v2336_v3, %v2336_v3 }
 0x855   : > { %v7898_v10 = vpop.eup %7897  ;;  %v5953_v29 = vld [vmem:[#allocation3 + $0x38] sm:$0xf] }
 0x856   : > { %2416 = vst.msk [vmem:[#allocation3 + $0x24] sm:$0xf] %vm519_vm1, %v6875_v61  ;;  %v2338_v43 = vmul.f32 %v7898_v10, %v10350_v31  ;;  %v5944_v4 = vld [vmem:[#allocation3 + $0x14] sm:$0xf]  ;;  %5969 = vst.msk [vmem:[#allocation4 + $0x38] sm:$0xf] %vm519_vm1, %v5953_v29 }
 0x857   : > { %5395 = vadd.xlane.f32.xlu1 %v5394_v9  ;;  %5960 = vst.msk [vmem:[#allocation4 + $0x14] sm:$0xf] %vm519_vm1, %v5944_v4  ;;  %v6077_v61 = vld [vmem:[#allocation3 + $0xa4] sm:$0xf] }
 0x858   : > { %v6877_v20 = vpack.c.bf16 %v2338_v43, %v2338_v43  ;;  %v6079_v43 = vld [vmem:[#allocation3 + $0xac] sm:$0xf] }
 0x859   : > { %v7900_v62 = vpop.eup %7899  ;;  %v5946_v56 = vld [vmem:[#allocation3 + $0x1c] sm:$0xf] }
 0x85a   : > { %2418 = vst.msk [vmem:[#allocation3 + $0x2c] sm:$0xf] %vm519_vm1, %v6877_v20  ;;  %v2340_v54 = vmul.f32 %v7900_v62, %v10351_v52  ;;  %5962 = vst.msk [vmem:[#allocation4 + $0x1c] sm:$0xf] %vm519_vm1, %v5946_v56  ;;  %v5984_v56 = vld [vmem:[#allocation3 + $0x74] sm:$0xf] }
 0x85b   : > { %5401 = vadd.xlane.f32.xlu1 %v5400_v23 }
 0x85c   : > { %v6879_v28 = vpack.c.bf16 %v2340_v54, %v2340_v54 }
 0x85d   : > { %v7902_v13 = vpop.eup %7901  ;;  %v5948_v44 = vld [vmem:[#allocation3 + $0x24] sm:$0xf] }
 0x85e   : > { %2420 = vst.msk [vmem:[#allocation3 + $0x34] sm:$0xf] %vm519_vm1, %v6879_v28  ;;  %v2342_v5 = vmul.f32 %v7902_v13, %v10352_v53  ;;  %5964 = vst.msk [vmem:[#allocation4 + $0x24] sm:$0xf] %vm519_vm1, %v5948_v44  ;;  %v5986_v44 = vld [vmem:[#allocation3 + $0x7c] sm:$0xf] }
 0x85f   : > { %5407 = vadd.xlane.f32.xlu1 %v5406_v0  ;;  %6108 = vrot.lane.b32.xlu0 %v6072_v1, %s8011_s18  ;;  %v6081_v1 = vld [vmem:[#allocation3 + $0xb4] sm:$0xf] }
 0x860   : > { %v6881_v15 = vpack.c.bf16 %v2342_v5, %v2342_v5 }
 0x861   : > { %v5950_v12 = vld [vmem:[#allocation3 + $0x2c] sm:$0xf] }
 0x862   : > { %2422 = vst.msk [vmem:[#allocation3 + $0x3c] sm:$0xf] %vm519_vm1, %v6881_v15  ;;  %5966 = vst.msk [vmem:[#allocation4 + $0x2c] sm:$0xf] %vm519_vm1, %v5950_v12 }
 0x863   : > { %5413 = vadd.xlane.f32.xlu1 %v5412_v55  ;;  %6112 = vrot.lane.b32.xlu0 %v6074_v19, %s8011_s18  ;;  %v6083_v19 = vld [vmem:[#allocation3 + $0xbc] sm:$0xf] }
 0x865   : > { %v5952_v16 = vld [vmem:[#allocation3 + $0x34] sm:$0xf] }
 0x866   : > { %5968 = vst.msk [vmem:[#allocation4 + $0x34] sm:$0xf] %vm519_vm1, %v5952_v16 }
 0x867   : > { %6019 = vrot.lane.b32.xlu0 %v5979_v48, %s8010_s17 }
 0x869   : > { %v5954_v6 = vld [vmem:[#allocation3 + $0x3c] sm:$0xf] }
 0x86a   : > { %5970 = vst.msk [vmem:[#allocation4 + $0x3c] sm:$0xf] %vm519_vm1, %v5954_v6 }
 0x86b   : > { %v9971_v17 = vpop.f32.mrf.mxu0  ;;  %6023 = vrot.lane.b32.xlu0 %v5981_v24, %s8010_s17 }
 0x86d   : > { %v7439_v35 = vpop.f32.mrf.mxu0 }
 0x86f   : > { %v9974_v22 = vpop.f32.mrf.mxu0  ;;  %6116 = vrot.lane.b32.xlu0 %v6076_v57, %s8011_s18 }
 0x870   : > { %v6006_v25 = vpop.permute.xlu0 %6005 }
 0x871   : > { %6053 = vst.msk [vmem:[#allocation4 + $0x4] sm:$0xf] %vm6051_vm5, %v6006_v25  ;;  %v7440_v50 = vpop.f32.mrf.mxu0 }
 0x873   : > { %6120 = vrot.lane.b32.xlu0 %v6078_v36, %s8011_s18  ;;  %v9979_v27 = vpop.f32.mrf.mxu1 }
 0x874   : > { %6110 = vrot.lane.b32.xlu1 %v6073_v41, %s8011_s18  ;;  %v6101_v7 = vpop.permute.xlu0 %6100 }
 0x875   : > { %v7445_v30 = vpop.f32.mrf.mxu1 }
 0x877   : > { %v9982_v47 = vpop.f32.mrf.mxu0  ;;  %6027 = vrot.lane.b32.xlu0 %v5983_v32, %s8010_s17  ;;  %v9985_v63 = vpop.f32.mrf.mxu1 }
 0x878   : > { %6114 = vrot.lane.b32.xlu1 %v6075_v14, %s8011_s18  ;;  %v6105_v11 = vpop.permute.xlu0 %6104 }
 0x879   : > { %v7446_v37 = vpop.f32.mrf.mxu1  ;;  %v7451_v26 = vpop.f32.mrf.mxu0 }
 0x87b   : > { %v9988_v51 = vpop.f32.mrf.mxu0  ;;  %6031 = vrot.lane.b32.xlu0 %v5985_v60, %s8010_s17  ;;  %v9992_v21 = vpop.f32.mrf.mxu1 }
 0x87c   : > { %6021 = vrot.lane.b32.xlu1 %v5980_v58, %s8010_s17  ;;  %v6012_v39 = vpop.permute.xlu0 %6011 }
 0x87d   : > { %v6004_v40 = vpop.permute.xlu1 %6003  ;;  %6056 = vst.msk [vmem:[#allocation4 + $0x10] sm:$0xf] %vm6051_vm5, %v6012_v39  ;;  %v7452_v18 = vpop.f32.mrf.mxu0 }
 0x87e   : > { %6052 = vst.msk [vmem:[#allocation4] sm:$0xf] %vm6051_vm5, %v6004_v40  ;;  %v7457_v33 = vpop.f32.mrf.mxu1 }
 0x87f   : > { %v9996_v38 = vpop.f32.mrf.mxu0  ;;  %6124 = vrot.lane.b32.xlu0 %v6080_v34, %s8011_s18  ;;  %6149 = vst.msk [vmem:[#allocation4] sm:$0xf] %vm6148_vm6, %v6101_v7 }
 0x880   : > { %6025 = vrot.lane.b32.xlu1 %v5982_v46, %s8010_s17  ;;  %v10001_v2 = vpop.f32.mrf.mxu1  ;;  %v6016_v8 = vpop.permute.xlu0 %6015 }
 0x881   : > { %v6008_v45 = vpop.permute.xlu1 %6007  ;;  %6058 = vst.msk [vmem:[#allocation4 + $0x18] sm:$0xf] %vm6051_vm5, %v6016_v8  ;;  %v7463_v42 = vpop.f32.mrf.mxu0 }
 0x882   : > { %6054 = vst.msk [vmem:[#allocation4 + $0x8] sm:$0xf] %vm6051_vm5, %v6008_v45  ;;  %v7458_v3 = vpop.f32.mrf.mxu1 }
 0x883   : > { %v10005_v49 = vpop.f32.mrf.mxu0  ;;  %6128 = vrot.lane.b32.xlu0 %v6082_v59, %s8011_s18  ;;  %6151 = vst.msk [vmem:[#allocation4 + $0x8] sm:$0xf] %vm6148_vm6, %v6105_v11 }
 0x884   : > { %6118 = vrot.lane.b32.xlu1 %v6077_v61, %s8011_s18 }
 0x885   : > { %v6010_v10 = vpop.permute.xlu1 %6009  ;;  %v7464_v29 = vpop.f32.mrf.mxu0 }
 0x886   : > { %6055 = vst.msk [vmem:[#allocation4 + $0xc] sm:$0xf] %vm6051_vm5, %v6010_v10 }
 0x887   : > { %v10011_v31 = vpop.f32.mrf.mxu0  ;;  %v10013_v9 = vpop.f32.mrf.mxu1 }
 0x888   : > { %6122 = vrot.lane.b32.xlu1 %v6079_v43, %s8011_s18 }
 0x889   : > { %v6103_v4 = vpop.permute.xlu1 %6102  ;;  %v7469_v20 = vpop.f32.mrf.mxu1 }
 0x88a   : > { %6150 = vst.msk [vmem:[#allocation4 + $0x4] sm:$0xf] %vm6148_vm6, %v6103_v4  ;;  %v7475_v62 = vpop.f32.mrf.mxu0 }
 0x88b   : > { %v10017_v52 = vpop.f32.mrf.mxu1 }
 0x88c   : > { %v10019_v54 = vpop.f32.mrf.mxu0  ;;  %6029 = vrot.lane.b32.xlu1 %v5984_v56, %s8010_s17 }
 0x88d   : > { %v6107_v23 = vpop.permute.xlu1 %6106  ;;  %v7470_v28 = vpop.f32.mrf.mxu1 }
 0x88e   : > { %6152 = vst.msk [vmem:[#allocation4 + $0xc] sm:$0xf] %vm6148_vm6, %v6107_v23  ;;  %v7476_v13 = vpop.f32.mrf.mxu0 }
 0x88f   : > { %v10023_v53 = vpop.f32.mrf.mxu1 }
 0x890   : > { %6033 = vrot.lane.b32.xlu1 %v5986_v44, %s8010_s17 }
 0x891   : > { %v6014_v5 = vpop.permute.xlu1 %6013  ;;  %v7481_v0 = vpop.f32.mrf.mxu1 }
 0x892   : > { %6057 = vst.msk [vmem:[#allocation4 + $0x14] sm:$0xf] %vm6051_vm5, %v6014_v5  ;;  %v7669_v5 = vld [vmem:[%s10210_s4 + $0x8] sm:$0xff]  }
 0x893   : > { %v10027_v15 = vpop.f32.mrf.mxu1  ;;  %7483 = vmatprep.subr.bf16.mxu0 %v7669_v5 }
 0x894   : > { %6126 = vrot.lane.b32.xlu1 %v6081_v1, %s8011_s18  ;;  %7484 = vmatpush3.bf16.msra.mxu0 %v7669_v5 }
 0x895   : > { %v6018_v12 = vpop.permute.xlu1 %6017  ;;  %v7482_v55 = vpop.f32.mrf.mxu1 }
 0x896   : > { %6059 = vst.msk [vmem:[#allocation4 + $0x1c] sm:$0xf] %vm6051_vm5, %v6018_v12 }
 0x898   : > { %6130 = vrot.lane.b32.xlu1 %v6083_v19, %s8011_s18 }
 0x8b6   : > { %v5375_v16 = vpop.xlane.xlu0 %5374 }
 0x8b7   : > { %7903 = vrcp.f32 %v5375_v16  ;;  %v7670_v16 = vld [vmem:[%s10210_s4] sm:$0xff]  }
 0x8b8   : > { %7485 = vmatprep.subr.bf16.mxu0 %v7670_v16 }
 0x8b9   : > { %7486 = vmatpush3.bf16.msra.mxu0 %v7670_v16 }
 0x8ba   : > { %v5381_v48 = vpop.xlane.xlu0 %5380 }
 0x8bb   : > { %7905 = vrcp.f32 %v5381_v48 }
 0x8be   : > { %v5387_v6 = vpop.xlane.xlu0 %5386 }
 0x8bf   : > { %7907 = vrcp.f32 %v5387_v6 }
 0x8c2   : > { %v5393_v24 = vpop.xlane.xlu0 %5392 }
 0x8c3   : > { %7909 = vrcp.f32 %v5393_v24 }
 0x8c4   : > { %v7904_v35 = vpop.eup %7903 }
 0x8c5   : > { %v5843_v57 = vmul.f32 %v7904_v35, %v9974_v22 }
 0x8c6   : > { %v5399_v25 = vpop.xlane.xlu0 %5398 }
 0x8c7   : > { %v6915_v50 = vpack.c.bf16 %v5843_v57, %v5843_v57  ;;  %7911 = vrcp.f32 %v5399_v25 }
 0x8c8   : > { %v7906_v36 = vpop.eup %7905 }
 0x8c9   : > { %5924 = vst.msk [vmem:[#allocation3 + $0xc4] sm:$0xf] %vm519_vm1, %v6915_v50  ;;  %v5845_v41 = vmul.f32 %v7906_v36, %v9985_v63 }
 0x8ca   : > { %v5405_v7 = vpop.xlane.xlu0 %5404 }
 0x8cb   : > { %v6917_v30 = vpack.c.bf16 %v5845_v41, %v5845_v41  ;;  %7913 = vrcp.f32 %v5405_v7 }
 0x8cc   : > { %v7908_v32 = vpop.eup %7907 }
 0x8cd   : > { %5926 = vst.msk [vmem:[#allocation3 + $0xcc] sm:$0xf] %vm519_vm1, %v6917_v30  ;;  %v5847_v14 = vmul.f32 %v7908_v32, %v9988_v51 }
 0x8ce   : > { %v5411_v11 = vpop.xlane.xlu0 %5410 }
 0x8cf   : > { %v6919_v37 = vpack.c.bf16 %v5847_v14, %v5847_v14  ;;  %7915 = vrcp.f32 %v5411_v11 }
 0x8d0   : > { %v7910_v22 = vpop.eup %7909  ;;  %v5372_v26 = vpop.xlane.xlu1 %5371  ;;  %v6166_v60 = vld [vmem:[#allocation3 + $0xc4] sm:$0xf] }
 0x8d1   : > { %5928 = vst.msk [vmem:[#allocation3 + $0xd4] sm:$0xf] %vm519_vm1, %v6919_v37  ;;  %v5849_v58 = vmul.f32 %v7910_v22, %v10001_v2  ;;  %7917 = vrcp.f32 %v5372_v26  ;;  %6199 = vrot.lane.b32.xlu1 %v6166_v60, %s8012_s19 }
 0x8d2   : > { %v5417_v63 = vpop.xlane.xlu0 %5416 }
 0x8d3   : > { %v6921_v39 = vpack.c.bf16 %v5849_v58, %v5849_v58  ;;  %7919 = vrcp.f32 %v5417_v63 }
 0x8d4   : > { %v7912_v40 = vpop.eup %7911  ;;  %v5378_v18 = vpop.xlane.xlu1 %5377  ;;  %v6168_v51 = vld [vmem:[#allocation3 + $0xcc] sm:$0xf] }
 0x8d5   : > { %5930 = vst.msk [vmem:[#allocation3 + $0xdc] sm:$0xf] %vm519_vm1, %v6921_v39  ;;  %v5851_v33 = vmul.f32 %v7912_v40, %v10005_v49  ;;  %7921 = vrcp.f32 %v5378_v18  ;;  %6203 = vrot.lane.b32.xlu1 %v6168_v51, %s8012_s19 }
 0x8d6   : > { %v6109_v34 = vpop.permute.xlu0 %6108 }
 0x8d7   : > { %v6923_v46 = vpack.c.bf16 %v5851_v33, %v5851_v33  ;;  %6153 = vst.msk [vmem:[#allocation4 + $0x10] sm:$0xf] %vm6148_vm6, %v6109_v34 }
 0x8d8   : > { %v7914_v2 = vpop.eup %7913  ;;  %v5384_v8 = vpop.xlane.xlu1 %5383  ;;  %v6170_v45 = vld [vmem:[#allocation3 + $0xd4] sm:$0xf] }
 0x8d9   : > { %5932 = vst.msk [vmem:[#allocation3 + $0xe4] sm:$0xf] %vm519_vm1, %v6923_v46  ;;  %v5853_v42 = vmul.f32 %v7914_v2, %v10017_v52  ;;  %7923 = vrcp.f32 %v5384_v8  ;;  %6207 = vrot.lane.b32.xlu1 %v6170_v45, %s8012_s19 }
 0x8da   : > { %v6113_v3 = vpop.permute.xlu0 %6112 }
 0x8db   : > { %v6925_v59 = vpack.c.bf16 %v5853_v42, %v5853_v42  ;;  %6155 = vst.msk [vmem:[#allocation4 + $0x18] sm:$0xf] %vm6148_vm6, %v6113_v3 }
 0x8dc   : > { %v7916_v49 = vpop.eup %7915  ;;  %v5390_v61 = vpop.xlane.xlu1 %5389  ;;  %v6172_v10 = vld [vmem:[#allocation3 + $0xdc] sm:$0xf] }
 0x8dd   : > { %5934 = vst.msk [vmem:[#allocation3 + $0xec] sm:$0xf] %vm519_vm1, %v6925_v59  ;;  %v5855_v29 = vmul.f32 %v7916_v49, %v10019_v54  ;;  %7925 = vrcp.f32 %v5390_v61  ;;  %6211 = vrot.lane.b32.xlu1 %v6172_v10, %s8012_s19 }
 0x8de   : > { %v7918_v43 = vpop.eup %7917  ;;  %v6020_v4 = vpop.permute.xlu0 %6019 }
 0x8df   : > { %v6927_v20 = vpack.c.bf16 %v5855_v29, %v5855_v29  ;;  %v5842_v62 = vmul.f32 %v7918_v43, %v9971_v17  ;;  %6060 = vst.msk [vmem:[#allocation4 + $0x20] sm:$0xf] %vm6051_vm5, %v6020_v4 }
 0x8e0   : > { %v7920_v56 = vpop.eup %7919  ;;  %v5396_v52 = vpop.xlane.xlu1 %5395  ;;  %v6174_v23 = vld [vmem:[#allocation3 + $0xe4] sm:$0xf] }
 0x8e1   : > { %5936 = vst.msk [vmem:[#allocation3 + $0xf4] sm:$0xf] %vm519_vm1, %v6927_v20  ;;  %v6914_v28 = vpack.c.bf16 %v5842_v62, %v5842_v62  ;;  %v5857_v13 = vmul.f32 %v7920_v56, %v10027_v15  ;;  %7927 = vrcp.f32 %v5396_v52  ;;  %6215 = vrot.lane.b32.xlu1 %v6174_v23, %s8012_s19 }
 0x8e2   : > { %v7922_v54 = vpop.eup %7921  ;;  %v6024_v44 = vpop.permute.xlu0 %6023 }
 0x8e3   : > { %5923 = vst.msk [vmem:[#allocation3 + $0xc0] sm:$0xf] %vm519_vm1, %v6914_v28  ;;  %v6929_v17 = vpack.c.bf16 %v5857_v13, %v5857_v13  ;;  %v5844_v0 = vmul.f32 %v7922_v54, %v9979_v27 }
 0x8e4   : > { %6062 = vst.msk [vmem:[#allocation4 + $0x28] sm:$0xf] %vm6051_vm5, %v6024_v44  ;;  %v5402_v1 = vpop.xlane.xlu1 %5401  ;;  %v6176_v12 = vld [vmem:[#allocation3 + $0xec] sm:$0xf] }
 0x8e5   : > { %5938 = vst.msk [vmem:[#allocation3 + $0xfc] sm:$0xf] %vm519_vm1, %v6929_v17  ;;  %v6916_v15 = vpack.c.bf16 %v5844_v0, %v5844_v0  ;;  %7929 = vrcp.f32 %v5402_v1  ;;  %6219 = vrot.lane.b32.xlu1 %v6176_v12, %s8012_s19 }
 0x8e6   : > { %v7924_v55 = vpop.eup %7923  ;;  %v6117_v19 = vpop.permute.xlu0 %6116 }
 0x8e7   : > { %5925 = vst.msk [vmem:[#allocation3 + $0xc8] sm:$0xf] %vm519_vm1, %v6916_v15  ;;  %v5846_v27 = vmul.f32 %v7924_v55, %v9982_v47 }
 0x8e8   : > { %6157 = vst.msk [vmem:[#allocation4 + $0x20] sm:$0xf] %vm6148_vm6, %v6117_v19  ;;  %v5408_v48 = vpop.xlane.xlu1 %5407  ;;  %v6178_v6 = vld [vmem:[#allocation3 + $0xf4] sm:$0xf] }
 0x8e9   : > { %v6918_v24 = vpack.c.bf16 %v5846_v27, %v5846_v27  ;;  %7931 = vrcp.f32 %v5408_v48  ;;  %6223 = vrot.lane.b32.xlu1 %v6178_v6, %s8012_s19 }
 0x8ea   : > { %v7926_v35 = vpop.eup %7925  ;;  %v6165_v57 = vld [vmem:[#allocation3 + $0xc0] sm:$0xf]  ;;  %v6121_v25 = vpop.permute.xlu0 %6120 }
 0x8eb   : > { %5927 = vst.msk [vmem:[#allocation3 + $0xd0] sm:$0xf] %vm519_vm1, %v6918_v24  ;;  %v5848_v50 = vmul.f32 %v7926_v35, %v9992_v21  ;;  %6197 = vrot.lane.b32.xlu0 %v6165_v57, %s8012_s19  ;;  %v6826_v35 = vld [vmem:[%s10211_s5] ss:$0 sm:$0xff] }
 0x8ec   : > { %6159 = vst.msk [vmem:[#allocation4 + $0x28] sm:$0xf] %vm6148_vm6, %v6121_v25  ;;  %v5414_v47 = vpop.xlane.xlu1 %5413  ;;  %v6180_v36 = vld [vmem:[#allocation3 + $0xfc] sm:$0xf] }
 0x8ed   : > { %v6920_v41 = vpack.c.bf16 %v5848_v50, %v5848_v50  ;;  %7933 = vrcp.f32 %v5414_v47  ;;  %6227 = vrot.lane.b32.xlu1 %v6180_v36, %s8012_s19 }
 0x8ee   : > { %v7928_v7 = vpop.eup %7927  ;;  %v6028_v30 = vpop.permute.xlu0 %6027  ;;  %v6167_v32 = vld [vmem:[#allocation3 + $0xc8] sm:$0xf] }
 0x8ef   : > { %5929 = vst.msk [vmem:[#allocation3 + $0xd8] sm:$0xf] %vm519_vm1, %v6920_v41  ;;  %v5850_v14 = vmul.f32 %v7928_v7, %v9996_v38  ;;  %6201 = vrot.lane.b32.xlu0 %v6167_v32, %s8012_s19 }
 0x8f0   : > { %6064 = vst.msk [vmem:[#allocation4 + $0x30] sm:$0xf] %vm6051_vm5, %v6028_v30  ;;  %v6111_v21 = vpop.permute.xlu1 %6110 }
 0x8f1   : > { %v6922_v11 = vpack.c.bf16 %v5850_v14, %v5850_v14  ;;  %6154 = vst.msk [vmem:[#allocation4 + $0x14] sm:$0xf] %vm6148_vm6, %v6111_v21 }
 0x8f2   : > { %v7930_v37 = vpop.eup %7929  ;;  %v6032_v22 = vpop.permute.xlu0 %6031  ;;  %v6169_v26 = vld [vmem:[#allocation3 + $0xd0] sm:$0xf] }
 0x8f3   : > { %5931 = vst.msk [vmem:[#allocation3 + $0xe0] sm:$0xf] %vm519_vm1, %v6922_v11  ;;  %v5852_v60 = vmul.f32 %v7930_v37, %v10013_v9  ;;  %6205 = vrot.lane.b32.xlu0 %v6169_v26, %s8012_s19 }
 0x8f4   : > { %6066 = vst.msk [vmem:[#allocation4 + $0x38] sm:$0xf] %vm6051_vm5, %v6032_v22  ;;  %v6115_v38 = vpop.permute.xlu1 %6114 }
 0x8f5   : > { %v6924_v58 = vpack.c.bf16 %v5852_v60, %v5852_v60  ;;  %6156 = vst.msk [vmem:[#allocation4 + $0x1c] sm:$0xf] %vm6148_vm6, %v6115_v38 }
 0x8f6   : > { %v7932_v63 = vpop.eup %7931  ;;  %v6125_v39 = vpop.permute.xlu0 %6124  ;;  %v6171_v40 = vld [vmem:[#allocation3 + $0xd8] sm:$0xf] }
 0x8f7   : > { %5933 = vst.msk [vmem:[#allocation3 + $0xe8] sm:$0xf] %vm519_vm1, %v6924_v58  ;;  %v5854_v18 = vmul.f32 %v7932_v63, %v10011_v31  ;;  %6209 = vrot.lane.b32.xlu0 %v6171_v40, %s8012_s19 }
 0x8f8   : > { %6161 = vst.msk [vmem:[#allocation4 + $0x30] sm:$0xf] %vm6148_vm6, %v6125_v39  ;;  %v6022_v9 = vpop.permute.xlu1 %6021 }
 0x8f9   : > { %v6926_v51 = vpack.c.bf16 %v5854_v18, %v5854_v18  ;;  %6061 = vst.msk [vmem:[#allocation4 + $0x24] sm:$0xf] %vm6051_vm5, %v6022_v9 }
 0x8fa   : > { %v7934_v33 = vpop.eup %7933  ;;  %v6129_v34 = vpop.permute.xlu0 %6128  ;;  %v6173_v46 = vld [vmem:[#allocation3 + $0xe0] sm:$0xf] }
 0x8fb   : > { %5935 = vst.msk [vmem:[#allocation3 + $0xf0] sm:$0xf] %vm519_vm1, %v6926_v51  ;;  %v5856_v2 = vmul.f32 %v7934_v33, %v10023_v53  ;;  %6213 = vrot.lane.b32.xlu0 %v6173_v46, %s8012_s19 }
 0x8fc   : > { %6163 = vst.msk [vmem:[#allocation4 + $0x38] sm:$0xf] %vm6148_vm6, %v6129_v34  ;;  %v6026_v31 = vpop.permute.xlu1 %6025 }
 0x8fd   : > { %v6928_v8 = vpack.c.bf16 %v5856_v2, %v5856_v2  ;;  %6063 = vst.msk [vmem:[#allocation4 + $0x2c] sm:$0xf] %vm6051_vm5, %v6026_v31 }
 0x8fe   : > { %v6175_v45 = vld [vmem:[#allocation3 + $0xe8] sm:$0xf] }
 0x8ff   : > { %5937 = vst.msk [vmem:[#allocation3 + $0xf8] sm:$0xf] %vm519_vm1, %v6928_v8  ;;  %6217 = vrot.lane.b32.xlu0 %v6175_v45, %s8012_s19 }
 0x900   : > { %v6119_v42 = vpop.permute.xlu1 %6118 }
 0x901   : > { %6158 = vst.msk [vmem:[#allocation4 + $0x24] sm:$0xf] %vm6148_vm6, %v6119_v42 }
 0x902   : > { %v6177_v3 = vld [vmem:[#allocation3 + $0xf0] sm:$0xf] }
 0x903   : > { %6221 = vrot.lane.b32.xlu0 %v6177_v3, %s8012_s19 }
 0x904   : > { %v6123_v53 = vpop.permute.xlu1 %6122 }
 0x905   : > { %6160 = vst.msk [vmem:[#allocation4 + $0x2c] sm:$0xf] %vm6148_vm6, %v6123_v53 }
 0x906   : > { %v6179_v59 = vld [vmem:[#allocation3 + $0xf8] sm:$0xf] }
 0x907   : > { %6225 = vrot.lane.b32.xlu0 %v6179_v59, %s8012_s19  ;;  %s10157_s19 = scalar_lea.hbm %s10212_s6, %s6930_s14 }
 0x908   : > { %v6030_v49 = vpop.permute.xlu1 %6029 }
 0x909   : > { %6065 = vst.msk [vmem:[#allocation4 + $0x34] sm:$0xf] %vm6051_vm5, %v6030_v49 }
 0x90c   : > { %v6034_v61 = vpop.permute.xlu1 %6033 }
 0x90d   : > { %6067 = vst.msk [vmem:[#allocation4 + $0x3c] sm:$0xf] %vm6051_vm5, %v6034_v61 }
 0x910   : > { %v6127_v10 = vpop.permute.xlu1 %6126 }
 0x911   : > { %6162 = vst.msk [vmem:[#allocation4 + $0x34] sm:$0xf] %vm6148_vm6, %v6127_v10 }
 0x914   : > { %v6131_v29 = vpop.permute.xlu1 %6130 }
 0x915   : > { %6164 = vst.msk [vmem:[#allocation4 + $0x3c] sm:$0xf] %vm6148_vm6, %v6131_v29 }
 0x943   : > { %v6200_v43 = vpop.permute.xlu1 %6199 }
 0x944   : > { %6247 = vst.msk [vmem:[#allocation4 + $0x4] sm:$0xf] %vm6245_vm7, %v6200_v43 }
 0x947   : > { %v6204_v4 = vpop.permute.xlu1 %6203 }
 0x948   : > { %6249 = vst.msk [vmem:[#allocation4 + $0xc] sm:$0xf] %vm6245_vm7, %v6204_v4 }
 0x94b   : > { %v6208_v20 = vpop.permute.xlu1 %6207 }
 0x94c   : > { %6251 = vst.msk [vmem:[#allocation4 + $0x14] sm:$0xf] %vm6245_vm7, %v6208_v20 }
 0x94f   : > { %v6212_v62 = vpop.permute.xlu1 %6211 }
 0x950   : > { %6253 = vst.msk [vmem:[#allocation4 + $0x1c] sm:$0xf] %vm6245_vm7, %v6212_v62 }
 0x953   : > { %v6216_v56 = vpop.permute.xlu1 %6215 }
 0x954   : > { %6255 = vst.msk [vmem:[#allocation4 + $0x24] sm:$0xf] %vm6245_vm7, %v6216_v56 }
 0x957   : > { %v6220_v52 = vpop.permute.xlu1 %6219 }
 0x958   : > { %6257 = vst.msk [vmem:[#allocation4 + $0x2c] sm:$0xf] %vm6245_vm7, %v6220_v52 }
 0x95b   : > { %v6224_v23 = vpop.permute.xlu1 %6223 }
 0x95c   : > { %6259 = vst.msk [vmem:[#allocation4 + $0x34] sm:$0xf] %vm6245_vm7, %v6224_v23 }
 0x95d   : > { %v6198_v28 = vpop.permute.xlu0 %6197 }
 0x95e   : > { %6246 = vst.msk [vmem:[#allocation4] sm:$0xf] %vm6245_vm7, %v6198_v28 }
 0x95f   : > { %v6228_v13 = vpop.permute.xlu1 %6227 }
 0x960   : > { %6261 = vst.msk [vmem:[#allocation4 + $0x3c] sm:$0xf] %vm6245_vm7, %v6228_v13 }
 0x961   : > { %v6202_v54 = vpop.permute.xlu0 %6201 }
 0x962   : > { %6248 = vst.msk [vmem:[#allocation4 + $0x8] sm:$0xf] %vm6245_vm7, %v6202_v54 }
 0x965   : > { %v6206_v44 = vpop.permute.xlu0 %6205  ;;  %v7671_v5 = vld [vmem:[#allocation4] sm:$0xff]  }
 0x966   : > { %6250 = vst.msk [vmem:[#allocation4 + $0x10] sm:$0xf] %vm6245_vm7, %v6206_v44  ;;  %7487 = vmatprep.mubr.msk.bf16.mxu0 %vm333_vm0, %v7671_v5 }
 0x969   : > { %v6210_v17 = vpop.permute.xlu0 %6209  ;;  %v7672_v0 = vld [vmem:[#allocation4 + $0x8] sm:$0xff]  }
 0x96a   : > { %6252 = vst.msk [vmem:[#allocation4 + $0x18] sm:$0xf] %vm6245_vm7, %v6210_v17  ;;  %7488 = vmatmul.mubr.msk.bf16.vlgmr.msra.gmra.mxu0 %vm333_vm0, %v7672_v0 }
 0x96d   : > { %v6214_v1 = vpop.permute.xlu0 %6213  ;;  %v7673_v12 = vld [vmem:[#allocation4 + $0x10] sm:$0xff]  }
 0x96e   : > { %6254 = vst.msk [vmem:[#allocation4 + $0x20] sm:$0xf] %vm6245_vm7, %v6214_v1  ;;  %7491 = vmatprep.mubr.msk.bf16.mxu0 %vm333_vm0, %v7673_v12 }
 0x971   : > { %v6218_v15 = vpop.permute.xlu0 %6217  ;;  %v7674_v55 = vld [vmem:[#allocation4 + $0x18] sm:$0xff]  }
 0x972   : > { %6256 = vst.msk [vmem:[#allocation4 + $0x28] sm:$0xf] %vm6245_vm7, %v6218_v15  ;;  %7492 = vmatmul.mubr.msk.bf16.gmra.mxu0 %vm333_vm0, %v7674_v55 }
 0x975   : > { %v6222_v19 = vpop.permute.xlu0 %6221  ;;  %v7675_v16 = vld [vmem:[#allocation4 + $0x20] sm:$0xff]  }
 0x976   : > { %6258 = vst.msk [vmem:[#allocation4 + $0x30] sm:$0xf] %vm6245_vm7, %v6222_v19  ;;  %7495 = vmatprep.mubr.msk.bf16.mxu0 %vm333_vm0, %v7675_v16 }
 0x979   : > { %v6226_v27 = vpop.permute.xlu0 %6225  ;;  %v7676_v48 = vld [vmem:[#allocation4 + $0x28] sm:$0xff]  }
 0x97a   : > { %6260 = vst.msk [vmem:[#allocation4 + $0x38] sm:$0xf] %vm6245_vm7, %v6226_v27  ;;  %7496 = vmatmul.mubr.msk.bf16.gmra.mxu0 %vm333_vm0, %v7676_v48 }
 0x97d   : > { %v7677_v6 = vld [vmem:[#allocation4 + $0x30] sm:$0xff]  }
 0x97e   : > { %7499 = vmatprep.mubr.msk.bf16.mxu0 %vm333_vm0, %v7677_v6 }
 0x981   : > { %v7678_v24 = vld [vmem:[#allocation4 + $0x38] sm:$0xff]  }
 0x982   : > { %7500 = vmatmul.mubr.msk.bf16.gmra.mxu0 %vm333_vm0, %v7678_v24 }
 0xa2a   : > { %v7489_v57 = vpop.f32.mrf.mxu0 }
 0xa2b   : > { %v6408_v25 = vadd.f32 %v7489_v57, %v6826_v35 }
 0xa2c   : > { %v6399_v50 = vpop.f32.mrf.mxu0 }
 0xa2d   : > { %6464 = vst [vmem:[%s10136_s13 + $0x10] sm:$0xff] %v6408_v25  ;;  %v6400_v47 = vadd.f32 %v6826_v35, %v6399_v50 }
 0xa2e   : > { %v7490_v36 = vpop.f32.mrf.mxu0 }
 0xa2f   : > { %6462 = vst [vmem:[%s10136_s13] sm:$0xff] %v6400_v47  ;;  %v6411_v41 = vadd.f32 %v7490_v36, %v6826_v35 }
 0xa30   : > { %v6402_v7 = vpop.f32.mrf.mxu0 }
 0xa31   : > { %6465 = vst [vmem:[%s10136_s13 + $0x18] sm:$0xff] %v6411_v41  ;;  %v6403_v30 = vadd.f32 %v6826_v35, %v6402_v7 }
 0xa32   : > { %v7493_v32 = vpop.f32.mrf.mxu0 }
 0xa33   : > { %6463 = vst [vmem:[%s10136_s13 + $0x8] sm:$0xff] %v6403_v30  ;;  %v6424_v14 = vadd.f32 %v7493_v32, %v6826_v35 }
 0xa34   : > { %v6415_v21 = vpop.f32.mrf.mxu0 }
 0xa35   : > { %6468 = vst [vmem:[%s10136_s13 + $0x30] sm:$0xff] %v6424_v14  ;;  %v6416_v11 = vadd.f32 %v6826_v35, %v6415_v21 }
 0xa36   : > { %v7494_v37 = vpop.f32.mrf.mxu0 }
 0xa37   : > { %6466 = vst [vmem:[%s10136_s13 + $0x20] sm:$0xff] %v6416_v11  ;;  %v6427_v22 = vadd.f32 %v7494_v37, %v6826_v35 }
 0xa38   : > { %v6418_v26 = vpop.f32.mrf.mxu0 }
 0xa39   : > { %6469 = vst [vmem:[%s10136_s13 + $0x38] sm:$0xff] %v6427_v22  ;;  %v6419_v60 = vadd.f32 %v6826_v35, %v6418_v26 }
 0xa3a   : > { %v7497_v38 = vpop.f32.mrf.mxu0 }
 0xa3b   : > { %6467 = vst [vmem:[%s10136_s13 + $0x28] sm:$0xff] %v6419_v60  ;;  %v6440_v58 = vadd.f32 %v7497_v38, %v6826_v35 }
 0xa3c   : > { %v6431_v63 = vpop.f32.mrf.mxu0 }
 0xa3d   : > { %6472 = vst [vmem:[%s10136_s13 + $0x50] sm:$0xff] %v6440_v58  ;;  %v6432_v39 = vadd.f32 %v6826_v35, %v6431_v63 }
 0xa3e   : > { %v7498_v40 = vpop.f32.mrf.mxu0 }
 0xa3f   : > { %6470 = vst [vmem:[%s10136_s13 + $0x40] sm:$0xff] %v6432_v39  ;;  %v6443_v18 = vadd.f32 %v7498_v40, %v6826_v35 }
 0xa40   : > { %v6434_v9 = vpop.f32.mrf.mxu0 }
 0xa41   : > { %6473 = vst [vmem:[%s10136_s13 + $0x58] sm:$0xff] %v6443_v18  ;;  %v6435_v51 = vadd.f32 %v6826_v35, %v6434_v9 }
 0xa42   : > { %v7501_v33 = vpop.f32.mrf.mxu0 }
 0xa43   : > { %6471 = vst [vmem:[%s10136_s13 + $0x48] sm:$0xff] %v6435_v51  ;;  %v6456_v34 = vadd.f32 %v7501_v33, %v6826_v35 }
 0xa44   : > { %v6447_v46 = vpop.f32.mrf.mxu0 }
 0xa45   : > { %6476 = vst [vmem:[%s10136_s13 + $0x70] sm:$0xff] %v6456_v34  ;;  %v6448_v2 = vadd.f32 %v6826_v35, %v6447_v46 }
 0xa46   : > { %v7502_v31 = vpop.f32.mrf.mxu0 }
 0xa47   : > { %6474 = vst [vmem:[%s10136_s13 + $0x60] sm:$0xff] %v6448_v2  ;;  %v6459_v8 = vadd.f32 %v7502_v31, %v6826_v35 }
 0xa48   : > { %v6450_v45 = vpop.f32.mrf.mxu0 }
 0xa49   : > { %6477 = vst [vmem:[%s10136_s13 + $0x78] sm:$0xff] %v6459_v8  ;;  %v6451_v42 = vadd.f32 %v6826_v35, %v6450_v45 }
 0xa4b   : > { %6475 = vst [vmem:[%s10136_s13 + $0x68] sm:$0xff] %v6451_v42 }
 0xa4c   : > { %7948 = shalt.err (!%p7945_p3)
}
 0xa4d   : > { %s7949_s9 = scalar_lea.hbm %s10157_s19, 2048  ;;  %s7953_s12 = scalar_lea.hbm %s10212_s6, 8192 }
 0xa4e   : > { %p7950_p4 = scmp.ne.s32.totalorder %s10157_s19, %s7949_s9  ;;  %p7954_p9 = scmp.lt.s32.totalorder %s10157_s19, %s10212_s6 }
 0xa4f   : > { %p7955_p10 = scmp.lt.s32.totalorder %s7953_s12, %s7949_s9 }
 0xa50   : > { %p7951_p7 = pnand %p7950_p4, %p8088_p5 }
 0xa51   : > { %p7956_p11 = por %p7955_p10, %p7954_p9 }
 0xa52   : > { %p7952_p8 = pneg %p7951_p7 }
 0xa54   : > { %p7957_p12 = pnand %p7956_p11, %p7952_p8 }
 0xa56   : > { %7960 = shalt.err (!%p7957_p12)
}
 0xa57   : > { %s8014_s16 = smov 128  }
 0xa58   : > { %7507 = dma.vmem_to_hbm [thread:$0]  (%p8088_p5), %s10160_s15, 2048, %s10157_s19, %s10165_s25, %s8014_s16, %s8014_s16, %s8010_s17  }
 0xa59 PF: > { %p7513_p13 = scmp.ge.s32.totalorder %s7995_s24, 2  ;;  %s6507_s18 = sand.u32 1, %s7983_s21  }
 0xa5a   : > { %s6508_s20 = scalar_lea.sflag [#allocation6], %s6507_s18 }
 0xa5b   : > { %p7510_p0 = pnand %p7513_p13, %p8092_p6 }
 0xa5d   : > { %p7511_p1 = pneg %p7510_p0 }
 0xa5f   : > { %7978 = dma.done.wait (%p7511_p1), %s6508_s20, 2048  }
 0xa60   : > { %7980 = vsyncadd (%p7511_p1), %s6508_s20, 4294965248  ;;  %p16_p2 = scmp.ge.s32.totalorder %s8075_s27, 6   ;;  %s10353_s21 = smov %s7987_s22 }
 0xa61   : > { %s10354_s22 = smov %s7991_s23  ;;  %s10355_s23 = smov %s8086_s30 }
 0xa62   : > { %s10356_s24 = smov %s8075_s27  ;;  %18 = sbr.rel (!%p16_p2) target bundleno = 3 (0x3), region = 96 }
 0xa67   :  { %6513 = vsyncpa [#allocation6], 1 }
 0xa68   :  { %6515 = vsyncpa [#allocation6 + $0x1], 1 }

// kernel: tpu_custom_call.1
= control target key start
LH: loop header
LB: loop body
LE: loop exit
PB: predicated region body
PF: predicated region fallthrough
CT: control target
= control target key end

     0   :  { %11 = vsyncpa [#allocation6], 0  ;;  %s10206_s0 = inlined_call_operand.vmem [shape: bf16[512,32], index: 0, kind: input, shape index: {}]   ;;  %s10207_s1 = inlined_call_operand.vmem [shape: bf16[32,96], index: 1, kind: input, shape index: {}]   ;;  %s10208_s2 = inlined_call_operand.vmem [shape: f32[1,96], index: 2, kind: input, shape index: {}]   ;;  %s10209_s3 = inlined_call_operand.vmem [shape: f32[4,16,16], index: 3, kind: input, shape index: {}]   ;;  %s10210_s4 = inlined_call_operand.vmem [shape: bf16[32,128], index: 4, kind: input, shape index: {}]   ;;  %s10211_s5 = inlined_call_operand.vmem [shape: f32[1,128], index: 5, kind: input, shape index: {}]   ;;  %s10212_s6 = inlined_call_operand.hbm [shape: f32[512,128], index: 6, kind: output, shape index: {}]  }
   0x1   :  { %13 = vsyncpa [#allocation6 + $0x1], 0  ;;  %s8050_s21 = smov 0   ;;  %s8052_s22 = smov 0  }
   0x2   :  { %s8054_s23 = smov 0   ;;  %s8056_s24 = smov 0  }
   0x3 LB: > { %s8071_s25 = sadd.s32 4294967295, %s7995_s24   ;;  %s6554_s26 = sadd.s32 4294967294, %s7995_s24   ;;  %s7995_s24 = sphi %s8056_s24, %s10356_s24   ;;  %s7991_s23 = sphi %s8054_s23, %s10355_s23   ;;  %s7987_s22 = sphi %s8052_s22, %s10354_s22   ;;  %s7983_s21 = sphi %s8050_s21, %s10353_s21  }
   0x4   : > { %s8075_s27 = sadd.s32 1, %s7995_s24   ;;  %s157_s28 = sadd.s32 1, %s7991_s23 }
   0x5   : > { %s154_s29 = ssub.s32 %s7995_s24, %s8075_s27  ;;  %p167_p0 = scmp.ne.s32.totalorder %s7991_s23, %s7987_s22 }
   0x6   : > { %p155_p1 = scmp.eq.s32.totalorder %s154_s29, 0  ;;  %p168_p2 = scmp.eq.s32.totalorder %s8071_s25, 3 }
   0x7   : > { %p173_p3 = scmp.ne.s32.totalorder %s7987_s22, %s7983_s21  ;;  %p174_p4 = scmp.eq.s32.totalorder %s6554_s26, 3 }
   0x8   : > { %s8086_s30 = scalar_select %p155_p1, %s7991_s23, %s157_s28  }
   0x9   : > { %p8088_p5 = por %p168_p2, %p167_p0  ;;  %p8092_p6 = por %p174_p4, %p173_p3 }
   0xa   : > { %p6557_p7 = scmp.ge.s32.totalorder %s7995_s24, 1  ;;  %p216_p8 = scmp.lt.s32.totalorder %s7995_s24, 5 }
   0xc   : > { %p217_p9 = pnand %p6557_p7, %p216_p8 }
   0xe   : > { %220 = sbr.rel (%p217_p9) target bundleno = 2649 (0xa59), region = 44 }
  0x13   : > { %v7563_v0 = vld [vmem:[%s10207_s1 + $0x8] sm:$0xff]   ;;  %s6559_s11 = sshll.u32 %s8071_s25, 4  ;;  %v7564_v1 = vld [vmem:[%s10207_s1] sm:$0xff]   ;;  %vm333_vm0 = vcmask 261120   ;;  %vm519_vm1 = vcmask 60416   ;;  %s7997_s20 = smov 96  }
  0x14   : > { %p247_p10 = scmp.lt.s32.totalorder %s6559_s11, 63  ;;  %7079 = vmatprep.subr.bf16.mxu0 %v7563_v0  ;;  %7503 = vmatprep.subr.bf16.mxu1 %v7563_v0  ;;  %v8119_v10 = vld [vmem:[%s10208_s2] ss:$0 sm:$0xff]  ;;  %v10213_v29 = vmov 0.0   ;;  %vm7999_vm2 = vmmov 0   ;;  %s8000_s26 = smov 64  }
  0x15   : > { %7080 = vmatpush3.bf16.msra.mxu0 %v7563_v0  ;;  %7505 = vmatpush3.bf16.msra.mxu1 %v7563_v0  ;;  %s8001_s28 = smov 88   ;;  %s8002_s29 = smov 120   ;;  %vm1311_vm3 = vcmask 64512   ;;  %vm1758_vm4 = vcmask 130048   ;;  %vm6051_vm5 = vcmask 126016   ;;  %vm6148_vm6 = vcmask 191616  }
  0x16   : > { %s10358_s11 = smov (!%p247_p10, %s6559_s11), 63  ;;  %7081 = vmatprep.subr.bf16.mxu0 %v7564_v1  ;;  %7504 = vmatprep.subr.bf16.mxu1 %v7564_v1  ;;  %s8003_s13 = smov 56   ;;  %vm6245_vm7 = vcmask 257216  }
  0x17   : > { %s6560_s14 = sshll.u32 %s10358_s11, 2  ;;  %s8005_s15 = smov 112  }
  0x18   : > { %s250_s17 = scalar_lea.vmem %s10206_s0, %s6560_s14  ;;  %s8004_s14 = smov 80  }
  0x19   : > { %7082 = vmatpush3.bf16.msra.mxu0 %v7564_v1  ;;  %v7565_v2 = vld [vmem:[%s250_s17] sm:$0xff]   ;;  %7506 = vmatpush3.bf16.msra.mxu1 %v7564_v1  ;;  %v7566_v3 = vld [vmem:[%s250_s17 + $0x8] sm:$0xff]   ;;  %v7567_v4 = vld [vmem:[%s250_s17 + $0x10] sm:$0xff]   ;;  %s8009_s12 = smov 40   ;;  %s8011_s18 = smov 16  }
  0x1a   : > { %7083 = vmatprep.mubr.msk.bf16.mxu0 %vm333_vm0, %v7565_v2  ;;  %v7569_v5 = vld [vmem:[%s250_s17 + $0x20] sm:$0xff]   ;;  %v7570_v6 = vld [vmem:[%s250_s17 + $0x28] sm:$0xff]   ;;  %v7571_v7 = vld [vmem:[%s250_s17 + $0x30] sm:$0xff]   ;;  %7099 = vmatprep.subr.bf16.mxu1 %v10213_v29  ;;  %s8012_s19 = smov 24   ;;  %s243_s9 = sand.u32 1, %s7987_s22  }
  0x1b   : > { %7091 = vmatprep.mubr.msk.bf16.mxu1 %vm333_vm0, %v7569_v5  ;;  %v7568_v8 = vld [vmem:[%s250_s17 + $0x18] sm:$0xff]   ;;  %7123 = vmatprep.subr.bf16.mxu0 %v10213_v29  ;;  %s6558_s10 = sshll.u32 %s243_s9, 7 }
  0x1c   : > { %7084 = vmatmul.mubr.msk.bf16.vlgmr.msra.gmra.mxu0 %vm333_vm0, %v7566_v3  ;;  %7092 = vmatmul.mubr.msk.bf16.vlgmr.msra.gmra.mxu1 %vm333_vm0, %v7570_v6  ;;  %v7572_v9 = vld [vmem:[%s250_s17 + $0x38] sm:$0xff]   ;;  %s8010_s17 = smov 8  }
  0x1d   : > { %7087 = vmatprep.mubr.msk.bf16.mxu0 %vm333_vm0, %v7567_v4  ;;  %7095 = vmatprep.mubr.msk.bf16.mxu1 %vm333_vm0, %v7571_v7 }
  0x24   : > { %7088 = vmatmul.mubr.msk.bf16.gmra.mxu0 %vm333_vm0, %v7568_v8  ;;  %7096 = vmatmul.mubr.msk.bf16.gmra.mxu1 %vm333_vm0, %v7572_v9 }
  0x25   : > { %7101 = vmatprep.mubr.msk.bf16.mxu1 %vm7999_vm2, %v10213_v29  ;;  %7125 = vmatprep.mubr.msk.bf16.mxu0 %vm7999_vm2, %v10213_v29 }
  0xdc   : > { %v7085_v11 = vpop.f32.mrf.mxu0  ;;  %v7093_v17 = vpop.f32.mrf.mxu1 }
  0xdd   : > { %v401_v12 = vadd.f32 %v7085_v11, %v8119_v10  ;;  %v433_v20 = vadd.f32 %v7093_v17, %v8119_v10 }
  0xde   : > { %v392_v13 = vpop.f32.mrf.mxu0  ;;  %v424_v22 = vpop.f32.mrf.mxu1 }
  0xdf   : > { %v8122_v14 = vpack.c.bf16 %v401_v12, %v401_v12  ;;  %v393_v15 = vadd.f32 %v8119_v10, %v392_v13  ;;  %v8138_v25 = vpack.c.bf16 %v433_v20, %v433_v20  ;;  %v425_v26 = vadd.f32 %v8119_v10, %v424_v22 }
  0xe0   : > { %v7086_v16 = vpop.f32.mrf.mxu0  ;;  %v7094_v28 = vpop.f32.mrf.mxu1 }
  0xe1   : > { %v8125_v18 = vpack.c.bf16 %v393_v15, %v393_v15  ;;  %v404_v19 = vadd.f32 %v7086_v16, %v8119_v10  ;;  %735 = vrot.lane.b32.xlu1 %v8122_v14, %s7997_s20  ;;  %522 = vst.msk [vmem:[#allocation2 + $0x8] sm:$0xf] %vm519_vm1, %v8122_v14  ;;  %v8150_v32 = vpack.c.bf16 %v425_v26, %v425_v26  ;;  %530 = vst.msk [vmem:[#allocation2 + $0x28] sm:$0xf] %vm519_vm1, %v8138_v25 }
  0xe2   : > { %v395_v21 = vpop.f32.mrf.mxu0  ;;  %v436_v33 = vadd.f32 %v7094_v28, %v8119_v10  ;;  %v427_v35 = vpop.f32.mrf.mxu1 }
  0xe3   : > { %v8133_v23 = vpack.c.bf16 %v404_v19, %v404_v19  ;;  %v396_v24 = vadd.f32 %v8119_v10, %v395_v21  ;;  %731 = vrot.lane.b32.xlu0 %v8125_v18, %s7997_s20  ;;  %520 = vst.msk [vmem:[#allocation2] sm:$0xf] %vm519_vm1, %v8125_v18  ;;  %v428_v39 = vadd.f32 %v8119_v10, %v427_v35  ;;  %528 = vst.msk [vmem:[#allocation2 + $0x20] sm:$0xf] %vm519_vm1, %v8150_v32 }
  0xe4   : > { %v7089_v27 = vpop.f32.mrf.mxu0  ;;  %v8162_v38 = vpack.c.bf16 %v436_v33, %v436_v33  ;;  %v7097_v41 = vpop.f32.mrf.mxu1 }
  0xe5   : > { %v8145_v30 = vpack.c.bf16 %v396_v24, %v396_v24  ;;  %v417_v31 = vadd.f32 %v7089_v27, %v8119_v10  ;;  %737 = vrot.lane.b32.xlu1 %v8133_v23, %s7997_s20  ;;  %523 = vst.msk [vmem:[#allocation2 + $0xc] sm:$0xf] %vm519_vm1, %v8133_v23  ;;  %v8172_v44 = vpack.c.bf16 %v428_v39, %v428_v39 }
  0xe6   : > { %v408_v34 = vpop.f32.mrf.mxu0  ;;  %v449_v45 = vadd.f32 %v7097_v41, %v8119_v10  ;;  %531 = vst.msk [vmem:[#allocation2 + $0x2c] sm:$0xf] %vm519_vm1, %v8162_v38  ;;  %v440_v47 = vpop.f32.mrf.mxu1 }
  0xe7   : > { %v8157_v36 = vpack.c.bf16 %v417_v31, %v417_v31  ;;  %v409_v37 = vadd.f32 %v8119_v10, %v408_v34  ;;  %733 = vrot.lane.b32.xlu0 %v8145_v30, %s7997_s20  ;;  %521 = vst.msk [vmem:[#allocation2 + $0x4] sm:$0xf] %vm519_vm1, %v8145_v30  ;;  %v441_v51 = vadd.f32 %v8119_v10, %v440_v47  ;;  %529 = vst.msk [vmem:[#allocation2 + $0x24] sm:$0xf] %vm519_vm1, %v8172_v44 }
  0xe8   : > { %v7090_v40 = vpop.f32.mrf.mxu0  ;;  %v8184_v50 = vpack.c.bf16 %v449_v45, %v449_v45  ;;  %v7098_v52 = vpop.f32.mrf.mxu1 }
  0xe9   : > { %v8169_v42 = vpack.c.bf16 %v409_v37, %v409_v37  ;;  %v420_v43 = vadd.f32 %v7090_v40, %v8119_v10  ;;  %526 = vst.msk [vmem:[#allocation2 + $0x18] sm:$0xf] %vm519_vm1, %v8157_v36  ;;  %v8197_v54 = vpack.c.bf16 %v441_v51, %v441_v51  ;;  %v452_v55 = vadd.f32 %v7098_v52, %v8119_v10 }
  0xea   : > { %v411_v46 = vpop.f32.mrf.mxu0  ;;  %534 = vst.msk [vmem:[#allocation2 + $0x38] sm:$0xf] %vm519_vm1, %v8184_v50  ;;  %v443_v56 = vpop.f32.mrf.mxu1 }
  0xeb   : > { %v8179_v48 = vpack.c.bf16 %v420_v43, %v420_v43  ;;  %v412_v49 = vadd.f32 %v8119_v10, %v411_v46  ;;  %739 = vrot.lane.b32.xlu0 %v8169_v42, %s7997_s20  ;;  %524 = vst.msk [vmem:[#allocation2 + $0x10] sm:$0xf] %vm519_vm1, %v8169_v42  ;;  %v8208_v57 = vpack.c.bf16 %v452_v55, %v452_v55  ;;  %532 = vst.msk [vmem:[#allocation2 + $0x30] sm:$0xf] %vm519_vm1, %v8197_v54 }
  0xec   : > { %v444_v58 = vadd.f32 %v8119_v10, %v443_v56  ;;  %v7576_v16 = vld [vmem:[#allocation2 + $0x8] sm:$0xff]  }
  0xed   : > { %v8195_v53 = vpack.c.bf16 %v412_v49, %v412_v49  ;;  %527 = vst.msk [vmem:[#allocation2 + $0x1c] sm:$0xf] %vm519_vm1, %v8179_v48  ;;  %535 = vst.msk [vmem:[#allocation2 + $0x3c] sm:$0xf] %vm519_vm1, %v8208_v57 }
  0xee   : > { %v8215_v59 = vpack.c.bf16 %v444_v58, %v444_v58  ;;  %v7574_v10 = vld [vmem:[#allocation2] sm:$0xff]  }
  0xef   : > { %741 = vrot.lane.b32.xlu1 %v8195_v53, %s7997_s20  ;;  %743 = vrot.lane.b32.xlu0 %v8157_v36, %s7997_s20  ;;  %525 = vst.msk [vmem:[#allocation2 + $0x14] sm:$0xf] %vm519_vm1, %v8195_v53  ;;  %v7580_v31 = vld [vmem:[#allocation2 + $0x20] sm:$0xff]  }
  0xf0   : > { %533 = vst.msk [vmem:[#allocation2 + $0x34] sm:$0xf] %vm519_vm1, %v8215_v59 }
  0xf3   : > { %745 = vrot.lane.b32.xlu1 %v8179_v48, %s7997_s20  ;;  %747 = vrot.lane.b32.xlu0 %v8150_v32, %s7997_s20 }
  0xf4   : > { %v7583_v45 = vld [vmem:[#allocation2 + $0x18] sm:$0xff]  }
  0xf6   : > { %v7579_v28 = vld [vmem:[#allocation2 + $0x10] sm:$0xff]  }
  0xf7   : > { %749 = vrot.lane.b32.xlu1 %v8172_v44, %s7997_s20  ;;  %751 = vrot.lane.b32.xlu0 %v8138_v25, %s7997_s20  ;;  %v7584_v46 = vld [vmem:[#allocation2 + $0x30] sm:$0xff]  }
  0xfb   : > { %753 = vrot.lane.b32.xlu1 %v8162_v38, %s7997_s20  ;;  %755 = vrot.lane.b32.xlu0 %v8197_v54, %s7997_s20 }
  0xff   : > { %757 = vrot.lane.b32.xlu1 %v8215_v59, %s7997_s20  ;;  %759 = vrot.lane.b32.xlu0 %v8184_v50, %s7997_s20 }
 0x103   : > { %761 = vrot.lane.b32.xlu1 %v8208_v57, %s7997_s20  ;;  %993 = vrot.lane.b32.xlu0 %v8145_v30, %s8000_s26  ;;  %s8006_s20 = smov 48  }
 0x107   : > { %991 = vrot.lane.b32.xlu1 %v8125_v18, %s8000_s26  ;;  %1007 = vrot.lane.b32.xlu0 %v8150_v32, %s8000_s26 }
 0x10b   : > { %995 = vrot.lane.b32.xlu1 %v8122_v14, %s8000_s26  ;;  %1011 = vrot.lane.b32.xlu0 %v8138_v25, %s8000_s26 }
 0x10f   : > { %997 = vrot.lane.b32.xlu1 %v8133_v23, %s8000_s26  ;;  %1015 = vrot.lane.b32.xlu0 %v8197_v54, %s8000_s26 }
 0x113   : > { %999 = vrot.lane.b32.xlu1 %v8169_v42, %s8000_s26  ;;  %1019 = vrot.lane.b32.xlu0 %v8184_v50, %s8000_s26 }
 0x117   : > { %1003 = vrot.lane.b32.xlu1 %v8157_v36, %s8000_s26  ;;  %796 = vrot.lane.b32.xlu0 %v8125_v18, %s8001_s28 }
 0x11b   : > { %1005 = vrot.lane.b32.xlu1 %v8179_v48, %s8000_s26  ;;  %800 = vrot.lane.b32.xlu0 %v8122_v14, %s8001_s28 }
 0x11f   : > { %1009 = vrot.lane.b32.xlu1 %v8172_v44, %s8000_s26  ;;  %536 = vrot.lane.b32.xlu0 %v8125_v18, %s8002_s29 }
 0x123   : > { %1013 = vrot.lane.b32.xlu1 %v8162_v38, %s8000_s26  ;;  %804 = vrot.lane.b32.xlu0 %v8169_v42, %s8001_s28 }
 0x127   : > { %1021 = vrot.lane.b32.xlu1 %v8208_v57, %s8000_s26  ;;  %540 = vrot.lane.b32.xlu0 %v8122_v14, %s8002_s29 }
 0x12b   : > { %798 = vrot.lane.b32.xlu1 %v8145_v30, %s8001_s28  ;;  %808 = vrot.lane.b32.xlu0 %v8157_v36, %s8001_s28 }
 0x12f   : > { %802 = vrot.lane.b32.xlu1 %v8133_v23, %s8001_s28  ;;  %544 = vrot.lane.b32.xlu0 %v8169_v42, %s8002_s29 }
 0x133   : > { %538 = vrot.lane.b32.xlu1 %v8145_v30, %s8002_s29  ;;  %812 = vrot.lane.b32.xlu0 %v8150_v32, %s8001_s28 }
 0x137   : > { %542 = vrot.lane.b32.xlu1 %v8133_v23, %s8002_s29  ;;  %1001 = vrot.lane.b32.xlu0 %v8195_v53, %s8000_s26 }
 0x13b   : > { %810 = vrot.lane.b32.xlu1 %v8179_v48, %s8001_s28 }
 0x13f   : > { %1017 = vrot.lane.b32.xlu1 %v8215_v59, %s8000_s26  ;;  %s8007_s26 = smov 72  }
 0x143   : > { %806 = vrot.lane.b32.xlu1 %v8195_v53, %s8001_s28 }
 0x147   : > { %546 = vrot.lane.b32.xlu1 %v8195_v53, %s8002_s29 }
 0x153   : > { %v736_v60 = vpop.permute.xlu1 %735 }
 0x154   : > { %782 = vst.msk [vmem:[#allocation2 + $0x108] sm:$0xf] %vm519_vm1, %v736_v60 }
 0x155   : > { %v732_v61 = vpop.permute.xlu0 %731 }
 0x156   : > { %780 = vst.msk [vmem:[#allocation2 + $0x100] sm:$0xf] %vm519_vm1, %v732_v61 }
 0x157   : > { %v738_v62 = vpop.permute.xlu1 %737 }
 0x158   : > { %783 = vst.msk [vmem:[#allocation2 + $0x10c] sm:$0xf] %vm519_vm1, %v738_v62  ;;  %v7587_v62 = vld [vmem:[#allocation2 + $0x28] sm:$0xff]  }
 0x159   : > { %v734_v63 = vpop.permute.xlu0 %733 }
 0x15a   : > { %781 = vst.msk [vmem:[#allocation2 + $0x104] sm:$0xf] %vm519_vm1, %v734_v63 }
 0x15d   : > { %v740_v0 = vpop.permute.xlu0 %739 }
 0x15e   : > { %784 = vst.msk [vmem:[#allocation2 + $0x110] sm:$0xf] %vm519_vm1, %v740_v0 }
 0x15f   : > { %v7575_v7 = vld [vmem:[#allocation2 + $0x108] sm:$0xff]  }
 0x160   : > { %v1373_v11 = vsel %vm1311_vm3, %v7575_v7, 0 }
 0x161   : > { %v742_v1 = vpop.permute.xlu1 %741  ;;  %v744_v2 = vpop.permute.xlu0 %743  ;;  %v7573_v3 = vld [vmem:[#allocation2 + $0x100] sm:$0xff]  }
 0x162   : > { %785 = vst.msk [vmem:[#allocation2 + $0x114] sm:$0xf] %vm519_vm1, %v742_v1  ;;  %786 = vst.msk [vmem:[#allocation2 + $0x118] sm:$0xf] %vm519_vm1, %v744_v2  ;;  %v1316_v4 = vsel %vm1311_vm3, %v7573_v3, 0 }
 0x163   : > { %7100 = vmatpush3.bf16.xpose.msra.mxu1 %v1316_v4  ;;  %v7589_v4 = vld [vmem:[#allocation2 + $0x38] sm:$0xff]  }
 0x164   : > { %7105 = vmatprep.subr.bf16.mxu1 %v10213_v29 }
 0x165   : > { %v746_v5 = vpop.permute.xlu1 %745  ;;  %v748_v6 = vpop.permute.xlu0 %747 }
 0x166   : > { %787 = vst.msk [vmem:[#allocation2 + $0x11c] sm:$0xf] %vm519_vm1, %v746_v5  ;;  %788 = vst.msk [vmem:[#allocation2 + $0x120] sm:$0xf] %vm519_vm1, %v748_v6 }
 0x169   : > { %v750_v8 = vpop.permute.xlu1 %749  ;;  %v752_v9 = vpop.permute.xlu0 %751  ;;  %v7578_v15 = vld [vmem:[#allocation2 + $0x110] sm:$0xff]  }
 0x16a   : > { %789 = vst.msk [vmem:[#allocation2 + $0x124] sm:$0xf] %vm519_vm1, %v750_v8  ;;  %790 = vst.msk [vmem:[#allocation2 + $0x128] sm:$0xf] %vm519_vm1, %v752_v9  ;;  %7102 = vmatmul.mubr.msk.bf16.vlgmr.msra.gmra.mxu1 %vm1311_vm3, %v7574_v10  ;;  %v1430_v22 = vsel %vm1311_vm3, %v7578_v15, 0 }
 0x16b   : > { %7106 = vmatpush3.bf16.xpose.msra.mxu1 %v1373_v11  ;;  %7107 = vmatprep.mubr.msk.bf16.mxu1 %vm7999_vm2, %v10213_v29 }
 0x16c   : > { %7111 = vmatprep.subr.bf16.mxu1 %v10213_v29 }
 0x16d   : > { %v754_v12 = vpop.permute.xlu1 %753  ;;  %v756_v13 = vpop.permute.xlu0 %755  ;;  %v7582_v27 = vld [vmem:[#allocation2 + $0x118] sm:$0xff]  }
 0x16e   : > { %791 = vst.msk [vmem:[#allocation2 + $0x12c] sm:$0xf] %vm519_vm1, %v754_v12  ;;  %792 = vst.msk [vmem:[#allocation2 + $0x130] sm:$0xf] %vm519_vm1, %v756_v13  ;;  %v1487_v39 = vsel %vm1311_vm3, %v7582_v27, 0 }
 0x171   : > { %v758_v17 = vpop.permute.xlu1 %757  ;;  %v760_v19 = vpop.permute.xlu0 %759  ;;  %v7577_v20 = vld [vmem:[#allocation2 + $0x120] sm:$0xff]  }
 0x172   : > { %793 = vst.msk [vmem:[#allocation2 + $0x134] sm:$0xf] %vm519_vm1, %v758_v17  ;;  %794 = vst.msk [vmem:[#allocation2 + $0x138] sm:$0xf] %vm519_vm1, %v760_v19  ;;  %7108 = vmatmul.mubr.msk.bf16.vlgmr.msra.gmra.mxu1 %vm1311_vm3, %v7576_v16  ;;  %v1544_v21 = vsel %vm1311_vm3, %v7577_v20, 0 }
 0x173   : > { %7124 = vmatpush3.bf16.xpose.msra.mxu0 %v1544_v21  ;;  %7112 = vmatpush3.bf16.xpose.msra.mxu1 %v1430_v22 }
 0x174   : > { %7113 = vmatprep.mubr.msk.bf16.mxu1 %vm7999_vm2, %v10213_v29  ;;  %7117 = vmatprep.subr.bf16.mxu1 %v10213_v29 }
 0x175   : > { %v762_v24 = vpop.permute.xlu1 %761  ;;  %v994_v26 = vpop.permute.xlu0 %993  ;;  %7135 = vmatprep.subr.bf16.mxu0 %v10213_v29  ;;  %v7586_v43 = vld [vmem:[#allocation2 + $0x128] sm:$0xff]  }
 0x176   : > { %795 = vst.msk [vmem:[#allocation2 + $0x13c] sm:$0xf] %vm519_vm1, %v762_v24  ;;  %1041 = vst.msk [vmem:[#allocation2 + $0x204] sm:$0xf] %vm519_vm1, %v994_v26  ;;  %v1601_v52 = vsel %vm1311_vm3, %v7586_v43, 0  ;;  %v8393_v26 = vld [vmem:[%s10209_s3] sm:$0xff] }
 0x177   : > { %v8403_v43 = vld [vmem:[%s10209_s3 + $0x8] sm:$0xff] }
 0x179   : > { %v992_v33 = vpop.permute.xlu1 %991  ;;  %v1008_v34 = vpop.permute.xlu0 %1007  ;;  %v7581_v35 = vld [vmem:[#allocation2 + $0x130] sm:$0xff]  }
 0x17a   : > { %1040 = vst.msk [vmem:[#allocation2 + $0x200] sm:$0xf] %vm519_vm1, %v992_v33  ;;  %1048 = vst.msk [vmem:[#allocation2 + $0x220] sm:$0xf] %vm519_vm1, %v1008_v34  ;;  %7114 = vmatmul.mubr.msk.bf16.vlgmr.msra.gmra.mxu1 %vm1311_vm3, %v7579_v28  ;;  %7126 = vmatmul.mubr.msk.bf16.vlgmr.msra.gmra.mxu0 %vm1311_vm3, %v7580_v31  ;;  %v1658_v37 = vsel %vm1311_vm3, %v7581_v35, 0 }
 0x17b   : > { %7136 = vmatpush3.bf16.xpose.msra.mxu0 %v1658_v37  ;;  %7118 = vmatpush3.bf16.xpose.msra.mxu1 %v1487_v39 }
 0x17c   : > { %7119 = vmatprep.mubr.msk.bf16.mxu1 %vm7999_vm2, %v10213_v29  ;;  %7137 = vmatprep.mubr.msk.bf16.mxu0 %vm7999_vm2, %v10213_v29 }
 0x17d   : > { %v996_v40 = vpop.permute.xlu1 %995  ;;  %v1012_v41 = vpop.permute.xlu0 %1011  ;;  %7129 = vmatprep.subr.bf16.mxu1 %v10213_v29  ;;  %7147 = vmatprep.subr.bf16.mxu0 %v10213_v29  ;;  %v7588_v58 = vld [vmem:[#allocation2 + $0x138] sm:$0xff]  }
 0x17e   : > { %1042 = vst.msk [vmem:[#allocation2 + $0x208] sm:$0xf] %vm519_vm1, %v996_v40  ;;  %1050 = vst.msk [vmem:[#allocation2 + $0x228] sm:$0xf] %vm519_vm1, %v1012_v41  ;;  %v1715_v63 = vsel %vm1311_vm3, %v7588_v58, 0 }
 0x181   : > { %v998_v47 = vpop.permute.xlu1 %997  ;;  %v1016_v49 = vpop.permute.xlu0 %1015  ;;  %v7585_v51 = vld [vmem:[#allocation2 + $0x200] sm:$0xff]  }
 0x182   : > { %1043 = vst.msk [vmem:[#allocation2 + $0x20c] sm:$0xf] %vm519_vm1, %v998_v47  ;;  %1052 = vst.msk [vmem:[#allocation2 + $0x230] sm:$0xf] %vm519_vm1, %v1016_v49  ;;  %7120 = vmatmul.mubr.msk.bf16.vlgmr.msra.gmra.mxu1 %vm1311_vm3, %v7583_v45  ;;  %7138 = vmatmul.mubr.msk.bf16.vlgmr.msra.gmra.mxu0 %vm1311_vm3, %v7584_v46 }
 0x183   : > { %7148 = vmatpush3.bf16.msra.mxu0 %v7585_v51  ;;  %7130 = vmatpush3.bf16.xpose.msra.mxu1 %v1601_v52 }
 0x184   : > { %7131 = vmatprep.mubr.msk.bf16.mxu1 %vm7999_vm2, %v10213_v29  ;;  %7141 = vmatprep.subr.bf16.mxu1 %v10213_v29 }
 0x185   : > { %v1000_v55 = vpop.permute.xlu1 %999  ;;  %v1020_v56 = vpop.permute.xlu0 %1019  ;;  %7149 = vmatprep.mubr.msk.bf16.mxu0 %vm7999_vm2, %v10213_v29  ;;  %7159 = vmatprep.subr.bf16.mxu0 %v10213_v29 }
 0x186   : > { %1044 = vst.msk [vmem:[#allocation2 + $0x210] sm:$0xf] %vm519_vm1, %v1000_v55  ;;  %1054 = vst.msk [vmem:[#allocation2 + $0x238] sm:$0xf] %vm519_vm1, %v1020_v56 }
 0x189   : > { %v1004_v60 = vpop.permute.xlu1 %1003  ;;  %v797_v61 = vpop.permute.xlu0 %796  ;;  %v7590_v5 = vld [vmem:[#allocation2 + $0x208] sm:$0xff]  }
 0x18a   : > { %1046 = vst.msk [vmem:[#allocation2 + $0x218] sm:$0xf] %vm519_vm1, %v1004_v60  ;;  %845 = vst.msk [vmem:[#allocation2 + $0x140] sm:$0xf] %vm519_vm1, %v797_v61  ;;  %7132 = vmatmul.mubr.msk.bf16.vlgmr.msra.gmra.mxu1 %vm1311_vm3, %v7587_v62 }
 0x18b   : > { %7142 = vmatpush3.bf16.xpose.msra.mxu1 %v1715_v63  ;;  %7143 = vmatprep.mubr.msk.bf16.mxu1 %vm7999_vm2, %v10213_v29 }
 0x18c   : > { %7153 = vmatprep.subr.bf16.mxu1 %v10213_v29 }
 0x18d   : > { %v1006_v0 = vpop.permute.xlu1 %1005  ;;  %v801_v1 = vpop.permute.xlu0 %800 }
 0x18e   : > { %1047 = vst.msk [vmem:[#allocation2 + $0x21c] sm:$0xf] %vm519_vm1, %v1006_v0  ;;  %847 = vst.msk [vmem:[#allocation2 + $0x148] sm:$0xf] %vm519_vm1, %v801_v1 }
 0x191   : > { %v1010_v2 = vpop.permute.xlu1 %1009  ;;  %v537_v3 = vpop.permute.xlu0 %536 }
 0x192   : > { %1049 = vst.msk [vmem:[#allocation2 + $0x224] sm:$0xf] %vm519_vm1, %v1010_v2  ;;  %585 = vst.msk [vmem:[#allocation2 + $0x40] sm:$0xf] %vm519_vm1, %v537_v3  ;;  %7144 = vmatmul.mubr.msk.bf16.vlgmr.msra.gmra.mxu1 %vm1311_vm3, %v7589_v4 }
 0x193   : > { %7154 = vmatpush3.bf16.msra.mxu1 %v7590_v5  ;;  %7155 = vmatprep.mubr.msk.bf16.mxu1 %vm7999_vm2, %v10213_v29 }
 0x194   : > { %7165 = vmatprep.subr.bf16.mxu1 %v10213_v29 }
 0x195   : > { %v1014_v6 = vpop.permute.xlu1 %1013  ;;  %v805_v7 = vpop.permute.xlu0 %804 }
 0x196   : > { %1051 = vst.msk [vmem:[#allocation2 + $0x22c] sm:$0xf] %vm519_vm1, %v1014_v6  ;;  %849 = vst.msk [vmem:[#allocation2 + $0x150] sm:$0xf] %vm519_vm1, %v805_v7 }
 0x199   : > { %v1022_v8 = vpop.permute.xlu1 %1021  ;;  %v541_v9 = vpop.permute.xlu0 %540 }
 0x19a   : > { %1055 = vst.msk [vmem:[#allocation2 + $0x23c] sm:$0xf] %vm519_vm1, %v1022_v8  ;;  %587 = vst.msk [vmem:[#allocation2 + $0x48] sm:$0xf] %vm519_vm1, %v541_v9 }
 0x19d   : > { %v799_v10 = vpop.permute.xlu1 %798  ;;  %v809_v11 = vpop.permute.xlu0 %808 }
 0x19e   : > { %846 = vst.msk [vmem:[#allocation2 + $0x144] sm:$0xf] %vm519_vm1, %v799_v10  ;;  %851 = vst.msk [vmem:[#allocation2 + $0x158] sm:$0xf] %vm519_vm1, %v809_v11 }
 0x1a1   : > { %v803_v12 = vpop.permute.xlu1 %802  ;;  %v545_v13 = vpop.permute.xlu0 %544 }
 0x1a2   : > { %848 = vst.msk [vmem:[#allocation2 + $0x14c] sm:$0xf] %vm519_vm1, %v803_v12  ;;  %589 = vst.msk [vmem:[#allocation2 + $0x50] sm:$0xf] %vm519_vm1, %v545_v13 }
 0x1a5   : > { %v539_v15 = vpop.permute.xlu1 %538  ;;  %v813_v16 = vpop.permute.xlu0 %812 }
 0x1a6   : > { %586 = vst.msk [vmem:[#allocation2 + $0x44] sm:$0xf] %vm519_vm1, %v539_v15  ;;  %853 = vst.msk [vmem:[#allocation2 + $0x160] sm:$0xf] %vm519_vm1, %v813_v16 }
 0x1a9   : > { %v543_v17 = vpop.permute.xlu1 %542  ;;  %v1002_v19 = vpop.permute.xlu0 %1001 }
 0x1aa   : > { %588 = vst.msk [vmem:[#allocation2 + $0x4c] sm:$0xf] %vm519_vm1, %v543_v17  ;;  %1045 = vst.msk [vmem:[#allocation2 + $0x214] sm:$0xf] %vm519_vm1, %v1002_v19 }
 0x1ad   : > { %v811_v20 = vpop.permute.xlu1 %810 }
 0x1ae   : > { %852 = vst.msk [vmem:[#allocation2 + $0x15c] sm:$0xf] %vm519_vm1, %v811_v20 }
 0x1b1   : > { %v1018_v21 = vpop.permute.xlu1 %1017 }
 0x1b2   : > { %1053 = vst.msk [vmem:[#allocation2 + $0x234] sm:$0xf] %vm519_vm1, %v1018_v21 }
 0x1b5   : > { %v807_v22 = vpop.permute.xlu1 %806 }
 0x1b6   : > { %850 = vst.msk [vmem:[#allocation2 + $0x154] sm:$0xf] %vm519_vm1, %v807_v22 }
 0x1b9   : > { %v547_v24 = vpop.permute.xlu1 %546 }
 0x1ba   : > { %590 = vst.msk [vmem:[#allocation2 + $0x54] sm:$0xf] %vm519_vm1, %v547_v24 }
 0x22a   : > { %v1352_v27 = vpop.f32.mrf.mxu1 }
 0x22b   : > { %v8396_v28 = vadd.f32 %v1352_v27, %v8393_v26 }
 0x22c   : > { %v7103_v31 = vpop.f32.mrf.mxu1 }
 0x22d   : > { %v1759_v33 = vsel %vm1758_vm4, %v8396_v28, -inf }
 0x22e   : > { %1760 = vmax.xlane.f32.xlu0 %v1759_v33  ;;  %v1355_v34 = vpop.f32.mrf.mxu1 }
 0x22f   : > { %v8409_v52 = vadd.f32 %v1355_v34, %v8403_v43 }
 0x230   : > { %v7104_v35 = vpop.f32.mrf.mxu1 }
 0x231   : > { %v1762_v1 = vsel %vm1758_vm4, %v8409_v52, -inf }
 0x232   : > { %v1409_v37 = vpop.f32.mrf.mxu1 }
 0x233   : > { %v8417_v63 = vadd.f32 %v1409_v37, %v8393_v26 }
 0x234   : > { %v7109_v39 = vpop.f32.mrf.mxu1 }
 0x235   : > { %v1765_v7 = vsel %vm1758_vm4, %v8417_v63, -inf }
 0x236   : > { %v1412_v40 = vpop.f32.mrf.mxu1 }
 0x237   : > { %v8432_v13 = vadd.f32 %v1412_v40, %v8403_v43 }
 0x238   : > { %v7110_v41 = vpop.f32.mrf.mxu1 }
 0x239   : > { %v1768_v24 = vsel %vm1758_vm4, %v8432_v13, -inf }
 0x23a   : > { %v1466_v45 = vpop.f32.mrf.mxu1  ;;  %v1580_v46 = vpop.f32.mrf.mxu0 }
 0x23b   : > { %v8406_v47 = vadd.f32 %v1580_v46, %v8393_v26  ;;  %v8435_v15 = vadd.f32 %v1466_v45, %v8393_v26 }
 0x23c   : > { %v7115_v49 = vpop.f32.mrf.mxu1  ;;  %v7127_v51 = vpop.f32.mrf.mxu0 }
 0x23d   : > { %v1783_v55 = vsel %vm1758_vm4, %v8406_v47, -inf  ;;  %v1771_v27 = vsel %vm1758_vm4, %v8435_v15, -inf }
 0x23e   : > { %1784 = vmax.xlane.f32.xlu1 %v1783_v55  ;;  %v1469_v56 = vpop.f32.mrf.mxu1  ;;  %v1583_v58 = vpop.f32.mrf.mxu0 }
 0x23f   : > { %v8414_v60 = vadd.f32 %v1583_v58, %v8403_v43  ;;  %v8442_v21 = vadd.f32 %v1469_v56, %v8403_v43 }
 0x240   : > { %v7116_v61 = vpop.f32.mrf.mxu1  ;;  %v7128_v62 = vpop.f32.mrf.mxu0 }
 0x241   : > { %v1786_v0 = vsel %vm1758_vm4, %v8414_v60, -inf  ;;  %v1774_v35 = vsel %vm1758_vm4, %v8442_v21, -inf }
 0x242   : > { %v1694_v2 = vpop.f32.mrf.mxu0  ;;  %1787 = vmax.xlane.f32.xlu0 %v1786_v0  ;;  %1763 = vmax.xlane.f32.xlu1 %v1762_v1  ;;  %v1523_v3 = vpop.f32.mrf.mxu1 }
 0x243   : > { %v8424_v6 = vadd.f32 %v1694_v2, %v8393_v26  ;;  %v8445_v22 = vadd.f32 %v1523_v3, %v8393_v26 }
 0x244   : > { %v7121_v4 = vpop.f32.mrf.mxu1  ;;  %v7139_v5 = vpop.f32.mrf.mxu0 }
 0x245   : > { %v1795_v17 = vsel %vm1758_vm4, %v8424_v6, -inf  ;;  %v1777_v37 = vsel %vm1758_vm4, %v8445_v22, -inf }
 0x246   : > { %v1697_v8 = vpop.f32.mrf.mxu0  ;;  %1766 = vmax.xlane.f32.xlu0 %v1765_v7  ;;  %v1526_v9 = vpop.f32.mrf.mxu1 }
 0x247   : > { %v8429_v10 = vadd.f32 %v1697_v8, %v8403_v43  ;;  %v8452_v34 = vadd.f32 %v1526_v9, %v8403_v43 }
 0x248   : > { %v7122_v11 = vpop.f32.mrf.mxu1  ;;  %v7140_v12 = vpop.f32.mrf.mxu0 }
 0x249   : > { %v1798_v16 = vsel %vm1758_vm4, %v8429_v10, -inf  ;;  %v1780_v41 = vsel %vm1758_vm4, %v8452_v34, -inf }
 0x24a   : > { %1799 = vmax.xlane.f32.xlu1 %v1798_v16  ;;  %1796 = vmax.xlane.f32.xlu0 %v1795_v17  ;;  %v1637_v19 = vpop.f32.mrf.mxu1 }
 0x24b   : > { %v8465_v49 = vadd.f32 %v1637_v19, %v8393_v26 }
 0x24c   : > { %v7133_v20 = vpop.f32.mrf.mxu1 }
 0x24d   : > { %v1789_v55 = vsel %vm1758_vm4, %v8465_v49, -inf }
 0x24e   : > { %1769 = vmax.xlane.f32.xlu0 %v1768_v24  ;;  %1772 = vmax.xlane.f32.xlu1 %v1771_v27  ;;  %v1640_v31 = vpop.f32.mrf.mxu1 }
 0x24f   : > { %v8468_v51 = vadd.f32 %v1640_v31, %v8403_v43 }
 0x250   : > { %v7134_v33 = vpop.f32.mrf.mxu1 }
 0x251   : > { %v1792_v58 = vsel %vm1758_vm4, %v8468_v51, -inf }
 0x252   : > { %1775 = vmax.xlane.f32.xlu0 %v1774_v35  ;;  %1778 = vmax.xlane.f32.xlu1 %v1777_v37  ;;  %v1751_v39 = vpop.f32.mrf.mxu1 }
 0x253   : > { %v8473_v56 = vadd.f32 %v1751_v39, %v8393_v26 }
 0x254   : > { %v7145_v40 = vpop.f32.mrf.mxu1 }
 0x255   : > { %v1801_v62 = vsel %vm1758_vm4, %v8473_v56, -inf }
 0x256   : > { %1781 = vmax.xlane.f32.xlu0 %v1780_v41  ;;  %v1754_v45 = vpop.f32.mrf.mxu1 }
 0x257   : > { %v8478_v61 = vadd.f32 %v1754_v45, %v8403_v43 }
 0x258   : > { %v7146_v46 = vpop.f32.mrf.mxu1 }
 0x259   : > { %v1804_v0 = vsel %vm1758_vm4, %v8478_v61, -inf  ;;  %v7591_v46 = vld [vmem:[#allocation2 + $0x210] sm:$0xff]  }
 0x263   : > { %814 = vrot.lane.b32.xlu1 %v8172_v44, %s8001_s28 }
 0x26c   : > { %548 = vrot.lane.b32.xlu0 %v8157_v36, %s8002_s29 }
 0x287   : > { %1790 = vmax.xlane.f32.xlu1 %v1789_v55 }
 0x28b   : > { %1793 = vmax.xlane.f32.xlu0 %v1792_v58 }
 0x28f   : > { %1802 = vmax.xlane.f32.xlu0 %v1801_v62 }
 0x293   : > { %1805 = vmax.xlane.f32.xlu0 %v1804_v0 }
 0x298   : > { %550 = vrot.lane.b32.xlu1 %v8179_v48, %s8002_s29 }
 0x29c   : > { %818 = vrot.lane.b32.xlu1 %v8162_v38, %s8001_s28 }
 0x2a0   : > { %554 = vrot.lane.b32.xlu1 %v8172_v44, %s8002_s29 }
 0x2a4   : > { %822 = vrot.lane.b32.xlu1 %v8215_v59, %s8001_s28 }
 0x2a8   : > { %558 = vrot.lane.b32.xlu1 %v8162_v38, %s8002_s29 }
 0x2a9   : > { %816 = vrot.lane.b32.xlu0 %v8138_v25, %s8001_s28 }
 0x2ac   : > { %826 = vrot.lane.b32.xlu1 %v8208_v57, %s8001_s28 }
 0x2ad   : > { %552 = vrot.lane.b32.xlu0 %v8150_v32, %s8002_s29 }
 0x2b0   : > { %562 = vrot.lane.b32.xlu1 %v8215_v59, %s8002_s29 }
 0x2b1   : > { %820 = vrot.lane.b32.xlu0 %v8197_v54, %s8001_s28 }
 0x2b4   : > { %566 = vrot.lane.b32.xlu1 %v8208_v57, %s8002_s29 }
 0x2b5   : > { %556 = vrot.lane.b32.xlu0 %v8138_v25, %s8002_s29 }
 0x2b7   : > { %v1761_v26 = vpop.xlane.xlu0 %1760 }
 0x2b8   : > { %1056 = vrot.lane.b32.xlu1 %v8125_v18, %s8003_s13  ;;  %v1807_v1 = vsub.f32 %v8396_v28, %v1761_v26 }
 0x2b9   : > { %824 = vrot.lane.b32.xlu0 %v8184_v50, %s8001_s28  ;;  %s8008_s28 = smov 104  }
 0x2ba   : > { %v1823_v4 = vmul.f32 1.442695, %v1807_v1 }
 0x2bc   : > { %1060 = vrot.lane.b32.xlu1 %v8122_v14, %s8003_s13  ;;  %7679 = vpow2.f32 %v1823_v4 }
 0x2bd   : > { %560 = vrot.lane.b32.xlu0 %v8197_v54, %s8002_s29 }
 0x2c0   : > { %1062 = vrot.lane.b32.xlu1 %v8133_v23, %s8003_s13 }
 0x2c1   : > { %564 = vrot.lane.b32.xlu0 %v8184_v50, %s8002_s29 }
 0x2c4   : > { %1064 = vrot.lane.b32.xlu1 %v8169_v42, %s8003_s13 }
 0x2c5   : > { %1058 = vrot.lane.b32.xlu0 %v8145_v30, %s8003_s13 }
 0x2c7   : > { %v8524_v43 = vpop.xlane.xlu1 %1784 }
 0x2c8   : > { %1068 = vrot.lane.b32.xlu1 %v8157_v36, %s8003_s13  ;;  %v1815_v41 = vsub.f32 %v8406_v47, %v8524_v43 }
 0x2c9   : > { %1066 = vrot.lane.b32.xlu0 %v8195_v53, %s8003_s13 }
 0x2cb   : > { %v1788_v2 = vpop.xlane.xlu0 %1787  ;;  %v1764_v3 = vpop.xlane.xlu1 %1763 }
 0x2cc   : > { %v1808_v5 = vsub.f32 %v8409_v52, %v1764_v3  ;;  %1070 = vrot.lane.b32.xlu1 %v8179_v48, %s8003_s13  ;;  %v1816_v35 = vsub.f32 %v8414_v60, %v1788_v2  ;;  %v7592_v2 = vld [vmem:[#allocation2 + $0x218] sm:$0xff]  }
 0x2cd   : > { %1072 = vrot.lane.b32.xlu0 %v8150_v32, %s8003_s13 }
 0x2ce   : > { %v1825_v7 = vmul.f32 1.442695, %v1808_v5  ;;  %v1841_v60 = vmul.f32 1.442695, %v1816_v35  ;;  %v7593_v5 = vld [vmem:[#allocation2 + $0x220] sm:$0xff]  }
 0x2cf   : > { %v1767_v8 = vpop.xlane.xlu0 %1766 }
 0x2d0   : > { %1074 = vrot.lane.b32.xlu1 %v8172_v44, %s8003_s13  ;;  %7681 = vpow2.f32 %v1825_v7  ;;  %v1809_v28 = vsub.f32 %v8417_v63, %v1767_v8 }
 0x2d1   : > { %1076 = vrot.lane.b32.xlu0 %v8138_v25, %s8003_s13 }
 0x2d2   : > { %v1827_v11 = vmul.f32 1.442695, %v1809_v28 }
 0x2d3   : > { %v1800_v9 = vpop.xlane.xlu1 %1799  ;;  %v1797_v52 = vpop.xlane.xlu0 %1796 }
 0x2d4   : > { %1078 = vrot.lane.b32.xlu1 %v8162_v38, %s8003_s13  ;;  %7683 = vpow2.f32 %v1827_v11  ;;  %v1820_v58 = vsub.f32 %v8429_v10, %v1800_v9  ;;  %v1819_v62 = vsub.f32 %v8424_v6, %v1797_v52  ;;  %v7594_v52 = vld [vmem:[#allocation2 + $0x228] sm:$0xff]  }
 0x2d5   : > { %1080 = vrot.lane.b32.xlu0 %v8197_v54, %s8003_s13 }
 0x2d6   : > { %v1849_v43 = vmul.f32 1.442695, %v1820_v58  ;;  %v1847_v10 = vmul.f32 1.442695, %v1819_v62 }
 0x2d7   : > { %v1770_v12 = vpop.xlane.xlu0 %1769  ;;  %v1773_v16 = vpop.xlane.xlu1 %1772 }
 0x2d8   : > { %v1810_v17 = vsub.f32 %v8432_v13, %v1770_v12  ;;  %v1811_v19 = vsub.f32 %v8435_v15, %v1773_v16  ;;  %1082 = vrot.lane.b32.xlu1 %v8215_v59, %s8003_s13  ;;  %v8555_v13 = vpop.eup %7679  ;;  %v7595_v16 = vld [vmem:[#allocation2 + $0x230] sm:$0xff]  }
 0x2d9   : > { %1084 = vrot.lane.b32.xlu0 %v8184_v50, %s8003_s13 }
 0x2da   : > { %v1829_v63 = vmul.f32 1.442695, %v1810_v17  ;;  %v1831_v20 = vmul.f32 1.442695, %v1811_v19 }
 0x2db   : > { %v1776_v24 = vpop.xlane.xlu0 %1775  ;;  %v1779_v27 = vpop.xlane.xlu1 %1778 }
 0x2dc   : > { %7685 = vpow2.f32 %v1829_v63  ;;  %v1812_v31 = vsub.f32 %v8442_v21, %v1776_v24  ;;  %v1813_v33 = vsub.f32 %v8445_v22, %v1779_v27  ;;  %1086 = vrot.lane.b32.xlu1 %v8208_v57, %s8003_s13  ;;  %v7596_v63 = vld [vmem:[#allocation2 + $0x140] sm:$0xff]   ;;  %v7598_v27 = vld [vmem:[#allocation2 + $0x150] sm:$0xff]   ;;  %s10136_s13 = scalar_lea.vmem [#allocation5], %s6558_s10 }
 0x2dd   : > { %861 = vrot.lane.b32.xlu0 %v8125_v18, %s8004_s14  ;;  %v8559_v15 = vpop.eup %7681  ;;  %7687 = vpow2.f32 %v1831_v20  ;;  %v2488_v24 = vsel %vm1311_vm3, %v7596_v63, 0 }
 0x2de   : > { %10230 = vst [vmem:[#allocation8_spill] sm:$0xff] %v8559_v15  ;;  %v1833_v37 = vmul.f32 1.442695, %v1812_v31  ;;  %v1835_v39 = vmul.f32 1.442695, %v1813_v33  ;;  %v1903_v22 = vpack.c.bf16 %v8559_v15, %v8555_v13  ;;  %v7597_v31 = vld [vmem:[#allocation2 + $0x40] sm:$0xff]  }
 0x2df   : > { %v815_v40 = vpop.permute.xlu1 %814  ;;  %v1782_v21 = vpop.xlane.xlu0 %1781  ;;  %v2602_v33 = vsel %vm1311_vm3, %v7598_v27, 0  ;;  %v7603_v27 = vld [vmem:[#allocation2 + $0x148] sm:$0xff]  }
 0x2e0   : > { %7689 = vpow2.f32 %v1833_v37  ;;  %854 = vst.msk [vmem:[#allocation2 + $0x164] sm:$0xf] %vm519_vm1, %v815_v40  ;;  %v1814_v45 = vsub.f32 %v8452_v34, %v1782_v21  ;;  %863 = vrot.lane.b32.xlu1 %v8145_v30, %s8004_s14  ;;  %7150 = vmatmul.mubr.msk.bf16.vlgmr.msra.gmra.mxu0 %vm1758_vm4, %v1903_v22  ;;  %v1839_v34 = vmul.f32 1.442695, %v1815_v41  ;;  %v7599_v37 = vld [vmem:[#allocation2 + $0x50] sm:$0xff]  }
 0x2e1   : > { %865 = vrot.lane.b32.xlu0 %v8122_v14, %s8004_s14  ;;  %7160 = vmatpush3.bf16.msra.mxu0 %v7591_v46  ;;  %7691 = vpow2.f32 %v1835_v39  ;;  %v8583_v0 = vpop.eup %7683 }
 0x2e2   : > { %v1837_v55 = vmul.f32 1.442695, %v1814_v45  ;;  %7161 = vmatprep.mubr.msk.bf16.mxu0 %vm7999_vm2, %v10213_v29  ;;  %7171 = vmatprep.subr.bf16.mxu0 %v10213_v29 }
 0x2e3   : > { %v549_v47 = vpop.permute.xlu0 %548 }
 0x2e4   : > { %7693 = vpow2.f32 %v1837_v55  ;;  %591 = vst.msk [vmem:[#allocation2 + $0x58] sm:$0xf] %vm519_vm1, %v549_v47  ;;  %867 = vrot.lane.b32.xlu1 %v8133_v23, %s8004_s14 }
 0x2e5   : > { %601 = vrot.lane.b32.xlu0 %v8125_v18, %s8005_s15  ;;  %7695 = vpow2.f32 %v1841_v60 }
 0x2e6   : > { %7697 = vpow2.f32 %v1839_v34 }
 0x2e7   : > { %7699 = vpow2.f32 %v1849_v43  ;;  %v7600_v35 = vld [vmem:[#allocation2 + $0x160] sm:$0xff]  }
 0x2e8   : > { %603 = vrot.lane.b32.xlu1 %v8145_v30, %s8005_s15  ;;  %7701 = vpow2.f32 %v1847_v10  ;;  %v2716_v39 = vsel %vm1311_vm3, %v7600_v35, 0 }
 0x2e9   : > { %v8587_v26 = vpop.eup %7685  ;;  %869 = vrot.lane.b32.xlu0 %v8169_v42, %s8004_s14 }
 0x2ea   : > { %10231 = vst [vmem:[#allocation9_spill] sm:$0xff] %v8587_v26  ;;  %v1904_v1 = vpack.c.bf16 %v8587_v26, %v8583_v0  ;;  %v8593_v3 = vpop.eup %7687 }
 0x2ec   : > { %7156 = vmatmul.mubr.msk.bf16.vlgmr.msra.gmra.mxu1 %vm1758_vm4, %v1904_v1  ;;  %871 = vrot.lane.b32.xlu1 %v8195_v53, %s8004_s14 }
 0x2ed   : > { %v8598_v6 = vpop.eup %7689  ;;  %7166 = vmatpush3.bf16.msra.mxu1 %v7592_v2  ;;  %605 = vrot.lane.b32.xlu0 %v8122_v14, %s8005_s15 }
 0x2ee   : > { %10232 = vst [vmem:[#allocation10_spill] sm:$0xff] %v8598_v6  ;;  %v1905_v4 = vpack.c.bf16 %v8598_v6, %v8593_v3  ;;  %7167 = vmatprep.mubr.msk.bf16.mxu1 %vm7999_vm2, %v10213_v29  ;;  %7177 = vmatprep.subr.bf16.mxu1 %v10213_v29  ;;  %v8607_v7 = vpop.eup %7691 }
 0x2f0   : > { %7162 = vmatmul.mubr.msk.bf16.vlgmr.msra.gmra.mxu0 %vm1758_vm4, %v1905_v4  ;;  %607 = vrot.lane.b32.xlu1 %v8133_v23, %s8005_s15 }
 0x2f1   : > { %v8612_v8 = vpop.eup %7693  ;;  %7172 = vmatpush3.bf16.msra.mxu0 %v7593_v5  ;;  %873 = vrot.lane.b32.xlu0 %v8157_v36, %s8004_s14 }
 0x2f2   : > { %10233 = vst [vmem:[#allocation11_spill] sm:$0xff] %v8612_v8  ;;  %v1906_v28 = vpack.c.bf16 %v8612_v8, %v8607_v7  ;;  %7173 = vmatprep.mubr.msk.bf16.mxu0 %vm7999_vm2, %v10213_v29  ;;  %7183 = vmatprep.subr.bf16.mxu0 %v10213_v29  ;;  %v8621_v9 = vpop.eup %7695 }
 0x2f3   : > { %10234 = vst [vmem:[#allocation12_spill] sm:$0xff] %v8621_v9  ;;  %v8626_v11 = vpop.eup %7697 }
 0x2f4   : > { %7168 = vmatmul.mubr.msk.bf16.vlgmr.msra.gmra.mxu1 %vm1758_vm4, %v1906_v28  ;;  %875 = vrot.lane.b32.xlu1 %v8179_v48, %s8004_s14  ;;  %v1907_v12 = vpack.c.bf16 %v8621_v9, %v8626_v11  ;;  %v8640_v17 = vpop.eup %7699 }
 0x2f5   : > { %7178 = vmatpush3.bf16.msra.mxu1 %v7594_v52  ;;  %609 = vrot.lane.b32.xlu0 %v8169_v42, %s8005_s15  ;;  %10235 = vst [vmem:[#allocation13_spill] sm:$0xff] %v8640_v17  ;;  %v8645_v19 = vpop.eup %7701 }
 0x2f6   : > { %7179 = vmatprep.mubr.msk.bf16.mxu1 %vm7999_vm2, %v10213_v29  ;;  %7189 = vmatprep.subr.bf16.mxu1 %v10213_v29  ;;  %10236 = vst [vmem:[#allocation14_spill] sm:$0xff] %v8645_v19  ;;  %v1909_v20 = vpack.c.bf16 %v8640_v17, %v8645_v19 }
 0x2f8   : > { %7174 = vmatmul.mubr.msk.bf16.vlgmr.msra.gmra.mxu0 %vm1758_vm4, %v1907_v12  ;;  %611 = vrot.lane.b32.xlu1 %v8195_v53, %s8005_s15  ;;  %v7601_v12 = vld [vmem:[#allocation2 + $0x238] sm:$0xff]  }
 0x2f9   : > { %7184 = vmatpush3.bf16.msra.mxu0 %v7595_v16  ;;  %877 = vrot.lane.b32.xlu0 %v8150_v32, %s8004_s14 }
 0x2fa   : > { %7185 = vmatprep.mubr.msk.bf16.mxu0 %vm7999_vm2, %v10213_v29  ;;  %7195 = vmatprep.subr.bf16.mxu0 %v10213_v29 }
 0x2fc   : > { %879 = vrot.lane.b32.xlu1 %v8172_v44, %s8004_s14 }
 0x2fd   : > { %613 = vrot.lane.b32.xlu0 %v8157_v36, %s8005_s15 }
 0x300   : > { %7186 = vmatmul.mubr.msk.bf16.vlgmr.msra.gmra.mxu0 %vm1758_vm4, %v1909_v20  ;;  %615 = vrot.lane.b32.xlu1 %v8179_v48, %s8005_s15 }
 0x301   : > { %7196 = vmatpush3.bf16.xpose.msra.mxu0 %v2488_v24  ;;  %7197 = vmatprep.mubr.msk.bf16.mxu0 %vm7999_vm2, %v10213_v29 }
 0x302   : > { %7207 = vmatprep.subr.bf16.mxu0 %v10213_v29 }
 0x308   : > { %7198 = vmatmul.mubr.msk.bf16.vlgmr.msra.gmra.mxu0 %vm1311_vm3, %v7597_v31 }
 0x309   : > { %7208 = vmatpush3.bf16.xpose.msra.mxu0 %v2602_v33  ;;  %7209 = vmatprep.mubr.msk.bf16.mxu0 %vm7999_vm2, %v10213_v29 }
 0x30a   : > { %7219 = vmatprep.subr.bf16.mxu0 %v10213_v29 }
 0x310   : > { %7210 = vmatmul.mubr.msk.bf16.vlgmr.msra.gmra.mxu0 %vm1311_vm3, %v7599_v37  ;;  %v1791_v40 = vpop.xlane.xlu1 %1790 }
 0x311   : > { %7220 = vmatpush3.bf16.xpose.msra.mxu0 %v2716_v39  ;;  %v1817_v21 = vsub.f32 %v8465_v49, %v1791_v40  ;;  %7221 = vmatprep.mubr.msk.bf16.mxu0 %vm7999_vm2, %v10213_v29  ;;  %v2545_v40 = vsel %vm1311_vm3, %v7603_v27, 0 }
 0x312   : > { %7231 = vmatprep.subr.bf16.mxu0 %v10213_v29 }
 0x313   : > { %v1843_v22 = vmul.f32 1.442695, %v1817_v21 }
 0x314   : > { %v551_v41 = vpop.permute.xlu1 %550  ;;  %v1794_v45 = vpop.xlane.xlu0 %1793 }
 0x315   : > { %592 = vst.msk [vmem:[#allocation2 + $0x5c] sm:$0xf] %vm519_vm1, %v551_v41  ;;  %v1818_v46 = vsub.f32 %v8468_v51, %v1794_v45  ;;  %7703 = vpow2.f32 %v1843_v22  ;;  %v7606_v45 = vld [vmem:[#allocation2 + $0x158] sm:$0xff]  }
 0x317   : > { %v1845_v60 = vmul.f32 1.442695, %v1818_v46  ;;  %v7605_v46 = vld [vmem:[#allocation2 + $0x48] sm:$0xff]  }
 0x318   : > { %v819_v55 = vpop.permute.xlu1 %818  ;;  %v1803_v47 = vpop.xlane.xlu0 %1802 }
 0x319   : > { %7705 = vpow2.f32 %v1845_v60  ;;  %856 = vst.msk [vmem:[#allocation2 + $0x16c] sm:$0xf] %vm519_vm1, %v819_v55  ;;  %v1821_v49 = vsub.f32 %v8473_v56, %v1803_v47  ;;  %v2659_v47 = vsel %vm1311_vm3, %v7606_v45, 0 }
 0x31b   : > { %v1851_v34 = vmul.f32 1.442695, %v1821_v49 }
 0x31c   : > { %v555_v58 = vpop.permute.xlu1 %554  ;;  %v1806_v62 = vpop.xlane.xlu0 %1805 }
 0x31d   : > { %594 = vst.msk [vmem:[#allocation2 + $0x64] sm:$0xf] %vm519_vm1, %v555_v58  ;;  %v1822_v43 = vsub.f32 %v8478_v61, %v1806_v62  ;;  %7707 = vpow2.f32 %v1851_v34 }
 0x31f   : > { %v1853_v10 = vmul.f32 1.442695, %v1822_v43  ;;  %v7608_v43 = vld [vmem:[#allocation2 + $0x58] sm:$0xff]  }
 0x320   : > { %v823_v1 = vpop.permute.xlu1 %822  ;;  %v817_v51 = vpop.permute.xlu0 %816 }
 0x321   : > { %7709 = vpow2.f32 %v1853_v10  ;;  %858 = vst.msk [vmem:[#allocation2 + $0x174] sm:$0xf] %vm519_vm1, %v823_v1  ;;  %855 = vst.msk [vmem:[#allocation2 + $0x168] sm:$0xf] %vm519_vm1, %v817_v51 }
 0x322   : > { %v8679_v5 = vpop.eup %7703 }
 0x323   : > { %10237 = vst [vmem:[#allocation15_spill] sm:$0xff] %v8679_v5 }
 0x324   : > { %v559_v2 = vpop.permute.xlu1 %558  ;;  %v553_v4 = vpop.permute.xlu0 %552 }
 0x325   : > { %596 = vst.msk [vmem:[#allocation2 + $0x6c] sm:$0xf] %vm519_vm1, %v559_v2  ;;  %593 = vst.msk [vmem:[#allocation2 + $0x60] sm:$0xf] %vm519_vm1, %v553_v4 }
 0x326   : > { %v8683_v56 = vpop.eup %7705 }
 0x327   : > { %10238 = vst [vmem:[#allocation16_spill] sm:$0xff] %v8683_v56  ;;  %v1908_v61 = vpack.c.bf16 %v8683_v56, %v8679_v5 }
 0x328   : > { %v827_v28 = vpop.permute.xlu1 %826  ;;  %v821_v52 = vpop.permute.xlu0 %820  ;;  %v7609_v62 = vld [vmem:[#allocation2 + $0x168] sm:$0xff]  }
 0x329   : > { %860 = vst.msk [vmem:[#allocation2 + $0x17c] sm:$0xf] %vm519_vm1, %v827_v28  ;;  %857 = vst.msk [vmem:[#allocation2 + $0x170] sm:$0xf] %vm519_vm1, %v821_v52  ;;  %7180 = vmatmul.mubr.msk.bf16.vlgmr.msra.gmra.mxu1 %vm1758_vm4, %v1908_v61  ;;  %v2773_v51 = vsel %vm1311_vm3, %v7609_v62, 0 }
 0x32a   : > { %7190 = vmatpush3.bf16.msra.mxu1 %v7601_v12  ;;  %7191 = vmatprep.mubr.msk.bf16.mxu1 %vm7999_vm2, %v10213_v29  ;;  %v8693_v24 = vpop.eup %7707 }
 0x32b   : > { %7201 = vmatprep.subr.bf16.mxu1 %v10213_v29  ;;  %10239 = vst [vmem:[#allocation17_spill] sm:$0xff] %v8693_v24 }
 0x32c   : > { %v563_v16 = vpop.permute.xlu1 %562  ;;  %v557_v63 = vpop.permute.xlu0 %556  ;;  %v7602_v20 = vld [vmem:[#allocation2 + $0x60] sm:$0xff]  }
 0x32d   : > { %598 = vst.msk [vmem:[#allocation2 + $0x74] sm:$0xf] %vm519_vm1, %v563_v16  ;;  %595 = vst.msk [vmem:[#allocation2 + $0x68] sm:$0xf] %vm519_vm1, %v557_v63  ;;  %7222 = vmatmul.mubr.msk.bf16.vlgmr.msra.gmra.mxu0 %vm1311_vm3, %v7602_v20 }
 0x32e   : > { %v8697_v31 = vpop.eup %7709  ;;  %7233 = vmatprep.mubr.msk.bf16.mxu0 %vm7999_vm2, %v10213_v29 }
 0x32f   : > { %10240 = vst [vmem:[#allocation18_spill] sm:$0xff] %v8697_v31  ;;  %v1910_v33 = vpack.c.bf16 %v8697_v31, %v8693_v24 }
 0x330   : > { %v567_v35 = vpop.permute.xlu1 %566  ;;  %v825_v37 = vpop.permute.xlu0 %824  ;;  %v7604_v39 = vld [vmem:[#allocation2 + $0x170] sm:$0xff]  }
 0x331   : > { %600 = vst.msk [vmem:[#allocation2 + $0x7c] sm:$0xf] %vm519_vm1, %v567_v35  ;;  %859 = vst.msk [vmem:[#allocation2 + $0x178] sm:$0xf] %vm519_vm1, %v825_v37  ;;  %7192 = vmatmul.mubr.msk.bf16.vlgmr.msra.gmra.mxu1 %vm1758_vm4, %v1910_v33  ;;  %v2830_v21 = vsel %vm1311_vm3, %v7604_v39, 0 }
 0x332   : > { %7202 = vmatpush3.bf16.xpose.msra.mxu1 %v2545_v40  ;;  %7203 = vmatprep.mubr.msk.bf16.mxu1 %vm7999_vm2, %v10213_v29 }
 0x333   : > { %7232 = vmatpush3.bf16.xpose.msra.mxu0 %v2830_v21  ;;  %7213 = vmatprep.subr.bf16.mxu1 %v10213_v29 }
 0x334   : > { %v1057_v22 = vpop.permute.xlu1 %1056  ;;  %v561_v41 = vpop.permute.xlu0 %560  ;;  %7243 = vmatprep.subr.bf16.mxu0 %v10213_v29  ;;  %v7611_v52 = vld [vmem:[#allocation2 + $0x68] sm:$0xff]  }
 0x335   : > { %1105 = vst.msk [vmem:[#allocation2 + $0x240] sm:$0xf] %vm519_vm1, %v1057_v22  ;;  %597 = vst.msk [vmem:[#allocation2 + $0x70] sm:$0xf] %vm519_vm1, %v561_v41 }
 0x338   : > { %v1061_v60 = vpop.permute.xlu1 %1060  ;;  %v565_v55 = vpop.permute.xlu0 %564  ;;  %v7612_v28 = vld [vmem:[#allocation2 + $0x178] sm:$0xff]  }
 0x339   : > { %1107 = vst.msk [vmem:[#allocation2 + $0x248] sm:$0xf] %vm519_vm1, %v1061_v60  ;;  %599 = vst.msk [vmem:[#allocation2 + $0x78] sm:$0xf] %vm519_vm1, %v565_v55  ;;  %7204 = vmatmul.mubr.msk.bf16.vlgmr.msra.gmra.mxu1 %vm1311_vm3, %v7605_v46  ;;  %v2887_v63 = vsel %vm1311_vm3, %v7612_v28, 0 }
 0x33a   : > { %7214 = vmatpush3.bf16.xpose.msra.mxu1 %v2659_v47  ;;  %7215 = vmatprep.mubr.msk.bf16.mxu1 %vm7999_vm2, %v10213_v29 }
 0x33b   : > { %7225 = vmatprep.subr.bf16.mxu1 %v10213_v29 }
 0x33c   : > { %v1063_v49 = vpop.permute.xlu1 %1062  ;;  %v1059_v34 = vpop.permute.xlu0 %1058  ;;  %v7607_v58 = vld [vmem:[#allocation2 + $0x70] sm:$0xff]  }
 0x33d   : > { %1108 = vst.msk [vmem:[#allocation2 + $0x24c] sm:$0xf] %vm519_vm1, %v1063_v49  ;;  %1106 = vst.msk [vmem:[#allocation2 + $0x244] sm:$0xf] %vm519_vm1, %v1059_v34  ;;  %7234 = vmatmul.mubr.msk.bf16.vlgmr.msra.gmra.mxu0 %vm1311_vm3, %v7607_v58 }
 0x33e   : > { %7245 = vmatprep.mubr.msk.bf16.mxu0 %vm7999_vm2, %v10213_v29 }
 0x340   : > { %v1065_v10 = vpop.permute.xlu1 %1064  ;;  %v1067_v1 = vpop.permute.xlu0 %1066  ;;  %v7613_v33 = vld [vmem:[#allocation2 + $0x78] sm:$0xff]  }
 0x341   : > { %1109 = vst.msk [vmem:[#allocation2 + $0x250] sm:$0xf] %vm519_vm1, %v1065_v10  ;;  %1110 = vst.msk [vmem:[#allocation2 + $0x254] sm:$0xf] %vm519_vm1, %v1067_v1  ;;  %7216 = vmatmul.mubr.msk.bf16.vlgmr.msra.gmra.mxu1 %vm1311_vm3, %v7608_v43 }
 0x342   : > { %7226 = vmatpush3.bf16.xpose.msra.mxu1 %v2773_v51  ;;  %7227 = vmatprep.mubr.msk.bf16.mxu1 %vm7999_vm2, %v10213_v29 }
 0x343   : > { %7237 = vmatprep.subr.bf16.mxu1 %v10213_v29 }
 0x344   : > { %v1069_v2 = vpop.permute.xlu1 %1068  ;;  %v1073_v4 = vpop.permute.xlu0 %1072  ;;  %v7610_v61 = vld [vmem:[#allocation2 + $0x240] sm:$0xff]   ;;  %v7614_v39 = vld [vmem:[#allocation2 + $0x248] sm:$0xff]  }
 0x345   : > { %1111 = vst.msk [vmem:[#allocation2 + $0x258] sm:$0xf] %vm519_vm1, %v1069_v2  ;;  %1113 = vst.msk [vmem:[#allocation2 + $0x260] sm:$0xf] %vm519_vm1, %v1073_v4  ;;  %7244 = vmatpush3.bf16.msra.mxu0 %v7610_v61 }
 0x346   : > { %7255 = vmatprep.subr.bf16.mxu0 %v10213_v29 }
 0x348   : > { %v1071_v12 = vpop.permute.xlu1 %1070  ;;  %v1077_v16 = vpop.permute.xlu0 %1076 }
 0x349   : > { %1112 = vst.msk [vmem:[#allocation2 + $0x25c] sm:$0xf] %vm519_vm1, %v1071_v12  ;;  %1115 = vst.msk [vmem:[#allocation2 + $0x268] sm:$0xf] %vm519_vm1, %v1077_v16  ;;  %7228 = vmatmul.mubr.msk.bf16.vlgmr.msra.gmra.mxu1 %vm1311_vm3, %v7611_v52 }
 0x34a   : > { %7238 = vmatpush3.bf16.xpose.msra.mxu1 %v2887_v63  ;;  %7239 = vmatprep.mubr.msk.bf16.mxu1 %vm7999_vm2, %v10213_v29 }
 0x34b   : > { %7249 = vmatprep.subr.bf16.mxu1 %v10213_v29 }
 0x34c   : > { %v1075_v20 = vpop.permute.xlu1 %1074  ;;  %v1081_v27 = vpop.permute.xlu0 %1080 }
 0x34d   : > { %1114 = vst.msk [vmem:[#allocation2 + $0x264] sm:$0xf] %vm519_vm1, %v1075_v20  ;;  %1117 = vst.msk [vmem:[#allocation2 + $0x270] sm:$0xf] %vm519_vm1, %v1081_v27 }
 0x350   : > { %v1079_v35 = vpop.permute.xlu1 %1078  ;;  %v1085_v37 = vpop.permute.xlu0 %1084 }
 0x351   : > { %1116 = vst.msk [vmem:[#allocation2 + $0x26c] sm:$0xf] %vm519_vm1, %v1079_v35  ;;  %1119 = vst.msk [vmem:[#allocation2 + $0x278] sm:$0xf] %vm519_vm1, %v1085_v37  ;;  %7240 = vmatmul.mubr.msk.bf16.vlgmr.msra.gmra.mxu1 %vm1311_vm3, %v7613_v33 }
 0x352   : > { %7250 = vmatpush3.bf16.msra.mxu1 %v7614_v39  ;;  %7251 = vmatprep.mubr.msk.bf16.mxu1 %vm7999_vm2, %v10213_v29 }
 0x353   : > { %7261 = vmatprep.subr.bf16.mxu1 %v10213_v29 }
 0x354   : > { %v1083_v40 = vpop.permute.xlu1 %1082  ;;  %v862_v21 = vpop.permute.xlu0 %861 }
 0x355   : > { %1118 = vst.msk [vmem:[#allocation2 + $0x274] sm:$0xf] %vm519_vm1, %v1083_v40  ;;  %910 = vst.msk [vmem:[#allocation2 + $0x180] sm:$0xf] %vm519_vm1, %v862_v21 }
 0x358   : > { %v1087_v22 = vpop.permute.xlu1 %1086  ;;  %v866_v41 = vpop.permute.xlu0 %865 }
 0x359   : > { %1120 = vst.msk [vmem:[#allocation2 + $0x27c] sm:$0xf] %vm519_vm1, %v1087_v22  ;;  %912 = vst.msk [vmem:[#allocation2 + $0x188] sm:$0xf] %vm519_vm1, %v866_v41 }
 0x35c   : > { %v864_v45 = vpop.permute.xlu1 %863  ;;  %v602_v46 = vpop.permute.xlu0 %601 }
 0x35d   : > { %911 = vst.msk [vmem:[#allocation2 + $0x184] sm:$0xf] %vm519_vm1, %v864_v45  ;;  %650 = vst.msk [vmem:[#allocation2 + $0x80] sm:$0xf] %vm519_vm1, %v602_v46 }
 0x360   : > { %v868_v60 = vpop.permute.xlu1 %867  ;;  %v870_v55 = vpop.permute.xlu0 %869 }
 0x361   : > { %913 = vst.msk [vmem:[#allocation2 + $0x18c] sm:$0xf] %vm519_vm1, %v868_v60  ;;  %914 = vst.msk [vmem:[#allocation2 + $0x190] sm:$0xf] %vm519_vm1, %v870_v55 }
 0x364   : > { %v604_v47 = vpop.permute.xlu1 %603  ;;  %v606_v49 = vpop.permute.xlu0 %605 }
 0x365   : > { %651 = vst.msk [vmem:[#allocation2 + $0x84] sm:$0xf] %vm519_vm1, %v604_v47  ;;  %652 = vst.msk [vmem:[#allocation2 + $0x88] sm:$0xf] %vm519_vm1, %v606_v49 }
 0x368   : > { %v872_v34 = vpop.permute.xlu1 %871  ;;  %v874_v58 = vpop.permute.xlu0 %873 }
 0x369   : > { %915 = vst.msk [vmem:[#allocation2 + $0x194] sm:$0xf] %vm519_vm1, %v872_v34  ;;  %916 = vst.msk [vmem:[#allocation2 + $0x198] sm:$0xf] %vm519_vm1, %v874_v58 }
 0x36c   : > { %v608_v62 = vpop.permute.xlu1 %607  ;;  %v610_v43 = vpop.permute.xlu0 %609 }
 0x36d   : > { %653 = vst.msk [vmem:[#allocation2 + $0x8c] sm:$0xf] %vm519_vm1, %v608_v62  ;;  %654 = vst.msk [vmem:[#allocation2 + $0x90] sm:$0xf] %vm519_vm1, %v610_v43  ;;  %v8799_v43 = vld [vmem:[%s10209_s3 + $0x10] sm:$0xff] }
 0x370   : > { %v876_v10 = vpop.permute.xlu1 %875  ;;  %v878_v1 = vpop.permute.xlu0 %877 }
 0x371   : > { %917 = vst.msk [vmem:[#allocation2 + $0x19c] sm:$0xf] %vm519_vm1, %v876_v10  ;;  %918 = vst.msk [vmem:[#allocation2 + $0x1a0] sm:$0xf] %vm519_vm1, %v878_v1 }
 0x374   : > { %v612_v51 = vpop.permute.xlu1 %611  ;;  %v614_v2 = vpop.permute.xlu0 %613 }
 0x375   : > { %655 = vst.msk [vmem:[#allocation2 + $0x94] sm:$0xf] %vm519_vm1, %v612_v51  ;;  %656 = vst.msk [vmem:[#allocation2 + $0x98] sm:$0xf] %vm519_vm1, %v614_v2  ;;  %v8807_v2 = vld [vmem:[%s10209_s3 + $0x18] sm:$0xff] }
 0x378   : > { %v880_v4 = vpop.permute.xlu1 %879 }
 0x379   : > { %919 = vst.msk [vmem:[#allocation2 + $0x1a4] sm:$0xf] %vm519_vm1, %v880_v4 }
 0x37c   : > { %v616_v61 = vpop.permute.xlu1 %615 }
 0x37d   : > { %657 = vst.msk [vmem:[#allocation2 + $0x9c] sm:$0xf] %vm519_vm1, %v616_v61 }
 0x3a0   : > { %v8772_v28 = vpop.f32.mrf.mxu0 }
 0x3a1   : > { %10241 = vst [vmem:[#allocation19_spill] sm:$0xff] %v8772_v28 }
 0x3a2   : > { %v7151_v52 = vpop.f32.mrf.mxu0 }
 0x3a4   : > { %v8774_v12 = vpop.f32.mrf.mxu0 }
 0x3a5   : > { %10242 = vst [vmem:[#allocation20_spill] sm:$0xff] %v8774_v12 }
 0x3a6   : > { %v7152_v16 = vpop.f32.mrf.mxu0 }
 0x3ac   : > { %v8776_v63 = vpop.f32.mrf.mxu1 }
 0x3ad   : > { %10243 = vst [vmem:[#allocation21_spill] sm:$0xff] %v8776_v63 }
 0x3ae   : > { %v7157_v20 = vpop.f32.mrf.mxu1 }
 0x3b0   : > { %v8778_v27 = vpop.f32.mrf.mxu1  ;;  %v8780_v33 = vpop.f32.mrf.mxu0 }
 0x3b1   : > { %10244 = vst [vmem:[#allocation22_spill] sm:$0xff] %v8778_v27  ;;  %10245 = vst [vmem:[#allocation23_spill] sm:$0xff] %v8780_v33 }
 0x3b2   : > { %v7158_v35 = vpop.f32.mrf.mxu1  ;;  %v7163_v37 = vpop.f32.mrf.mxu0 }
 0x3b4   : > { %v8782_v39 = vpop.f32.mrf.mxu0  ;;  %v8784_v40 = vpop.f32.mrf.mxu1 }
 0x3b5   : > { %10246 = vst [vmem:[#allocation24_spill] sm:$0xff] %v8782_v39  ;;  %10247 = vst [vmem:[#allocation25_spill] sm:$0xff] %v8784_v40 }
 0x3b6   : > { %v7164_v21 = vpop.f32.mrf.mxu0  ;;  %v7169_v22 = vpop.f32.mrf.mxu1 }
 0x3b8   : > { %v8786_v41 = vpop.f32.mrf.mxu1  ;;  %v8788_v45 = vpop.f32.mrf.mxu0 }
 0x3b9   : > { %10248 = vst [vmem:[#allocation26_spill] sm:$0xff] %v8786_v41  ;;  %10249 = vst [vmem:[#allocation27_spill] sm:$0xff] %v8788_v45 }
 0x3ba   : > { %v7170_v46 = vpop.f32.mrf.mxu1  ;;  %v7175_v60 = vpop.f32.mrf.mxu0 }
 0x3bc   : > { %v8790_v55 = vpop.f32.mrf.mxu0 }
 0x3bd   : > { %10250 = vst [vmem:[#allocation28_spill] sm:$0xff] %v8790_v55 }
 0x3be   : > { %v7176_v47 = vpop.f32.mrf.mxu0 }
 0x3c0   : > { %v8792_v49 = vpop.f32.mrf.mxu0 }
 0x3c1   : > { %10251 = vst [vmem:[#allocation29_spill] sm:$0xff] %v8792_v49 }
 0x3c2   : > { %v7187_v34 = vpop.f32.mrf.mxu0 }
 0x3c4   : > { %v8794_v58 = vpop.f32.mrf.mxu0 }
 0x3c5   : > { %10252 = vst [vmem:[#allocation30_spill] sm:$0xff] %v8794_v58 }
 0x3c6   : > { %v7188_v62 = vpop.f32.mrf.mxu0 }
 0x3c8   : > { %v2524_v10 = vpop.f32.mrf.mxu0 }
 0x3c9   : > { %v8802_v1 = vadd.f32 %v8799_v43, %v2524_v10 }
 0x3ca   : > { %v7199_v51 = vpop.f32.mrf.mxu0 }
 0x3cb   : > { %v2930_v4 = vsel %vm1758_vm4, %v8802_v1, -inf }
 0x3cc   : > { %v2527_v61 = vpop.f32.mrf.mxu0  ;;  %2931 = vmax.xlane.f32.xlu0 %v2930_v4 }
 0x3cd   : > { %v8812_v52 = vadd.f32 %v8807_v2, %v2527_v61 }
 0x3ce   : > { %v7200_v16 = vpop.f32.mrf.mxu0 }
 0x3cf   : > { %v2933_v20 = vsel %vm1758_vm4, %v8812_v52, -inf }
 0x3d0   : > { %v2638_v35 = vpop.f32.mrf.mxu0  ;;  %2934 = vmax.xlane.f32.xlu1 %v2933_v20 }
 0x3d1   : > { %v8817_v37 = vadd.f32 %v8799_v43, %v2638_v35 }
 0x3d2   : > { %v7211_v21 = vpop.f32.mrf.mxu0 }
 0x3d3   : > { %v2942_v22 = vsel %vm1758_vm4, %v8817_v37, -inf }
 0x3d4   : > { %v2641_v46 = vpop.f32.mrf.mxu0  ;;  %2943 = vmax.xlane.f32.xlu1 %v2942_v22 }
 0x3d6   : > { %v7212_v60 = vpop.f32.mrf.mxu0 }
 0x3e9   : > { %v8821_v47 = vpop.f32.mrf.mxu1 }
 0x3ea   : > { %10253 = vst [vmem:[#allocation31_spill] sm:$0xff] %v8821_v47 }
 0x3eb   : > { %v7181_v34 = vpop.f32.mrf.mxu1 }
 0x3ed   : > { %v8823_v62 = vpop.f32.mrf.mxu1  ;;  %v2752_v10 = vpop.f32.mrf.mxu0 }
 0x3ee   : > { %10254 = vst [vmem:[#allocation32_spill] sm:$0xff] %v8823_v62  ;;  %v8846_v41 = vadd.f32 %v8799_v43, %v2752_v10 }
 0x3ef   : > { %v7182_v51 = vpop.f32.mrf.mxu1  ;;  %v7223_v4 = vpop.f32.mrf.mxu0 }
 0x3f0   : > { %v2954_v10 = vsel %vm1758_vm4, %v8846_v41, -inf }
 0x3f1   : > { %v8825_v61 = vpop.f32.mrf.mxu1  ;;  %v2755_v16 = vpop.f32.mrf.mxu0 }
 0x3f2   : > { %10255 = vst [vmem:[#allocation33_spill] sm:$0xff] %v8825_v61  ;;  %v8856_v39 = vadd.f32 %v8807_v2, %v2755_v16 }
 0x3f3   : > { %v7193_v20 = vpop.f32.mrf.mxu1  ;;  %v7224_v35 = vpop.f32.mrf.mxu0 }
 0x3f4   : > { %v8838_v20 = vadd.f32 %v8807_v2, %v2641_v46  ;;  %v2957_v16 = vsel %vm1758_vm4, %v8856_v39, -inf }
 0x3f5   : > { %v8827_v21 = vpop.f32.mrf.mxu1 }
 0x3f6   : > { %10256 = vst [vmem:[#allocation34_spill] sm:$0xff] %v8827_v21 }
 0x3f7   : > { %v7194_v29 = vpop.f32.mrf.mxu1 }
 0x3f9   : > { %v2581_v58 = vpop.f32.mrf.mxu1 }
 0x3fa   : > { %v8830_v22 = vadd.f32 %v8799_v43, %v2581_v58 }
 0x3fb   : > { %v7205_v60 = vpop.f32.mrf.mxu1 }
 0x3fc   : > { %v2936_v34 = vsel %vm1758_vm4, %v8830_v22, -inf }
 0x3fd   : > { %2937 = vmax.xlane.f32.xlu0 %v2936_v34  ;;  %v2584_v62 = vpop.f32.mrf.mxu1  ;;  %v2866_v4 = vpop.f32.mrf.mxu0 }
 0x3fe   : > { %v8835_v51 = vadd.f32 %v8807_v2, %v2584_v62 }
 0x3ff   : > { %v7206_v55 = vpop.f32.mrf.mxu1  ;;  %v7235_v35 = vpop.f32.mrf.mxu0 }
 0x400   : > { %v2939_v29 = vsel %vm1758_vm4, %v8835_v51, -inf  ;;  %v2945_v55 = vsel %vm1758_vm4, %v8838_v20, -inf }
 0x401   : > { %2940 = vmax.xlane.f32.xlu0 %v2939_v29  ;;  %v2695_v58 = vpop.f32.mrf.mxu1  ;;  %v2869_v21 = vpop.f32.mrf.mxu0 }
 0x402   : > { %v8843_v60 = vadd.f32 %v8799_v43, %v2695_v58 }
 0x403   : > { %v7217_v34 = vpop.f32.mrf.mxu1  ;;  %v7236_v62 = vpop.f32.mrf.mxu0 }
 0x404   : > { %v2948_v46 = vsel %vm1758_vm4, %v8843_v60, -inf }
 0x405   : > { %2946 = vmax.xlane.f32.xlu0 %v2945_v55  ;;  %2949 = vmax.xlane.f32.xlu1 %v2948_v46  ;;  %v2698_v35 = vpop.f32.mrf.mxu1 }
 0x406   : > { %v8853_v29 = vadd.f32 %v8807_v2, %v2698_v35  ;;  %v8866_v35 = vadd.f32 %v8799_v43, %v2866_v4 }
 0x407   : > { %v7218_v58 = vpop.f32.mrf.mxu1 }
 0x408   : > { %v2951_v34 = vsel %vm1758_vm4, %v8853_v29, -inf  ;;  %v8869_v58 = vadd.f32 %v8807_v2, %v2869_v21  ;;  %v2966_v4 = vsel %vm1758_vm4, %v8866_v35, -inf }
 0x409   : > { %2955 = vmax.xlane.f32.xlu1 %v2954_v10  ;;  %2952 = vmax.xlane.f32.xlu0 %v2951_v34  ;;  %v2809_v62 = vpop.f32.mrf.mxu1 }
 0x40a   : > { %v8863_v55 = vadd.f32 %v8799_v43, %v2809_v62  ;;  %v2969_v21 = vsel %vm1758_vm4, %v8869_v58, -inf }
 0x40b   : > { %v7229_v46 = vpop.f32.mrf.mxu1 }
 0x40c   : > { %v2960_v61 = vsel %vm1758_vm4, %v8863_v55, -inf }
 0x40d   : > { %2958 = vmax.xlane.f32.xlu0 %v2957_v16  ;;  %2961 = vmax.xlane.f32.xlu1 %v2960_v61  ;;  %v2812_v10 = vpop.f32.mrf.mxu1 }
 0x40e   : > { %v8876_v62 = vadd.f32 %v8807_v2, %v2812_v10 }
 0x40f   : > { %v7230_v34 = vpop.f32.mrf.mxu1 }
 0x410   : > { %v2963_v61 = vsel %vm1758_vm4, %v8876_v62, -inf }
 0x411   : > { %2967 = vmax.xlane.f32.xlu0 %v2966_v4  ;;  %2970 = vmax.xlane.f32.xlu1 %v2969_v21  ;;  %v2923_v46 = vpop.f32.mrf.mxu1 }
 0x412   : > { %v8883_v49 = vadd.f32 %v8799_v43, %v2923_v46 }
 0x413   : > { %v7241_v27 = vpop.f32.mrf.mxu1 }
 0x414   : > { %v2972_v12 = vsel %vm1758_vm4, %v8883_v49, -inf }
 0x415   : > { %2964 = vmax.xlane.f32.xlu0 %v2963_v61  ;;  %v2926_v16 = vpop.f32.mrf.mxu1 }
 0x416   : > { %v8888_v34 = vadd.f32 %v8807_v2, %v2926_v16  ;;  %v7615_v16 = vld [vmem:[#allocation2 + $0x250] sm:$0xff]  }
 0x417   : > { %v7242_v10 = vpop.f32.mrf.mxu1 }
 0x418   : > { %v2975_v4 = vsel %vm1758_vm4, %v8888_v34, -inf  ;;  %v10257_v10 = vmov 0.0  }
 0x419   : > { %2973 = vmax.xlane.f32.xlu0 %v2972_v12 }
 0x41d   : > { %2976 = vmax.xlane.f32.xlu0 %v2975_v4 }
 0x422   : > { %883 = vrot.lane.b32.xlu1 %v8162_v38, %s8004_s14 }
 0x426   : > { %619 = vrot.lane.b32.xlu1 %v8172_v44, %s8005_s15 }
 0x42a   : > { %887 = vrot.lane.b32.xlu1 %v8215_v59, %s8004_s14 }
 0x42e   : > { %623 = vrot.lane.b32.xlu1 %v8162_v38, %s8005_s15 }
 0x432   : > { %891 = vrot.lane.b32.xlu1 %v8208_v57, %s8004_s14 }
 0x433   : > { %881 = vrot.lane.b32.xlu0 %v8138_v25, %s8004_s14 }
 0x436   : > { %627 = vrot.lane.b32.xlu1 %v8215_v59, %s8005_s15 }
 0x437   : > { %617 = vrot.lane.b32.xlu0 %v8150_v32, %s8005_s15 }
 0x43a   : > { %631 = vrot.lane.b32.xlu1 %v8208_v57, %s8005_s15 }
 0x43b   : > { %885 = vrot.lane.b32.xlu0 %v8197_v54, %s8004_s14 }
 0x43e   : > { %1121 = vrot.lane.b32.xlu1 %v8125_v18, %s8006_s20 }
 0x43f   : > { %621 = vrot.lane.b32.xlu0 %v8138_v25, %s8005_s15 }
 0x442   : > { %1125 = vrot.lane.b32.xlu1 %v8122_v14, %s8006_s20 }
 0x443   : > { %889 = vrot.lane.b32.xlu0 %v8184_v50, %s8004_s14  ;;  %s6930_s14 = sshll.u32 %s8071_s25, 11  ;;  %s10165_s25 = scalar_lea.sflag [#allocation6], %s243_s9 }
 0x446   : > { %1127 = vrot.lane.b32.xlu1 %v8133_v23, %s8006_s20 }
 0x447   : > { %625 = vrot.lane.b32.xlu0 %v8197_v54, %s8005_s15 }
 0x44a   : > { %1129 = vrot.lane.b32.xlu1 %v8169_v42, %s8006_s20 }
 0x44b   : > { %629 = vrot.lane.b32.xlu0 %v8184_v50, %s8005_s15  ;;  %s6492_s15 = sshll.u32 %s10136_s13, 4  ;;  %s10160_s15 = int_to_ptr.vmem [resolvable:$true] %s6492_s15 }
 0x44e   : > { %1133 = vrot.lane.b32.xlu1 %v8157_v36, %s8006_s20 }
 0x44f   : > { %1123 = vrot.lane.b32.xlu0 %v8145_v30, %s8006_s20 }
 0x452   : > { %1135 = vrot.lane.b32.xlu1 %v8179_v48, %s8006_s20 }
 0x453   : > { %1131 = vrot.lane.b32.xlu0 %v8195_v53, %s8006_s20 }
 0x455   : > { %v2932_v12 = vpop.xlane.xlu0 %2931 }
 0x456   : > { %v2978_v27 = vsub.f32 %v8802_v1, %v2932_v12  ;;  %1139 = vrot.lane.b32.xlu1 %v8172_v44, %s8006_s20 }
 0x457   : > { %1137 = vrot.lane.b32.xlu0 %v8150_v32, %s8006_s20 }
 0x458   : > { %v2994_v43 = vmul.f32 1.442695, %v2978_v27 }
 0x459   : > { %v2935_v2 = vpop.xlane.xlu1 %2934 }
 0x45a   : > { %v2979_v21 = vsub.f32 %v8812_v52, %v2935_v2  ;;  %1143 = vrot.lane.b32.xlu1 %v8162_v38, %s8006_s20  ;;  %7711 = vpow2.f32 %v2994_v43 }
 0x45b   : > { %1141 = vrot.lane.b32.xlu0 %v8138_v25, %s8006_s20 }
 0x45c   : > { %v2996_v46 = vmul.f32 1.442695, %v2979_v21 }
 0x45d   : > { %v2944_v12 = vpop.xlane.xlu1 %2943 }
 0x45e   : > { %7713 = vpow2.f32 %v2996_v46  ;;  %1147 = vrot.lane.b32.xlu1 %v8215_v59, %s8006_s20  ;;  %v2982_v43 = vsub.f32 %v8817_v37, %v2944_v12 }
 0x45f   : > { %1145 = vrot.lane.b32.xlu0 %v8197_v54, %s8006_s20 }
 0x462   : > { %1151 = vrot.lane.b32.xlu1 %v8208_v57, %s8006_s20 }
 0x463   : > { %1149 = vrot.lane.b32.xlu0 %v8184_v50, %s8006_s20  ;;  %s7935_s20 = scalar_lea.vmem %s10160_s15, 2048 }
 0x464   : > { %p7936_p11 = scmp.ne.s32.totalorder %s10160_s15, %s7935_s20 }
 0x466   : > { %928 = vrot.lane.b32.xlu1 %v8145_v30, %s8007_s26  ;;  %p7937_p12 = pnand %p7936_p11, %p8088_p5 }
 0x467   : > { %926 = vrot.lane.b32.xlu0 %v8125_v18, %s8007_s26  ;;  %v8944_v1 = vpop.eup %7711 }
 0x468   : > { %p7938_p13 = pneg %p7937_p12 }
 0x46a   : > { %932 = vrot.lane.b32.xlu1 %v8133_v23, %s8007_s26 }
 0x46b   : > { %v8948_v52 = vpop.eup %7713  ;;  %930 = vrot.lane.b32.xlu0 %v8122_v14, %s8007_s26 }
 0x46c   : > { %v3074_v61 = vpack.c.bf16 %v8948_v52, %v8944_v1 }
 0x46e   : > { %7246 = vmatmul.mubr.msk.bf16.vlgmr.msra.gmra.mxu0 %vm1758_vm4, %v3074_v61  ;;  %668 = vrot.lane.b32.xlu1 %v8145_v30, %s8008_s28 }
 0x46f   : > { %7256 = vmatpush3.bf16.msra.mxu0 %v7615_v16  ;;  %666 = vrot.lane.b32.xlu0 %v8125_v18, %s8008_s28  ;;  %v3002_v16 = vmul.f32 1.442695, %v2982_v43 }
 0x470   : > { %7257 = vmatprep.mubr.msk.bf16.mxu0 %vm7999_vm2, %v10257_v10  ;;  %7267 = vmatprep.subr.bf16.mxu0 %v10257_v10 }
 0x472   : > { %936 = vrot.lane.b32.xlu1 %v8195_v53, %s8007_s26 }
 0x473   : > { %934 = vrot.lane.b32.xlu0 %v8169_v42, %s8007_s26 }
 0x476   : > { %672 = vrot.lane.b32.xlu1 %v8133_v23, %s8008_s28 }
 0x477   : > { %670 = vrot.lane.b32.xlu0 %v8122_v14, %s8008_s28 }
 0x47a   : > { %940 = vrot.lane.b32.xlu1 %v8179_v48, %s8007_s26 }
 0x47b   : > { %938 = vrot.lane.b32.xlu0 %v8157_v36, %s8007_s26 }
 0x47e   : > { %676 = vrot.lane.b32.xlu1 %v8195_v53, %s8008_s28 }
 0x47f   : > { %674 = vrot.lane.b32.xlu0 %v8169_v42, %s8008_s28 }
 0x482   : > { %944 = vrot.lane.b32.xlu1 %v8172_v44, %s8007_s26 }
 0x483   : > { %942 = vrot.lane.b32.xlu0 %v8150_v32, %s8007_s26 }
 0x486   : > { %v2938_v4 = vpop.xlane.xlu0 %2937  ;;  %680 = vrot.lane.b32.xlu1 %v8179_v48, %s8008_s28 }
 0x487   : > { %v2980_v27 = vsub.f32 %v8830_v22, %v2938_v4  ;;  %678 = vrot.lane.b32.xlu0 %v8157_v36, %s8008_s28 }
 0x489   : > { %v2998_v2 = vmul.f32 1.442695, %v2980_v27 }
 0x48a   : > { %v2941_v21 = vpop.xlane.xlu0 %2940 }
 0x48b   : > { %v2981_v46 = vsub.f32 %v8835_v51, %v2941_v21  ;;  %7715 = vpow2.f32 %v2998_v2 }
 0x48d   : > { %v3000_v61 = vmul.f32 1.442695, %v2981_v46 }
 0x48e   : > { %v2947_v47 = vpop.xlane.xlu0 %2946  ;;  %v2950_v45 = vpop.xlane.xlu1 %2949 }
 0x48f   : > { %7717 = vpow2.f32 %v3000_v61  ;;  %v2983_v40 = vsub.f32 %v8838_v20, %v2947_v47  ;;  %v2984_v33 = vsub.f32 %v8843_v60, %v2950_v45 }
 0x490   : > { %7719 = vpow2.f32 %v3002_v16 }
 0x491   : > { %v3004_v22 = vmul.f32 1.442695, %v2983_v40  ;;  %v3006_v37 = vmul.f32 1.442695, %v2984_v33 }
 0x492   : > { %v2956_v4 = vpop.xlane.xlu1 %2955  ;;  %v2953_v63 = vpop.xlane.xlu0 %2952 }
 0x493   : > { %7721 = vpow2.f32 %v3004_v22  ;;  %v2986_v12 = vsub.f32 %v8846_v41, %v2956_v4  ;;  %v2985_v51 = vsub.f32 %v8853_v29, %v2953_v63 }
 0x494   : > { %7723 = vpow2.f32 %v3006_v37 }
 0x495   : > { %v3008_v27 = vmul.f32 1.442695, %v2985_v51  ;;  %v3010_v43 = vmul.f32 1.442695, %v2986_v12 }
 0x496   : > { %v2959_v2 = vpop.xlane.xlu0 %2958  ;;  %v2962_v21 = vpop.xlane.xlu1 %2961 }
 0x497   : > { %v2987_v46 = vsub.f32 %v8856_v39, %v2959_v2  ;;  %7725 = vpow2.f32 %v3008_v27  ;;  %v2988_v40 = vsub.f32 %v8863_v55, %v2962_v21  ;;  %v7616_v55 = vld [vmem:[#allocation2 + $0x258] sm:$0xff]  }
 0x498   : > { %7727 = vpow2.f32 %v3010_v43  ;;  %v8995_v60 = vpop.eup %7715 }
 0x499   : > { %v3012_v47 = vmul.f32 1.442695, %v2987_v46  ;;  %v3014_v16 = vmul.f32 1.442695, %v2988_v40 }
 0x49a   : > { %v2968_v45 = vpop.xlane.xlu0 %2967  ;;  %v2971_v20 = vpop.xlane.xlu1 %2970 }
 0x49b   : > { %7729 = vpow2.f32 %v3012_v47  ;;  %v2990_v33 = vsub.f32 %v8866_v35, %v2968_v45  ;;  %v2991_v63 = vsub.f32 %v8869_v58, %v2971_v20 }
 0x49c   : > { %v8999_v41 = vpop.eup %7717 }
 0x49d   : > { %v3018_v29 = vmul.f32 1.442695, %v2990_v33  ;;  %v3020_v61 = vmul.f32 1.442695, %v2991_v63  ;;  %v3075_v39 = vpack.c.bf16 %v8999_v41, %v8995_v60  ;;  %v9003_v37 = vpop.eup %7719  ;;  %v7618_v63 = vld [vmem:[#allocation2 + $0x268] sm:$0xff]  }
 0x49e   : > { %v884_v22 = vpop.permute.xlu1 %883  ;;  %v2965_v4 = vpop.xlane.xlu0 %2964 }
 0x49f   : > { %921 = vst.msk [vmem:[#allocation2 + $0x1ac] sm:$0xf] %vm519_vm1, %v884_v22  ;;  %v2989_v12 = vsub.f32 %v8876_v62, %v2965_v4  ;;  %7252 = vmatmul.mubr.msk.bf16.vlgmr.msra.gmra.mxu1 %vm1758_vm4, %v3075_v39  ;;  %7731 = vpow2.f32 %v3018_v29  ;;  %v7617_v62 = vld [vmem:[#allocation2 + $0x260] sm:$0xff]   ;;  %v7619_v4 = vld [vmem:[#allocation2 + $0x270] sm:$0xff]  }
 0x4a0   : > { %v9008_v35 = vpop.eup %7721  ;;  %7262 = vmatpush3.bf16.msra.mxu1 %v7616_v55  ;;  %7263 = vmatprep.mubr.msk.bf16.mxu1 %vm7999_vm2, %v10257_v10  ;;  %7733 = vpow2.f32 %v3020_v61 }
 0x4a1   : > { %v3016_v58 = vmul.f32 1.442695, %v2989_v12  ;;  %v3076_v51 = vpack.c.bf16 %v9008_v35, %v9003_v37  ;;  %7273 = vmatprep.subr.bf16.mxu1 %v10257_v10  ;;  %7735 = vpow2.f32 %v3014_v16  ;;  %v9018_v21 = vpop.eup %7723 }
 0x4a2   : > { %v620_v27 = vpop.permute.xlu1 %619  ;;  %v2974_v43 = vpop.xlane.xlu0 %2973 }
 0x4a3   : > { %7737 = vpow2.f32 %v3016_v58  ;;  %659 = vst.msk [vmem:[#allocation2 + $0xa4] sm:$0xf] %vm519_vm1, %v620_v27  ;;  %v2992_v2 = vsub.f32 %v8883_v49, %v2974_v43  ;;  %7258 = vmatmul.mubr.msk.bf16.vlgmr.msra.gmra.mxu0 %vm1758_vm4, %v3076_v51  ;;  %v7621_v27 = vld [vmem:[#allocation2 + $0x180] sm:$0xff]  }
 0x4a4   : > { %7268 = vmatpush3.bf16.msra.mxu0 %v7617_v62  ;;  %7269 = vmatprep.mubr.msk.bf16.mxu0 %vm7999_vm2, %v10257_v10  ;;  %v9022_v46 = vpop.eup %7725 }
 0x4a5   : > { %7279 = vmatprep.subr.bf16.mxu0 %v10257_v10  ;;  %v3022_v47 = vmul.f32 1.442695, %v2992_v2  ;;  %v3077_v20 = vpack.c.bf16 %v9022_v46, %v9018_v21  ;;  %v9027_v33 = vpop.eup %7727 }
 0x4a6   : > { %v888_v40 = vpop.permute.xlu1 %887  ;;  %v2977_v45 = vpop.xlane.xlu0 %2976 }
 0x4a7   : > { %923 = vst.msk [vmem:[#allocation2 + $0x1b4] sm:$0xf] %vm519_vm1, %v888_v40  ;;  %v2993_v49 = vsub.f32 %v8888_v34, %v2977_v45  ;;  %7264 = vmatmul.mubr.msk.bf16.vlgmr.msra.gmra.mxu1 %vm1758_vm4, %v3077_v20  ;;  %7739 = vpow2.f32 %v3022_v47  ;;  %v7620_v45 = vld [vmem:[#allocation2 + $0x278] sm:$0xff]   ;;  %v3660_v20 = vsel %vm1311_vm3, %v7621_v27, 0 }
 0x4a8   : > { %v9031_v29 = vpop.eup %7729  ;;  %7274 = vmatpush3.bf16.msra.mxu1 %v7618_v63  ;;  %7275 = vmatprep.mubr.msk.bf16.mxu1 %vm7999_vm2, %v10257_v10 }
 0x4a9   : > { %v3024_v61 = vmul.f32 1.442695, %v2993_v49  ;;  %v3078_v39 = vpack.c.bf16 %v9031_v29, %v9027_v33  ;;  %7285 = vmatprep.subr.bf16.mxu1 %v10257_v10 }
 0x4aa   : > { %v624_v16 = vpop.permute.xlu1 %623  ;;  %v882_v22 = vpop.permute.xlu0 %881 }
 0x4ab   : > { %7741 = vpow2.f32 %v3024_v61  ;;  %661 = vst.msk [vmem:[#allocation2 + $0xac] sm:$0xf] %vm519_vm1, %v624_v16  ;;  %920 = vst.msk [vmem:[#allocation2 + $0x1a8] sm:$0xf] %vm519_vm1, %v882_v22  ;;  %7270 = vmatmul.mubr.msk.bf16.vlgmr.msra.gmra.mxu0 %vm1758_vm4, %v3078_v39  ;;  %v7623_v39 = vld [vmem:[#allocation2 + $0x188] sm:$0xff]   ;;  %v7624_v16 = vld [vmem:[#allocation2 + $0x190] sm:$0xff]  }
 0x4ac   : > { %7280 = vmatpush3.bf16.msra.mxu0 %v7619_v4  ;;  %7281 = vmatprep.mubr.msk.bf16.mxu0 %vm7999_vm2, %v10257_v10  ;;  %v9044_v34 = vpop.eup %7731 }
 0x4ad   : > { %7291 = vmatprep.subr.bf16.mxu0 %v10257_v10  ;;  %v9047_v55 = vpop.eup %7733 }
 0x4ae   : > { %v892_v12 = vpop.permute.xlu1 %891  ;;  %v618_v58 = vpop.permute.xlu0 %617  ;;  %v3080_v2 = vpack.c.bf16 %v9047_v55, %v9044_v34 }
 0x4af   : > { %v9049_v51 = vpop.eup %7735  ;;  %925 = vst.msk [vmem:[#allocation2 + $0x1bc] sm:$0xf] %vm519_vm1, %v892_v12  ;;  %658 = vst.msk [vmem:[#allocation2 + $0xa0] sm:$0xf] %vm519_vm1, %v618_v58  ;;  %v7622_v12 = vld [vmem:[#allocation2 + $0x80] sm:$0xff]  }
 0x4b0   : > { %v9053_v43 = vpop.eup %7737 }
 0x4b1   : > { %v3079_v62 = vpack.c.bf16 %v9053_v43, %v9049_v51 }
 0x4b2   : > { %v628_v47 = vpop.permute.xlu1 %627  ;;  %v886_v40 = vpop.permute.xlu0 %885 }
 0x4b3   : > { %663 = vst.msk [vmem:[#allocation2 + $0xb4] sm:$0xf] %vm519_vm1, %v628_v47  ;;  %922 = vst.msk [vmem:[#allocation2 + $0x1b0] sm:$0xf] %vm519_vm1, %v886_v40  ;;  %7276 = vmatmul.mubr.msk.bf16.vlgmr.msra.gmra.mxu1 %vm1758_vm4, %v3079_v62  ;;  %7282 = vmatmul.mubr.msk.bf16.vlgmr.msra.gmra.mxu0 %vm1758_vm4, %v3080_v2  ;;  %v3717_v62 = vsel %vm1311_vm3, %v7623_v39, 0  ;;  %v3774_v2 = vsel %vm1311_vm3, %v7624_v16, 0 }
 0x4b4   : > { %7286 = vmatpush3.bf16.msra.mxu1 %v7620_v45  ;;  %7292 = vmatpush3.bf16.xpose.msra.mxu0 %v3660_v20  ;;  %v9070_v61 = vpop.eup %7739  ;;  %v7627_v45 = vld [vmem:[#allocation2 + $0x198] sm:$0xff]   ;;  %v7628_v20 = vld [vmem:[#allocation2 + $0x1a0] sm:$0xff]  }
 0x4b5   : > { %7293 = vmatprep.mubr.msk.bf16.mxu0 %vm7999_vm2, %v10257_v10  ;;  %7303 = vmatprep.subr.bf16.mxu0 %v10257_v10 }
 0x4b6   : > { %v632_v49 = vpop.permute.xlu1 %631  ;;  %v622_v63 = vpop.permute.xlu0 %621  ;;  %7287 = vmatprep.mubr.msk.bf16.mxu1 %vm7999_vm2, %v10257_v10  ;;  %7297 = vmatprep.subr.bf16.mxu1 %v10257_v10 }
 0x4b7   : > { %665 = vst.msk [vmem:[#allocation2 + $0xbc] sm:$0xf] %vm519_vm1, %v632_v49  ;;  %660 = vst.msk [vmem:[#allocation2 + $0xa8] sm:$0xf] %vm519_vm1, %v622_v63  ;;  %v7625_v49 = vld [vmem:[#allocation2 + $0x88] sm:$0xff]   ;;  %v7626_v63 = vld [vmem:[#allocation2 + $0x90] sm:$0xff]  }
 0x4b8   : > { %v9074_v22 = vpop.eup %7741 }
 0x4b9   : > { %v3081_v4 = vpack.c.bf16 %v9074_v22, %v9070_v61 }
 0x4ba   : > { %v1122_v58 = vpop.permute.xlu1 %1121  ;;  %v890_v27 = vpop.permute.xlu0 %889 }
 0x4bb   : > { %1170 = vst.msk [vmem:[#allocation2 + $0x280] sm:$0xf] %vm519_vm1, %v1122_v58  ;;  %924 = vst.msk [vmem:[#allocation2 + $0x1b8] sm:$0xf] %vm519_vm1, %v890_v27  ;;  %7288 = vmatmul.mubr.msk.bf16.vlgmr.msra.gmra.mxu1 %vm1758_vm4, %v3081_v4  ;;  %7294 = vmatmul.mubr.msk.bf16.vlgmr.msra.gmra.mxu0 %vm1311_vm3, %v7622_v12  ;;  %v3831_v4 = vsel %vm1311_vm3, %v7627_v45, 0  ;;  %v3888_v12 = vsel %vm1311_vm3, %v7628_v20, 0 }
 0x4bc   : > { %7298 = vmatpush3.bf16.xpose.msra.mxu1 %v3717_v62  ;;  %7304 = vmatpush3.bf16.xpose.msra.mxu0 %v3774_v2  ;;  %v7631_v62 = vld [vmem:[#allocation2 + $0x1a8] sm:$0xff]   ;;  %v7632_v2 = vld [vmem:[#allocation2 + $0x1b0] sm:$0xff]  }
 0x4bd   : > { %7305 = vmatprep.mubr.msk.bf16.mxu0 %vm7999_vm2, %v10257_v10  ;;  %7315 = vmatprep.subr.bf16.mxu0 %v10257_v10 }
 0x4be   : > { %v1126_v47 = vpop.permute.xlu1 %1125  ;;  %v626_v40 = vpop.permute.xlu0 %625  ;;  %7299 = vmatprep.mubr.msk.bf16.mxu1 %vm7999_vm2, %v10257_v10  ;;  %7309 = vmatprep.subr.bf16.mxu1 %v10257_v10 }
 0x4bf   : > { %1172 = vst.msk [vmem:[#allocation2 + $0x288] sm:$0xf] %vm519_vm1, %v1126_v47  ;;  %662 = vst.msk [vmem:[#allocation2 + $0xb0] sm:$0xf] %vm519_vm1, %v626_v40  ;;  %v7629_v47 = vld [vmem:[#allocation2 + $0x98] sm:$0xff]   ;;  %v7630_v40 = vld [vmem:[#allocation2 + $0xa0] sm:$0xff]  }
 0x4c2   : > { %v1128_v39 = vpop.permute.xlu1 %1127  ;;  %v630_v16 = vpop.permute.xlu0 %629 }
 0x4c3   : > { %1173 = vst.msk [vmem:[#allocation2 + $0x28c] sm:$0xf] %vm519_vm1, %v1128_v39  ;;  %664 = vst.msk [vmem:[#allocation2 + $0xb8] sm:$0xf] %vm519_vm1, %v630_v16  ;;  %7300 = vmatmul.mubr.msk.bf16.vlgmr.msra.gmra.mxu1 %vm1311_vm3, %v7625_v49  ;;  %7306 = vmatmul.mubr.msk.bf16.vlgmr.msra.gmra.mxu0 %vm1311_vm3, %v7626_v63  ;;  %v3945_v49 = vsel %vm1311_vm3, %v7631_v62, 0  ;;  %v4002_v63 = vsel %vm1311_vm3, %v7632_v2, 0 }
 0x4c4   : > { %7310 = vmatpush3.bf16.xpose.msra.mxu1 %v3831_v4  ;;  %7316 = vmatpush3.bf16.xpose.msra.mxu0 %v3888_v12  ;;  %v7635_v4 = vld [vmem:[#allocation2 + $0x1b8] sm:$0xff]   ;;  %v7633_v12 = vld [vmem:[#allocation2 + $0xa8] sm:$0xff]  }
 0x4c5   : > { %7317 = vmatprep.mubr.msk.bf16.mxu0 %vm7999_vm2, %v10257_v10  ;;  %7327 = vmatprep.subr.bf16.mxu0 %v10257_v10 }
 0x4c6   : > { %v1130_v58 = vpop.permute.xlu1 %1129  ;;  %v1124_v27 = vpop.permute.xlu0 %1123  ;;  %7311 = vmatprep.mubr.msk.bf16.mxu1 %vm7999_vm2, %v10257_v10  ;;  %7321 = vmatprep.subr.bf16.mxu1 %v10257_v10 }
 0x4c7   : > { %1174 = vst.msk [vmem:[#allocation2 + $0x290] sm:$0xf] %vm519_vm1, %v1130_v58  ;;  %1171 = vst.msk [vmem:[#allocation2 + $0x284] sm:$0xf] %vm519_vm1, %v1124_v27  ;;  %v7634_v58 = vld [vmem:[#allocation2 + $0xb0] sm:$0xff]  }
 0x4ca   : > { %v1134_v45 = vpop.permute.xlu1 %1133  ;;  %v1132_v20 = vpop.permute.xlu0 %1131 }
 0x4cb   : > { %1176 = vst.msk [vmem:[#allocation2 + $0x298] sm:$0xf] %vm519_vm1, %v1134_v45  ;;  %1175 = vst.msk [vmem:[#allocation2 + $0x294] sm:$0xf] %vm519_vm1, %v1132_v20  ;;  %7312 = vmatmul.mubr.msk.bf16.vlgmr.msra.gmra.mxu1 %vm1311_vm3, %v7629_v47  ;;  %7318 = vmatmul.mubr.msk.bf16.vlgmr.msra.gmra.mxu0 %vm1311_vm3, %v7630_v40  ;;  %v4059_v47 = vsel %vm1311_vm3, %v7635_v4, 0  ;;  %v7637_v20 = vld [vmem:[#allocation2 + $0xb8] sm:$0xff]  }
 0x4cc   : > { %7322 = vmatpush3.bf16.xpose.msra.mxu1 %v3945_v49  ;;  %7328 = vmatpush3.bf16.xpose.msra.mxu0 %v4002_v63 }
 0x4cd   : > { %7323 = vmatprep.mubr.msk.bf16.mxu1 %vm7999_vm2, %v10257_v10  ;;  %7329 = vmatprep.mubr.msk.bf16.mxu0 %vm7999_vm2, %v10257_v10 }
 0x4ce   : > { %v1136_v39 = vpop.permute.xlu1 %1135  ;;  %v1138_v16 = vpop.permute.xlu0 %1137  ;;  %7333 = vmatprep.subr.bf16.mxu1 %v10257_v10  ;;  %7339 = vmatprep.subr.bf16.mxu0 %v10257_v10  ;;  %v7636_v2 = vld [vmem:[#allocation2 + $0x280] sm:$0xff]  }
 0x4cf   : > { %1177 = vst.msk [vmem:[#allocation2 + $0x29c] sm:$0xf] %vm519_vm1, %v1136_v39  ;;  %1178 = vst.msk [vmem:[#allocation2 + $0x2a0] sm:$0xf] %vm519_vm1, %v1138_v16  ;;  %v7638_v39 = vld [vmem:[#allocation2 + $0x288] sm:$0xff]  }
 0x4d2   : > { %v1140_v27 = vpop.permute.xlu1 %1139  ;;  %v1142_v62 = vpop.permute.xlu0 %1141 }
 0x4d3   : > { %1179 = vst.msk [vmem:[#allocation2 + $0x2a4] sm:$0xf] %vm519_vm1, %v1140_v27  ;;  %1180 = vst.msk [vmem:[#allocation2 + $0x2a8] sm:$0xf] %vm519_vm1, %v1142_v62  ;;  %7324 = vmatmul.mubr.msk.bf16.vlgmr.msra.gmra.mxu1 %vm1311_vm3, %v7633_v12  ;;  %7330 = vmatmul.mubr.msk.bf16.vlgmr.msra.gmra.mxu0 %vm1311_vm3, %v7634_v58 }
 0x4d4   : > { %7334 = vmatpush3.bf16.xpose.msra.mxu1 %v4059_v47  ;;  %7340 = vmatpush3.bf16.msra.mxu0 %v7636_v2 }
 0x4d5   : > { %7335 = vmatprep.mubr.msk.bf16.mxu1 %vm7999_vm2, %v10257_v10  ;;  %7345 = vmatprep.subr.bf16.mxu1 %v10257_v10 }
 0x4d6   : > { %v1144_v40 = vpop.permute.xlu1 %1143  ;;  %v1146_v45 = vpop.permute.xlu0 %1145  ;;  %7341 = vmatprep.mubr.msk.bf16.mxu0 %vm7999_vm2, %v10257_v10  ;;  %7351 = vmatprep.subr.bf16.mxu0 %v10257_v10 }
 0x4d7   : > { %1181 = vst.msk [vmem:[#allocation2 + $0x2ac] sm:$0xf] %vm519_vm1, %v1144_v40  ;;  %1182 = vst.msk [vmem:[#allocation2 + $0x2b0] sm:$0xf] %vm519_vm1, %v1146_v45 }
 0x4da   : > { %v1148_v49 = vpop.permute.xlu1 %1147  ;;  %v1150_v63 = vpop.permute.xlu0 %1149 }
 0x4db   : > { %1183 = vst.msk [vmem:[#allocation2 + $0x2b4] sm:$0xf] %vm519_vm1, %v1148_v49  ;;  %1184 = vst.msk [vmem:[#allocation2 + $0x2b8] sm:$0xf] %vm519_vm1, %v1150_v63  ;;  %7336 = vmatmul.mubr.msk.bf16.vlgmr.msra.gmra.mxu1 %vm1311_vm3, %v7637_v20 }
 0x4dc   : > { %7346 = vmatpush3.bf16.msra.mxu1 %v7638_v39  ;;  %7347 = vmatprep.mubr.msk.bf16.mxu1 %vm7999_vm2, %v10257_v10 }
 0x4dd   : > { %7357 = vmatprep.subr.bf16.mxu1 %v10257_v10 }
 0x4de   : > { %v1152_v16 = vpop.permute.xlu1 %1151  ;;  %v927_v4 = vpop.permute.xlu0 %926 }
 0x4df   : > { %1185 = vst.msk [vmem:[#allocation2 + $0x2bc] sm:$0xf] %vm519_vm1, %v1152_v16  ;;  %975 = vst.msk [vmem:[#allocation2 + $0x1c0] sm:$0xf] %vm519_vm1, %v927_v4 }
 0x4e2   : > { %v929_v12 = vpop.permute.xlu1 %928  ;;  %v931_v58 = vpop.permute.xlu0 %930 }
 0x4e3   : > { %976 = vst.msk [vmem:[#allocation2 + $0x1c4] sm:$0xf] %vm519_vm1, %v929_v12  ;;  %977 = vst.msk [vmem:[#allocation2 + $0x1c8] sm:$0xf] %vm519_vm1, %v931_v58 }
 0x4e6   : > { %v933_v27 = vpop.permute.xlu1 %932  ;;  %v667_v62 = vpop.permute.xlu0 %666 }
 0x4e7   : > { %978 = vst.msk [vmem:[#allocation2 + $0x1cc] sm:$0xf] %vm519_vm1, %v933_v27  ;;  %715 = vst.msk [vmem:[#allocation2 + $0xc0] sm:$0xf] %vm519_vm1, %v667_v62 }
 0x4ea   : > { %v669_v2 = vpop.permute.xlu1 %668  ;;  %v935_v47 = vpop.permute.xlu0 %934 }
 0x4eb   : > { %716 = vst.msk [vmem:[#allocation2 + $0xc4] sm:$0xf] %vm519_vm1, %v669_v2  ;;  %979 = vst.msk [vmem:[#allocation2 + $0x1d0] sm:$0xf] %vm519_vm1, %v935_v47 }
 0x4ee   : > { %v937_v40 = vpop.permute.xlu1 %936  ;;  %v671_v45 = vpop.permute.xlu0 %670 }
 0x4ef   : > { %980 = vst.msk [vmem:[#allocation2 + $0x1d4] sm:$0xf] %vm519_vm1, %v937_v40  ;;  %717 = vst.msk [vmem:[#allocation2 + $0xc8] sm:$0xf] %vm519_vm1, %v671_v45 }
 0x4f2   : > { %v673_v20 = vpop.permute.xlu1 %672  ;;  %v939_v49 = vpop.permute.xlu0 %938 }
 0x4f3   : > { %718 = vst.msk [vmem:[#allocation2 + $0xcc] sm:$0xf] %vm519_vm1, %v673_v20  ;;  %981 = vst.msk [vmem:[#allocation2 + $0x1d8] sm:$0xf] %vm519_vm1, %v939_v49 }
 0x4f6   : > { %v941_v63 = vpop.permute.xlu1 %940  ;;  %v675_v39 = vpop.permute.xlu0 %674 }
 0x4f7   : > { %982 = vst.msk [vmem:[#allocation2 + $0x1dc] sm:$0xf] %vm519_vm1, %v941_v63  ;;  %719 = vst.msk [vmem:[#allocation2 + $0xd0] sm:$0xf] %vm519_vm1, %v675_v39 }
 0x4fa   : > { %v677_v16 = vpop.permute.xlu1 %676  ;;  %v943_v4 = vpop.permute.xlu0 %942 }
 0x4fb   : > { %720 = vst.msk [vmem:[#allocation2 + $0xd4] sm:$0xf] %vm519_vm1, %v677_v16  ;;  %983 = vst.msk [vmem:[#allocation2 + $0x1e0] sm:$0xf] %vm519_vm1, %v943_v4 }
 0x4fe   : > { %v945_v12 = vpop.permute.xlu1 %944  ;;  %v679_v58 = vpop.permute.xlu0 %678 }
 0x4ff   : > { %984 = vst.msk [vmem:[#allocation2 + $0x1e4] sm:$0xf] %vm519_vm1, %v945_v12  ;;  %721 = vst.msk [vmem:[#allocation2 + $0xd8] sm:$0xf] %vm519_vm1, %v679_v58 }
 0x502   : > { %v681_v27 = vpop.permute.xlu1 %680 }
 0x503   : > { %722 = vst.msk [vmem:[#allocation2 + $0xdc] sm:$0xf] %vm519_vm1, %v681_v27 }
 0x52e   : > { %v9158_v62 = vpop.f32.mrf.mxu0 }
 0x52f   : > { %10258 = vst [vmem:[#allocation35_spill] sm:$0xff] %v9158_v62 }
 0x530   : > { %v7247_v2 = vpop.f32.mrf.mxu0 }
 0x532   : > { %v9160_v47 = vpop.f32.mrf.mxu0 }
 0x533   : > { %10259 = vst [vmem:[#allocation36_spill] sm:$0xff] %v9160_v47 }
 0x534   : > { %v7248_v40 = vpop.f32.mrf.mxu0 }
 0x55f   : > { %v9162_v45 = vpop.f32.mrf.mxu1 }
 0x560   : > { %10260 = vst [vmem:[#allocation37_spill] sm:$0xff] %v9162_v45 }
 0x561   : > { %v7253_v20 = vpop.f32.mrf.mxu1 }
 0x563   : > { %v9164_v49 = vpop.f32.mrf.mxu1  ;;  %v9166_v63 = vpop.f32.mrf.mxu0 }
 0x564   : > { %10261 = vst [vmem:[#allocation38_spill] sm:$0xff] %v9164_v49  ;;  %10262 = vst [vmem:[#allocation39_spill] sm:$0xff] %v9166_v63 }
 0x565   : > { %v7254_v39 = vpop.f32.mrf.mxu1  ;;  %v7259_v16 = vpop.f32.mrf.mxu0 }
 0x567   : > { %v9168_v4 = vpop.f32.mrf.mxu0  ;;  %v9170_v12 = vpop.f32.mrf.mxu1 }
 0x568   : > { %10263 = vst [vmem:[#allocation40_spill] sm:$0xff] %v9168_v4  ;;  %10264 = vst [vmem:[#allocation41_spill] sm:$0xff] %v9170_v12 }
 0x569   : > { %v7260_v58 = vpop.f32.mrf.mxu0  ;;  %v7265_v27 = vpop.f32.mrf.mxu1 }
 0x56b   : > { %v9172_v28 = vpop.f32.mrf.mxu0  ;;  %v9174_v2 = vpop.f32.mrf.mxu1 }
 0x56c   : > { %10265 = vst [vmem:[#allocation42_spill] sm:$0xff] %v9172_v28  ;;  %10266 = vst [vmem:[#allocation43_spill] sm:$0xff] %v9174_v2 }
 0x56d   : > { %v7271_v40 = vpop.f32.mrf.mxu0  ;;  %v7266_v62 = vpop.f32.mrf.mxu1 }
 0x56e   : > { %v9189_v40 = vld [vmem:[%s10209_s3 + $0x20] sm:$0xff] }
 0x56f   : > { %v9176_v45 = vpop.f32.mrf.mxu0 }
 0x570   : > { %10267 = vst [vmem:[#allocation44_spill] sm:$0xff] %v9176_v45 }
 0x571   : > { %v7272_v20 = vpop.f32.mrf.mxu0 }
 0x573   : > { %v9178_v49 = vpop.f32.mrf.mxu1  ;;  %v9180_v63 = vpop.f32.mrf.mxu0 }
 0x574   : > { %10268 = vst [vmem:[#allocation45_spill] sm:$0xff] %v9178_v49  ;;  %10269 = vst [vmem:[#allocation46_spill] sm:$0xff] %v9180_v63 }
 0x575   : > { %v7277_v39 = vpop.f32.mrf.mxu1  ;;  %v7283_v16 = vpop.f32.mrf.mxu0 }
 0x576   : > { %v9199_v16 = vld [vmem:[%s10209_s3 + $0x28] sm:$0xff] }
 0x577   : > { %v9182_v4 = vpop.f32.mrf.mxu1  ;;  %v9184_v12 = vpop.f32.mrf.mxu0 }
 0x578   : > { %10270 = vst [vmem:[#allocation47_spill] sm:$0xff] %v9182_v4  ;;  %10271 = vst [vmem:[#allocation48_spill] sm:$0xff] %v9184_v12 }
 0x579   : > { %v7278_v58 = vpop.f32.mrf.mxu1  ;;  %v7284_v27 = vpop.f32.mrf.mxu0 }
 0x57b   : > { %v9191_v62 = vpop.f32.mrf.mxu1  ;;  %v3696_v20 = vpop.f32.mrf.mxu0 }
 0x57c   : > { %10272 = vst [vmem:[#allocation49_spill] sm:$0xff] %v9191_v62  ;;  %v9194_v45 = vadd.f32 %v9189_v40, %v3696_v20 }
 0x57d   : > { %v7289_v63 = vpop.f32.mrf.mxu1  ;;  %v7295_v39 = vpop.f32.mrf.mxu0 }
 0x57e   : > { %v4102_v58 = vsel %vm1758_vm4, %v9194_v45, -inf }
 0x57f   : > { %v3699_v27 = vpop.f32.mrf.mxu0  ;;  %4103 = vmax.xlane.f32.xlu0 %v4102_v58  ;;  %v9203_v12 = vpop.f32.mrf.mxu1 }
 0x580   : > { %10273 = vst [vmem:[#allocation50_spill] sm:$0xff] %v9203_v12  ;;  %v9206_v4 = vadd.f32 %v9199_v16, %v3699_v27 }
 0x581   : > { %v7290_v62 = vpop.f32.mrf.mxu1  ;;  %v7296_v20 = vpop.f32.mrf.mxu0 }
 0x582   : > { %v4105_v63 = vsel %vm1758_vm4, %v9206_v4, -inf }
 0x583   : > { %4106 = vmax.xlane.f32.xlu1 %v4105_v63  ;;  %v3753_v39 = vpop.f32.mrf.mxu1  ;;  %v3810_v2 = vpop.f32.mrf.mxu0 }
 0x584   : > { %v9211_v49 = vadd.f32 %v9189_v40, %v3753_v39  ;;  %v9214_v28 = vadd.f32 %v9189_v40, %v3810_v2 }
 0x585   : > { %v7301_v58 = vpop.f32.mrf.mxu1  ;;  %v7307_v47 = vpop.f32.mrf.mxu0 }
 0x586   : > { %v4114_v27 = vsel %vm1758_vm4, %v9214_v28, -inf  ;;  %v4108_v62 = vsel %vm1758_vm4, %v9211_v49, -inf }
 0x587   : > { %4115 = vmax.xlane.f32.xlu1 %v4114_v27  ;;  %v3813_v20 = vpop.f32.mrf.mxu0  ;;  %4109 = vmax.xlane.f32.xlu0 %v4108_v62  ;;  %v3756_v63 = vpop.f32.mrf.mxu1 }
 0x588   : > { %v9221_v12 = vadd.f32 %v9199_v16, %v3756_v63  ;;  %v9224_v2 = vadd.f32 %v9199_v16, %v3813_v20 }
 0x589   : > { %v7302_v39 = vpop.f32.mrf.mxu1  ;;  %v7308_v31 = vpop.f32.mrf.mxu0 }
 0x58a   : > { %v4111_v47 = vsel %vm1758_vm4, %v9221_v12, -inf  ;;  %v4117_v31 = vsel %vm1758_vm4, %v9224_v2, -inf }
 0x58b   : > { %v3924_v58 = vpop.f32.mrf.mxu0  ;;  %4112 = vmax.xlane.f32.xlu0 %v4111_v47  ;;  %v3867_v17 = vpop.f32.mrf.mxu1 }
 0x58c   : > { %v9229_v56 = vadd.f32 %v9189_v40, %v3867_v17  ;;  %v9232_v9 = vadd.f32 %v9189_v40, %v3924_v58 }
 0x58d   : > { %v7313_v27 = vpop.f32.mrf.mxu1  ;;  %v7319_v62 = vpop.f32.mrf.mxu0 }
 0x58e   : > { %v4120_v20 = vsel %vm1758_vm4, %v9229_v56, -inf  ;;  %v4126_v58 = vsel %vm1758_vm4, %v9232_v9, -inf }
 0x58f   : > { %v3927_v63 = vpop.f32.mrf.mxu0  ;;  %4118 = vmax.xlane.f32.xlu0 %v4117_v31  ;;  %4121 = vmax.xlane.f32.xlu1 %v4120_v20  ;;  %v3870_v39 = vpop.f32.mrf.mxu1 }
 0x590   : > { %v9239_v47 = vadd.f32 %v9199_v16, %v3870_v39  ;;  %v9242_v27 = vadd.f32 %v9199_v16, %v3927_v63 }
 0x591   : > { %v7314_v17 = vpop.f32.mrf.mxu1  ;;  %v7320_v8 = vpop.f32.mrf.mxu0 }
 0x592   : > { %v4123_v62 = vsel %vm1758_vm4, %v9239_v47, -inf  ;;  %v4129_v63 = vsel %vm1758_vm4, %v9242_v27, -inf }
 0x593   : > { %v4038_v24 = vpop.f32.mrf.mxu0  ;;  %4127 = vmax.xlane.f32.xlu1 %v4126_v58  ;;  %4124 = vmax.xlane.f32.xlu0 %v4123_v62  ;;  %v3981_v31 = vpop.f32.mrf.mxu1 }
 0x594   : > { %v9249_v20 = vadd.f32 %v9189_v40, %v3981_v31  ;;  %v9252_v8 = vadd.f32 %v9189_v40, %v4038_v24 }
 0x595   : > { %v7325_v39 = vpop.f32.mrf.mxu1  ;;  %v7331_v6 = vpop.f32.mrf.mxu0 }
 0x596   : > { %v4132_v17 = vsel %vm1758_vm4, %v9249_v20, -inf  ;;  %v4138_v24 = vsel %vm1758_vm4, %v9252_v8, -inf }
 0x597   : > { %v4041_v26 = vpop.f32.mrf.mxu0  ;;  %4130 = vmax.xlane.f32.xlu0 %v4129_v63  ;;  %4133 = vmax.xlane.f32.xlu1 %v4132_v17  ;;  %v3984_v58 = vpop.f32.mrf.mxu1 }
 0x598   : > { %v9259_v62 = vadd.f32 %v9199_v16, %v4041_v26  ;;  %v9262_v6 = vadd.f32 %v9199_v16, %v3984_v58 }
 0x599   : > { %v7326_v31 = vpop.f32.mrf.mxu1  ;;  %v7332_v19 = vpop.f32.mrf.mxu0 }
 0x59a   : > { %v4141_v39 = vsel %vm1758_vm4, %v9259_v62, -inf  ;;  %v4135_v26 = vsel %vm1758_vm4, %v9262_v6, -inf }
 0x59b   : > { %4139 = vmax.xlane.f32.xlu0 %v4138_v24  ;;  %4142 = vmax.xlane.f32.xlu1 %v4141_v39  ;;  %v4095_v15 = vpop.f32.mrf.mxu1 }
 0x59c   : > { %v9269_v17 = vadd.f32 %v9189_v40, %v4095_v15 }
 0x59d   : > { %v7337_v63 = vpop.f32.mrf.mxu1 }
 0x59e   : > { %v4144_v5 = vsel %vm1758_vm4, %v9269_v17, -inf }
 0x59f   : > { %4136 = vmax.xlane.f32.xlu0 %v4135_v26  ;;  %v4098_v19 = vpop.f32.mrf.mxu1 }
 0x5a0   : > { %v9274_v31 = vadd.f32 %v9199_v16, %v4098_v19 }
 0x5a1   : > { %v7338_v58 = vpop.f32.mrf.mxu1 }
 0x5a2   : > { %v4147_v24 = vsel %vm1758_vm4, %v9274_v31, -inf }
 0x5a3   : > { %4145 = vmax.xlane.f32.xlu0 %v4144_v5 }
 0x5a7   : > { %4148 = vmax.xlane.f32.xlu0 %v4147_v24 }
 0x5ac   : > { %948 = vrot.lane.b32.xlu1 %v8162_v38, %s8007_s26 }
 0x5b0   : > { %684 = vrot.lane.b32.xlu1 %v8172_v44, %s8008_s28 }
 0x5b4   : > { %952 = vrot.lane.b32.xlu1 %v8215_v59, %s8007_s26 }
 0x5b8   : > { %688 = vrot.lane.b32.xlu1 %v8162_v38, %s8008_s28 }
 0x5bc   : > { %956 = vrot.lane.b32.xlu1 %v8208_v57, %s8007_s26 }
 0x5bd   : > { %946 = vrot.lane.b32.xlu0 %v8138_v25, %s8007_s26 }
 0x5c0   : > { %692 = vrot.lane.b32.xlu1 %v8215_v59, %s8008_s28 }
 0x5c1   : > { %682 = vrot.lane.b32.xlu0 %v8150_v32, %s8008_s28 }
 0x5c4   : > { %696 = vrot.lane.b32.xlu1 %v8208_v57, %s8008_s28 }
 0x5c5   : > { %950 = vrot.lane.b32.xlu0 %v8197_v54, %s8007_s26 }
 0x5c8   : > { %1186 = vrot.lane.b32.xlu1 %v8125_v18, %s8009_s12 }
 0x5c9   : > { %686 = vrot.lane.b32.xlu0 %v8138_v25, %s8008_s28 }
 0x5cc   : > { %1190 = vrot.lane.b32.xlu1 %v8122_v14, %s8009_s12 }
 0x5cd   : > { %954 = vrot.lane.b32.xlu0 %v8184_v50, %s8007_s26  ;;  %s8013_s26 = smov [#allocation5]  }
 0x5d0   : > { %1192 = vrot.lane.b32.xlu1 %v8133_v23, %s8009_s12 }
 0x5d1   : > { %690 = vrot.lane.b32.xlu0 %v8197_v54, %s8008_s28 }
 0x5d4   : > { %1194 = vrot.lane.b32.xlu1 %v8169_v42, %s8009_s12 }
 0x5d5   : > { %694 = vrot.lane.b32.xlu0 %v8184_v50, %s8008_s28  ;;  %s7939_s28 = sshll.u32 %s8013_s26, 4  ;;  %s7940_s28 = int_to_ptr.vmem [resolvable:$false] %s7939_s28 }
 0x5d6   : > { %s7941_s29 = scalar_lea.vmem %s7940_s28, 4096  ;;  %p7942_p0 = scmp.lt.s32.totalorder %s10160_s15, %s7940_s28 }
 0x5d7   : > { %p7943_p1 = scmp.lt.s32.totalorder %s7941_s29, %s7935_s20 }
 0x5d8   : > { %1198 = vrot.lane.b32.xlu1 %v8157_v36, %s8009_s12 }
 0x5d9   : > { %1188 = vrot.lane.b32.xlu0 %v8145_v30, %s8009_s12  ;;  %p7944_p2 = por %p7943_p1, %p7942_p0 }
 0x5db   : > { %p7945_p3 = pnand %p7944_p2, %p7938_p13 }
 0x5dc   : > { %1200 = vrot.lane.b32.xlu1 %v8179_v48, %s8009_s12 }
 0x5dd   : > { %1196 = vrot.lane.b32.xlu0 %v8195_v53, %s8009_s12 }
 0x5e0   : > { %1204 = vrot.lane.b32.xlu1 %v8172_v44, %s8009_s12 }
 0x5e1   : > { %1202 = vrot.lane.b32.xlu0 %v8150_v32, %s8009_s12 }
 0x5e4   : > { %1208 = vrot.lane.b32.xlu1 %v8162_v38, %s8009_s12 }
 0x5e5   : > { %1206 = vrot.lane.b32.xlu0 %v8138_v25, %s8009_s12 }
 0x5e8   : > { %1212 = vrot.lane.b32.xlu1 %v8215_v59, %s8009_s12 }
 0x5e9   : > { %1210 = vrot.lane.b32.xlu0 %v8197_v54, %s8009_s12 }
 0x608   : > { %v4104_v14 = vpop.xlane.xlu0 %4103 }
 0x609   : > { %v4150_v18 = vsub.f32 %v9194_v45, %v4104_v14 }
 0x60b   : > { %v4166_v23 = vmul.f32 1.442695, %v4150_v18  ;;  %v7639_v18 = vld [vmem:[#allocation2 + $0x290] sm:$0xff]  }
 0x60c   : > { %v4107_v30 = vpop.xlane.xlu1 %4106 }
 0x60d   : > { %v4151_v36 = vsub.f32 %v9206_v4, %v4107_v30  ;;  %7743 = vpow2.f32 %v4166_v23 }
 0x60f   : > { %v4168_v32 = vmul.f32 1.442695, %v4151_v36 }
 0x610   : > { %v4110_v42 = vpop.xlane.xlu0 %4109  ;;  %v4116_v38 = vpop.xlane.xlu1 %4115 }
 0x611   : > { %7745 = vpow2.f32 %v4168_v32  ;;  %v4152_v25 = vsub.f32 %v9211_v49, %v4110_v42  ;;  %v4154_v44 = vsub.f32 %v9214_v28, %v4116_v38 }
 0x613   : > { %v4170_v48 = vmul.f32 1.442695, %v4152_v25  ;;  %v4174_v15 = vmul.f32 1.442695, %v4154_v44 }
 0x614   : > { %v4113_v53 = vpop.xlane.xlu0 %4112 }
 0x615   : > { %v4153_v54 = vsub.f32 %v9221_v12, %v4113_v53  ;;  %7747 = vpow2.f32 %v4170_v48 }
 0x617   : > { %v4172_v59 = vmul.f32 1.442695, %v4153_v54 }
 0x618   : > { %v4119_v5 = vpop.xlane.xlu0 %4118  ;;  %v4122_v45 = vpop.xlane.xlu1 %4121 }
 0x619   : > { %7749 = vpow2.f32 %v4172_v59  ;;  %v4155_v4 = vsub.f32 %v9224_v2, %v4119_v5  ;;  %v4156_v40 = vsub.f32 %v9229_v56, %v4122_v45 }
 0x61a   : > { %7751 = vpow2.f32 %v4174_v15  ;;  %v9343_v63 = vpop.eup %7743 }
 0x61b   : > { %v4176_v16 = vmul.f32 1.442695, %v4155_v4  ;;  %v4178_v28 = vmul.f32 1.442695, %v4156_v40 }
 0x61c   : > { %v4128_v39 = vpop.xlane.xlu1 %4127  ;;  %v4125_v49 = vpop.xlane.xlu0 %4124 }
 0x61d   : > { %7753 = vpow2.f32 %v4176_v16  ;;  %v4158_v12 = vsub.f32 %v9232_v9, %v4128_v39  ;;  %v4157_v26 = vsub.f32 %v9239_v47, %v4125_v49 }
 0x61e   : > { %v9347_v19 = vpop.eup %7745  ;;  %7755 = vpow2.f32 %v4178_v28 }
 0x61f   : > { %v4180_v58 = vmul.f32 1.442695, %v4157_v26  ;;  %v4246_v2 = vpack.c.bf16 %v9347_v19, %v9343_v63  ;;  %v4182_v24 = vmul.f32 1.442695, %v4158_v12 }
 0x620   : > { %v4131_v56 = vpop.xlane.xlu0 %4130  ;;  %v4134_v14 = vpop.xlane.xlu1 %4133 }
 0x621   : > { %v4159_v23 = vsub.f32 %v9242_v27, %v4131_v56  ;;  %7342 = vmatmul.mubr.msk.bf16.vlgmr.msra.gmra.mxu0 %vm1758_vm4, %v4246_v2  ;;  %7757 = vpow2.f32 %v4180_v58  ;;  %v4160_v47 = vsub.f32 %v9249_v20, %v4134_v14  ;;  %v7640_v20 = vld [vmem:[#allocation2 + $0x298] sm:$0xff]  }
 0x622   : > { %7352 = vmatpush3.bf16.msra.mxu0 %v7639_v18  ;;  %7353 = vmatprep.mubr.msk.bf16.mxu0 %vm7999_vm2, %v10257_v10  ;;  %7759 = vpow2.f32 %v4182_v24  ;;  %v9357_v32 = vpop.eup %7747  ;;  %v7642_v24 = vld [vmem:[#allocation2 + $0x2a8] sm:$0xff]  }
 0x623   : > { %v4184_v9 = vmul.f32 1.442695, %v4159_v23  ;;  %7363 = vmatprep.subr.bf16.mxu0 %v10257_v10  ;;  %v4186_v53 = vmul.f32 1.442695, %v4160_v47  ;;  %v7643_v47 = vld [vmem:[#allocation2 + $0x2b0] sm:$0xff]  }
 0x624   : > { %v4140_v30 = vpop.xlane.xlu0 %4139  ;;  %v4143_v36 = vpop.xlane.xlu1 %4142 }
 0x625   : > { %7761 = vpow2.f32 %v4184_v9  ;;  %v4162_v27 = vsub.f32 %v9252_v8, %v4140_v30  ;;  %v4163_v42 = vsub.f32 %v9259_v62, %v4143_v36 }
 0x626   : > { %v9361_v38 = vpop.eup %7749 }
 0x627   : > { %v4190_v25 = vmul.f32 1.442695, %v4162_v27  ;;  %v4192_v44 = vmul.f32 1.442695, %v4163_v42  ;;  %v4247_v48 = vpack.c.bf16 %v9361_v38, %v9357_v32  ;;  %v9365_v15 = vpop.eup %7751 }
 0x628   : > { %v949_v54 = vpop.permute.xlu1 %948  ;;  %v4137_v59 = vpop.xlane.xlu0 %4136 }
 0x629   : > { %986 = vst.msk [vmem:[#allocation2 + $0x1ec] sm:$0xf] %vm519_vm1, %v949_v54  ;;  %v4161_v5 = vsub.f32 %v9262_v6, %v4137_v59  ;;  %7348 = vmatmul.mubr.msk.bf16.vlgmr.msra.gmra.mxu1 %vm1758_vm4, %v4247_v48  ;;  %7763 = vpow2.f32 %v4190_v25  ;;  %v7641_v6 = vld [vmem:[#allocation2 + $0x2a0] sm:$0xff]  }
 0x62a   : > { %v9370_v8 = vpop.eup %7753  ;;  %7358 = vmatpush3.bf16.msra.mxu1 %v7640_v20  ;;  %7359 = vmatprep.mubr.msk.bf16.mxu1 %vm7999_vm2, %v10257_v10  ;;  %7765 = vpow2.f32 %v4192_v44  ;;  %v7645_v25 = vld [vmem:[#allocation2 + $0x1c0] sm:$0xff]   ;;  %v7644_v20 = vld [vmem:[#allocation2 + $0x2b8] sm:$0xff]  }
 0x62b   : > { %v4188_v62 = vmul.f32 1.442695, %v4161_v5  ;;  %v4248_v45 = vpack.c.bf16 %v9370_v8, %v9365_v15  ;;  %7369 = vmatprep.subr.bf16.mxu1 %v10257_v10  ;;  %7767 = vpow2.f32 %v4186_v53  ;;  %v9380_v39 = vpop.eup %7755  ;;  %v4832_v5 = vsel %vm1311_vm3, %v7645_v25, 0 }
 0x62c   : > { %v685_v4 = vpop.permute.xlu1 %684  ;;  %v4146_v40 = vpop.xlane.xlu0 %4145 }
 0x62d   : > { %7769 = vpow2.f32 %v4188_v62  ;;  %724 = vst.msk [vmem:[#allocation2 + $0xe4] sm:$0xf] %vm519_vm1, %v685_v4  ;;  %v4164_v16 = vsub.f32 %v9269_v17, %v4146_v40  ;;  %7354 = vmatmul.mubr.msk.bf16.vlgmr.msra.gmra.mxu0 %vm1758_vm4, %v4248_v45  ;;  %v7647_v40 = vld [vmem:[#allocation2 + $0x1c8] sm:$0xff]  }
 0x62e   : > { %7364 = vmatpush3.bf16.msra.mxu0 %v7641_v6  ;;  %7365 = vmatprep.mubr.msk.bf16.mxu0 %vm7999_vm2, %v10257_v10  ;;  %v9384_v49 = vpop.eup %7757  ;;  %v7648_v6 = vld [vmem:[#allocation2 + $0x1d0] sm:$0xff]  }
 0x62f   : > { %7375 = vmatprep.subr.bf16.mxu0 %v10257_v10  ;;  %v4194_v28 = vmul.f32 1.442695, %v4164_v16  ;;  %v4249_v58 = vpack.c.bf16 %v9384_v49, %v9380_v39  ;;  %v9389_v2 = vpop.eup %7759 }
 0x630   : > { %v953_v12 = vpop.permute.xlu1 %952  ;;  %v4149_v26 = vpop.xlane.xlu0 %4148 }
 0x631   : > { %988 = vst.msk [vmem:[#allocation2 + $0x1f4] sm:$0xf] %vm519_vm1, %v953_v12  ;;  %v4165_v17 = vsub.f32 %v9274_v31, %v4149_v26  ;;  %7360 = vmatmul.mubr.msk.bf16.vlgmr.msra.gmra.mxu1 %vm1758_vm4, %v4249_v58  ;;  %7771 = vpow2.f32 %v4194_v28  ;;  %v7646_v12 = vld [vmem:[#allocation2 + $0xc0] sm:$0xff]  }
 0x632   : > { %v9393_v56 = vpop.eup %7761  ;;  %7370 = vmatpush3.bf16.msra.mxu1 %v7642_v24  ;;  %7371 = vmatprep.mubr.msk.bf16.mxu1 %vm7999_vm2, %v10257_v10  ;;  %v4946_v24 = vsel %vm1311_vm3, %v7648_v6, 0 }
 0x633   : > { %v4196_v14 = vmul.f32 1.442695, %v4165_v17  ;;  %v4250_v18 = vpack.c.bf16 %v9393_v56, %v9389_v2  ;;  %7381 = vmatprep.subr.bf16.mxu1 %v10257_v10  ;;  %v4889_v17 = vsel %vm1311_vm3, %v7647_v40, 0 }
 0x634   : > { %v689_v23 = vpop.permute.xlu1 %688  ;;  %v947_v9 = vpop.permute.xlu0 %946 }
 0x635   : > { %7773 = vpow2.f32 %v4196_v14  ;;  %726 = vst.msk [vmem:[#allocation2 + $0xec] sm:$0xf] %vm519_vm1, %v689_v23  ;;  %985 = vst.msk [vmem:[#allocation2 + $0x1e8] sm:$0xf] %vm519_vm1, %v947_v9  ;;  %7366 = vmatmul.mubr.msk.bf16.vlgmr.msra.gmra.mxu0 %vm1758_vm4, %v4250_v18  ;;  %v7651_v23 = vld [vmem:[#allocation2 + $0x1d8] sm:$0xff]   ;;  %v7652_v9 = vld [vmem:[#allocation2 + $0x1e0] sm:$0xff]  }
 0x636   : > { %7376 = vmatpush3.bf16.msra.mxu0 %v7643_v47  ;;  %7377 = vmatprep.mubr.msk.bf16.mxu0 %vm7999_vm2, %v10257_v10  ;;  %v9406_v31 = vpop.eup %7763  ;;  %v7649_v47 = vld [vmem:[#allocation2 + $0xc8] sm:$0xff]  }
 0x637   : > { %7387 = vmatprep.subr.bf16.mxu0 %v10257_v10  ;;  %v9409_v30 = vpop.eup %7765 }
 0x638   : > { %v957_v36 = vpop.permute.xlu1 %956  ;;  %v683_v27 = vpop.permute.xlu0 %682  ;;  %v4252_v53 = vpack.c.bf16 %v9409_v30, %v9406_v31 }
 0x639   : > { %v9411_v42 = vpop.eup %7767  ;;  %990 = vst.msk [vmem:[#allocation2 + $0x1fc] sm:$0xf] %vm519_vm1, %v957_v36  ;;  %723 = vst.msk [vmem:[#allocation2 + $0xe0] sm:$0xf] %vm519_vm1, %v683_v27  ;;  %v7650_v36 = vld [vmem:[#allocation2 + $0xd0] sm:$0xff]  }
 0x63a   : > { %v9415_v44 = vpop.eup %7769 }
 0x63b   : > { %v4251_v48 = vpack.c.bf16 %v9415_v44, %v9411_v42 }
 0x63c   : > { %v693_v54 = vpop.permute.xlu1 %692  ;;  %v951_v59 = vpop.permute.xlu0 %950 }
 0x63d   : > { %728 = vst.msk [vmem:[#allocation2 + $0xf4] sm:$0xf] %vm519_vm1, %v693_v54  ;;  %987 = vst.msk [vmem:[#allocation2 + $0x1f0] sm:$0xf] %vm519_vm1, %v951_v59  ;;  %7372 = vmatmul.mubr.msk.bf16.vlgmr.msra.gmra.mxu1 %vm1758_vm4, %v4251_v48  ;;  %7378 = vmatmul.mubr.msk.bf16.vlgmr.msra.gmra.mxu0 %vm1758_vm4, %v4252_v53  ;;  %v5003_v48 = vsel %vm1311_vm3, %v7651_v23, 0  ;;  %v5060_v53 = vsel %vm1311_vm3, %v7652_v9, 0 }
 0x63e   : > { %7382 = vmatpush3.bf16.msra.mxu1 %v7644_v20  ;;  %7388 = vmatpush3.bf16.xpose.msra.mxu0 %v4832_v5  ;;  %v9432_v4 = vpop.eup %7771  ;;  %v7655_v20 = vld [vmem:[#allocation2 + $0x1e8] sm:$0xff]  }
 0x63f   : > { %7389 = vmatprep.mubr.msk.bf16.mxu0 %vm7999_vm2, %v10257_v10  ;;  %7399 = vmatprep.subr.bf16.mxu0 %v10257_v10 }
 0x640   : > { %v697_v62 = vpop.permute.xlu1 %696  ;;  %v687_v45 = vpop.permute.xlu0 %686  ;;  %7383 = vmatprep.mubr.msk.bf16.mxu1 %vm7999_vm2, %v10257_v10  ;;  %7393 = vmatprep.subr.bf16.mxu1 %v10257_v10 }
 0x641   : > { %730 = vst.msk [vmem:[#allocation2 + $0xfc] sm:$0xf] %vm519_vm1, %v697_v62  ;;  %725 = vst.msk [vmem:[#allocation2 + $0xe8] sm:$0xf] %vm519_vm1, %v687_v45  ;;  %v7653_v62 = vld [vmem:[#allocation2 + $0xd8] sm:$0xff]   ;;  %v7654_v45 = vld [vmem:[#allocation2 + $0xe0] sm:$0xff]  }
 0x642   : > { %v9436_v16 = vpop.eup %7773 }
 0x643   : > { %v4253_v28 = vpack.c.bf16 %v9436_v16, %v9432_v4 }
 0x644   : > { %v1187_v26 = vpop.permute.xlu1 %1186  ;;  %v955_v58 = vpop.permute.xlu0 %954  ;;  %v7656_v5 = vld [vmem:[#allocation2 + $0x1f0] sm:$0xff]  }
 0x645   : > { %1235 = vst.msk [vmem:[#allocation2 + $0x2c0] sm:$0xf] %vm519_vm1, %v1187_v26  ;;  %989 = vst.msk [vmem:[#allocation2 + $0x1f8] sm:$0xf] %vm519_vm1, %v955_v58  ;;  %7384 = vmatmul.mubr.msk.bf16.vlgmr.msra.gmra.mxu1 %vm1758_vm4, %v4253_v28  ;;  %7390 = vmatmul.mubr.msk.bf16.vlgmr.msra.gmra.mxu0 %vm1311_vm3, %v7646_v12  ;;  %v5117_v28 = vsel %vm1311_vm3, %v7655_v20, 0  ;;  %v5174_v12 = vsel %vm1311_vm3, %v7656_v5, 0 }
 0x646   : > { %7394 = vmatpush3.bf16.xpose.msra.mxu1 %v4889_v17  ;;  %7400 = vmatpush3.bf16.xpose.msra.mxu0 %v4946_v24 }
 0x647   : > { %7401 = vmatprep.mubr.msk.bf16.mxu0 %vm7999_vm2, %v10257_v10  ;;  %7411 = vmatprep.subr.bf16.mxu0 %v10257_v10 }
 0x648   : > { %v1191_v14 = vpop.permute.xlu1 %1190  ;;  %v691_v18 = vpop.permute.xlu0 %690  ;;  %7395 = vmatprep.mubr.msk.bf16.mxu1 %vm7999_vm2, %v10257_v10  ;;  %7405 = vmatprep.subr.bf16.mxu1 %v10257_v10  ;;  %v7657_v24 = vld [vmem:[#allocation2 + $0xe8] sm:$0xff]  }
 0x649   : > { %1237 = vst.msk [vmem:[#allocation2 + $0x2c8] sm:$0xf] %vm519_vm1, %v1191_v14  ;;  %727 = vst.msk [vmem:[#allocation2 + $0xf0] sm:$0xf] %vm519_vm1, %v691_v18 }
 0x64c   : > { %v1193_v27 = vpop.permute.xlu1 %1192  ;;  %v695_v25 = vpop.permute.xlu0 %694  ;;  %v7659_v17 = vld [vmem:[#allocation2 + $0x1f8] sm:$0xff]  }
 0x64d   : > { %1238 = vst.msk [vmem:[#allocation2 + $0x2cc] sm:$0xf] %vm519_vm1, %v1193_v27  ;;  %729 = vst.msk [vmem:[#allocation2 + $0xf8] sm:$0xf] %vm519_vm1, %v695_v25  ;;  %7396 = vmatmul.mubr.msk.bf16.vlgmr.msra.gmra.mxu1 %vm1311_vm3, %v7649_v47  ;;  %7402 = vmatmul.mubr.msk.bf16.vlgmr.msra.gmra.mxu0 %vm1311_vm3, %v7650_v36  ;;  %v5231_v47 = vsel %vm1311_vm3, %v7659_v17, 0 }
 0x64e   : > { %7406 = vmatpush3.bf16.xpose.msra.mxu1 %v5003_v48  ;;  %7412 = vmatpush3.bf16.xpose.msra.mxu0 %v5060_v53 }
 0x64f   : > { %7413 = vmatprep.mubr.msk.bf16.mxu0 %vm7999_vm2, %v10257_v10  ;;  %7423 = vmatprep.subr.bf16.mxu0 %v10257_v10 }
 0x650   : > { %v1195_v54 = vpop.permute.xlu1 %1194  ;;  %v1189_v59 = vpop.permute.xlu0 %1188  ;;  %7407 = vmatprep.mubr.msk.bf16.mxu1 %vm7999_vm2, %v10257_v10  ;;  %7417 = vmatprep.subr.bf16.mxu1 %v10257_v10  ;;  %v7658_v14 = vld [vmem:[#allocation2 + $0xf0] sm:$0xff]  }
 0x651   : > { %1239 = vst.msk [vmem:[#allocation2 + $0x2d0] sm:$0xf] %vm519_vm1, %v1195_v54  ;;  %1236 = vst.msk [vmem:[#allocation2 + $0x2c4] sm:$0xf] %vm519_vm1, %v1189_v59 }
 0x654   : > { %v1199_v40 = vpop.permute.xlu1 %1198  ;;  %v1197_v6 = vpop.permute.xlu0 %1196  ;;  %v7661_v25 = vld [vmem:[#allocation2 + $0xf8] sm:$0xff]   ;;  %v7662_v53 = vld [vmem:[#allocation2 + $0x2c8] sm:$0xff]  }
 0x655   : > { %1241 = vst.msk [vmem:[#allocation2 + $0x2d8] sm:$0xf] %vm519_vm1, %v1199_v40  ;;  %1240 = vst.msk [vmem:[#allocation2 + $0x2d4] sm:$0xf] %vm519_vm1, %v1197_v6  ;;  %7408 = vmatmul.mubr.msk.bf16.vlgmr.msra.gmra.mxu1 %vm1311_vm3, %v7653_v62  ;;  %7414 = vmatmul.mubr.msk.bf16.vlgmr.msra.gmra.mxu0 %vm1311_vm3, %v7654_v45 }
 0x656   : > { %7418 = vmatpush3.bf16.xpose.msra.mxu1 %v5117_v28  ;;  %7424 = vmatpush3.bf16.xpose.msra.mxu0 %v5174_v12 }
 0x657   : > { %7419 = vmatprep.mubr.msk.bf16.mxu1 %vm7999_vm2, %v10257_v10  ;;  %7425 = vmatprep.mubr.msk.bf16.mxu0 %vm7999_vm2, %v10257_v10 }
 0x658   : > { %v1201_v26 = vpop.permute.xlu1 %1200  ;;  %v1203_v58 = vpop.permute.xlu0 %1202  ;;  %7429 = vmatprep.subr.bf16.mxu1 %v10257_v10  ;;  %7435 = vmatprep.subr.bf16.mxu0 %v10257_v10  ;;  %v7660_v9 = vld [vmem:[#allocation2 + $0x2c0] sm:$0xff]  }
 0x659   : > { %1242 = vst.msk [vmem:[#allocation2 + $0x2dc] sm:$0xf] %vm519_vm1, %v1201_v26  ;;  %1243 = vst.msk [vmem:[#allocation2 + $0x2e0] sm:$0xf] %vm519_vm1, %v1203_v58 }
 0x65c   : > { %v1205_v18 = vpop.permute.xlu1 %1204  ;;  %v1207_v23 = vpop.permute.xlu0 %1206 }
 0x65d   : > { %1244 = vst.msk [vmem:[#allocation2 + $0x2e4] sm:$0xf] %vm519_vm1, %v1205_v18  ;;  %1245 = vst.msk [vmem:[#allocation2 + $0x2e8] sm:$0xf] %vm519_vm1, %v1207_v23  ;;  %7420 = vmatmul.mubr.msk.bf16.vlgmr.msra.gmra.mxu1 %vm1311_vm3, %v7657_v24  ;;  %7426 = vmatmul.mubr.msk.bf16.vlgmr.msra.gmra.mxu0 %vm1311_vm3, %v7658_v14 }
 0x65e   : > { %7430 = vmatpush3.bf16.xpose.msra.mxu1 %v5231_v47  ;;  %7436 = vmatpush3.bf16.msra.mxu0 %v7660_v9 }
 0x65f   : > { %7431 = vmatprep.mubr.msk.bf16.mxu1 %vm7999_vm2, %v10257_v10  ;;  %7441 = vmatprep.subr.bf16.mxu1 %v10257_v10 }
 0x660   : > { %v1209_v36 = vpop.permute.xlu1 %1208  ;;  %v1211_v27 = vpop.permute.xlu0 %1210  ;;  %7437 = vmatprep.mubr.msk.bf16.mxu0 %vm7999_vm2, %v10257_v10  ;;  %7447 = vmatprep.subr.bf16.mxu0 %v10257_v10 }
 0x661   : > { %1246 = vst.msk [vmem:[#allocation2 + $0x2ec] sm:$0xf] %vm519_vm1, %v1209_v36  ;;  %1247 = vst.msk [vmem:[#allocation2 + $0x2f0] sm:$0xf] %vm519_vm1, %v1211_v27 }
 0x664   : > { %v1213_v48 = vpop.permute.xlu1 %1212 }
 0x665   : > { %1248 = vst.msk [vmem:[#allocation2 + $0x2f4] sm:$0xf] %vm519_vm1, %v1213_v48  ;;  %7432 = vmatmul.mubr.msk.bf16.vlgmr.msra.gmra.mxu1 %vm1311_vm3, %v7661_v25 }
 0x666   : > { %7442 = vmatpush3.bf16.msra.mxu1 %v7662_v53  ;;  %7443 = vmatprep.mubr.msk.bf16.mxu1 %vm7999_vm2, %v10257_v10 }
 0x667   : > { %7453 = vmatprep.subr.bf16.mxu1 %v10257_v10 }
 0x6e1   : > { %v9500_v54 = vpop.f32.mrf.mxu0 }
 0x6e2   : > { %10274 = vst [vmem:[#allocation51_spill] sm:$0xff] %v9500_v54 }
 0x6e3   : > { %v7343_v59 = vpop.f32.mrf.mxu0 }
 0x6e5   : > { %v9502_v20 = vpop.f32.mrf.mxu0 }
 0x6e6   : > { %10275 = vst [vmem:[#allocation52_spill] sm:$0xff] %v9502_v20 }
 0x6e7   : > { %v7344_v5 = vpop.f32.mrf.mxu0 }
 0x6e9   : > { %v9504_v62 = vpop.f32.mrf.mxu1 }
 0x6ea   : > { %10276 = vst [vmem:[#allocation53_spill] sm:$0xff] %v9504_v62 }
 0x6eb   : > { %v7349_v45 = vpop.f32.mrf.mxu1 }
 0x6ed   : > { %v9506_v40 = vpop.f32.mrf.mxu1  ;;  %v9508_v6 = vpop.f32.mrf.mxu0 }
 0x6ee   : > { %10277 = vst [vmem:[#allocation54_spill] sm:$0xff] %v9506_v40  ;;  %10278 = vst [vmem:[#allocation55_spill] sm:$0xff] %v9508_v6 }
 0x6ef   : > { %v7350_v28 = vpop.f32.mrf.mxu1  ;;  %v7355_v12 = vpop.f32.mrf.mxu0 }
 0x6f0   : > { %v9531_v12 = vld [vmem:[%s10209_s3 + $0x30] sm:$0xff] }
 0x6f1   : > { %v9510_v26 = vpop.f32.mrf.mxu0  ;;  %v9512_v58 = vpop.f32.mrf.mxu1 }
 0x6f2   : > { %10279 = vst [vmem:[#allocation56_spill] sm:$0xff] %v9510_v26  ;;  %10280 = vst [vmem:[#allocation57_spill] sm:$0xff] %v9512_v58 }
 0x6f3   : > { %v7356_v17 = vpop.f32.mrf.mxu0  ;;  %v7361_v24 = vpop.f32.mrf.mxu1 }
 0x6f5   : > { %v9514_v14 = vpop.f32.mrf.mxu0  ;;  %v9516_v18 = vpop.f32.mrf.mxu1 }
 0x6f6   : > { %10281 = vst [vmem:[#allocation58_spill] sm:$0xff] %v9514_v14  ;;  %10282 = vst [vmem:[#allocation59_spill] sm:$0xff] %v9516_v18 }
 0x6f7   : > { %v7367_v23 = vpop.f32.mrf.mxu0  ;;  %v7362_v9 = vpop.f32.mrf.mxu1 }
 0x6f9   : > { %v9518_v47 = vpop.f32.mrf.mxu0 }
 0x6fa   : > { %10283 = vst [vmem:[#allocation60_spill] sm:$0xff] %v9518_v47 }
 0x6fb   : > { %v7368_v36 = vpop.f32.mrf.mxu0 }
 0x6fd   : > { %v9520_v27 = vpop.f32.mrf.mxu1  ;;  %v9522_v25 = vpop.f32.mrf.mxu0 }
 0x6fe   : > { %10284 = vst [vmem:[#allocation61_spill] sm:$0xff] %v9520_v27  ;;  %10285 = vst [vmem:[#allocation62_spill] sm:$0xff] %v9522_v25 }
 0x6ff   : > { %v7373_v48 = vpop.f32.mrf.mxu1  ;;  %v7379_v53 = vpop.f32.mrf.mxu0 }
 0x700   : > { %v9541_v48 = vld [vmem:[%s10209_s3 + $0x38] sm:$0xff] }
 0x701   : > { %v9524_v59 = vpop.f32.mrf.mxu1  ;;  %v9526_v5 = vpop.f32.mrf.mxu0 }
 0x702   : > { %10286 = vst [vmem:[#allocation63_spill] sm:$0xff] %v9524_v59  ;;  %10287 = vst [vmem:[#allocation64_spill] sm:$0xff] %v9526_v5 }
 0x703   : > { %v7374_v45 = vpop.f32.mrf.mxu1  ;;  %v7380_v28 = vpop.f32.mrf.mxu0 }
 0x705   : > { %v9533_v17 = vpop.f32.mrf.mxu1  ;;  %v4868_v24 = vpop.f32.mrf.mxu0 }
 0x706   : > { %10288 = vst [vmem:[#allocation65_spill] sm:$0xff] %v9533_v17  ;;  %v9536_v23 = vadd.f32 %v9531_v12, %v4868_v24 }
 0x707   : > { %v7385_v9 = vpop.f32.mrf.mxu1  ;;  %v7391_v36 = vpop.f32.mrf.mxu0 }
 0x708   : > { %v5274_v53 = vsel %vm1758_vm4, %v9536_v23, -inf }
 0x709   : > { %v4871_v45 = vpop.f32.mrf.mxu0  ;;  %5275 = vmax.xlane.f32.xlu0 %v5274_v53  ;;  %v9545_v28 = vpop.f32.mrf.mxu1 }
 0x70a   : > { %10289 = vst [vmem:[#allocation66_spill] sm:$0xff] %v9545_v28  ;;  %v9548_v5 = vadd.f32 %v9541_v48, %v4871_v45 }
 0x70b   : > { %v7386_v59 = vpop.f32.mrf.mxu1  ;;  %v7392_v24 = vpop.f32.mrf.mxu0 }
 0x70c   : > { %v5277_v9 = vsel %vm1758_vm4, %v9548_v5, -inf }
 0x70d   : > { %5278 = vmax.xlane.f32.xlu1 %v5277_v9  ;;  %v4925_v36 = vpop.f32.mrf.mxu1  ;;  %v4982_v47 = vpop.f32.mrf.mxu0 }
 0x70e   : > { %v9553_v17 = vadd.f32 %v9531_v12, %v4925_v36  ;;  %v9556_v25 = vadd.f32 %v9531_v12, %v4982_v47 }
 0x70f   : > { %v7397_v53 = vpop.f32.mrf.mxu1  ;;  %v7403_v18 = vpop.f32.mrf.mxu0 }
 0x710   : > { %v5286_v45 = vsel %vm1758_vm4, %v9556_v25, -inf  ;;  %v5280_v59 = vsel %vm1758_vm4, %v9553_v17, -inf }
 0x711   : > { %5287 = vmax.xlane.f32.xlu1 %v5286_v45  ;;  %v4985_v24 = vpop.f32.mrf.mxu0  ;;  %5281 = vmax.xlane.f32.xlu0 %v5280_v59  ;;  %v4928_v9 = vpop.f32.mrf.mxu1 }
 0x712   : > { %v9563_v28 = vadd.f32 %v9541_v48, %v4928_v9  ;;  %v9566_v47 = vadd.f32 %v9541_v48, %v4985_v24 }
 0x713   : > { %v7398_v36 = vpop.f32.mrf.mxu1  ;;  %v7404_v26 = vpop.f32.mrf.mxu0 }
 0x714   : > { %v5283_v18 = vsel %vm1758_vm4, %v9563_v28, -inf  ;;  %v5289_v26 = vsel %vm1758_vm4, %v9566_v47, -inf }
 0x715   : > { %v5096_v53 = vpop.f32.mrf.mxu0  ;;  %5284 = vmax.xlane.f32.xlu0 %v5283_v18  ;;  %v5039_v27 = vpop.f32.mrf.mxu1 }
 0x716   : > { %v9571_v14 = vadd.f32 %v9531_v12, %v5039_v27  ;;  %v9574_v40 = vadd.f32 %v9531_v12, %v5096_v53 }
 0x717   : > { %v7409_v45 = vpop.f32.mrf.mxu1  ;;  %v7415_v59 = vpop.f32.mrf.mxu0 }
 0x718   : > { %v5292_v24 = vsel %vm1758_vm4, %v9571_v14, -inf  ;;  %v5298_v53 = vsel %vm1758_vm4, %v9574_v40, -inf }
 0x719   : > { %v5099_v9 = vpop.f32.mrf.mxu0  ;;  %5290 = vmax.xlane.f32.xlu0 %v5289_v26  ;;  %5293 = vmax.xlane.f32.xlu1 %v5292_v24  ;;  %v5042_v36 = vpop.f32.mrf.mxu1 }
 0x71a   : > { %v9581_v18 = vadd.f32 %v9541_v48, %v5042_v36  ;;  %v9584_v45 = vadd.f32 %v9541_v48, %v5099_v9 }
 0x71b   : > { %v7410_v27 = vpop.f32.mrf.mxu1  ;;  %v7416_v20 = vpop.f32.mrf.mxu0 }
 0x71c   : > { %v5295_v59 = vsel %vm1758_vm4, %v9581_v18, -inf  ;;  %v5301_v9 = vsel %vm1758_vm4, %v9584_v45, -inf }
 0x71d   : > { %v5210_v58 = vpop.f32.mrf.mxu0  ;;  %5299 = vmax.xlane.f32.xlu1 %v5298_v53  ;;  %5296 = vmax.xlane.f32.xlu0 %v5295_v59  ;;  %v5153_v26 = vpop.f32.mrf.mxu1 }
 0x71e   : > { %v9591_v24 = vadd.f32 %v9531_v12, %v5153_v26  ;;  %v9594_v20 = vadd.f32 %v9531_v12, %v5210_v58 }
 0x71f   : > { %v7421_v36 = vpop.f32.mrf.mxu1  ;;  %v7427_v6 = vpop.f32.mrf.mxu0 }
 0x720   : > { %10290 = vst [vmem:[#allocation67_spill] sm:$0xff] %v9591_v24  ;;  %10291 = vst [vmem:[#allocation68_spill] sm:$0xff] %v9594_v20  ;;  %v5304_v27 = vsel %vm1758_vm4, %v9591_v24, -inf  ;;  %v5310_v58 = vsel %vm1758_vm4, %v9594_v20, -inf }
 0x721   : > { %v5213_v62 = vpop.f32.mrf.mxu0  ;;  %5302 = vmax.xlane.f32.xlu0 %v5301_v9  ;;  %5305 = vmax.xlane.f32.xlu1 %v5304_v27  ;;  %v5156_v53 = vpop.f32.mrf.mxu1 }
 0x722   : > { %v9601_v59 = vadd.f32 %v9541_v48, %v5213_v62  ;;  %v9604_v6 = vadd.f32 %v9541_v48, %v5156_v53 }
 0x723   : > { %v7422_v26 = vpop.f32.mrf.mxu1  ;;  %v7428_v54 = vpop.f32.mrf.mxu0 }
 0x724   : > { %v5313_v36 = vsel %vm1758_vm4, %v9601_v59, -inf  ;;  %v5307_v62 = vsel %vm1758_vm4, %v9604_v6, -inf }
 0x725   : > { %5311 = vmax.xlane.f32.xlu0 %v5310_v58  ;;  %5314 = vmax.xlane.f32.xlu1 %v5313_v36  ;;  %v5267_v24 = vpop.f32.mrf.mxu1  ;;  %v1855_v36 = vsel %vm1758_vm4, %v8555_v13, 0.0 }
 0x726   : > { %v9611_v27 = vadd.f32 %v9531_v12, %v5267_v24  ;;  %v3029_v12 = vsel %vm1758_vm4, %v8948_v52, 0.0  ;;  %v4204_v24 = vsel %vm1758_vm4, %v9357_v32, 0.0  ;;  %v3032_v52 = vsel %vm1758_vm4, %v8995_v60, 0.0 }
 0x727   : > { %v7433_v9 = vpop.f32.mrf.mxu1  ;;  %v3035_v32 = vsel %vm1758_vm4, %v8999_v41, 0.0  ;;  %v3050_v60 = vsel %vm1758_vm4, %v9027_v33, 0.0  ;;  %v3056_v41 = vsel %vm1758_vm4, %v9049_v51, 0.0  ;;  %v4228_v33 = vsel %vm1758_vm4, %v9411_v42, 0.0 }
 0x728   : > { %v5316_v20 = vsel %vm1758_vm4, %v9611_v27, -inf  ;;  %v4219_v51 = vsel %vm1758_vm4, %v9384_v49, 0.0  ;;  %v3059_v42 = vsel %vm1758_vm4, %v9053_v43, 0.0  ;;  %v4225_v49 = vsel %vm1758_vm4, %v9393_v56, 0.0 }
 0x729   : > { %5308 = vmax.xlane.f32.xlu0 %v5307_v62  ;;  %v5270_v54 = vpop.f32.mrf.mxu1  ;;  %v1861_v56 = vsel %vm1758_vm4, %v8583_v0, 0.0 }
 0x72a   : > { %v9616_v26 = vadd.f32 %v9541_v48, %v5270_v54  ;;  %v4198_v48 = vsel %vm1758_vm4, %v9343_v63, 0.0  ;;  %v4210_v63 = vsel %vm1758_vm4, %v9365_v15, 0.0  ;;  %v3041_v15 = vsel %vm1758_vm4, %v9008_v35, 0.0 }
 0x72b   : > { %v7434_v53 = vpop.f32.mrf.mxu1  ;;  %v3062_v35 = vsel %vm1758_vm4, %v9044_v34, 0.0  ;;  %v4240_v34 = vsel %vm1758_vm4, %v9432_v4, 0.0  ;;  %v3065_v54 = vsel %vm1758_vm4, %v9047_v55, 0.0 }
 0x72c   : > { %v5319_v58 = vsel %vm1758_vm4, %v9616_v26, -inf  ;;  %v1867_v53 = vsel %vm1758_vm4, %v8593_v3, 0.0 }
 0x72d   : > { %5317 = vmax.xlane.f32.xlu0 %v5316_v20  ;;  %v3038_v20 = vsel %vm1758_vm4, %v9003_v37, 0.0  ;;  %v4201_v37 = vsel %vm1758_vm4, %v9347_v19, 0.0  ;;  %v4222_v19 = vsel %vm1758_vm4, %v9389_v2, 0.0  ;;  %v3053_v2 = vsel %vm1758_vm4, %v9031_v29, 0.0 }
 0x731   : > { %5320 = vmax.xlane.f32.xlu0 %v5319_v58 }
 0x736   : > { %1216 = vrot.lane.b32.xlu1 %v8208_v57, %s8009_s12  ;;  %v3026_v57 = vsel %vm1758_vm4, %v8944_v1, 0.0  ;;  %v4216_v1 = vsel %vm1758_vm4, %v9380_v39, 0.0  ;;  %v3047_v39 = vsel %vm1758_vm4, %v9022_v46, 0.0  ;;  %v3068_v46 = vsel %vm1758_vm4, %v9070_v61, 0.0 }
 0x747   : > { %1214 = vrot.lane.b32.xlu0 %v8184_v50, %s8009_s12  ;;  %v3044_v50 = vsel %vm1758_vm4, %v9018_v21, 0.0  ;;  %v4207_v21 = vsel %vm1758_vm4, %v9361_v38, 0.0  ;;  %v4213_v38 = vsel %vm1758_vm4, %v9370_v8, 0.0  ;;  %v4234_v8 = vsel %vm1758_vm4, %v9406_v31, 0.0 }
 0x748   : > { %v4231_v31 = vsel %vm1758_vm4, %v9415_v44, 0.0 }
 0x75a   : > { %3030 = vadd.xlane.f32.xlu1 %v3029_v12 }
 0x75e   : > { %4199 = vadd.xlane.f32.xlu1 %v4198_v48 }
 0x762   : > { %4205 = vadd.xlane.f32.xlu1 %v4204_v24  ;;  %v1873_v24 = vsel %vm1758_vm4, %v8607_v7, 0.0  ;;  %v4243_v7 = vsel %vm1758_vm4, %v9436_v16, 0.0  ;;  %v10292_v16 = vld [vmem:[#allocation15_spill] sm:$0xff] }
 0x766   : > { %3039 = vadd.xlane.f32.xlu1 %v3038_v20  ;;  %3027 = vadd.xlane.f32.xlu0 %v3026_v57 }
 0x76a   : > { %3045 = vadd.xlane.f32.xlu1 %v3044_v50  ;;  %3033 = vadd.xlane.f32.xlu0 %v3032_v52 }
 0x76e   : > { %4211 = vadd.xlane.f32.xlu1 %v4210_v63  ;;  %3036 = vadd.xlane.f32.xlu0 %v3035_v32 }
 0x772   : > { %4217 = vadd.xlane.f32.xlu1 %v4216_v1  ;;  %4202 = vadd.xlane.f32.xlu0 %v4201_v37 }
 0x776   : > { %3051 = vadd.xlane.f32.xlu1 %v3050_v60  ;;  %4208 = vadd.xlane.f32.xlu0 %v4207_v21  ;;  %v1885_v60 = vsel %vm1758_vm4, %v10292_v16, 0.0  ;;  %v10293_v21 = vld [vmem:[#allocation8_spill] sm:$0xff] }
 0x77a   : > { %3057 = vadd.xlane.f32.xlu1 %v3056_v41  ;;  %3042 = vadd.xlane.f32.xlu0 %v3041_v15  ;;  %v1858_v41 = vsel %vm1758_vm4, %v10293_v21, 0.0 }
 0x77e   : > { %4223 = vadd.xlane.f32.xlu1 %v4222_v19  ;;  %3048 = vadd.xlane.f32.xlu0 %v3047_v39 }
 0x782   : > { %4229 = vadd.xlane.f32.xlu1 %v4228_v33  ;;  %4214 = vadd.xlane.f32.xlu0 %v4213_v38  ;;  %v10294_v38 = vld [vmem:[#allocation14_spill] sm:$0xff] }
 0x786   : > { %3063 = vadd.xlane.f32.xlu1 %v3062_v35  ;;  %4220 = vadd.xlane.f32.xlu0 %v4219_v51  ;;  %v1891_v35 = vsel %vm1758_vm4, %v10294_v38, 0.0  ;;  %v10295_v51 = vld [vmem:[#allocation9_spill] sm:$0xff] }
 0x78a   : > { %3069 = vadd.xlane.f32.xlu1 %v3068_v46  ;;  %3054 = vadd.xlane.f32.xlu0 %v3053_v2  ;;  %v1864_v46 = vsel %vm1758_vm4, %v10295_v51, 0.0  ;;  %v10296_v2 = vld [vmem:[#allocation67_spill] sm:$0xff] }
 0x78e   : > { %4235 = vadd.xlane.f32.xlu1 %v4234_v8  ;;  %3060 = vadd.xlane.f32.xlu0 %v3059_v42 }
 0x792   : > { %v5276_v61 = vpop.xlane.xlu0 %5275  ;;  %4241 = vadd.xlane.f32.xlu1 %v4240_v34  ;;  %4226 = vadd.xlane.f32.xlu0 %v4225_v49  ;;  %v10297_v49 = vld [vmem:[#allocation68_spill] sm:$0xff] }
 0x793   : > { %v5322_v29 = vsub.f32 %v9536_v23, %v5276_v61 }
 0x795   : > { %v5338_v43 = vmul.f32 1.442695, %v5322_v29 }
 0x796   : > { %v5279_v9 = vpop.xlane.xlu1 %5278  ;;  %1856 = vadd.xlane.f32.xlu1 %v1855_v36  ;;  %4232 = vadd.xlane.f32.xlu0 %v4231_v31  ;;  %v10298_v31 = vld [vmem:[#allocation10_spill] sm:$0xff] }
 0x797   : > { %v5323_v4 = vsub.f32 %v9548_v5, %v5279_v9  ;;  %7775 = vpow2.f32 %v5338_v43  ;;  %v3071_v5 = vsel %vm1758_vm4, %v9074_v22, 0.0  ;;  %v1870_v43 = vsel %vm1758_vm4, %v10298_v31, 0.0 }
 0x799   : > { %v5340_v62 = vmul.f32 1.442695, %v5323_v4 }
 0x79a   : > { %v5282_v23 = vpop.xlane.xlu0 %5281  ;;  %1862 = vadd.xlane.f32.xlu1 %v1861_v56  ;;  %3066 = vadd.xlane.f32.xlu0 %v3065_v54  ;;  %v5288_v13 = vpop.xlane.xlu1 %5287  ;;  %v10299_v56 = vld [vmem:[#allocation17_spill] sm:$0xff] }
 0x79b   : > { %7777 = vpow2.f32 %v5340_v62  ;;  %v5324_v44 = vsub.f32 %v9553_v17, %v5282_v23  ;;  %v5326_v58 = vsub.f32 %v9556_v25, %v5288_v13  ;;  %v4237_v17 = vsel %vm1758_vm4, %v9409_v30, 0.0 }
 0x79c   : > { %v1897_v54 = vsel %vm1758_vm4, %v10299_v56, 0.0 }
 0x79d   : > { %v5342_v0 = vmul.f32 1.442695, %v5324_v44  ;;  %v5346_v20 = vmul.f32 1.442695, %v5326_v58 }
 0x79e   : > { %v5285_v12 = vpop.xlane.xlu0 %5284  ;;  %1868 = vadd.xlane.f32.xlu1 %v1867_v53  ;;  %3072 = vadd.xlane.f32.xlu0 %v3071_v5  ;;  %v7664_v53 = vld [vmem:[#allocation2 + $0x2d8] sm:$0xff]  }
 0x79f   : > { %v5325_v55 = vsub.f32 %v9563_v28, %v5285_v12  ;;  %7779 = vpow2.f32 %v5342_v0  ;;  %v1879_v28 = vsel %vm1758_vm4, %v8626_v11, 0.0 }
 0x7a1   : > { %v5344_v48 = vmul.f32 1.442695, %v5325_v55  ;;  %v10300_v55 = vld [vmem:[#allocation11_spill] sm:$0xff] }
 0x7a2   : > { %v5291_v3 = vpop.xlane.xlu0 %5290  ;;  %v5294_v57 = vpop.xlane.xlu1 %5293  ;;  %1874 = vadd.xlane.f32.xlu1 %v1873_v24  ;;  %4238 = vadd.xlane.f32.xlu0 %v4237_v17  ;;  %v7665_v24 = vld [vmem:[#allocation2 + $0x2e0] sm:$0xff]  }
 0x7a3   : > { %7781 = vpow2.f32 %v5344_v48  ;;  %v5327_v22 = vsub.f32 %v9566_v47, %v5291_v3  ;;  %v5328_v25 = vsub.f32 %v9571_v14, %v5294_v57  ;;  %v1876_v48 = vsel %vm1758_vm4, %v10300_v55, 0.0  ;;  %v10301_v57 = vld [vmem:[#allocation12_spill] sm:$0xff] }
 0x7a4   : > { %7783 = vpow2.f32 %v5346_v20  ;;  %v9707_v63 = vpop.eup %7775 }
 0x7a5   : > { %v5348_v50 = vmul.f32 1.442695, %v5327_v22  ;;  %v5350_v32 = vmul.f32 1.442695, %v5328_v25  ;;  %v1882_v22 = vsel %vm1758_vm4, %v10301_v57, 0.0 }
 0x7a6   : > { %v5300_v30 = vpop.xlane.xlu1 %5299  ;;  %v5297_v52 = vpop.xlane.xlu0 %5296  ;;  %1880 = vadd.xlane.f32.xlu1 %v1879_v28  ;;  %4244 = vadd.xlane.f32.xlu0 %v4243_v7 }
 0x7a7   : > { %7785 = vpow2.f32 %v5348_v50  ;;  %v5330_v47 = vsub.f32 %v9574_v40, %v5300_v30  ;;  %v5329_v14 = vsub.f32 %v9581_v18, %v5297_v52  ;;  %v7663_v40 = vld [vmem:[#allocation2 + $0x2d0] sm:$0xff]   ;;  %v7666_v30 = vld [vmem:[#allocation2 + $0x2e8] sm:$0xff]  }
 0x7a8   : > { %v9711_v1 = vpop.eup %7777  ;;  %7787 = vpow2.f32 %v5350_v32 }
 0x7a9   : > { %v5418_v11 = vpack.c.bf16 %v9711_v1, %v9707_v63  ;;  %v5352_v37 = vmul.f32 1.442695, %v5329_v14  ;;  %v5354_v15 = vmul.f32 1.442695, %v5330_v47  ;;  %v10302_v14 = vld [vmem:[#allocation16_spill] sm:$0xff] }
 0x7aa   : > { %v5303_v19 = vpop.xlane.xlu0 %5302  ;;  %1886 = vadd.xlane.f32.xlu1 %v1885_v60  ;;  %v5306_v39 = vpop.xlane.xlu1 %5305  ;;  %1859 = vadd.xlane.f32.xlu0 %v1858_v41  ;;  %v10303_v60 = vld [vmem:[#allocation13_spill] sm:$0xff] }
 0x7ab   : > { %v5331_v18 = vsub.f32 %v9584_v45, %v5303_v19  ;;  %7438 = vmatmul.mubr.msk.bf16.vlgmr.msra.gmra.mxu0 %vm1758_vm4, %v5418_v11  ;;  %7789 = vpow2.f32 %v5352_v37  ;;  %v5332_v8 = vsub.f32 %v10296_v2, %v5306_v39  ;;  %v1888_v11 = vsel %vm1758_vm4, %v10302_v14, 0.0 }
 0x7ac   : > { %7448 = vmatpush3.bf16.msra.mxu0 %v7663_v40  ;;  %7449 = vmatprep.mubr.msk.bf16.mxu0 %vm7999_vm2, %v10257_v10  ;;  %7791 = vpow2.f32 %v5354_v15  ;;  %v9729_v34 = vpop.eup %7779  ;;  %v1894_v21 = vsel %vm1758_vm4, %v10303_v60, 0.0 }
 0x7ad   : > { %v5356_v33 = vmul.f32 1.442695, %v5331_v18  ;;  %7459 = vmatprep.subr.bf16.mxu0 %v10257_v10  ;;  %v5358_v23 = vmul.f32 1.442695, %v5332_v8  ;;  %v10304_v18 = vld [vmem:[#allocation18_spill] sm:$0xff] }
 0x7ae   : > { %v5312_v45 = vpop.xlane.xlu0 %5311  ;;  %1892 = vadd.xlane.f32.xlu1 %v1891_v35  ;;  %v5315_v42 = vpop.xlane.xlu1 %5314  ;;  %1865 = vadd.xlane.f32.xlu0 %v1864_v46 }
 0x7af   : > { %7793 = vpow2.f32 %v5356_v33  ;;  %v5334_v61 = vsub.f32 %v10297_v49, %v5312_v45  ;;  %v5335_v29 = vsub.f32 %v9601_v59, %v5315_v42  ;;  %v1900_v33 = vsel %vm1758_vm4, %v10304_v18, 0.0 }
 0x7b0   : > { %v9733_v36 = vpop.eup %7781 }
 0x7b1   : > { %v5419_v9 = vpack.c.bf16 %v9733_v36, %v9729_v34  ;;  %v5362_v4 = vmul.f32 1.442695, %v5334_v61  ;;  %v5364_v62 = vmul.f32 1.442695, %v5335_v29  ;;  %v9741_v59 = vpop.eup %7783 }
 0x7b2   : > { %1898 = vadd.xlane.f32.xlu1 %v1897_v54  ;;  %v1217_v13 = vpop.permute.xlu1 %1216  ;;  %v5309_v44 = vpop.xlane.xlu0 %5308  ;;  %1871 = vadd.xlane.f32.xlu0 %v1870_v43 }
 0x7b3   : > { %1250 = vst.msk [vmem:[#allocation2 + $0x2fc] sm:$0xf] %vm519_vm1, %v1217_v13  ;;  %v5333_v5 = vsub.f32 %v9604_v6, %v5309_v44  ;;  %7444 = vmatmul.mubr.msk.bf16.vlgmr.msra.gmra.mxu1 %vm1758_vm4, %v5419_v9  ;;  %7795 = vpow2.f32 %v5362_v4 }
 0x7b4   : > { %v9746_v58 = vpop.eup %7785  ;;  %7454 = vmatpush3.bf16.msra.mxu1 %v7664_v53  ;;  %7455 = vmatprep.mubr.msk.bf16.mxu1 %vm7999_vm2, %v10257_v10  ;;  %7797 = vpow2.f32 %v5364_v62  ;;  %v10306_v62 = vld [vmem:[#allocation51_spill] sm:$0xff]  ;;  %v10307_v53 = vld [vmem:[#allocation53_spill] sm:$0xff] }
 0x7b5   : > { %v5420_v0 = vpack.c.bf16 %v9746_v58, %v9741_v59  ;;  %v5360_v12 = vmul.f32 1.442695, %v5333_v5  ;;  %7465 = vmatprep.subr.bf16.mxu1 %v10257_v10  ;;  %7799 = vpow2.f32 %v5358_v23  ;;  %v9757_v20 = vpop.eup %7787 }
 0x7b6   : > { %v5318_v6 = vpop.xlane.xlu0 %5317  ;;  %1877 = vadd.xlane.f32.xlu0 %v1876_v48 }
 0x7b7   : > { %7801 = vpow2.f32 %v5360_v12  ;;  %v5336_v17 = vsub.f32 %v9611_v27, %v5318_v6  ;;  %7450 = vmatmul.mubr.msk.bf16.vlgmr.msra.gmra.mxu0 %vm1758_vm4, %v5420_v0 }
 0x7b8   : > { %7460 = vmatpush3.bf16.msra.mxu0 %v7665_v24  ;;  %7461 = vmatprep.mubr.msk.bf16.mxu0 %vm7999_vm2, %v10257_v10  ;;  %v9761_v3 = vpop.eup %7789 }
 0x7b9   : > { %7471 = vmatprep.subr.bf16.mxu0 %v10257_v10  ;;  %v5421_v25 = vpack.c.bf16 %v9761_v3, %v9757_v20  ;;  %v5366_v50 = vmul.f32 1.442695, %v5336_v17  ;;  %v9768_v28 = vpop.eup %7791  ;;  %v10308_v17 = vld [vmem:[#allocation39_spill] sm:$0xff] }
 0x7ba   : > { %1883 = vadd.xlane.f32.xlu0 %v1882_v22  ;;  %v5321_v27 = vpop.xlane.xlu0 %5320  ;;  %v10309_v22 = vld [vmem:[#allocation35_spill] sm:$0xff] }
 0x7bb   : > { %v5337_v7 = vsub.f32 %v9616_v26, %v5321_v27  ;;  %7456 = vmatmul.mubr.msk.bf16.vlgmr.msra.gmra.mxu1 %vm1758_vm4, %v5421_v25  ;;  %7803 = vpow2.f32 %v5366_v50  ;;  %v7667_v26 = vld [vmem:[#allocation2 + $0x2f0] sm:$0xff]  }
 0x7bc   : > { %v9771_v52 = vpop.eup %7793  ;;  %7466 = vmatpush3.bf16.msra.mxu1 %v7666_v30  ;;  %7467 = vmatprep.mubr.msk.bf16.mxu1 %vm7999_vm2, %v10257_v10 }
 0x7bd   : > { %v5422_v32 = vpack.c.bf16 %v9771_v52, %v9768_v28  ;;  %v5368_v47 = vmul.f32 1.442695, %v5337_v7  ;;  %7477 = vmatprep.subr.bf16.mxu1 %v10257_v10 }
 0x7be   : > { %1889 = vadd.xlane.f32.xlu0 %v1888_v11  ;;  %v1215_v37 = vpop.permute.xlu0 %1214  ;;  %v10310_v11 = vld [vmem:[#allocation41_spill] sm:$0xff] }
 0x7bf   : > { %7805 = vpow2.f32 %v5368_v47  ;;  %1249 = vst.msk [vmem:[#allocation2 + $0x2f8] sm:$0xf] %vm519_vm1, %v1215_v37  ;;  %7462 = vmatmul.mubr.msk.bf16.vlgmr.msra.gmra.mxu0 %vm1758_vm4, %v5422_v32 }
 0x7c0   : > { %7472 = vmatpush3.bf16.msra.mxu0 %v7667_v26  ;;  %7473 = vmatprep.mubr.msk.bf16.mxu0 %vm7999_vm2, %v10257_v10  ;;  %v9785_v16 = vpop.eup %7795  ;;  %v10311_v26 = vld [vmem:[#allocation37_spill] sm:$0xff] }
 0x7c1   : > { %v9789_v41 = vpop.eup %7797 }
 0x7c2   : > { %1895 = vadd.xlane.f32.xlu0 %v1894_v21  ;;  %v9791_v15 = vpop.eup %7799  ;;  %v5424_v39 = vpack.c.bf16 %v9789_v41, %v9785_v16 }
 0x7c4   : > { %v9793_v19 = vpop.eup %7801 }
 0x7c5   : > { %v5423_v40 = vpack.c.bf16 %v9793_v19, %v9791_v15 }
 0x7c6   : > { %1901 = vadd.xlane.f32.xlu0 %v1900_v33  ;;  %v7668_v38 = vld [vmem:[#allocation2 + $0x2f8] sm:$0xff]  }
 0x7c7   : > { %7468 = vmatmul.mubr.msk.bf16.vlgmr.msra.gmra.mxu1 %vm1758_vm4, %v5423_v40  ;;  %7474 = vmatmul.mubr.msk.bf16.vlgmr.msra.gmra.mxu0 %vm1758_vm4, %v5424_v39 }
 0x7c8   : > { %7478 = vmatpush3.bf16.msra.mxu1 %v7668_v38  ;;  %7479 = vmatprep.mubr.msk.bf16.mxu1 %vm7999_vm2, %v10257_v10  ;;  %v9805_v35 = vpop.eup %7803  ;;  %v10305_v10 = vld [vmem:[#allocation36_spill] sm:$0xff] }
 0x7cc   : > { %v9807_v51 = vpop.eup %7805 }
 0x7cd   : > { %v5425_v46 = vpack.c.bf16 %v9807_v51, %v9805_v35 }
 0x7cf   : > { %7480 = vmatmul.mubr.msk.bf16.vlgmr.msra.gmra.mxu1 %vm1758_vm4, %v5425_v46 }
 0x7e3   : > { %v3031_v2 = vpop.xlane.xlu1 %3030 }
 0x7e4   : > { %7807 = vrcp.f32 %v3031_v2  ;;  %v10312_v2 = vld [vmem:[#allocation55_spill] sm:$0xff] }
 0x7e7   : > { %v4200_v8 = vpop.xlane.xlu1 %4199 }
 0x7e8   : > { %7809 = vrcp.f32 %v4200_v8 }
 0x7eb   : > { %v4206_v45 = vpop.xlane.xlu1 %4205 }
 0x7ec   : > { %7811 = vrcp.f32 %v4206_v45  ;;  %v10313_v45 = vld [vmem:[#allocation38_spill] sm:$0xff] }
 0x7ef   : > { %v3040_v42 = vpop.xlane.xlu1 %3039  ;;  %v3028_v49 = vpop.xlane.xlu0 %3027 }
 0x7f0   : > { %7813 = vrcp.f32 %v3040_v42 }
 0x7f1   : > { %v7808_v61 = vpop.eup %7807  ;;  %7815 = vrcp.f32 %v3028_v49 }
 0x7f2   : > { %v3499_v29 = vmul.f32 %v7808_v61, %v10305_v10 }
 0x7f3   : > { %v3046_v31 = vpop.xlane.xlu1 %3045  ;;  %v3034_v43 = vpop.xlane.xlu0 %3033 }
 0x7f4   : > { %v6883_v9 = vpack.c.bf16 %v3499_v29, %v3499_v29  ;;  %7817 = vrcp.f32 %v3046_v31 }
 0x7f5   : > { %v7810_v4 = vpop.eup %7809  ;;  %7819 = vrcp.f32 %v3034_v43 }
 0x7f6   : > { %3580 = vst.msk [vmem:[#allocation3 + $0x44] sm:$0xf] %vm519_vm1, %v6883_v9  ;;  %v4670_v56 = vmul.f32 %v7810_v4, %v10306_v62  ;;  %v10314_v4 = vld [vmem:[#allocation57_spill] sm:$0xff] }
 0x7f7   : > { %v4212_v54 = vpop.xlane.xlu1 %4211  ;;  %v3037_v23 = vpop.xlane.xlu0 %3036 }
 0x7f8   : > { %v6898_v13 = vpack.c.bf16 %v4670_v56, %v4670_v56  ;;  %7821 = vrcp.f32 %v4212_v54  ;;  %v10315_v54 = vld [vmem:[#allocation52_spill] sm:$0xff] }
 0x7f9   : > { %v7812_v44 = vpop.eup %7811  ;;  %7823 = vrcp.f32 %v3037_v23 }
 0x7fa   : > { %4751 = vst.msk [vmem:[#allocation3 + $0x80] sm:$0xf] %vm519_vm1, %v6898_v13  ;;  %v4672_v5 = vmul.f32 %v7812_v44, %v10307_v53 }
 0x7fb   : > { %v4218_v0 = vpop.xlane.xlu1 %4217  ;;  %v4203_v12 = vpop.xlane.xlu0 %4202 }
 0x7fc   : > { %v6900_v55 = vpack.c.bf16 %v4672_v5, %v4672_v5  ;;  %7825 = vrcp.f32 %v4218_v0 }
 0x7fd   : > { %v7814_v48 = vpop.eup %7813  ;;  %7827 = vrcp.f32 %v4203_v12  ;;  %v5972_v6 = vld [vmem:[#allocation3 + $0x44] sm:$0xf] }
 0x7fe   : > { %v7816_v24 = vpop.eup %7815  ;;  %4753 = vst.msk [vmem:[#allocation3 + $0x88] sm:$0xf] %vm519_vm1, %v6900_v55  ;;  %v3502_v57 = vmul.f32 %v7814_v48, %v10308_v17  ;;  %6005 = vrot.lane.b32.xlu0 %v5972_v6, %s8010_s17  ;;  %v10316_v48 = vld [vmem:[#allocation42_spill] sm:$0xff] }
 0x7ff   : > { %v3498_v25 = vmul.f32 %v7816_v24, %v10309_v22  ;;  %v3052_v50 = vpop.xlane.xlu1 %3051  ;;  %v4209_v27 = vpop.xlane.xlu0 %4208  ;;  %v10317_v17 = vld [vmem:[#allocation54_spill] sm:$0xff] }
 0x800   : > { %v6886_v7 = vpack.c.bf16 %v3502_v57, %v3502_v57  ;;  %7829 = vrcp.f32 %v3052_v50 }
 0x801   : > { %v7818_v30 = vpop.eup %7817  ;;  %v6882_v32 = vpack.c.bf16 %v3498_v25, %v3498_v25  ;;  %7831 = vrcp.f32 %v4209_v27  ;;  %v6068_v47 = vld [vmem:[#allocation3 + $0x80] sm:$0xf] }
 0x802   : > { %v7820_v14 = vpop.eup %7819  ;;  %3583 = vst.msk [vmem:[#allocation3 + $0x50] sm:$0xf] %vm519_vm1, %v6886_v7  ;;  %v3504_v37 = vmul.f32 %v7818_v30, %v10310_v11  ;;  %6100 = vrot.lane.b32.xlu0 %v6068_v47, %s8011_s18  ;;  %v10319_v11 = vld [vmem:[#allocation40_spill] sm:$0xff] }
 0x803   : > { %3579 = vst.msk [vmem:[#allocation3 + $0x40] sm:$0xf] %vm519_vm1, %v6882_v32  ;;  %v3500_v60 = vmul.f32 %v7820_v14, %v10311_v26  ;;  %v3058_v21 = vpop.xlane.xlu1 %3057  ;;  %v3043_v39 = vpop.xlane.xlu0 %3042  ;;  %v10318_v32 = vld [vmem:[#allocation45_spill] sm:$0xff] }
 0x804   : > { %v6888_v40 = vpack.c.bf16 %v3504_v37, %v3504_v37  ;;  %7833 = vrcp.f32 %v3058_v21 }
 0x805   : > { %v7822_v18 = vpop.eup %7821  ;;  %v6884_v33 = vpack.c.bf16 %v3500_v60, %v3500_v60  ;;  %7835 = vrcp.f32 %v3043_v39  ;;  %v6070_v38 = vld [vmem:[#allocation3 + $0x88] sm:$0xf] }
 0x806   : > { %v7824_v46 = vpop.eup %7823  ;;  %3585 = vst.msk [vmem:[#allocation3 + $0x58] sm:$0xf] %vm519_vm1, %v6888_v40  ;;  %v4674_v8 = vmul.f32 %v7822_v18, %v10312_v2  ;;  %6104 = vrot.lane.b32.xlu0 %v6070_v38, %s8011_s18  ;;  %v10321_v2 = vld [vmem:[#allocation43_spill] sm:$0xff] }
 0x807   : > { %3581 = vst.msk [vmem:[#allocation3 + $0x48] sm:$0xf] %vm519_vm1, %v6884_v33  ;;  %v3501_v42 = vmul.f32 %v7824_v46, %v10313_v45  ;;  %v4224_v49 = vpop.xlane.xlu1 %4223  ;;  %v3049_v61 = vpop.xlane.xlu0 %3048  ;;  %v10320_v33 = vld [vmem:[#allocation58_spill] sm:$0xff] }
 0x808   : > { %v6902_v10 = vpack.c.bf16 %v4674_v8, %v4674_v8  ;;  %7837 = vrcp.f32 %v4224_v49 }
 0x809   : > { %v7826_v29 = vpop.eup %7825  ;;  %v6885_v31 = vpack.c.bf16 %v3501_v42, %v3501_v42  ;;  %7839 = vrcp.f32 %v3049_v61  ;;  %v5975_v43 = vld [vmem:[#allocation3 + $0x50] sm:$0xf] }
 0x80a   : > { %v7828_v9 = vpop.eup %7827  ;;  %4755 = vst.msk [vmem:[#allocation3 + $0x90] sm:$0xf] %vm519_vm1, %v6902_v10  ;;  %v4676_v62 = vmul.f32 %v7826_v29, %v10314_v4  ;;  %6011 = vrot.lane.b32.xlu0 %v5975_v43, %s8010_s17  ;;  %v5971_v56 = vld [vmem:[#allocation3 + $0x40] sm:$0xf] }
 0x80b   : > { %3582 = vst.msk [vmem:[#allocation3 + $0x4c] sm:$0xf] %vm519_vm1, %v6885_v31  ;;  %v4671_v23 = vmul.f32 %v7828_v9, %v10315_v54  ;;  %6003 = vrot.lane.b32.xlu1 %v5971_v56, %s8010_s17  ;;  %v4230_v13 = vpop.xlane.xlu1 %4229  ;;  %v4215_v44 = vpop.xlane.xlu0 %4214  ;;  %v10322_v31 = vld [vmem:[#allocation61_spill] sm:$0xff]  ;;  %v10323_v4 = vld [vmem:[#allocation56_spill] sm:$0xff] }
 0x80c   : > { %v6904_v53 = vpack.c.bf16 %v4676_v62, %v4676_v62  ;;  %7841 = vrcp.f32 %v4230_v13 }
 0x80d   : > { %v7830_v5 = vpop.eup %7829  ;;  %v6899_v0 = vpack.c.bf16 %v4671_v23, %v4671_v23  ;;  %7843 = vrcp.f32 %v4215_v44  ;;  %v5977_v12 = vld [vmem:[#allocation3 + $0x58] sm:$0xf] }
 0x80e   : > { %v7832_v55 = vpop.eup %7831  ;;  %4757 = vst.msk [vmem:[#allocation3 + $0x98] sm:$0xf] %vm519_vm1, %v6904_v53  ;;  %v3506_v6 = vmul.f32 %v7830_v5, %v10316_v48  ;;  %6015 = vrot.lane.b32.xlu0 %v5977_v12, %s8010_s17  ;;  %v5973_v24 = vld [vmem:[#allocation3 + $0x48] sm:$0xf]  ;;  %v10324_v5 = vld [vmem:[#allocation46_spill] sm:$0xff] }
 0x80f   : > { %4752 = vst.msk [vmem:[#allocation3 + $0x84] sm:$0xf] %vm519_vm1, %v6899_v0  ;;  %v4673_v57 = vmul.f32 %v7832_v55, %v10317_v17  ;;  %6007 = vrot.lane.b32.xlu1 %v5973_v24, %s8010_s17  ;;  %v3064_v22 = vpop.xlane.xlu1 %3063  ;;  %v4221_v25 = vpop.xlane.xlu0 %4220  ;;  %v10325_v55 = vld [vmem:[#allocation59_spill] sm:$0xff] }
 0x810   : > { %v6890_v50 = vpack.c.bf16 %v3506_v6, %v3506_v6  ;;  %7845 = vrcp.f32 %v3064_v22 }
 0x811   : > { %v7834_v27 = vpop.eup %7833  ;;  %v6901_v7 = vpack.c.bf16 %v4673_v57, %v4673_v57  ;;  %7847 = vrcp.f32 %v4221_v25 }
 0x812   : > { %v7836_v30 = vpop.eup %7835  ;;  %3587 = vst.msk [vmem:[#allocation3 + $0x60] sm:$0xf] %vm519_vm1, %v6890_v50  ;;  %v3508_v47 = vmul.f32 %v7834_v27, %v10318_v32  ;;  %v5974_v14 = vld [vmem:[#allocation3 + $0x4c] sm:$0xf] }
 0x813   : > { %4754 = vst.msk [vmem:[#allocation3 + $0x8c] sm:$0xf] %vm519_vm1, %v6901_v7  ;;  %v3503_v37 = vmul.f32 %v7836_v30, %v10319_v11  ;;  %6009 = vrot.lane.b32.xlu1 %v5974_v14, %s8010_s17  ;;  %v3070_v26 = vpop.xlane.xlu1 %3069  ;;  %v3055_v60 = vpop.xlane.xlu0 %3054  ;;  %v10326_v50 = vld [vmem:[#allocation49_spill] sm:$0xff]  ;;  %v10327_v30 = vld [vmem:[#allocation44_spill] sm:$0xff] }
 0x814   : > { %v6892_v21 = vpack.c.bf16 %v3508_v47, %v3508_v47  ;;  %7849 = vrcp.f32 %v3070_v26 }
 0x815   : > { %v7838_v39 = vpop.eup %7837  ;;  %v6887_v40 = vpack.c.bf16 %v3503_v37, %v3503_v37  ;;  %7851 = vrcp.f32 %v3055_v60 }
 0x816   : > { %v7840_v18 = vpop.eup %7839  ;;  %3589 = vst.msk [vmem:[#allocation3 + $0x68] sm:$0xf] %vm519_vm1, %v6892_v21  ;;  %v4678_v38 = vmul.f32 %v7838_v39, %v10320_v33  ;;  %v6069_v46 = vld [vmem:[#allocation3 + $0x84] sm:$0xf]  ;;  %v10328_v21 = vld [vmem:[#allocation62_spill] sm:$0xff] }
 0x817   : > { %3584 = vst.msk [vmem:[#allocation3 + $0x54] sm:$0xf] %vm519_vm1, %v6887_v40  ;;  %v3505_v8 = vmul.f32 %v7840_v18, %v10321_v2  ;;  %6102 = vrot.lane.b32.xlu1 %v6069_v46, %s8011_s18  ;;  %v4236_v45 = vpop.xlane.xlu1 %4235  ;;  %v3061_v42 = vpop.xlane.xlu0 %3060  ;;  %v10329_v40 = vld [vmem:[#allocation47_spill] sm:$0xff] }
 0x818   : > { %v6906_v49 = vpack.c.bf16 %v4678_v38, %v4678_v38  ;;  %7853 = vrcp.f32 %v4236_v45 }
 0x819   : > { %v7842_v61 = vpop.eup %7841  ;;  %v6889_v10 = vpack.c.bf16 %v3505_v8, %v3505_v8  ;;  %7855 = vrcp.f32 %v3061_v42  ;;  %v10330_v42 = vld [vmem:[#allocation65_spill] sm:$0xff] }
 0x81a   : > { %v7844_v29 = vpop.eup %7843  ;;  %4759 = vst.msk [vmem:[#allocation3 + $0xa0] sm:$0xf] %vm519_vm1, %v6906_v49  ;;  %v4680_v43 = vmul.f32 %v7842_v61, %v10322_v31  ;;  %v6071_v9 = vld [vmem:[#allocation3 + $0x8c] sm:$0xf]  ;;  %v10331_v61 = vld [vmem:[#allocation60_spill] sm:$0xff] }
 0x81b   : > { %3586 = vst.msk [vmem:[#allocation3 + $0x5c] sm:$0xf] %vm519_vm1, %v6889_v10  ;;  %v4675_v62 = vmul.f32 %v7844_v29, %v10323_v4  ;;  %6106 = vrot.lane.b32.xlu1 %v6071_v9, %s8011_s18  ;;  %v4242_v56 = vpop.xlane.xlu1 %4241  ;;  %v4227_v54 = vpop.xlane.xlu0 %4226  ;;  %v5373_v9 = vsel %vm1758_vm4, %v9711_v1, 0.0  ;;  %v5379_v1 = vsel %vm1758_vm4, %v9733_v36, 0.0  ;;  %v5385_v36 = vsel %vm1758_vm4, %v9746_v58, 0.0 }
 0x81c   : > { %v6908_v23 = vpack.c.bf16 %v4680_v43, %v4680_v43  ;;  %7857 = vrcp.f32 %v4242_v56  ;;  %v5391_v58 = vsel %vm1758_vm4, %v9761_v3, 0.0  ;;  %v5397_v3 = vsel %vm1758_vm4, %v9771_v52, 0.0 }
 0x81d   : > { %v7846_v13 = vpop.eup %7845  ;;  %v6903_v44 = vpack.c.bf16 %v4675_v62, %v4675_v62  ;;  %7859 = vrcp.f32 %v4227_v54  ;;  %v10332_v54 = vld [vmem:[#allocation19_spill] sm:$0xff]  ;;  %v5403_v52 = vsel %vm1758_vm4, %v9793_v19, 0.0  ;;  %v5409_v19 = vsel %vm1758_vm4, %v9789_v41, 0.0 }
 0x81e   : > { %v7848_v53 = vpop.eup %7847  ;;  %4761 = vst.msk [vmem:[#allocation3 + $0xa8] sm:$0xf] %vm519_vm1, %v6908_v23  ;;  %v3510_v0 = vmul.f32 %v7846_v13, %v10324_v5  ;;  %v5976_v12 = vld [vmem:[#allocation3 + $0x54] sm:$0xf]  ;;  %v10333_v13 = vld [vmem:[#allocation63_spill] sm:$0xff] }
 0x81f   : > { %4756 = vst.msk [vmem:[#allocation3 + $0x94] sm:$0xf] %vm519_vm1, %v6903_v44  ;;  %v4677_v48 = vmul.f32 %v7848_v53, %v10325_v55  ;;  %6013 = vrot.lane.b32.xlu1 %v5976_v12, %s8010_s17  ;;  %v1857_v6 = vpop.xlane.xlu1 %1856  ;;  %v4233_v24 = vpop.xlane.xlu0 %4232 }
 0x820   : > { %v6894_v17 = vpack.c.bf16 %v3510_v0, %v3510_v0  ;;  %7861 = vrcp.f32 %v1857_v6  ;;  %v10334_v6 = vld [vmem:[#allocation21_spill] sm:$0xff] }
 0x821   : > { %v7850_v57 = vpop.eup %7849  ;;  %v6905_v22 = vpack.c.bf16 %v4677_v48, %v4677_v48  ;;  %7863 = vrcp.f32 %v4233_v24 }
 0x822   : > { %v7852_v25 = vpop.eup %7851  ;;  %3591 = vst.msk [vmem:[#allocation3 + $0x70] sm:$0xf] %vm519_vm1, %v6894_v17  ;;  %v3512_v27 = vmul.f32 %v7850_v57, %v10326_v50  ;;  %v5978_v7 = vld [vmem:[#allocation3 + $0x5c] sm:$0xf]  ;;  %v10335_v17 = vld [vmem:[#allocation48_spill] sm:$0xff] }
 0x823   : > { %4758 = vst.msk [vmem:[#allocation3 + $0x9c] sm:$0xf] %vm519_vm1, %v6905_v22  ;;  %v3507_v32 = vmul.f32 %v7852_v25, %v10327_v30  ;;  %6017 = vrot.lane.b32.xlu1 %v5978_v7, %s8010_s17  ;;  %v1863_v47 = vpop.xlane.xlu1 %1862  ;;  %v3067_v14 = vpop.xlane.xlu0 %3066 }
 0x824   : > { %v6896_v11 = vpack.c.bf16 %v3512_v27, %v3512_v27  ;;  %7865 = vrcp.f32 %v1863_v47 }
 0x825   : > { %v7854_v37 = vpop.eup %7853  ;;  %v6891_v26 = vpack.c.bf16 %v3507_v32, %v3507_v32  ;;  %7867 = vrcp.f32 %v3067_v14  ;;  %v10336_v32 = vld [vmem:[#allocation23_spill] sm:$0xff]  ;;  %v10337_v14 = vld [vmem:[#allocation50_spill] sm:$0xff] }
 0x826   : > { %v7856_v60 = vpop.eup %7855  ;;  %3593 = vst.msk [vmem:[#allocation3 + $0x78] sm:$0xf] %vm519_vm1, %v6896_v11  ;;  %v4682_v39 = vmul.f32 %v7854_v37, %v10328_v21 }
 0x827   : > { %3588 = vst.msk [vmem:[#allocation3 + $0x64] sm:$0xf] %vm519_vm1, %v6891_v26  ;;  %v3509_v18 = vmul.f32 %v7856_v60, %v10329_v40  ;;  %v1869_v33 = vpop.xlane.xlu1 %1868  ;;  %v3073_v38 = vpop.xlane.xlu0 %3072 }
 0x828   : > { %v6910_v46 = vpack.c.bf16 %v4682_v39, %v4682_v39  ;;  %7869 = vrcp.f32 %v1869_v33  ;;  %v10338_v33 = vld [vmem:[#allocation25_spill] sm:$0xff] }
 0x829   : > { %v7858_v2 = vpop.eup %7857  ;;  %v6893_v8 = vpack.c.bf16 %v3509_v18, %v3509_v18  ;;  %7871 = vrcp.f32 %v3073_v38 }
 0x82a   : > { %v7860_v45 = vpop.eup %7859  ;;  %4763 = vst.msk [vmem:[#allocation3 + $0xb0] sm:$0xf] %vm519_vm1, %v6910_v46  ;;  %v4684_v49 = vmul.f32 %v7858_v2, %v10330_v42  ;;  %v10339_v46 = vld [vmem:[#allocation64_spill] sm:$0xff] }
 0x82b   : > { %3590 = vst.msk [vmem:[#allocation3 + $0x6c] sm:$0xf] %vm519_vm1, %v6893_v8  ;;  %v4679_v10 = vmul.f32 %v7860_v45, %v10331_v61  ;;  %v1875_v29 = vpop.xlane.xlu1 %1874  ;;  %v4239_v31 = vpop.xlane.xlu0 %4238 }
 0x82c   : > { %v6912_v43 = vpack.c.bf16 %v4684_v49, %v4684_v49  ;;  %7873 = vrcp.f32 %v1875_v29 }
 0x82d   : > { %v7862_v4 = vpop.eup %7861  ;;  %v6907_v62 = vpack.c.bf16 %v4679_v10, %v4679_v10  ;;  %7875 = vrcp.f32 %v4239_v31  ;;  %5374 = vadd.xlane.f32.xlu0 %v5373_v9  ;;  %v10340_v31 = vld [vmem:[#allocation27_spill] sm:$0xff]  ;;  %v10341_v9 = vld [vmem:[#allocation66_spill] sm:$0xff] }
 0x82e   : > { %v7864_v56 = vpop.eup %7863  ;;  %4765 = vst.msk [vmem:[#allocation3 + $0xb8] sm:$0xf] %vm519_vm1, %v6912_v43  ;;  %v2327_v23 = vmul.f32 %v7862_v4, %v10332_v54 }
 0x82f   : > { %4760 = vst.msk [vmem:[#allocation3 + $0xa4] sm:$0xf] %vm519_vm1, %v6907_v62  ;;  %v4681_v44 = vmul.f32 %v7864_v56, %v10333_v13  ;;  %v1881_v53 = vpop.xlane.xlu1 %1880  ;;  %v4245_v5 = vpop.xlane.xlu0 %4244 }
 0x830   : > { %v6866_v0 = vpack.c.bf16 %v2327_v23, %v2327_v23  ;;  %7877 = vrcp.f32 %v1881_v53  ;;  %v10342_v53 = vld [vmem:[#allocation31_spill] sm:$0xff] }
 0x831   : > { %v7866_v12 = vpop.eup %7865  ;;  %v6909_v55 = vpack.c.bf16 %v4681_v44, %v4681_v44  ;;  %7879 = vrcp.f32 %v4245_v5  ;;  %5380 = vadd.xlane.f32.xlu0 %v5379_v1 }
 0x832   : > { %v7868_v48 = vpop.eup %7867  ;;  %2407 = vst.msk [vmem:[#allocation3] sm:$0xf] %vm519_vm1, %v6866_v0  ;;  %v2329_v24 = vmul.f32 %v7866_v12, %v10334_v6  ;;  %v10343_v0 = vld [vmem:[#allocation20_spill] sm:$0xff] }
 0x833   : > { %4762 = vst.msk [vmem:[#allocation3 + $0xac] sm:$0xf] %vm519_vm1, %v6909_v55  ;;  %v3511_v57 = vmul.f32 %v7868_v48, %v10335_v17  ;;  %v1887_v22 = vpop.xlane.xlu1 %1886  ;;  %v1860_v25 = vpop.xlane.xlu0 %1859 }
 0x834   : > { %v6868_v50 = vpack.c.bf16 %v2329_v24, %v2329_v24  ;;  %7881 = vrcp.f32 %v1887_v22 }
 0x835   : > { %v7870_v27 = vpop.eup %7869  ;;  %v6895_v7 = vpack.c.bf16 %v3511_v57, %v3511_v57  ;;  %7883 = vrcp.f32 %v1860_v25  ;;  %5386 = vadd.xlane.f32.xlu0 %v5385_v36  ;;  %v10344_v57 = vld [vmem:[#allocation29_spill] sm:$0xff]  ;;  %v5370_v25 = vsel %vm1758_vm4, %v9707_v63, 0.0 }
 0x836   : > { %v7872_v30 = vpop.eup %7871  ;;  %2409 = vst.msk [vmem:[#allocation3 + $0x8] sm:$0xf] %vm519_vm1, %v6868_v50  ;;  %v2331_v47 = vmul.f32 %v7870_v27, %v10336_v32  ;;  %v10345_v50 = vld [vmem:[#allocation22_spill] sm:$0xff]  ;;  %v10346_v63 = vld [vmem:[#allocation33_spill] sm:$0xff] }
 0x837   : > { %3592 = vst.msk [vmem:[#allocation3 + $0x74] sm:$0xf] %vm519_vm1, %v6895_v7  ;;  %v3513_v11 = vmul.f32 %v7872_v30, %v10337_v14  ;;  %v1893_v37 = vpop.xlane.xlu1 %1892  ;;  %v1866_v26 = vpop.xlane.xlu0 %1865  ;;  %v5415_v7 = vsel %vm1758_vm4, %v9807_v51, 0.0 }
 0x838   : > { %v6870_v60 = vpack.c.bf16 %v2331_v47, %v2331_v47  ;;  %7885 = vrcp.f32 %v1893_v37  ;;  %v5376_v37 = vsel %vm1758_vm4, %v9729_v34, 0.0  ;;  %v5382_v34 = vsel %vm1758_vm4, %v9741_v59, 0.0 }
 0x839   : > { %v7874_v21 = vpop.eup %7873  ;;  %v6897_v39 = vpack.c.bf16 %v3513_v11, %v3513_v11  ;;  %7887 = vrcp.f32 %v1866_v26  ;;  %5392 = vadd.xlane.f32.xlu0 %v5391_v58  ;;  %v5939_v40 = vld [vmem:[#allocation3] sm:$0xf]  ;;  %v5388_v59 = vsel %vm1758_vm4, %v9757_v20, 0.0 }
 0x83a   : > { %v7876_v18 = vpop.eup %7875  ;;  %2411 = vst.msk [vmem:[#allocation3 + $0x10] sm:$0xf] %vm519_vm1, %v6870_v60  ;;  %v2333_v38 = vmul.f32 %v7874_v21, %v10338_v33  ;;  %5955 = vst.msk [vmem:[#allocation4] sm:$0xf] %vm519_vm1, %v5939_v40  ;;  %v10347_v26 = vld [vmem:[#allocation24_spill] sm:$0xff] }
 0x83b   : > { %3594 = vst.msk [vmem:[#allocation3 + $0x7c] sm:$0xf] %vm519_vm1, %v6897_v39  ;;  %v4683_v2 = vmul.f32 %v7876_v18, %v10339_v46  ;;  %v1899_v8 = vpop.xlane.xlu1 %1898  ;;  %v1872_v45 = vpop.xlane.xlu0 %1871  ;;  %v10348_v18 = vld [vmem:[#allocation26_spill] sm:$0xff] }
 0x83c   : > { %v6872_v42 = vpack.c.bf16 %v2333_v38, %v2333_v38  ;;  %7889 = vrcp.f32 %v1899_v8 }
 0x83d   : > { %v7878_v49 = vpop.eup %7877  ;;  %v6911_v61 = vpack.c.bf16 %v4683_v2, %v4683_v2  ;;  %7891 = vrcp.f32 %v1872_v45  ;;  %5398 = vadd.xlane.f32.xlu0 %v5397_v3  ;;  %v5941_v10 = vld [vmem:[#allocation3 + $0x8] sm:$0xf] }
 0x83e   : > { %v7880_v29 = vpop.eup %7879  ;;  %2413 = vst.msk [vmem:[#allocation3 + $0x18] sm:$0xf] %vm519_vm1, %v6872_v42  ;;  %v2335_v43 = vmul.f32 %v7878_v49, %v10340_v31  ;;  %5957 = vst.msk [vmem:[#allocation4 + $0x8] sm:$0xf] %vm519_vm1, %v5941_v10  ;;  %v10349_v42 = vld [vmem:[#allocation28_spill] sm:$0xff] }
 0x83f   : > { %4764 = vst.msk [vmem:[#allocation3 + $0xb4] sm:$0xf] %vm519_vm1, %v6911_v61  ;;  %v4685_v4 = vmul.f32 %v7880_v29, %v10341_v9  ;;  %v1878_v62 = vpop.xlane.xlu0 %1877  ;;  %v10350_v31 = vld [vmem:[#allocation32_spill] sm:$0xff]  ;;  %v5394_v9 = vsel %vm1758_vm4, %v9768_v28, 0.0 }
 0x840   : > { %v6874_v56 = vpack.c.bf16 %v2335_v43, %v2335_v43  ;;  %7893 = vrcp.f32 %v1878_v62 }
 0x841   : > { %v7882_v54 = vpop.eup %7881  ;;  %v6913_v23 = vpack.c.bf16 %v4685_v4, %v4685_v4  ;;  %5404 = vadd.xlane.f32.xlu0 %v5403_v52  ;;  %v5943_v13 = vld [vmem:[#allocation3 + $0x10] sm:$0xf] }
 0x842   : > { %v7884_v44 = vpop.eup %7883  ;;  %2415 = vst.msk [vmem:[#allocation3 + $0x20] sm:$0xf] %vm519_vm1, %v6874_v56  ;;  %v2337_v5 = vmul.f32 %v7882_v54, %v10342_v53  ;;  %5959 = vst.msk [vmem:[#allocation4 + $0x10] sm:$0xf] %vm519_vm1, %v5943_v13  ;;  %v10351_v52 = vld [vmem:[#allocation30_spill] sm:$0xff] }
 0x843   : > { %4766 = vst.msk [vmem:[#allocation3 + $0xbc] sm:$0xf] %vm519_vm1, %v6913_v23  ;;  %v2328_v1 = vmul.f32 %v7884_v44, %v10343_v0  ;;  %v1884_v12 = vpop.xlane.xlu0 %1883  ;;  %v5400_v23 = vsel %vm1758_vm4, %v9791_v15, 0.0  ;;  %v10352_v53 = vld [vmem:[#allocation34_spill] sm:$0xff]  ;;  %v5406_v0 = vsel %vm1758_vm4, %v9785_v16, 0.0 }
 0x844   : > { %v6876_v55 = vpack.c.bf16 %v2337_v5, %v2337_v5  ;;  %7895 = vrcp.f32 %v1884_v12 }
 0x845   : > { %v7886_v48 = vpop.eup %7885  ;;  %v6867_v6 = vpack.c.bf16 %v2328_v1, %v2328_v1  ;;  %5410 = vadd.xlane.f32.xlu0 %v5409_v19  ;;  %v5945_v24 = vld [vmem:[#allocation3 + $0x18] sm:$0xf]  ;;  %v6072_v1 = vld [vmem:[#allocation3 + $0x90] sm:$0xf] }
 0x846   : > { %v7888_v17 = vpop.eup %7887  ;;  %2417 = vst.msk [vmem:[#allocation3 + $0x28] sm:$0xf] %vm519_vm1, %v6876_v55  ;;  %v2339_v22 = vmul.f32 %v7886_v48, %v10344_v57  ;;  %5961 = vst.msk [vmem:[#allocation4 + $0x18] sm:$0xf] %vm519_vm1, %v5945_v24  ;;  %v5412_v55 = vsel %vm1758_vm4, %v9805_v35, 0.0 }
 0x847   : > { %2408 = vst.msk [vmem:[#allocation3 + $0x4] sm:$0xf] %vm519_vm1, %v6867_v6  ;;  %v2330_v36 = vmul.f32 %v7888_v17, %v10345_v50  ;;  %5371 = vadd.xlane.f32.xlu1 %v5370_v25  ;;  %v1890_v41 = vpop.xlane.xlu0 %1889  ;;  %v6074_v19 = vld [vmem:[#allocation3 + $0x98] sm:$0xf]  ;;  %v5979_v48 = vld [vmem:[#allocation3 + $0x60] sm:$0xf] }
 0x848   : > { %v6878_v27 = vpack.c.bf16 %v2339_v22, %v2339_v22  ;;  %7897 = vrcp.f32 %v1890_v41  ;;  %v5981_v24 = vld [vmem:[#allocation3 + $0x68] sm:$0xf]  ;;  %v6076_v57 = vld [vmem:[#allocation3 + $0xa0] sm:$0xf]  ;;  %v6073_v41 = vld [vmem:[#allocation3 + $0x94] sm:$0xf] }
 0x849   : > { %v7890_v30 = vpop.eup %7889  ;;  %v6869_v32 = vpack.c.bf16 %v2330_v36, %v2330_v36  ;;  %5416 = vadd.xlane.f32.xlu0 %v5415_v7  ;;  %v5947_v47 = vld [vmem:[#allocation3 + $0x20] sm:$0xf]  ;;  %v6078_v36 = vld [vmem:[#allocation3 + $0xa8] sm:$0xf] }
 0x84a   : > { %v7892_v14 = vpop.eup %7891  ;;  %2419 = vst.msk [vmem:[#allocation3 + $0x30] sm:$0xf] %vm519_vm1, %v6878_v27  ;;  %v2341_v11 = vmul.f32 %v7890_v30, %v10346_v63  ;;  %5963 = vst.msk [vmem:[#allocation4 + $0x20] sm:$0xf] %vm519_vm1, %v5947_v47 }
 0x84b   : > { %2410 = vst.msk [vmem:[#allocation3 + $0xc] sm:$0xf] %vm519_vm1, %v6869_v32  ;;  %v2332_v60 = vmul.f32 %v7892_v14, %v10347_v26  ;;  %5377 = vadd.xlane.f32.xlu1 %v5376_v37  ;;  %v1896_v51 = vpop.xlane.xlu0 %1895  ;;  %v5983_v32 = vld [vmem:[#allocation3 + $0x70] sm:$0xf]  ;;  %v6075_v14 = vld [vmem:[#allocation3 + $0x9c] sm:$0xf] }
 0x84c   : > { %v6880_v58 = vpack.c.bf16 %v2341_v11, %v2341_v11  ;;  %7899 = vrcp.f32 %v1896_v51 }
 0x84d   : > { %v7894_v21 = vpop.eup %7893  ;;  %v6871_v39 = vpack.c.bf16 %v2332_v60, %v2332_v60  ;;  %v5949_v40 = vld [vmem:[#allocation3 + $0x28] sm:$0xf]  ;;  %v5985_v60 = vld [vmem:[#allocation3 + $0x78] sm:$0xf] }
 0x84e   : > { %2421 = vst.msk [vmem:[#allocation3 + $0x38] sm:$0xf] %vm519_vm1, %v6880_v58  ;;  %v2334_v33 = vmul.f32 %v7894_v21, %v10348_v18  ;;  %v5940_v38 = vld [vmem:[#allocation3 + $0x4] sm:$0xf]  ;;  %5965 = vst.msk [vmem:[#allocation4 + $0x28] sm:$0xf] %vm519_vm1, %v5949_v40 }
 0x84f   : > { %2412 = vst.msk [vmem:[#allocation3 + $0x14] sm:$0xf] %vm519_vm1, %v6871_v39  ;;  %5383 = vadd.xlane.f32.xlu1 %v5382_v34  ;;  %v1902_v46 = vpop.xlane.xlu0 %1901  ;;  %5956 = vst.msk [vmem:[#allocation4 + $0x4] sm:$0xf] %vm519_vm1, %v5940_v38  ;;  %v5980_v58 = vld [vmem:[#allocation3 + $0x64] sm:$0xf] }
 0x850   : > { %v6873_v2 = vpack.c.bf16 %v2334_v33, %v2334_v33  ;;  %7901 = vrcp.f32 %v1902_v46  ;;  %v6080_v34 = vld [vmem:[#allocation3 + $0xb0] sm:$0xf]  ;;  %v5982_v46 = vld [vmem:[#allocation3 + $0x6c] sm:$0xf] }
 0x851   : > { %v7896_v8 = vpop.eup %7895  ;;  %v5951_v45 = vld [vmem:[#allocation3 + $0x30] sm:$0xf] }
 0x852   : > { %2414 = vst.msk [vmem:[#allocation3 + $0x1c] sm:$0xf] %vm519_vm1, %v6873_v2  ;;  %v2336_v3 = vmul.f32 %v7896_v8, %v10349_v42  ;;  %v5942_v49 = vld [vmem:[#allocation3 + $0xc] sm:$0xf]  ;;  %5967 = vst.msk [vmem:[#allocation4 + $0x30] sm:$0xf] %vm519_vm1, %v5951_v45 }
 0x853   : > { %5389 = vadd.xlane.f32.xlu1 %v5388_v59  ;;  %5958 = vst.msk [vmem:[#allocation4 + $0xc] sm:$0xf] %vm519_vm1, %v5942_v49  ;;  %v6082_v59 = vld [vmem:[#allocation3 + $0xb8] sm:$0xf] }
 0x854   : > { %v6875_v61 = vpack.c.bf16 %v2336_v3, %v2336_v3 }
 0x855   : > { %v7898_v10 = vpop.eup %7897  ;;  %v5953_v29 = vld [vmem:[#allocation3 + $0x38] sm:$0xf] }
 0x856   : > { %2416 = vst.msk [vmem:[#allocation3 + $0x24] sm:$0xf] %vm519_vm1, %v6875_v61  ;;  %v2338_v43 = vmul.f32 %v7898_v10, %v10350_v31  ;;  %v5944_v4 = vld [vmem:[#allocation3 + $0x14] sm:$0xf]  ;;  %5969 = vst.msk [vmem:[#allocation4 + $0x38] sm:$0xf] %vm519_vm1, %v5953_v29 }
 0x857   : > { %5395 = vadd.xlane.f32.xlu1 %v5394_v9  ;;  %5960 = vst.msk [vmem:[#allocation4 + $0x14] sm:$0xf] %vm519_vm1, %v5944_v4  ;;  %v6077_v61 = vld [vmem:[#allocation3 + $0xa4] sm:$0xf] }
 0x858   : > { %v6877_v20 = vpack.c.bf16 %v2338_v43, %v2338_v43  ;;  %v6079_v43 = vld [vmem:[#allocation3 + $0xac] sm:$0xf] }
 0x859   : > { %v7900_v62 = vpop.eup %7899  ;;  %v5946_v56 = vld [vmem:[#allocation3 + $0x1c] sm:$0xf] }
 0x85a   : > { %2418 = vst.msk [vmem:[#allocation3 + $0x2c] sm:$0xf] %vm519_vm1, %v6877_v20  ;;  %v2340_v54 = vmul.f32 %v7900_v62, %v10351_v52  ;;  %5962 = vst.msk [vmem:[#allocation4 + $0x1c] sm:$0xf] %vm519_vm1, %v5946_v56  ;;  %v5984_v56 = vld [vmem:[#allocation3 + $0x74] sm:$0xf] }
 0x85b   : > { %5401 = vadd.xlane.f32.xlu1 %v5400_v23 }
 0x85c   : > { %v6879_v28 = vpack.c.bf16 %v2340_v54, %v2340_v54 }
 0x85d   : > { %v7902_v13 = vpop.eup %7901  ;;  %v5948_v44 = vld [vmem:[#allocation3 + $0x24] sm:$0xf] }
 0x85e   : > { %2420 = vst.msk [vmem:[#allocation3 + $0x34] sm:$0xf] %vm519_vm1, %v6879_v28  ;;  %v2342_v5 = vmul.f32 %v7902_v13, %v10352_v53  ;;  %5964 = vst.msk [vmem:[#allocation4 + $0x24] sm:$0xf] %vm519_vm1, %v5948_v44  ;;  %v5986_v44 = vld [vmem:[#allocation3 + $0x7c] sm:$0xf] }
 0x85f   : > { %5407 = vadd.xlane.f32.xlu1 %v5406_v0  ;;  %6108 = vrot.lane.b32.xlu0 %v6072_v1, %s8011_s18  ;;  %v6081_v1 = vld [vmem:[#allocation3 + $0xb4] sm:$0xf] }
 0x860   : > { %v6881_v15 = vpack.c.bf16 %v2342_v5, %v2342_v5 }
 0x861   : > { %v5950_v12 = vld [vmem:[#allocation3 + $0x2c] sm:$0xf] }
 0x862   : > { %2422 = vst.msk [vmem:[#allocation3 + $0x3c] sm:$0xf] %vm519_vm1, %v6881_v15  ;;  %5966 = vst.msk [vmem:[#allocation4 + $0x2c] sm:$0xf] %vm519_vm1, %v5950_v12 }
 0x863   : > { %5413 = vadd.xlane.f32.xlu1 %v5412_v55  ;;  %6112 = vrot.lane.b32.xlu0 %v6074_v19, %s8011_s18  ;;  %v6083_v19 = vld [vmem:[#allocation3 + $0xbc] sm:$0xf] }
 0x865   : > { %v5952_v16 = vld [vmem:[#allocation3 + $0x34] sm:$0xf] }
 0x866   : > { %5968 = vst.msk [vmem:[#allocation4 + $0x34] sm:$0xf] %vm519_vm1, %v5952_v16 }
 0x867   : > { %6019 = vrot.lane.b32.xlu0 %v5979_v48, %s8010_s17 }
 0x869   : > { %v5954_v6 = vld [vmem:[#allocation3 + $0x3c] sm:$0xf] }
 0x86a   : > { %5970 = vst.msk [vmem:[#allocation4 + $0x3c] sm:$0xf] %vm519_vm1, %v5954_v6 }
 0x86b   : > { %v9971_v17 = vpop.f32.mrf.mxu0  ;;  %6023 = vrot.lane.b32.xlu0 %v5981_v24, %s8010_s17 }
 0x86d   : > { %v7439_v35 = vpop.f32.mrf.mxu0 }
 0x86f   : > { %v9974_v22 = vpop.f32.mrf.mxu0  ;;  %6116 = vrot.lane.b32.xlu0 %v6076_v57, %s8011_s18 }
 0x870   : > { %v6006_v25 = vpop.permute.xlu0 %6005 }
 0x871   : > { %6053 = vst.msk [vmem:[#allocation4 + $0x4] sm:$0xf] %vm6051_vm5, %v6006_v25  ;;  %v7440_v50 = vpop.f32.mrf.mxu0 }
 0x873   : > { %6120 = vrot.lane.b32.xlu0 %v6078_v36, %s8011_s18  ;;  %v9979_v27 = vpop.f32.mrf.mxu1 }
 0x874   : > { %6110 = vrot.lane.b32.xlu1 %v6073_v41, %s8011_s18  ;;  %v6101_v7 = vpop.permute.xlu0 %6100 }
 0x875   : > { %v7445_v30 = vpop.f32.mrf.mxu1 }
 0x877   : > { %v9982_v47 = vpop.f32.mrf.mxu0  ;;  %6027 = vrot.lane.b32.xlu0 %v5983_v32, %s8010_s17  ;;  %v9985_v63 = vpop.f32.mrf.mxu1 }
 0x878   : > { %6114 = vrot.lane.b32.xlu1 %v6075_v14, %s8011_s18  ;;  %v6105_v11 = vpop.permute.xlu0 %6104 }
 0x879   : > { %v7446_v37 = vpop.f32.mrf.mxu1  ;;  %v7451_v26 = vpop.f32.mrf.mxu0 }
 0x87b   : > { %v9988_v51 = vpop.f32.mrf.mxu0  ;;  %6031 = vrot.lane.b32.xlu0 %v5985_v60, %s8010_s17  ;;  %v9992_v21 = vpop.f32.mrf.mxu1 }
 0x87c   : > { %6021 = vrot.lane.b32.xlu1 %v5980_v58, %s8010_s17  ;;  %v6012_v39 = vpop.permute.xlu0 %6011 }
 0x87d   : > { %v6004_v40 = vpop.permute.xlu1 %6003  ;;  %6056 = vst.msk [vmem:[#allocation4 + $0x10] sm:$0xf] %vm6051_vm5, %v6012_v39  ;;  %v7452_v18 = vpop.f32.mrf.mxu0 }
 0x87e   : > { %6052 = vst.msk [vmem:[#allocation4] sm:$0xf] %vm6051_vm5, %v6004_v40  ;;  %v7457_v33 = vpop.f32.mrf.mxu1 }
 0x87f   : > { %v9996_v38 = vpop.f32.mrf.mxu0  ;;  %6124 = vrot.lane.b32.xlu0 %v6080_v34, %s8011_s18  ;;  %6149 = vst.msk [vmem:[#allocation4] sm:$0xf] %vm6148_vm6, %v6101_v7 }
 0x880   : > { %6025 = vrot.lane.b32.xlu1 %v5982_v46, %s8010_s17  ;;  %v10001_v2 = vpop.f32.mrf.mxu1  ;;  %v6016_v8 = vpop.permute.xlu0 %6015 }
 0x881   : > { %v6008_v45 = vpop.permute.xlu1 %6007  ;;  %6058 = vst.msk [vmem:[#allocation4 + $0x18] sm:$0xf] %vm6051_vm5, %v6016_v8  ;;  %v7463_v42 = vpop.f32.mrf.mxu0 }
 0x882   : > { %6054 = vst.msk [vmem:[#allocation4 + $0x8] sm:$0xf] %vm6051_vm5, %v6008_v45  ;;  %v7458_v3 = vpop.f32.mrf.mxu1 }
 0x883   : > { %v10005_v49 = vpop.f32.mrf.mxu0  ;;  %6128 = vrot.lane.b32.xlu0 %v6082_v59, %s8011_s18  ;;  %6151 = vst.msk [vmem:[#allocation4 + $0x8] sm:$0xf] %vm6148_vm6, %v6105_v11 }
 0x884   : > { %6118 = vrot.lane.b32.xlu1 %v6077_v61, %s8011_s18 }
 0x885   : > { %v6010_v10 = vpop.permute.xlu1 %6009  ;;  %v7464_v29 = vpop.f32.mrf.mxu0 }
 0x886   : > { %6055 = vst.msk [vmem:[#allocation4 + $0xc] sm:$0xf] %vm6051_vm5, %v6010_v10 }
 0x887   : > { %v10011_v31 = vpop.f32.mrf.mxu0  ;;  %v10013_v9 = vpop.f32.mrf.mxu1 }
 0x888   : > { %6122 = vrot.lane.b32.xlu1 %v6079_v43, %s8011_s18 }
 0x889   : > { %v6103_v4 = vpop.permute.xlu1 %6102  ;;  %v7469_v20 = vpop.f32.mrf.mxu1 }
 0x88a   : > { %6150 = vst.msk [vmem:[#allocation4 + $0x4] sm:$0xf] %vm6148_vm6, %v6103_v4  ;;  %v7475_v62 = vpop.f32.mrf.mxu0 }
 0x88b   : > { %v10017_v52 = vpop.f32.mrf.mxu1 }
 0x88c   : > { %v10019_v54 = vpop.f32.mrf.mxu0  ;;  %6029 = vrot.lane.b32.xlu1 %v5984_v56, %s8010_s17 }
 0x88d   : > { %v6107_v23 = vpop.permute.xlu1 %6106  ;;  %v7470_v28 = vpop.f32.mrf.mxu1 }
 0x88e   : > { %6152 = vst.msk [vmem:[#allocation4 + $0xc] sm:$0xf] %vm6148_vm6, %v6107_v23  ;;  %v7476_v13 = vpop.f32.mrf.mxu0 }
 0x88f   : > { %v10023_v53 = vpop.f32.mrf.mxu1 }
 0x890   : > { %6033 = vrot.lane.b32.xlu1 %v5986_v44, %s8010_s17 }
 0x891   : > { %v6014_v5 = vpop.permute.xlu1 %6013  ;;  %v7481_v0 = vpop.f32.mrf.mxu1 }
 0x892   : > { %6057 = vst.msk [vmem:[#allocation4 + $0x14] sm:$0xf] %vm6051_vm5, %v6014_v5  ;;  %v7669_v5 = vld [vmem:[%s10210_s4 + $0x8] sm:$0xff]  }
 0x893   : > { %v10027_v15 = vpop.f32.mrf.mxu1  ;;  %7483 = vmatprep.subr.bf16.mxu0 %v7669_v5 }
 0x894   : > { %6126 = vrot.lane.b32.xlu1 %v6081_v1, %s8011_s18  ;;  %7484 = vmatpush3.bf16.msra.mxu0 %v7669_v5 }
 0x895   : > { %v6018_v12 = vpop.permute.xlu1 %6017  ;;  %v7482_v55 = vpop.f32.mrf.mxu1 }
 0x896   : > { %6059 = vst.msk [vmem:[#allocation4 + $0x1c] sm:$0xf] %vm6051_vm5, %v6018_v12 }
 0x898   : > { %6130 = vrot.lane.b32.xlu1 %v6083_v19, %s8011_s18 }
 0x8b6   : > { %v5375_v16 = vpop.xlane.xlu0 %5374 }
 0x8b7   : > { %7903 = vrcp.f32 %v5375_v16  ;;  %v7670_v16 = vld [vmem:[%s10210_s4] sm:$0xff]  }
 0x8b8   : > { %7485 = vmatprep.subr.bf16.mxu0 %v7670_v16 }
 0x8b9   : > { %7486 = vmatpush3.bf16.msra.mxu0 %v7670_v16 }
 0x8ba   : > { %v5381_v48 = vpop.xlane.xlu0 %5380 }
 0x8bb   : > { %7905 = vrcp.f32 %v5381_v48 }
 0x8be   : > { %v5387_v6 = vpop.xlane.xlu0 %5386 }
 0x8bf   : > { %7907 = vrcp.f32 %v5387_v6 }
 0x8c2   : > { %v5393_v24 = vpop.xlane.xlu0 %5392 }
 0x8c3   : > { %7909 = vrcp.f32 %v5393_v24 }
 0x8c4   : > { %v7904_v35 = vpop.eup %7903 }
 0x8c5   : > { %v5843_v57 = vmul.f32 %v7904_v35, %v9974_v22 }
 0x8c6   : > { %v5399_v25 = vpop.xlane.xlu0 %5398 }
 0x8c7   : > { %v6915_v50 = vpack.c.bf16 %v5843_v57, %v5843_v57  ;;  %7911 = vrcp.f32 %v5399_v25 }
 0x8c8   : > { %v7906_v36 = vpop.eup %7905 }
 0x8c9   : > { %5924 = vst.msk [vmem:[#allocation3 + $0xc4] sm:$0xf] %vm519_vm1, %v6915_v50  ;;  %v5845_v41 = vmul.f32 %v7906_v36, %v9985_v63 }
 0x8ca   : > { %v5405_v7 = vpop.xlane.xlu0 %5404 }
 0x8cb   : > { %v6917_v30 = vpack.c.bf16 %v5845_v41, %v5845_v41  ;;  %7913 = vrcp.f32 %v5405_v7 }
 0x8cc   : > { %v7908_v32 = vpop.eup %7907 }
 0x8cd   : > { %5926 = vst.msk [vmem:[#allocation3 + $0xcc] sm:$0xf] %vm519_vm1, %v6917_v30  ;;  %v5847_v14 = vmul.f32 %v7908_v32, %v9988_v51 }
 0x8ce   : > { %v5411_v11 = vpop.xlane.xlu0 %5410 }
 0x8cf   : > { %v6919_v37 = vpack.c.bf16 %v5847_v14, %v5847_v14  ;;  %7915 = vrcp.f32 %v5411_v11 }
 0x8d0   : > { %v7910_v22 = vpop.eup %7909  ;;  %v5372_v26 = vpop.xlane.xlu1 %5371  ;;  %v6166_v60 = vld [vmem:[#allocation3 + $0xc4] sm:$0xf] }
 0x8d1   : > { %5928 = vst.msk [vmem:[#allocation3 + $0xd4] sm:$0xf] %vm519_vm1, %v6919_v37  ;;  %v5849_v58 = vmul.f32 %v7910_v22, %v10001_v2  ;;  %7917 = vrcp.f32 %v5372_v26  ;;  %6199 = vrot.lane.b32.xlu1 %v6166_v60, %s8012_s19 }
 0x8d2   : > { %v5417_v63 = vpop.xlane.xlu0 %5416 }
 0x8d3   : > { %v6921_v39 = vpack.c.bf16 %v5849_v58, %v5849_v58  ;;  %7919 = vrcp.f32 %v5417_v63 }
 0x8d4   : > { %v7912_v40 = vpop.eup %7911  ;;  %v5378_v18 = vpop.xlane.xlu1 %5377  ;;  %v6168_v51 = vld [vmem:[#allocation3 + $0xcc] sm:$0xf] }
 0x8d5   : > { %5930 = vst.msk [vmem:[#allocation3 + $0xdc] sm:$0xf] %vm519_vm1, %v6921_v39  ;;  %v5851_v33 = vmul.f32 %v7912_v40, %v10005_v49  ;;  %7921 = vrcp.f32 %v5378_v18  ;;  %6203 = vrot.lane.b32.xlu1 %v6168_v51, %s8012_s19 }
 0x8d6   : > { %v6109_v34 = vpop.permute.xlu0 %6108 }
 0x8d7   : > { %v6923_v46 = vpack.c.bf16 %v5851_v33, %v5851_v33  ;;  %6153 = vst.msk [vmem:[#allocation4 + $0x10] sm:$0xf] %vm6148_vm6, %v6109_v34 }
 0x8d8   : > { %v7914_v2 = vpop.eup %7913  ;;  %v5384_v8 = vpop.xlane.xlu1 %5383  ;;  %v6170_v45 = vld [vmem:[#allocation3 + $0xd4] sm:$0xf] }
 0x8d9   : > { %5932 = vst.msk [vmem:[#allocation3 + $0xe4] sm:$0xf] %vm519_vm1, %v6923_v46  ;;  %v5853_v42 = vmul.f32 %v7914_v2, %v10017_v52  ;;  %7923 = vrcp.f32 %v5384_v8  ;;  %6207 = vrot.lane.b32.xlu1 %v6170_v45, %s8012_s19 }
 0x8da   : > { %v6113_v3 = vpop.permute.xlu0 %6112 }
 0x8db   : > { %v6925_v59 = vpack.c.bf16 %v5853_v42, %v5853_v42  ;;  %6155 = vst.msk [vmem:[#allocation4 + $0x18] sm:$0xf] %vm6148_vm6, %v6113_v3 }
 0x8dc   : > { %v7916_v49 = vpop.eup %7915  ;;  %v5390_v61 = vpop.xlane.xlu1 %5389  ;;  %v6172_v10 = vld [vmem:[#allocation3 + $0xdc] sm:$0xf] }
 0x8dd   : > { %5934 = vst.msk [vmem:[#allocation3 + $0xec] sm:$0xf] %vm519_vm1, %v6925_v59  ;;  %v5855_v29 = vmul.f32 %v7916_v49, %v10019_v54  ;;  %7925 = vrcp.f32 %v5390_v61  ;;  %6211 = vrot.lane.b32.xlu1 %v6172_v10, %s8012_s19 }
 0x8de   : > { %v7918_v43 = vpop.eup %7917  ;;  %v6020_v4 = vpop.permute.xlu0 %6019 }
 0x8df   : > { %v6927_v20 = vpack.c.bf16 %v5855_v29, %v5855_v29  ;;  %v5842_v62 = vmul.f32 %v7918_v43, %v9971_v17  ;;  %6060 = vst.msk [vmem:[#allocation4 + $0x20] sm:$0xf] %vm6051_vm5, %v6020_v4 }
 0x8e0   : > { %v7920_v56 = vpop.eup %7919  ;;  %v5396_v52 = vpop.xlane.xlu1 %5395  ;;  %v6174_v23 = vld [vmem:[#allocation3 + $0xe4] sm:$0xf] }
 0x8e1   : > { %5936 = vst.msk [vmem:[#allocation3 + $0xf4] sm:$0xf] %vm519_vm1, %v6927_v20  ;;  %v6914_v28 = vpack.c.bf16 %v5842_v62, %v5842_v62  ;;  %v5857_v13 = vmul.f32 %v7920_v56, %v10027_v15  ;;  %7927 = vrcp.f32 %v5396_v52  ;;  %6215 = vrot.lane.b32.xlu1 %v6174_v23, %s8012_s19 }
 0x8e2   : > { %v7922_v54 = vpop.eup %7921  ;;  %v6024_v44 = vpop.permute.xlu0 %6023 }
 0x8e3   : > { %5923 = vst.msk [vmem:[#allocation3 + $0xc0] sm:$0xf] %vm519_vm1, %v6914_v28  ;;  %v6929_v17 = vpack.c.bf16 %v5857_v13, %v5857_v13  ;;  %v5844_v0 = vmul.f32 %v7922_v54, %v9979_v27 }
 0x8e4   : > { %6062 = vst.msk [vmem:[#allocation4 + $0x28] sm:$0xf] %vm6051_vm5, %v6024_v44  ;;  %v5402_v1 = vpop.xlane.xlu1 %5401  ;;  %v6176_v12 = vld [vmem:[#allocation3 + $0xec] sm:$0xf] }
 0x8e5   : > { %5938 = vst.msk [vmem:[#allocation3 + $0xfc] sm:$0xf] %vm519_vm1, %v6929_v17  ;;  %v6916_v15 = vpack.c.bf16 %v5844_v0, %v5844_v0  ;;  %7929 = vrcp.f32 %v5402_v1  ;;  %6219 = vrot.lane.b32.xlu1 %v6176_v12, %s8012_s19 }
 0x8e6   : > { %v7924_v55 = vpop.eup %7923  ;;  %v6117_v19 = vpop.permute.xlu0 %6116 }
 0x8e7   : > { %5925 = vst.msk [vmem:[#allocation3 + $0xc8] sm:$0xf] %vm519_vm1, %v6916_v15  ;;  %v5846_v27 = vmul.f32 %v7924_v55, %v9982_v47 }
 0x8e8   : > { %6157 = vst.msk [vmem:[#allocation4 + $0x20] sm:$0xf] %vm6148_vm6, %v6117_v19  ;;  %v5408_v48 = vpop.xlane.xlu1 %5407  ;;  %v6178_v6 = vld [vmem:[#allocation3 + $0xf4] sm:$0xf] }
 0x8e9   : > { %v6918_v24 = vpack.c.bf16 %v5846_v27, %v5846_v27  ;;  %7931 = vrcp.f32 %v5408_v48  ;;  %6223 = vrot.lane.b32.xlu1 %v6178_v6, %s8012_s19 }
 0x8ea   : > { %v7926_v35 = vpop.eup %7925  ;;  %v6165_v57 = vld [vmem:[#allocation3 + $0xc0] sm:$0xf]  ;;  %v6121_v25 = vpop.permute.xlu0 %6120 }
 0x8eb   : > { %5927 = vst.msk [vmem:[#allocation3 + $0xd0] sm:$0xf] %vm519_vm1, %v6918_v24  ;;  %v5848_v50 = vmul.f32 %v7926_v35, %v9992_v21  ;;  %6197 = vrot.lane.b32.xlu0 %v6165_v57, %s8012_s19  ;;  %v6826_v35 = vld [vmem:[%s10211_s5] ss:$0 sm:$0xff] }
 0x8ec   : > { %6159 = vst.msk [vmem:[#allocation4 + $0x28] sm:$0xf] %vm6148_vm6, %v6121_v25  ;;  %v5414_v47 = vpop.xlane.xlu1 %5413  ;;  %v6180_v36 = vld [vmem:[#allocation3 + $0xfc] sm:$0xf] }
 0x8ed   : > { %v6920_v41 = vpack.c.bf16 %v5848_v50, %v5848_v50  ;;  %7933 = vrcp.f32 %v5414_v47  ;;  %6227 = vrot.lane.b32.xlu1 %v6180_v36, %s8012_s19 }
 0x8ee   : > { %v7928_v7 = vpop.eup %7927  ;;  %v6028_v30 = vpop.permute.xlu0 %6027  ;;  %v6167_v32 = vld [vmem:[#allocation3 + $0xc8] sm:$0xf] }
 0x8ef   : > { %5929 = vst.msk [vmem:[#allocation3 + $0xd8] sm:$0xf] %vm519_vm1, %v6920_v41  ;;  %v5850_v14 = vmul.f32 %v7928_v7, %v9996_v38  ;;  %6201 = vrot.lane.b32.xlu0 %v6167_v32, %s8012_s19 }
 0x8f0   : > { %6064 = vst.msk [vmem:[#allocation4 + $0x30] sm:$0xf] %vm6051_vm5, %v6028_v30  ;;  %v6111_v21 = vpop.permute.xlu1 %6110 }
 0x8f1   : > { %v6922_v11 = vpack.c.bf16 %v5850_v14, %v5850_v14  ;;  %6154 = vst.msk [vmem:[#allocation4 + $0x14] sm:$0xf] %vm6148_vm6, %v6111_v21 }
 0x8f2   : > { %v7930_v37 = vpop.eup %7929  ;;  %v6032_v22 = vpop.permute.xlu0 %6031  ;;  %v6169_v26 = vld [vmem:[#allocation3 + $0xd0] sm:$0xf] }
 0x8f3   : > { %5931 = vst.msk [vmem:[#allocation3 + $0xe0] sm:$0xf] %vm519_vm1, %v6922_v11  ;;  %v5852_v60 = vmul.f32 %v7930_v37, %v10013_v9  ;;  %6205 = vrot.lane.b32.xlu0 %v6169_v26, %s8012_s19 }
 0x8f4   : > { %6066 = vst.msk [vmem:[#allocation4 + $0x38] sm:$0xf] %vm6051_vm5, %v6032_v22  ;;  %v6115_v38 = vpop.permute.xlu1 %6114 }
 0x8f5   : > { %v6924_v58 = vpack.c.bf16 %v5852_v60, %v5852_v60  ;;  %6156 = vst.msk [vmem:[#allocation4 + $0x1c] sm:$0xf] %vm6148_vm6, %v6115_v38 }
 0x8f6   : > { %v7932_v63 = vpop.eup %7931  ;;  %v6125_v39 = vpop.permute.xlu0 %6124  ;;  %v6171_v40 = vld [vmem:[#allocation3 + $0xd8] sm:$0xf] }
 0x8f7   : > { %5933 = vst.msk [vmem:[#allocation3 + $0xe8] sm:$0xf] %vm519_vm1, %v6924_v58  ;;  %v5854_v18 = vmul.f32 %v7932_v63, %v10011_v31  ;;  %6209 = vrot.lane.b32.xlu0 %v6171_v40, %s8012_s19 }
 0x8f8   : > { %6161 = vst.msk [vmem:[#allocation4 + $0x30] sm:$0xf] %vm6148_vm6, %v6125_v39  ;;  %v6022_v9 = vpop.permute.xlu1 %6021 }
 0x8f9   : > { %v6926_v51 = vpack.c.bf16 %v5854_v18, %v5854_v18  ;;  %6061 = vst.msk [vmem:[#allocation4 + $0x24] sm:$0xf] %vm6051_vm5, %v6022_v9 }
 0x8fa   : > { %v7934_v33 = vpop.eup %7933  ;;  %v6129_v34 = vpop.permute.xlu0 %6128  ;;  %v6173_v46 = vld [vmem:[#allocation3 + $0xe0] sm:$0xf] }
 0x8fb   : > { %5935 = vst.msk [vmem:[#allocation3 + $0xf0] sm:$0xf] %vm519_vm1, %v6926_v51  ;;  %v5856_v2 = vmul.f32 %v7934_v33, %v10023_v53  ;;  %6213 = vrot.lane.b32.xlu0 %v6173_v46, %s8012_s19 }
 0x8fc   : > { %6163 = vst.msk [vmem:[#allocation4 + $0x38] sm:$0xf] %vm6148_vm6, %v6129_v34  ;;  %v6026_v31 = vpop.permute.xlu1 %6025 }
 0x8fd   : > { %v6928_v8 = vpack.c.bf16 %v5856_v2, %v5856_v2  ;;  %6063 = vst.msk [vmem:[#allocation4 + $0x2c] sm:$0xf] %vm6051_vm5, %v6026_v31 }
 0x8fe   : > { %v6175_v45 = vld [vmem:[#allocation3 + $0xe8] sm:$0xf] }
 0x8ff   : > { %5937 = vst.msk [vmem:[#allocation3 + $0xf8] sm:$0xf] %vm519_vm1, %v6928_v8  ;;  %6217 = vrot.lane.b32.xlu0 %v6175_v45, %s8012_s19 }
 0x900   : > { %v6119_v42 = vpop.permute.xlu1 %6118 }
 0x901   : > { %6158 = vst.msk [vmem:[#allocation4 + $0x24] sm:$0xf] %vm6148_vm6, %v6119_v42 }
 0x902   : > { %v6177_v3 = vld [vmem:[#allocation3 + $0xf0] sm:$0xf] }
 0x903   : > { %6221 = vrot.lane.b32.xlu0 %v6177_v3, %s8012_s19 }
 0x904   : > { %v6123_v53 = vpop.permute.xlu1 %6122 }
 0x905   : > { %6160 = vst.msk [vmem:[#allocation4 + $0x2c] sm:$0xf] %vm6148_vm6, %v6123_v53 }
 0x906   : > { %v6179_v59 = vld [vmem:[#allocation3 + $0xf8] sm:$0xf] }
 0x907   : > { %6225 = vrot.lane.b32.xlu0 %v6179_v59, %s8012_s19  ;;  %s10157_s19 = scalar_lea.hbm %s10212_s6, %s6930_s14 }
 0x908   : > { %v6030_v49 = vpop.permute.xlu1 %6029 }
 0x909   : > { %6065 = vst.msk [vmem:[#allocation4 + $0x34] sm:$0xf] %vm6051_vm5, %v6030_v49 }
 0x90c   : > { %v6034_v61 = vpop.permute.xlu1 %6033 }
 0x90d   : > { %6067 = vst.msk [vmem:[#allocation4 + $0x3c] sm:$0xf] %vm6051_vm5, %v6034_v61 }
 0x910   : > { %v6127_v10 = vpop.permute.xlu1 %6126 }
 0x911   : > { %6162 = vst.msk [vmem:[#allocation4 + $0x34] sm:$0xf] %vm6148_vm6, %v6127_v10 }
 0x914   : > { %v6131_v29 = vpop.permute.xlu1 %6130 }
 0x915   : > { %6164 = vst.msk [vmem:[#allocation4 + $0x3c] sm:$0xf] %vm6148_vm6, %v6131_v29 }
 0x943   : > { %v6200_v43 = vpop.permute.xlu1 %6199 }
 0x944   : > { %6247 = vst.msk [vmem:[#allocation4 + $0x4] sm:$0xf] %vm6245_vm7, %v6200_v43 }
 0x947   : > { %v6204_v4 = vpop.permute.xlu1 %6203 }
 0x948   : > { %6249 = vst.msk [vmem:[#allocation4 + $0xc] sm:$0xf] %vm6245_vm7, %v6204_v4 }
 0x94b   : > { %v6208_v20 = vpop.permute.xlu1 %6207 }
 0x94c   : > { %6251 = vst.msk [vmem:[#allocation4 + $0x14] sm:$0xf] %vm6245_vm7, %v6208_v20 }
 0x94f   : > { %v6212_v62 = vpop.permute.xlu1 %6211 }
 0x950   : > { %6253 = vst.msk [vmem:[#allocation4 + $0x1c] sm:$0xf] %vm6245_vm7, %v6212_v62 }
 0x953   : > { %v6216_v56 = vpop.permute.xlu1 %6215 }
 0x954   : > { %6255 = vst.msk [vmem:[#allocation4 + $0x24] sm:$0xf] %vm6245_vm7, %v6216_v56 }
 0x957   : > { %v6220_v52 = vpop.permute.xlu1 %6219 }
 0x958   : > { %6257 = vst.msk [vmem:[#allocation4 + $0x2c] sm:$0xf] %vm6245_vm7, %v6220_v52 }
 0x95b   : > { %v6224_v23 = vpop.permute.xlu1 %6223 }
 0x95c   : > { %6259 = vst.msk [vmem:[#allocation4 + $0x34] sm:$0xf] %vm6245_vm7, %v6224_v23 }
 0x95d   : > { %v6198_v28 = vpop.permute.xlu0 %6197 }
 0x95e   : > { %6246 = vst.msk [vmem:[#allocation4] sm:$0xf] %vm6245_vm7, %v6198_v28 }
 0x95f   : > { %v6228_v13 = vpop.permute.xlu1 %6227 }
 0x960   : > { %6261 = vst.msk [vmem:[#allocation4 + $0x3c] sm:$0xf] %vm6245_vm7, %v6228_v13 }
 0x961   : > { %v6202_v54 = vpop.permute.xlu0 %6201 }
 0x962   : > { %6248 = vst.msk [vmem:[#allocation4 + $0x8] sm:$0xf] %vm6245_vm7, %v6202_v54 }
 0x965   : > { %v6206_v44 = vpop.permute.xlu0 %6205  ;;  %v7671_v5 = vld [vmem:[#allocation4] sm:$0xff]  }
 0x966   : > { %6250 = vst.msk [vmem:[#allocation4 + $0x10] sm:$0xf] %vm6245_vm7, %v6206_v44  ;;  %7487 = vmatprep.mubr.msk.bf16.mxu0 %vm333_vm0, %v7671_v5 }
 0x969   : > { %v6210_v17 = vpop.permute.xlu0 %6209  ;;  %v7672_v0 = vld [vmem:[#allocation4 + $0x8] sm:$0xff]  }
 0x96a   : > { %6252 = vst.msk [vmem:[#allocation4 + $0x18] sm:$0xf] %vm6245_vm7, %v6210_v17  ;;  %7488 = vmatmul.mubr.msk.bf16.vlgmr.msra.gmra.mxu0 %vm333_vm0, %v7672_v0 }
 0x96d   : > { %v6214_v1 = vpop.permute.xlu0 %6213  ;;  %v7673_v12 = vld [vmem:[#allocation4 + $0x10] sm:$0xff]  }
 0x96e   : > { %6254 = vst.msk [vmem:[#allocation4 + $0x20] sm:$0xf] %vm6245_vm7, %v6214_v1  ;;  %7491 = vmatprep.mubr.msk.bf16.mxu0 %vm333_vm0, %v7673_v12 }
 0x971   : > { %v6218_v15 = vpop.permute.xlu0 %6217  ;;  %v7674_v55 = vld [vmem:[#allocation4 + $0x18] sm:$0xff]  }
 0x972   : > { %6256 = vst.msk [vmem:[#allocation4 + $0x28] sm:$0xf] %vm6245_vm7, %v6218_v15  ;;  %7492 = vmatmul.mubr.msk.bf16.gmra.mxu0 %vm333_vm0, %v7674_v55 }
 0x975   : > { %v6222_v19 = vpop.permute.xlu0 %6221  ;;  %v7675_v16 = vld [vmem:[#allocation4 + $0x20] sm:$0xff]  }
 0x976   : > { %6258 = vst.msk [vmem:[#allocation4 + $0x30] sm:$0xf] %vm6245_vm7, %v6222_v19  ;;  %7495 = vmatprep.mubr.msk.bf16.mxu0 %vm333_vm0, %v7675_v16 }
 0x979   : > { %v6226_v27 = vpop.permute.xlu0 %6225  ;;  %v7676_v48 = vld [vmem:[#allocation4 + $0x28] sm:$0xff]  }
 0x97a   : > { %6260 = vst.msk [vmem:[#allocation4 + $0x38] sm:$0xf] %vm6245_vm7, %v6226_v27  ;;  %7496 = vmatmul.mubr.msk.bf16.gmra.mxu0 %vm333_vm0, %v7676_v48 }
 0x97d   : > { %v7677_v6 = vld [vmem:[#allocation4 + $0x30] sm:$0xff]  }
 0x97e   : > { %7499 = vmatprep.mubr.msk.bf16.mxu0 %vm333_vm0, %v7677_v6 }
 0x981   : > { %v7678_v24 = vld [vmem:[#allocation4 + $0x38] sm:$0xff]  }
 0x982   : > { %7500 = vmatmul.mubr.msk.bf16.gmra.mxu0 %vm333_vm0, %v7678_v24 }
 0xa2a   : > { %v7489_v57 = vpop.f32.mrf.mxu0 }
 0xa2b   : > { %v6408_v25 = vadd.f32 %v7489_v57, %v6826_v35 }
 0xa2c   : > { %v6399_v50 = vpop.f32.mrf.mxu0 }
 0xa2d   : > { %6464 = vst [vmem:[%s10136_s13 + $0x10] sm:$0xff] %v6408_v25  ;;  %v6400_v47 = vadd.f32 %v6826_v35, %v6399_v50 }
 0xa2e   : > { %v7490_v36 = vpop.f32.mrf.mxu0 }
 0xa2f   : > { %6462 = vst [vmem:[%s10136_s13] sm:$0xff] %v6400_v47  ;;  %v6411_v41 = vadd.f32 %v7490_v36, %v6826_v35 }
 0xa30   : > { %v6402_v7 = vpop.f32.mrf.mxu0 }
 0xa31   : > { %6465 = vst [vmem:[%s10136_s13 + $0x18] sm:$0xff] %v6411_v41  ;;  %v6403_v30 = vadd.f32 %v6826_v35, %v6402_v7 }
 0xa32   : > { %v7493_v32 = vpop.f32.mrf.mxu0 }
 0xa33   : > { %6463 = vst [vmem:[%s10136_s13 + $0x8] sm:$0xff] %v6403_v30  ;;  %v6424_v14 = vadd.f32 %v7493_v32, %v6826_v35 }
 0xa34   : > { %v6415_v21 = vpop.f32.mrf.mxu0 }
 0xa35   : > { %6468 = vst [vmem:[%s10136_s13 + $0x30] sm:$0xff] %v6424_v14  ;;  %v6416_v11 = vadd.f32 %v6826_v35, %v6415_v21 }
 0xa36   : > { %v7494_v37 = vpop.f32.mrf.mxu0 }
 0xa37   : > { %6466 = vst [vmem:[%s10136_s13 + $0x20] sm:$0xff] %v6416_v11  ;;  %v6427_v22 = vadd.f32 %v7494_v37, %v6826_v35 }
 0xa38   : > { %v6418_v26 = vpop.f32.mrf.mxu0 }
 0xa39   : > { %6469 = vst [vmem:[%s10136_s13 + $0x38] sm:$0xff] %v6427_v22  ;;  %v6419_v60 = vadd.f32 %v6826_v35, %v6418_v26 }
 0xa3a   : > { %v7497_v38 = vpop.f32.mrf.mxu0 }
 0xa3b   : > { %6467 = vst [vmem:[%s10136_s13 + $0x28] sm:$0xff] %v6419_v60  ;;  %v6440_v58 = vadd.f32 %v7497_v38, %v6826_v35 }
 0xa3c   : > { %v6431_v63 = vpop.f32.mrf.mxu0 }
 0xa3d   : > { %6472 = vst [vmem:[%s10136_s13 + $0x50] sm:$0xff] %v6440_v58  ;;  %v6432_v39 = vadd.f32 %v6826_v35, %v6431_v63 }
 0xa3e   : > { %v7498_v40 = vpop.f32.mrf.mxu0 }
 0xa3f   : > { %6470 = vst [vmem:[%s10136_s13 + $0x40] sm:$0xff] %v6432_v39  ;;  %v6443_v18 = vadd.f32 %v7498_v40, %v6826_v35 }
 0xa40   : > { %v6434_v9 = vpop.f32.mrf.mxu0 }
 0xa41   : > { %6473 = vst [vmem:[%s10136_s13 + $0x58] sm:$0xff] %v6443_v18  ;;  %v6435_v51 = vadd.f32 %v6826_v35, %v6434_v9 }
 0xa42   : > { %v7501_v33 = vpop.f32.mrf.mxu0 }
 0xa43   : > { %6471 = vst [vmem:[%s10136_s13 + $0x48] sm:$0xff] %v6435_v51  ;;  %v6456_v34 = vadd.f32 %v7501_v33, %v6826_v35 }
 0xa44   : > { %v6447_v46 = vpop.f32.mrf.mxu0 }
 0xa45   : > { %6476 = vst [vmem:[%s10136_s13 + $0x70] sm:$0xff] %v6456_v34  ;;  %v6448_v2 = vadd.f32 %v6826_v35, %v6447_v46 }
 0xa46   : > { %v7502_v31 = vpop.f32.mrf.mxu0 }
 0xa47   : > { %6474 = vst [vmem:[%s10136_s13 + $0x60] sm:$0xff] %v6448_v2  ;;  %v6459_v8 = vadd.f32 %v7502_v31, %v6826_v35 }
 0xa48   : > { %v6450_v45 = vpop.f32.mrf.mxu0 }
 0xa49   : > { %6477 = vst [vmem:[%s10136_s13 + $0x78] sm:$0xff] %v6459_v8  ;;  %v6451_v42 = vadd.f32 %v6826_v35, %v6450_v45 }
 0xa4b   : > { %6475 = vst [vmem:[%s10136_s13 + $0x68] sm:$0xff] %v6451_v42 }
 0xa4c   : > { %7948 = shalt.err (!%p7945_p3)
}
 0xa4d   : > { %s7949_s9 = scalar_lea.hbm %s10157_s19, 2048  ;;  %s7953_s12 = scalar_lea.hbm %s10212_s6, 8192 }
 0xa4e   : > { %p7950_p4 = scmp.ne.s32.totalorder %s10157_s19, %s7949_s9  ;;  %p7954_p9 = scmp.lt.s32.totalorder %s10157_s19, %s10212_s6 }
 0xa4f   : > { %p7955_p10 = scmp.lt.s32.totalorder %s7953_s12, %s7949_s9 }
 0xa50   : > { %p7951_p7 = pnand %p7950_p4, %p8088_p5 }
 0xa51   : > { %p7956_p11 = por %p7955_p10, %p7954_p9 }
 0xa52   : > { %p7952_p8 = pneg %p7951_p7 }
 0xa54   : > { %p7957_p12 = pnand %p7956_p11, %p7952_p8 }
 0xa56   : > { %7960 = shalt.err (!%p7957_p12)
}
 0xa57   : > { %s8014_s16 = smov 128  }
 0xa58   : > { %7507 = dma.vmem_to_hbm [thread:$0]  (%p8088_p5), %s10160_s15, 2048, %s10157_s19, %s10165_s25, %s8014_s16, %s8014_s16, %s8010_s17  }
 0xa59 PF: > { %p7513_p13 = scmp.ge.s32.totalorder %s7995_s24, 2  ;;  %s6507_s18 = sand.u32 1, %s7983_s21  }
 0xa5a   : > { %s6508_s20 = scalar_lea.sflag [#allocation6], %s6507_s18 }
 0xa5b   : > { %p7510_p0 = pnand %p7513_p13, %p8092_p6 }
 0xa5d   : > { %p7511_p1 = pneg %p7510_p0 }
 0xa5f   : > { %7978 = dma.done.wait (%p7511_p1), %s6508_s20, 2048  }
 0xa60   : > { %7980 = vsyncadd (%p7511_p1), %s6508_s20, 4294965248  ;;  %p16_p2 = scmp.ge.s32.totalorder %s8075_s27, 6   ;;  %s10353_s21 = smov %s7987_s22 }
 0xa61   : > { %s10354_s22 = smov %s7991_s23  ;;  %s10355_s23 = smov %s8086_s30 }
 0xa62   : > { %s10356_s24 = smov %s8075_s27  ;;  %18 = sbr.rel (!%p16_p2) target bundleno = 3 (0x3), region = 96 }
 0xa67   :  { %6513 = vsyncpa [#allocation6], 1 }
 0xa68   :  { %6515 = vsyncpa [#allocation6 + $0x1], 1 }

</bundles_post_ra>
